<compile_context>
chip_gen: v6e
topology: v6e:2x2x1
jax: 0.10.0
libtpu: 0.0.40
codegen_flags: <defaults>
</compile_context>

<pallas_src>
import functools

import jax
import jax.numpy as jnp
from jax.experimental import pallas as pl
from jax.experimental.pallas import tpu as pltpu


def _conv3d_relu_kernel(x_ref, w_ref, b_ref, o_ref, xpad_ref, patch_ref, *,
                        D, H, W, C, TD, KP):
    # x_ref:     (1, D, H, W, C)       one batch element, NDHWC, unpadded
    # w_ref:     (KP, NP)              im2col weight, zero-padded to 128-lane K/N
    # b_ref:     (1, NP)               bias, zero-padded to NP lanes
    # o_ref:     (1, TD*H*W, NP)       lane-dense output tile
    # xpad_ref:  (D+2, H+2, W+2, C)    VMEM scratch: halo-padded activations
    # patch_ref: (TD, H, W, KP)        VMEM scratch: im2col patch matrix
    dt = pl.program_id(1)

    # Build the zero-padded (pad=1) volume in VMEM — replaces wrapper jnp.pad.
    # Unconditional refill is a few KiB and is safe under megacore sharding of
    # the dt axis (each core owns its own scratch).
    xpad_ref[...] = jnp.zeros_like(xpad_ref)
    xpad_ref[1:D + 1, 1:H + 1, 1:W + 1, :] = x_ref[0]

    # Zero the K-padding lanes so the (zero-weight) pad rows of the contraction
    # never see uninitialized VMEM (0 * NaN = NaN on the MXU).
    kpad = KP - 27 * C
    if kpad > 0:
        patch_ref[:, :, :, 27 * C:] = jnp.zeros((TD, H, W, kpad),
                                                patch_ref.dtype)

    # im2col-in-VMEM: pack the 27 shifted views into the contraction dim.
    # Static 27-iteration loop -> static slice offsets; one masked lane store
    # per tap, no per-tap matmuls / reshapes.
    d0 = dt * TD  # first output depth-plane of this tile (padded coordinates)
    for kd in range(3):
        for kh in range(3):
            for kw in range(3):
                k_idx = (kd * 3 + kh) * 3 + kw
                tap = xpad_ref[pl.ds(d0 + kd, TD), kh:kh + H, kw:kw + W, :]
                patch_ref[:, :, :, k_idx * C:(k_idx + 1) * C] = (
                    tap.astype(patch_ref.dtype))

    # One big MXU matmul per grid step: (TD*H*W, KP) @ (KP, NP), f32 accumulate.
    patches = patch_ref[...].reshape(TD * H * W, KP)
    acc = jnp.dot(patches, w_ref[...], preferred_element_type=jnp.float32)
    acc = acc + b_ref[...]            # single hoisted (1, NP) broadcast
    acc = jnp.maximum(acc, 0.0)       # ReLU (soft=False in the Conv block)
    o_ref[0] = acc.astype(o_ref.dtype)


def _round_up(v, m):
    return (v + m - 1) // m * m


def _pick_depth_tile(D, H, W, target_rows=256):
    """Largest divisor of D giving ~target_rows (>=256 where possible) per dot."""
    td = max(1, min(D, max(1, target_rows // (H * W))))
    while D % td:
        td -= 1
    return td


def conv_gs_forward(x_ncdhw, weight_oidhw, bias, *, matmul_dtype=jnp.float32):
    """Conv3d(k=3, padding=1) + ReLU.  x: (N, C, D, H, W) float32."""
    N, C, D, H, W = x_ncdhw.shape
    COUT = weight_oidhw.shape[0]

    KP = _round_up(27 * C, 128)      # contraction dim, padded to lane width
    NP = _round_up(COUT, 128)        # output channels, padded to lane width
    TD = _pick_depth_tile(D, H, W)   # depth planes per grid step
    DT = D // TD
    M_TILE = TD * H * W

    # Boundary layout change only (PyTorch NCDHW -> NDHWC); no jnp.pad — the
    # halo is built in-kernel.  In a full NDHWC JAX pipeline this transpose
    # (and the output transpose below) disappears.
    x = jnp.transpose(x_ncdhw, (0, 2, 3, 4, 1)).astype(jnp.float32)

    # (O, I, kd, kh, kw) -> (kd, kh, kw, I, O) -> (27*C, O), zero-padded to
    # (KP, NP) so the kernel matmul is a clean 128-aligned MXU op.
    w_mat = jnp.transpose(weight_oidhw, (2, 3, 4, 1, 0)).reshape(27 * C, COUT)
    w_mat = jnp.zeros((KP, NP), matmul_dtype).at[:27 * C, :COUT].set(
        w_mat.astype(matmul_dtype))
    b_vec = jnp.zeros((1, NP), jnp.float32).at[0, :COUT].set(
        bias.astype(jnp.float32))

    kernel = functools.partial(
        _conv3d_relu_kernel, D=D, H=H, W=W, C=C, TD=TD, KP=KP)

    # NOTE(scaling): at real VAE resolutions the per-batch whole-volume input
    # block must be replaced by halo'd D/H tiles sized to ~half of v7x's
    # 64 MiB VMEM (with vmem_limit_bytes set explicitly).  At these toy shapes
    # the whole volume is a few KiB and stays resident across the dt axis.
    out = pl.pallas_call(
        kernel,
        out_shape=jax.ShapeDtypeStruct((N, D * H * W, NP), jnp.float32),
        grid_spec=pltpu.PrefetchScalarGridSpec(
            num_scalar_prefetch=0,
            grid=(N, DT),
            in_specs=[
                # Block index constant across dt -> stays resident in VMEM.
                pl.BlockSpec((1, D, H, W, C), lambda n, t: (n, 0, 0, 0, 0)),
                pl.BlockSpec((KP, NP), lambda n, t: (0, 0)),
                pl.BlockSpec((1, NP), lambda n, t: (0, 0)),
            ],
            out_specs=pl.BlockSpec((1, M_TILE, NP), lambda n, t: (n, t, 0)),
            scratch_shapes=[
                pltpu.VMEM((D + 2, H + 2, W + 2, C), jnp.float32),
                pltpu.VMEM((TD, H, W, KP), matmul_dtype),
            ],
        ),
        compiler_params=pltpu.CompilerParams(
            # Both axes independent: megacore (v7x) shards N*DT work units.
            dimension_semantics=("parallel", "parallel"),
        ),
    )(x, w_mat, b_vec)

    # Strip channel padding, back to PyTorch layout NCDHW.
    out = out[:, :, :COUT].reshape(N, D, H, W, COUT)
    return jnp.transpose(out, (0, 4, 1, 2, 3))


def _reference(x_ncdhw, weight_oidhw, bias):
    y = jax.lax.conv_general_dilated(
        x_ncdhw,
        weight_oidhw,
        window_strides=(1, 1, 1),
        padding="SAME",
        dimension_numbers=("NCDHW", "OIDHW", "NCDHW"),
    )
    y = y + bias[None, :, None, None, None]
    return jnp.maximum(y, 0.0)


if __name__ == "__main__":
    # Small shapes consistent with Conv(in_ch=4, out_ch=8) of the VAE.
    N, CIN, COUT, D, H, W = 2, 4, 8, 8, 8, 8

    key = jax.random.PRNGKey(0)
    kx, kw, kb = jax.random.split(key, 3)

    x = jax.random.normal(kx, (N, CIN, D, H, W), jnp.float32)
    fan_in = CIN * 3 * 3 * 3
    weight = jax.random.normal(kw, (COUT, CIN, 3, 3, 3), jnp.float32) / jnp.sqrt(
        jnp.float32(fan_in))
    bias = jax.random.normal(kb, (COUT,), jnp.float32) * 0.1

    ref = _reference(x, weight, bias)

    # f32 MXU path.
    out = jax.block_until_ready(conv_gs_forward(x, weight, bias))
    assert out.shape == (N, COUT, D, H, W)
    assert jnp.allclose(out, ref, atol=1e-4, rtol=1e-4)

    # Optional bf16-operand path (f32 accumulation) — halves matmul-operand
    # VMEM / weight DMA bytes on v6e/v7x; looser tolerance by construction.
    out_bf16 = jax.block_until_ready(
        conv_gs_forward(x, weight, bias, matmul_dtype=jnp.bfloat16))
    assert jnp.allclose(out_bf16, ref, atol=5e-2, rtol=5e-2)

    print("KERNEL_OK")
</pallas_src>

<mosaic_0001>
module attributes {stable_mosaic.version = 11 : i64} {
  func.func @_conv3d_relu_kernel(%arg0: i32, %arg1: i32, %arg2: memref<1x8x8x8x4xf32, #tpu.memory_space<vmem>>, %arg3: memref<128x128xf32, #tpu.memory_space<vmem>>, %arg4: memref<1x128xf32, #tpu.memory_space<vmem>>, %arg5: memref<1x256x128xf32, #tpu.memory_space<vmem>>, %arg6: memref<10x10x10x4xf32, #tpu.memory_space<vmem>>, %arg7: memref<4x8x8x128xf32, #tpu.memory_space<vmem>>) attributes {dimension_semantics = [#tpu.dimension_semantics<parallel>, #tpu.dimension_semantics<parallel>], iteration_bounds = array<i64: 2, 2>, scalar_prefetch = 0 : i64, scratch_operands = 2 : i64, tpu.core_type = #tpu.core_type<tc>, window_params = [{transform_indices = @transform_0, window_bounds = array<i64: 1, 8, 8, 8, 4>}, {pipeline_mode = #tpu.pipeline_mode<synchronous>, transform_indices = @transform_1, window_bounds = array<i64: 128, 128>}, {pipeline_mode = #tpu.pipeline_mode<synchronous>, transform_indices = @transform_2, window_bounds = array<i64: 1, 128>}, {transform_indices = @transform_3, window_bounds = array<i64: 1, 256, 128>}]} {
    %cst = arith.constant 0.000000e+00 : f32
    %0 = vector.broadcast %cst : f32 to vector<10x10x10x4xf32>
    %c0 = arith.constant 0 : index
    %c0_0 = arith.constant 0 : index
    %c0_1 = arith.constant 0 : index
    %c0_2 = arith.constant 0 : index
    %1 = vector.load %arg6[%c0, %c0_0, %c0_1, %c0_2] : memref<10x10x10x4xf32, #tpu.memory_space<vmem>>, vector<10x10x10x4xf32>
    tpu.vector_store %arg6[%c0, %c0_0, %c0_1, %c0_2], %0 {strides = array<i32>} : memref<10x10x10x4xf32, #tpu.memory_space<vmem>>, vector<10x10x10x4xf32>,
    %c0_3 = arith.constant 0 : index
    %c0_4 = arith.constant 0 : index
    %c0_5 = arith.constant 0 : index
    %c0_6 = arith.constant 0 : index
    %c0_7 = arith.constant 0 : index
    %2 = vector.load %arg2[%c0_3, %c0_4, %c0_5, %c0_6, %c0_7] : memref<1x8x8x8x4xf32, #tpu.memory_space<vmem>>, vector<1x8x8x8x4xf32>
    %3 = vector.shape_cast %2 : vector<1x8x8x8x4xf32> to vector<8x8x8x4xf32>
    %c1 = arith.constant 1 : index
    %c1_8 = arith.constant 1 : index
    %c1_9 = arith.constant 1 : index
    %c0_10 = arith.constant 0 : index
    %4 = vector.load %arg6[%c1, %c1_8, %c1_9, %c0_10] : memref<10x10x10x4xf32, #tpu.memory_space<vmem>>, vector<8x8x8x4xf32>
    tpu.vector_store %arg6[%c1, %c1_8, %c1_9, %c0_10], %3 {strides = array<i32>} : memref<10x10x10x4xf32, #tpu.memory_space<vmem>>, vector<8x8x8x4xf32>,
    %cst_11 = arith.constant 0.000000e+00 : f32
    %5 = vector.broadcast %cst_11 : f32 to vector<4x8x8x20xf32>
    %c0_12 = arith.constant 0 : index
    %c0_13 = arith.constant 0 : index
    %c0_14 = arith.constant 0 : index
    %c108 = arith.constant 108 : index
    %6 = vector.load %arg7[%c0_12, %c0_13, %c0_14, %c108] : memref<4x8x8x128xf32, #tpu.memory_space<vmem>>, vector<4x8x8x20xf32>
    tpu.vector_store %arg7[%c0_12, %c0_13, %c0_14, %c108], %5 {strides = array<i32>} : memref<4x8x8x128xf32, #tpu.memory_space<vmem>>, vector<4x8x8x20xf32>,
    %c4_i32 = arith.constant 4 : i32
    %7 = arith.muli %arg1, %c4_i32 : i32
    %c0_i32 = arith.constant 0 : i32
    %8 = arith.addi %7, %c0_i32 : i32
    %9 = arith.index_cast %8 : i32 to index
    %c0_15 = arith.constant 0 : index
    %c0_16 = arith.constant 0 : index
    %c0_17 = arith.constant 0 : index
    %10 = vector.load %arg6[%9, %c0_15, %c0_16, %c0_17] : memref<10x10x10x4xf32, #tpu.memory_space<vmem>>, vector<4x8x8x4xf32>
    %c0_18 = arith.constant 0 : index
    %c0_19 = arith.constant 0 : index
    %c0_20 = arith.constant 0 : index
    %c0_21 = arith.constant 0 : index
    %11 = vector.load %arg7[%c0_18, %c0_19, %c0_20, %c0_21] : memref<4x8x8x128xf32, #tpu.memory_space<vmem>>, vector<4x8x8x4xf32>
    tpu.vector_store %arg7[%c0_18, %c0_19, %c0_20, %c0_21], %10 {strides = array<i32>} : memref<4x8x8x128xf32, #tpu.memory_space<vmem>>, vector<4x8x8x4xf32>,
    %c0_i32_22 = arith.constant 0 : i32
    %12 = arith.addi %7, %c0_i32_22 : i32
    %13 = arith.index_cast %12 : i32 to index
    %c0_23 = arith.constant 0 : index
    %c1_24 = arith.constant 1 : index
    %c0_25 = arith.constant 0 : index
    %14 = vector.load %arg6[%13, %c0_23, %c1_24, %c0_25] : memref<10x10x10x4xf32, #tpu.memory_space<vmem>>, vector<4x8x8x4xf32>
    %c0_26 = arith.constant 0 : index
    %c0_27 = arith.constant 0 : index
    %c0_28 = arith.constant 0 : index
    %c4 = arith.constant 4 : index
    %15 = vector.load %arg7[%c0_26, %c0_27, %c0_28, %c4] : memref<4x8x8x128xf32, #tpu.memory_space<vmem>>, vector<4x8x8x4xf32>
    tpu.vector_store %arg7[%c0_26, %c0_27, %c0_28, %c4], %14 {strides = array<i32>} : memref<4x8x8x128xf32, #tpu.memory_space<vmem>>, vector<4x8x8x4xf32>,
    %c0_i32_29 = arith.constant 0 : i32
    %16 = arith.addi %7, %c0_i32_29 : i32
    %17 = arith.index_cast %16 : i32 to index
    %c0_30 = arith.constant 0 : index
    %c2 = arith.constant 2 : index
    %c0_31 = arith.constant 0 : index
    %18 = vector.load %arg6[%17, %c0_30, %c2, %c0_31] : memref<10x10x10x4xf32, #tpu.memory_space<vmem>>, vector<4x8x8x4xf32>
    %c0_32 = arith.constant 0 : index
    %c0_33 = arith.constant 0 : index
    %c0_34 = arith.constant 0 : index
    %c8 = arith.constant 8 : index
    %19 = vector.load %arg7[%c0_32, %c0_33, %c0_34, %c8] : memref<4x8x8x128xf32, #tpu.memory_space<vmem>>, vector<4x8x8x4xf32>
    tpu.vector_store %arg7[%c0_32, %c0_33, %c0_34, %c8], %18 {strides = array<i32>} : memref<4x8x8x128xf32, #tpu.memory_space<vmem>>, vector<4x8x8x4xf32>,
    %c0_i32_35 = arith.constant 0 : i32
    %20 = arith.addi %7, %c0_i32_35 : i32
    %21 = arith.index_cast %20 : i32 to index
    %c1_36 = arith.constant 1 : index
    %c0_37 = arith.constant 0 : index
    %c0_38 = arith.constant 0 : index
    %22 = vector.load %arg6[%21, %c1_36, %c0_37, %c0_38] : memref<10x10x10x4xf32, #tpu.memory_space<vmem>>, vector<4x8x8x4xf32>
    %c0_39 = arith.constant 0 : index
    %c0_40 = arith.constant 0 : index
    %c0_41 = arith.constant 0 : index
    %c12 = arith.constant 12 : index
    %23 = vector.load %arg7[%c0_39, %c0_40, %c0_41, %c12] : memref<4x8x8x128xf32, #tpu.memory_space<vmem>>, vector<4x8x8x4xf32>
    tpu.vector_store %arg7[%c0_39, %c0_40, %c0_41, %c12], %22 {strides = array<i32>} : memref<4x8x8x128xf32, #tpu.memory_space<vmem>>, vector<4x8x8x4xf32>,
    %c0_i32_42 = arith.constant 0 : i32
    %24 = arith.addi %7, %c0_i32_42 : i32
    %25 = arith.index_cast %24 : i32 to index
    %c1_43 = arith.constant 1 : index
    %c1_44 = arith.constant 1 : index
    %c0_45 = arith.constant 0 : index
    %26 = vector.load %arg6[%25, %c1_43, %c1_44, %c0_45] : memref<10x10x10x4xf32, #tpu.memory_space<vmem>>, vector<4x8x8x4xf32>
    %c0_46 = arith.constant 0 : index
    %c0_47 = arith.constant 0 : index
    %c0_48 = arith.constant 0 : index
    %c16 = arith.constant 16 : index
    %27 = vector.load %arg7[%c0_46, %c0_47, %c0_48, %c16] : memref<4x8x8x128xf32, #tpu.memory_space<vmem>>, vector<4x8x8x4xf32>
    tpu.vector_store %arg7[%c0_46, %c0_47, %c0_48, %c16], %26 {strides = array<i32>} : memref<4x8x8x128xf32, #tpu.memory_space<vmem>>, vector<4x8x8x4xf32>,
    %c0_i32_49 = arith.constant 0 : i32
    %28 = arith.addi %7, %c0_i32_49 : i32
    %29 = arith.index_cast %28 : i32 to index
    %c1_50 = arith.constant 1 : index
    %c2_51 = arith.constant 2 : index
    %c0_52 = arith.constant 0 : index
    %30 = vector.load %arg6[%29, %c1_50, %c2_51, %c0_52] : memref<10x10x10x4xf32, #tpu.memory_space<vmem>>, vector<4x8x8x4xf32>
    %c0_53 = arith.constant 0 : index
    %c0_54 = arith.constant 0 : index
    %c0_55 = arith.constant 0 : index
    %c20 = arith.constant 20 : index
    %31 = vector.load %arg7[%c0_53, %c0_54, %c0_55, %c20] : memref<4x8x8x128xf32, #tpu.memory_space<vmem>>, vector<4x8x8x4xf32>
    tpu.vector_store %arg7[%c0_53, %c0_54, %c0_55, %c20], %30 {strides = array<i32>} : memref<4x8x8x128xf32, #tpu.memory_space<vmem>>, vector<4x8x8x4xf32>,
    %c0_i32_56 = arith.constant 0 : i32
    %32 = arith.addi %7, %c0_i32_56 : i32
    %33 = arith.index_cast %32 : i32 to index
    %c2_57 = arith.constant 2 : index
    %c0_58 = arith.constant 0 : index
    %c0_59 = arith.constant 0 : index
    %34 = vector.load %arg6[%33, %c2_57, %c0_58, %c0_59] : memref<10x10x10x4xf32, #tpu.memory_space<vmem>>, vector<4x8x8x4xf32>
    %c0_60 = arith.constant 0 : index
    %c0_61 = arith.constant 0 : index
    %c0_62 = arith.constant 0 : index
    %c24 = arith.constant 24 : index
    %35 = vector.load %arg7[%c0_60, %c0_61, %c0_62, %c24] : memref<4x8x8x128xf32, #tpu.memory_space<vmem>>, vector<4x8x8x4xf32>
    tpu.vector_store %arg7[%c0_60, %c0_61, %c0_62, %c24], %34 {strides = array<i32>} : memref<4x8x8x128xf32, #tpu.memory_space<vmem>>, vector<4x8x8x4xf32>,
    %c0_i32_63 = arith.constant 0 : i32
    %36 = arith.addi %7, %c0_i32_63 : i32
    %37 = arith.index_cast %36 : i32 to index
    %c2_64 = arith.constant 2 : index
    %c1_65 = arith.constant 1 : index
    %c0_66 = arith.constant 0 : index
    %38 = vector.load %arg6[%37, %c2_64, %c1_65, %c0_66] : memref<10x10x10x4xf32, #tpu.memory_space<vmem>>, vector<4x8x8x4xf32>
    %c0_67 = arith.constant 0 : index
    %c0_68 = arith.constant 0 : index
    %c0_69 = arith.constant 0 : index
    %c28 = arith.constant 28 : index
    %39 = vector.load %arg7[%c0_67, %c0_68, %c0_69, %c28] : memref<4x8x8x128xf32, #tpu.memory_space<vmem>>, vector<4x8x8x4xf32>
    tpu.vector_store %arg7[%c0_67, %c0_68, %c0_69, %c28], %38 {strides = array<i32>} : memref<4x8x8x128xf32, #tpu.memory_space<vmem>>, vector<4x8x8x4xf32>,
    %c0_i32_70 = arith.constant 0 : i32
    %40 = arith.addi %7, %c0_i32_70 : i32
    %41 = arith.index_cast %40 : i32 to index
    %c2_71 = arith.constant 2 : index
    %c2_72 = arith.constant 2 : index
    %c0_73 = arith.constant 0 : index
    %42 = vector.load %arg6[%41, %c2_71, %c2_72, %c0_73] : memref<10x10x10x4xf32, #tpu.memory_space<vmem>>, vector<4x8x8x4xf32>
    %c0_74 = arith.constant 0 : index
    %c0_75 = arith.constant 0 : index
    %c0_76 = arith.constant 0 : index
    %c32 = arith.constant 32 : index
    %43 = vector.load %arg7[%c0_74, %c0_75, %c0_76, %c32] : memref<4x8x8x128xf32, #tpu.memory_space<vmem>>, vector<4x8x8x4xf32>
    tpu.vector_store %arg7[%c0_74, %c0_75, %c0_76, %c32], %42 {strides = array<i32>} : memref<4x8x8x128xf32, #tpu.memory_space<vmem>>, vector<4x8x8x4xf32>,
    %c1_i32 = arith.constant 1 : i32
    %44 = arith.addi %7, %c1_i32 : i32
    %45 = arith.index_cast %44 : i32 to index
    %c0_77 = arith.constant 0 : index
    %c0_78 = arith.constant 0 : index
    %c0_79 = arith.constant 0 : index
    %46 = vector.load %arg6[%45, %c0_77, %c0_78, %c0_79] : memref<10x10x10x4xf32, #tpu.memory_space<vmem>>, vector<4x8x8x4xf32>
    %c0_80 = arith.constant 0 : index
    %c0_81 = arith.constant 0 : index
    %c0_82 = arith.constant 0 : index
    %c36 = arith.constant 36 : index
    %47 = vector.load %arg7[%c0_80, %c0_81, %c0_82, %c36] : memref<4x8x8x128xf32, #tpu.memory_space<vmem>>, vector<4x8x8x4xf32>
    tpu.vector_store %arg7[%c0_80, %c0_81, %c0_82, %c36], %46 {strides = array<i32>} : memref<4x8x8x128xf32, #tpu.memory_space<vmem>>, vector<4x8x8x4xf32>,
    %c1_i32_83 = arith.constant 1 : i32
    %48 = arith.addi %7, %c1_i32_83 : i32
    %49 = arith.index_cast %48 : i32 to index
    %c0_84 = arith.constant 0 : index
    %c1_85 = arith.constant 1 : index
    %c0_86 = arith.constant 0 : index
    %50 = vector.load %arg6[%49, %c0_84, %c1_85, %c0_86] : memref<10x10x10x4xf32, #tpu.memory_space<vmem>>, vector<4x8x8x4xf32>
    %c0_87 = arith.constant 0 : index
    %c0_88 = arith.constant 0 : index
    %c0_89 = arith.constant 0 : index
    %c40 = arith.constant 40 : index
    %51 = vector.load %arg7[%c0_87, %c0_88, %c0_89, %c40] : memref<4x8x8x128xf32, #tpu.memory_space<vmem>>, vector<4x8x8x4xf32>
    tpu.vector_store %arg7[%c0_87, %c0_88, %c0_89, %c40], %50 {strides = array<i32>} : memref<4x8x8x128xf32, #tpu.memory_space<vmem>>, vector<4x8x8x4xf32>,
    %c1_i32_90 = arith.constant 1 : i32
    %52 = arith.addi %7, %c1_i32_90 : i32
    %53 = arith.index_cast %52 : i32 to index
    %c0_91 = arith.constant 0 : index
    %c2_92 = arith.constant 2 : index
    %c0_93 = arith.constant 0 : index
    %54 = vector.load %arg6[%53, %c0_91, %c2_92, %c0_93] : memref<10x10x10x4xf32, #tpu.memory_space<vmem>>, vector<4x8x8x4xf32>
    %c0_94 = arith.constant 0 : index
    %c0_95 = arith.constant 0 : index
    %c0_96 = arith.constant 0 : index
    %c44 = arith.constant 44 : index
    %55 = vector.load %arg7[%c0_94, %c0_95, %c0_96, %c44] : memref<4x8x8x128xf32, #tpu.memory_space<vmem>>, vector<4x8x8x4xf32>
    tpu.vector_store %arg7[%c0_94, %c0_95, %c0_96, %c44], %54 {strides = array<i32>} : memref<4x8x8x128xf32, #tpu.memory_space<vmem>>, vector<4x8x8x4xf32>,
    %c1_i32_97 = arith.constant 1 : i32
    %56 = arith.addi %7, %c1_i32_97 : i32
    %57 = arith.index_cast %56 : i32 to index
    %c1_98 = arith.constant 1 : index
    %c0_99 = arith.constant 0 : index
    %c0_100 = arith.constant 0 : index
    %58 = vector.load %arg6[%57, %c1_98, %c0_99, %c0_100] : memref<10x10x10x4xf32, #tpu.memory_space<vmem>>, vector<4x8x8x4xf32>
    %c0_101 = arith.constant 0 : index
    %c0_102 = arith.constant 0 : index
    %c0_103 = arith.constant 0 : index
    %c48 = arith.constant 48 : index
    %59 = vector.load %arg7[%c0_101, %c0_102, %c0_103, %c48] : memref<4x8x8x128xf32, #tpu.memory_space<vmem>>, vector<4x8x8x4xf32>
    tpu.vector_store %arg7[%c0_101, %c0_102, %c0_103, %c48], %58 {strides = array<i32>} : memref<4x8x8x128xf32, #tpu.memory_space<vmem>>, vector<4x8x8x4xf32>,
    %c1_i32_104 = arith.constant 1 : i32
    %60 = arith.addi %7, %c1_i32_104 : i32
    %61 = arith.index_cast %60 : i32 to index
    %c1_105 = arith.constant 1 : index
    %c1_106 = arith.constant 1 : index
    %c0_107 = arith.constant 0 : index
    %62 = vector.load %arg6[%61, %c1_105, %c1_106, %c0_107] : memref<10x10x10x4xf32, #tpu.memory_space<vmem>>, vector<4x8x8x4xf32>
    %c0_108 = arith.constant 0 : index
    %c0_109 = arith.constant 0 : index
    %c0_110 = arith.constant 0 : index
    %c52 = arith.constant 52 : index
    %63 = vector.load %arg7[%c0_108, %c0_109, %c0_110, %c52] : memref<4x8x8x128xf32, #tpu.memory_space<vmem>>, vector<4x8x8x4xf32>
    tpu.vector_store %arg7[%c0_108, %c0_109, %c0_110, %c52], %62 {strides = array<i32>} : memref<4x8x8x128xf32, #tpu.memory_space<vmem>>, vector<4x8x8x4xf32>,
    %c1_i32_111 = arith.constant 1 : i32
    %64 = arith.addi %7, %c1_i32_111 : i32
    %65 = arith.index_cast %64 : i32 to index
    %c1_112 = arith.constant 1 : index
    %c2_113 = arith.constant 2 : index
    %c0_114 = arith.constant 0 : index
    %66 = vector.load %arg6[%65, %c1_112, %c2_113, %c0_114] : memref<10x10x10x4xf32, #tpu.memory_space<vmem>>, vector<4x8x8x4xf32>
    %c0_115 = arith.constant 0 : index
    %c0_116 = arith.constant 0 : index
    %c0_117 = arith.constant 0 : index
    %c56 = arith.constant 56 : index
    %67 = vector.load %arg7[%c0_115, %c0_116, %c0_117, %c56] : memref<4x8x8x128xf32, #tpu.memory_space<vmem>>, vector<4x8x8x4xf32>
    tpu.vector_store %arg7[%c0_115, %c0_116, %c0_117, %c56], %66 {strides = array<i32>} : memref<4x8x8x128xf32, #tpu.memory_space<vmem>>, vector<4x8x8x4xf32>,
    %c1_i32_118 = arith.constant 1 : i32
    %68 = arith.addi %7, %c1_i32_118 : i32
    %69 = arith.index_cast %68 : i32 to index
    %c2_119 = arith.constant 2 : index
    %c0_120 = arith.constant 0 : index
    %c0_121 = arith.constant 0 : index
    %70 = vector.load %arg6[%69, %c2_119, %c0_120, %c0_121] : memref<10x10x10x4xf32, #tpu.memory_space<vmem>>, vector<4x8x8x4xf32>
    %c0_122 = arith.constant 0 : index
    %c0_123 = arith.constant 0 : index
    %c0_124 = arith.constant 0 : index
    %c60 = arith.constant 60 : index
    %71 = vector.load %arg7[%c0_122, %c0_123, %c0_124, %c60] : memref<4x8x8x128xf32, #tpu.memory_space<vmem>>, vector<4x8x8x4xf32>
    tpu.vector_store %arg7[%c0_122, %c0_123, %c0_124, %c60], %70 {strides = array<i32>} : memref<4x8x8x128xf32, #tpu.memory_space<vmem>>, vector<4x8x8x4xf32>,
    %c1_i32_125 = arith.constant 1 : i32
    %72 = arith.addi %7, %c1_i32_125 : i32
    %73 = arith.index_cast %72 : i32 to index
    %c2_126 = arith.constant 2 : index
    %c1_127 = arith.constant 1 : index
    %c0_128 = arith.constant 0 : index
    %74 = vector.load %arg6[%73, %c2_126, %c1_127, %c0_128] : memref<10x10x10x4xf32, #tpu.memory_space<vmem>>, vector<4x8x8x4xf32>
    %c0_129 = arith.constant 0 : index
    %c0_130 = arith.constant 0 : index
    %c0_131 = arith.constant 0 : index
    %c64 = arith.constant 64 : index
    %75 = vector.load %arg7[%c0_129, %c0_130, %c0_131, %c64] : memref<4x8x8x128xf32, #tpu.memory_space<vmem>>, vector<4x8x8x4xf32>
    tpu.vector_store %arg7[%c0_129, %c0_130, %c0_131, %c64], %74 {strides = array<i32>} : memref<4x8x8x128xf32, #tpu.memory_space<vmem>>, vector<4x8x8x4xf32>,
    %c1_i32_132 = arith.constant 1 : i32
    %76 = arith.addi %7, %c1_i32_132 : i32
    %77 = arith.index_cast %76 : i32 to index
    %c2_133 = arith.constant 2 : index
    %c2_134 = arith.constant 2 : index
    %c0_135 = arith.constant 0 : index
    %78 = vector.load %arg6[%77, %c2_133, %c2_134, %c0_135] : memref<10x10x10x4xf32, #tpu.memory_space<vmem>>, vector<4x8x8x4xf32>
    %c0_136 = arith.constant 0 : index
    %c0_137 = arith.constant 0 : index
    %c0_138 = arith.constant 0 : index
    %c68 = arith.constant 68 : index
    %79 = vector.load %arg7[%c0_136, %c0_137, %c0_138, %c68] : memref<4x8x8x128xf32, #tpu.memory_space<vmem>>, vector<4x8x8x4xf32>
    tpu.vector_store %arg7[%c0_136, %c0_137, %c0_138, %c68], %78 {strides = array<i32>} : memref<4x8x8x128xf32, #tpu.memory_space<vmem>>, vector<4x8x8x4xf32>,
    %c2_i32 = arith.constant 2 : i32
    %80 = arith.addi %7, %c2_i32 : i32
    %81 = arith.index_cast %80 : i32 to index
    %c0_139 = arith.constant 0 : index
    %c0_140 = arith.constant 0 : index
    %c0_141 = arith.constant 0 : index
    %82 = vector.load %arg6[%81, %c0_139, %c0_140, %c0_141] : memref<10x10x10x4xf32, #tpu.memory_space<vmem>>, vector<4x8x8x4xf32>
    %c0_142 = arith.constant 0 : index
    %c0_143 = arith.constant 0 : index
    %c0_144 = arith.constant 0 : index
    %c72 = arith.constant 72 : index
    %83 = vector.load %arg7[%c0_142, %c0_143, %c0_144, %c72] : memref<4x8x8x128xf32, #tpu.memory_space<vmem>>, vector<4x8x8x4xf32>
    tpu.vector_store %arg7[%c0_142, %c0_143, %c0_144, %c72], %82 {strides = array<i32>} : memref<4x8x8x128xf32, #tpu.memory_space<vmem>>, vector<4x8x8x4xf32>,
    %c2_i32_145 = arith.constant 2 : i32
    %84 = arith.addi %7, %c2_i32_145 : i32
    %85 = arith.index_cast %84 : i32 to index
    %c0_146 = arith.constant 0 : index
    %c1_147 = arith.constant 1 : index
    %c0_148 = arith.constant 0 : index
    %86 = vector.load %arg6[%85, %c0_146, %c1_147, %c0_148] : memref<10x10x10x4xf32, #tpu.memory_space<vmem>>, vector<4x8x8x4xf32>
    %c0_149 = arith.constant 0 : index
    %c0_150 = arith.constant 0 : index
    %c0_151 = arith.constant 0 : index
    %c76 = arith.constant 76 : index
    %87 = vector.load %arg7[%c0_149, %c0_150, %c0_151, %c76] : memref<4x8x8x128xf32, #tpu.memory_space<vmem>>, vector<4x8x8x4xf32>
    tpu.vector_store %arg7[%c0_149, %c0_150, %c0_151, %c76], %86 {strides = array<i32>} : memref<4x8x8x128xf32, #tpu.memory_space<vmem>>, vector<4x8x8x4xf32>,
    %c2_i32_152 = arith.constant 2 : i32
    %88 = arith.addi %7, %c2_i32_152 : i32
    %89 = arith.index_cast %88 : i32 to index
    %c0_153 = arith.constant 0 : index
    %c2_154 = arith.constant 2 : index
    %c0_155 = arith.constant 0 : index
    %90 = vector.load %arg6[%89, %c0_153, %c2_154, %c0_155] : memref<10x10x10x4xf32, #tpu.memory_space<vmem>>, vector<4x8x8x4xf32>
    %c0_156 = arith.constant 0 : index
    %c0_157 = arith.constant 0 : index
    %c0_158 = arith.constant 0 : index
    %c80 = arith.constant 80 : index
    %91 = vector.load %arg7[%c0_156, %c0_157, %c0_158, %c80] : memref<4x8x8x128xf32, #tpu.memory_space<vmem>>, vector<4x8x8x4xf32>
    tpu.vector_store %arg7[%c0_156, %c0_157, %c0_158, %c80], %90 {strides = array<i32>} : memref<4x8x8x128xf32, #tpu.memory_space<vmem>>, vector<4x8x8x4xf32>,
    %c2_i32_159 = arith.constant 2 : i32
    %92 = arith.addi %7, %c2_i32_159 : i32
    %93 = arith.index_cast %92 : i32 to index
    %c1_160 = arith.constant 1 : index
    %c0_161 = arith.constant 0 : index
    %c0_162 = arith.constant 0 : index
    %94 = vector.load %arg6[%93, %c1_160, %c0_161, %c0_162] : memref<10x10x10x4xf32, #tpu.memory_space<vmem>>, vector<4x8x8x4xf32>
    %c0_163 = arith.constant 0 : index
    %c0_164 = arith.constant 0 : index
    %c0_165 = arith.constant 0 : index
    %c84 = arith.constant 84 : index
    %95 = vector.load %arg7[%c0_163, %c0_164, %c0_165, %c84] : memref<4x8x8x128xf32, #tpu.memory_space<vmem>>, vector<4x8x8x4xf32>
    tpu.vector_store %arg7[%c0_163, %c0_164, %c0_165, %c84], %94 {strides = array<i32>} : memref<4x8x8x128xf32, #tpu.memory_space<vmem>>, vector<4x8x8x4xf32>,
    %c2_i32_166 = arith.constant 2 : i32
    %96 = arith.addi %7, %c2_i32_166 : i32
    %97 = arith.index_cast %96 : i32 to index
    %c1_167 = arith.constant 1 : index
    %c1_168 = arith.constant 1 : index
    %c0_169 = arith.constant 0 : index
    %98 = vector.load %arg6[%97, %c1_167, %c1_168, %c0_169] : memref<10x10x10x4xf32, #tpu.memory_space<vmem>>, vector<4x8x8x4xf32>
    %c0_170 = arith.constant 0 : index
    %c0_171 = arith.constant 0 : index
    %c0_172 = arith.constant 0 : index
    %c88 = arith.constant 88 : index
    %99 = vector.load %arg7[%c0_170, %c0_171, %c0_172, %c88] : memref<4x8x8x128xf32, #tpu.memory_space<vmem>>, vector<4x8x8x4xf32>
    tpu.vector_store %arg7[%c0_170, %c0_171, %c0_172, %c88], %98 {strides = array<i32>} : memref<4x8x8x128xf32, #tpu.memory_space<vmem>>, vector<4x8x8x4xf32>,
    %c2_i32_173 = arith.constant 2 : i32
    %100 = arith.addi %7, %c2_i32_173 : i32
    %101 = arith.index_cast %100 : i32 to index
    %c1_174 = arith.constant 1 : index
    %c2_175 = arith.constant 2 : index
    %c0_176 = arith.constant 0 : index
    %102 = vector.load %arg6[%101, %c1_174, %c2_175, %c0_176] : memref<10x10x10x4xf32, #tpu.memory_space<vmem>>, vector<4x8x8x4xf32>
    %c0_177 = arith.constant 0 : index
    %c0_178 = arith.constant 0 : index
    %c0_179 = arith.constant 0 : index
    %c92 = arith.constant 92 : index
    %103 = vector.load %arg7[%c0_177, %c0_178, %c0_179, %c92] : memref<4x8x8x128xf32, #tpu.memory_space<vmem>>, vector<4x8x8x4xf32>
    tpu.vector_store %arg7[%c0_177, %c0_178, %c0_179, %c92], %102 {strides = array<i32>} : memref<4x8x8x128xf32, #tpu.memory_space<vmem>>, vector<4x8x8x4xf32>,
    %c2_i32_180 = arith.constant 2 : i32
    %104 = arith.addi %7, %c2_i32_180 : i32
    %105 = arith.index_cast %104 : i32 to index
    %c2_181 = arith.constant 2 : index
    %c0_182 = arith.constant 0 : index
    %c0_183 = arith.constant 0 : index
    %106 = vector.load %arg6[%105, %c2_181, %c0_182, %c0_183] : memref<10x10x10x4xf32, #tpu.memory_space<vmem>>, vector<4x8x8x4xf32>
    %c0_184 = arith.constant 0 : index
    %c0_185 = arith.constant 0 : index
    %c0_186 = arith.constant 0 : index
    %c96 = arith.constant 96 : index
    %107 = vector.load %arg7[%c0_184, %c0_185, %c0_186, %c96] : memref<4x8x8x128xf32, #tpu.memory_space<vmem>>, vector<4x8x8x4xf32>
    tpu.vector_store %arg7[%c0_184, %c0_185, %c0_186, %c96], %106 {strides = array<i32>} : memref<4x8x8x128xf32, #tpu.memory_space<vmem>>, vector<4x8x8x4xf32>,
    %c2_i32_187 = arith.constant 2 : i32
    %108 = arith.addi %7, %c2_i32_187 : i32
    %109 = arith.index_cast %108 : i32 to index
    %c2_188 = arith.constant 2 : index
    %c1_189 = arith.constant 1 : index
    %c0_190 = arith.constant 0 : index
    %110 = vector.load %arg6[%109, %c2_188, %c1_189, %c0_190] : memref<10x10x10x4xf32, #tpu.memory_space<vmem>>, vector<4x8x8x4xf32>
    %c0_191 = arith.constant 0 : index
    %c0_192 = arith.constant 0 : index
    %c0_193 = arith.constant 0 : index
    %c100 = arith.constant 100 : index
    %111 = vector.load %arg7[%c0_191, %c0_192, %c0_193, %c100] : memref<4x8x8x128xf32, #tpu.memory_space<vmem>>, vector<4x8x8x4xf32>
    tpu.vector_store %arg7[%c0_191, %c0_192, %c0_193, %c100], %110 {strides = array<i32>} : memref<4x8x8x128xf32, #tpu.memory_space<vmem>>, vector<4x8x8x4xf32>,
    %c2_i32_194 = arith.constant 2 : i32
    %112 = arith.addi %7, %c2_i32_194 : i32
    %113 = arith.index_cast %112 : i32 to index
    %c2_195 = arith.constant 2 : index
    %c2_196 = arith.constant 2 : index
    %c0_197 = arith.constant 0 : index
    %114 = vector.load %arg6[%113, %c2_195, %c2_196, %c0_197] : memref<10x10x10x4xf32, #tpu.memory_space<vmem>>, vector<4x8x8x4xf32>
    %c0_198 = arith.constant 0 : index
    %c0_199 = arith.constant 0 : index
    %c0_200 = arith.constant 0 : index
    %c104 = arith.constant 104 : index
    %115 = vector.load %arg7[%c0_198, %c0_199, %c0_200, %c104] : memref<4x8x8x128xf32, #tpu.memory_space<vmem>>, vector<4x8x8x4xf32>
    tpu.vector_store %arg7[%c0_198, %c0_199, %c0_200, %c104], %114 {strides = array<i32>} : memref<4x8x8x128xf32, #tpu.memory_space<vmem>>, vector<4x8x8x4xf32>,
    %c0_201 = arith.constant 0 : index
    %c0_202 = arith.constant 0 : index
    %c0_203 = arith.constant 0 : index
    %c0_204 = arith.constant 0 : index
    %116 = vector.load %arg7[%c0_201, %c0_202, %c0_203, %c0_204] : memref<4x8x8x128xf32, #tpu.memory_space<vmem>>, vector<4x8x8x128xf32>
    %117 = vector.shape_cast %116 : vector<4x8x8x128xf32> to vector<256x128xf32>
    %c0_205 = arith.constant 0 : index
    %c0_206 = arith.constant 0 : index
    %118 = vector.load %arg3[%c0_205, %c0_206] : memref<128x128xf32, #tpu.memory_space<vmem>>, vector<128x128xf32>
    %cst_207 = arith.constant dense<0.000000e+00> : vector<256x128xf32>
    %119 = tpu.matmul %117, %118, %cst_207 {dimension_numbers = #tpu.dot_dimension_numbers<[1], [0], [0], [1], [0, 0, 1, 1], [], []>} : vector<256x128xf32>, vector<128x128xf32>, vector<256x128xf32> -> vector<256x128xf32>
    %c0_208 = arith.constant 0 : index
    %c0_209 = arith.constant 0 : index
    %120 = vector.load %arg4[%c0_208, %c0_209] : memref<1x128xf32, #tpu.memory_space<vmem>>, vector<1x128xf32>
    %121 = vector.broadcast %120 : vector<1x128xf32> to vector<256x128xf32>
    %122 = arith.addf %119, %121 : vector<256x128xf32>
    %cst_210 = arith.constant 0.000000e+00 : f32
    %123 = vector.broadcast %cst_210 : f32 to vector<256x128xf32>
    %124 = arith.maximumf %122, %123 : vector<256x128xf32>
    %c0_211 = arith.constant 0 : index
    %c0_212 = arith.constant 0 : index
    %c0_213 = arith.constant 0 : index
    %125 = vector.load %arg5[%c0_211, %c0_212, %c0_213] : memref<1x256x128xf32, #tpu.memory_space<vmem>>, vector<1x256x128xf32>
    %126 = vector.shape_cast %125 : vector<1x256x128xf32> to vector<256x128xf32>
    %127 = vector.shape_cast %124 : vector<256x128xf32> to vector<1x256x128xf32>
    tpu.vector_store %arg5[%c0_211, %c0_212, %c0_213], %127 {strides = array<i32>} : memref<1x256x128xf32, #tpu.memory_space<vmem>>, vector<1x256x128xf32>,
    return
  }
  func.func @transform_0(%arg0: i32, %arg1: i32) -> (i32, i32, i32, i32, i32) {
    %c0_i32 = arith.constant 0 : i32
    %c0_i32_0 = arith.constant 0 : i32
    %c0_i32_1 = arith.constant 0 : i32
    %c0_i32_2 = arith.constant 0 : i32
    %c0_i32_3 = arith.constant 0 : i32
    return %arg0, %c0_i32, %c0_i32_0, %c0_i32_1, %c0_i32_2 : i32, i32, i32, i32, i32
  }
  func.func @transform_1(%arg0: i32, %arg1: i32) -> (i32, i32) {
    %c0_i32 = arith.constant 0 : i32
    %c0_i32_0 = arith.constant 0 : i32
    %c0_i32_1 = arith.constant 0 : i32
    return %c0_i32, %c0_i32_0 : i32, i32
  }
  func.func @transform_2(%arg0: i32, %arg1: i32) -> (i32, i32) {
    %c0_i32 = arith.constant 0 : i32
    %c0_i32_0 = arith.constant 0 : i32
    %c0_i32_1 = arith.constant 0 : i32
    return %c0_i32, %c0_i32_0 : i32, i32
  }
  func.func @transform_3(%arg0: i32, %arg1: i32) -> (i32, i32, i32) {
    %c0_i32 = arith.constant 0 : i32
    %c0_i32_0 = arith.constant 0 : i32
    return %arg0, %arg1, %c0_i32 : i32, i32, i32
  }
}

</mosaic_0001>

<bundles_post_ra>
// kernel: tpu_custom_call.1
= control target key start
LH: loop header
LB: loop body
LE: loop exit
PB: predicated region body
PF: predicated region fallthrough
CT: control target
= control target key end

     0   :  { %8 = vsyncpa [#allocation5], 0  ;;  %s11615_s0 = inlined_call_operand.vmem [shape: f32[2,8,8,8,4], index: 0, kind: input, shape index: {}]   ;;  %s11616_s1 = inlined_call_operand.vmem [shape: f32[128,128], index: 1, kind: input, shape index: {}]   ;;  %s11617_s2 = inlined_call_operand.vmem [shape: f32[1,128], index: 2, kind: input, shape index: {}]   ;;  %s11618_s3 = inlined_call_operand.hbm [shape: f32[2,512,128], index: 3, kind: output, shape index: {}]  }
   0x1   :  { %10 = vsyncpa [#allocation5 + $0x1], 0  ;;  %s7321_s12 = smov 0   ;;  %s7323_s13 = smov 0  }
   0x2   :  { %s7325_s14 = smov 0   ;;  %s7327_s15 = smov 0  }
   0x3   :  { %s7329_s16 = smov 0   ;;  %s7331_s17 = smov 0  }
   0x4   :  { %s7333_s18 = smov 0   ;;  %s7335_s19 = smov 0  }
   0x5 LB: > { %s6119_s20 = sadd.s32 4294967295, %s7270_s19   ;;  %s6120_s21 = sadd.s32 4294967294, %s7270_s19   ;;  %s7270_s19 = sphi %s7335_s19, %s16_s19   ;;  %s7266_s18 = sphi %s7333_s18, %s11729_s18   ;;  %s7262_s17 = sphi %s7331_s17, %s11728_s17   ;;  %s7258_s16 = sphi %s7329_s16, %s11727_s16   ;;  %s7254_s15 = sphi %s7327_s15, %s11726_s15   ;;  %s7250_s14 = sphi %s7325_s14, %s11725_s14   ;;  %s7246_s13 = sphi %s7323_s13, %s11724_s13   ;;  %s7242_s12 = sphi %s7321_s12, %s11723_s12  }
   0x6   : > { %s25_s22 = sadd.s32 1, %s7262_s17  ;;  %s28_s23 = sadd.s32 1, %s7266_s18 }
   0x7   : > { %p26_p0 = scmp.ge.s32.totalorder %s25_s22, 2  ;;  %p115_p1 = scmp.ne.s32.totalorder %s7250_s14, %s7246_s13 }
   0x8   : > { %p116_p2 = scmp.eq.s32.totalorder %s6119_s20, 3  ;;  %p121_p5 = scmp.ne.s32.totalorder %s7246_s13, %s7242_s12 }
   0x9   : > { %s11731_s22 = smov (%p26_p0, %s25_s22), 0  ;;  %s11733_s23 = smov (!%p26_p0, %s28_s23), %s7266_s18 }
   0xa   : > { %s101_s24 = ssub.s32 %s7262_s17, %s11731_s22  ;;  %p7372_p3 = por %p116_p2, %p115_p1 }
   0xb   : > { %p30_p4 = scmp.ge.s32.totalorder %s11733_s23, 2  ;;  %p122_p6 = scmp.eq.s32.totalorder %s6120_s21, 3 }
   0xc   : > { %p6123_p7 = scmp.ge.s32.totalorder %s7270_s19, 1  ;;  %p154_p9 = scmp.lt.s32.totalorder %s7270_s19, 5 }
   0xd   : > { %s11735_s23 = smov (%p30_p4, %s11733_s23), 0  ;;  %p7381_p8 = por %p122_p6, %p121_p5 }
   0xe   : > { %s100_s27 = ssub.s32 %s7266_s18, %s11735_s23  ;;  %s105_s28 = sadd.s32 1, %s7250_s14 }
   0xf   : > { %s102_s29 = sor.u32 %s101_s24, %s100_s27  ;;  %p155_p10 = pnand %p6123_p7, %p154_p9 }
  0x10   : > { %p103_p11 = scmp.eq.s32.totalorder %s102_s29, 0 }
  0x11   : > { %158 = sbr.rel (%p155_p10) target bundleno = 2175 (0x87f), region = 32 }
  0x12   : > { %s7390_s30 = scalar_select %p103_p11, %s7250_s14, %s105_s28  }
  0x16   : > { %p178_p12 = scmp.lt.s32.totalorder %s7258_s16, 1  ;;  %vm184_vm0 = vcmask 31744   ;;  %vm186_vm1 = vcmask 25600   ;;  %v7272_v0 = vmov 0.0   ;;  %vm515_vm2 = vcmask 1048416   ;;  %s6128_s9 = smul.u32 640, %s7254_s15 }
  0x17   : > { %185 = vst.msk [vmem:[#allocation2] sm:$0xff] %vm184_vm0, %v7272_v0  ;;  %188 = vst.msk [vmem:[#allocation2 + $0x10] sm:$0xff] %vm184_vm0, %v7272_v0  ;;  %s7273_s11 = smov 4   ;;  %s7274_s20 = smov 8   ;;  %vm775_vm3 = vcmask 64544   ;;  %vm968_vm4 = vcmask 97344  }
  0x18   : > { %187 = vst.msk [vmem:[#allocation2 + $0x8] sm:$0x3] %vm186_vm1, %v7272_v0  ;;  %189 = vst.msk [vmem:[#allocation2 + $0x18] sm:$0x3] %vm186_vm1, %v7272_v0  ;;  %s179_s4 = scalar_select %p178_p12, %s7258_s16, 1  ;;  %vm1163_vm5 = vcmask 130144  }
  0x19   : > { %190 = vst.msk [vmem:[#allocation2 + $0x20] sm:$0xff] %vm184_vm0, %v7272_v0  ;;  %192 = vst.msk [vmem:[#allocation2 + $0x30] sm:$0xff] %vm184_vm0, %v7272_v0  ;;  %s7994_s10 = scalar_lea.vmem [#allocation2], %s6128_s9  ;;  %s7275_s21 = smov 12   ;;  %vm1356_vm6 = vcmask 162944   ;;  %vm1549_vm7 = vcmask 195744  }
  0x1a   : > { %191 = vst.msk [vmem:[#allocation2 + $0x28] sm:$0x3] %vm186_vm1, %v7272_v0  ;;  %193 = vst.msk [vmem:[#allocation2 + $0x38] sm:$0x3] %vm186_vm1, %v7272_v0  ;;  %s6916_s5 = sshll.u32 %s179_s4, 9  ;;  %s7276_s24 = smov 16  }
  0x1b   : > { %194 = vst.msk [vmem:[#allocation2 + $0x40] sm:$0xff] %vm184_vm0, %v7272_v0  ;;  %196 = vst.msk [vmem:[#allocation2 + $0x50] sm:$0xff] %vm184_vm0, %v7272_v0  ;;  %s7799_s8 = scalar_lea.vmem %s11615_s0, %s6916_s5  ;;  %s7277_s27 = smov 20   ;;  %vm1744_vm8 = vcmask 228544   ;;  %vm1937_vm9 = vcmask 261344   ;;  %vm2130_vm10 = vcmask 294144  }
  0x1c   : > { %195 = vst.msk [vmem:[#allocation2 + $0x48] sm:$0x3] %vm186_vm1, %v7272_v0  ;;  %197 = vst.msk [vmem:[#allocation2 + $0x58] sm:$0x3] %vm186_vm1, %v7272_v0  ;;  %v386_v1 = vld [vmem:[%s7799_s8] sm:$0xff]  ;;  %v387_v2 = vld [vmem:[%s7799_s8 + $0x8] sm:$0xff] }
  0x1d   : > { %198 = vst.msk [vmem:[#allocation2 + $0x60] sm:$0xff] %vm184_vm0, %v7272_v0  ;;  %200 = vst.msk [vmem:[#allocation2 + $0x70] sm:$0xff] %vm184_vm0, %v7272_v0  ;;  %v388_v3 = vld [vmem:[%s7799_s8 + $0x10] sm:$0xff]  ;;  %v389_v4 = vld [vmem:[%s7799_s8 + $0x18] sm:$0xff]  ;;  %s7278_s28 = smov 24   ;;  %s7279_s29 = smov 28  }
  0x1e   : > { %199 = vst.msk [vmem:[#allocation2 + $0x68] sm:$0x3] %vm186_vm1, %v7272_v0  ;;  %201 = vst.msk [vmem:[#allocation2 + $0x78] sm:$0x3] %vm186_vm1, %v7272_v0  ;;  %v390_v5 = vld [vmem:[%s7799_s8 + $0x20] sm:$0xff]  ;;  %v391_v6 = vld [vmem:[%s7799_s8 + $0x28] sm:$0xff] }
  0x1f   : > { %202 = vst.msk [vmem:[#allocation2 + $0x80] sm:$0xff] %vm184_vm0, %v7272_v0  ;;  %204 = vst.msk [vmem:[#allocation2 + $0x90] sm:$0xff] %vm184_vm0, %v7272_v0  ;;  %v392_v7 = vld [vmem:[%s7799_s8 + $0x30] sm:$0xff]  ;;  %v393_v8 = vld [vmem:[%s7799_s8 + $0x38] sm:$0xff]  ;;  %s7280_s4 = smov 32   ;;  %s7281_s5 = smov 36  }
  0x20   : > { %203 = vst.msk [vmem:[#allocation2 + $0x88] sm:$0x3] %vm186_vm1, %v7272_v0  ;;  %205 = vst.msk [vmem:[#allocation2 + $0x98] sm:$0x3] %vm186_vm1, %v7272_v0  ;;  %v394_v9 = vld [vmem:[%s7799_s8 + $0x40] sm:$0xff]  ;;  %v395_v10 = vld [vmem:[%s7799_s8 + $0x48] sm:$0xff] }
  0x21   : > { %206 = vst.msk [vmem:[#allocation2 + $0xa0] sm:$0xff] %vm184_vm0, %v7272_v0  ;;  %208 = vst.msk [vmem:[#allocation2 + $0xb0] sm:$0xff] %vm184_vm0, %v7272_v0  ;;  %v396_v11 = vld [vmem:[%s7799_s8 + $0x50] sm:$0xff]  ;;  %v397_v12 = vld [vmem:[%s7799_s8 + $0x58] sm:$0xff]  ;;  %s7282_s6 = smov 40   ;;  %vm2326_vm11 = vcmask 326944  }
  0x22   : > { %207 = vst.msk [vmem:[#allocation2 + $0xa8] sm:$0x3] %vm186_vm1, %v7272_v0  ;;  %209 = vst.msk [vmem:[#allocation2 + $0xb8] sm:$0x3] %vm186_vm1, %v7272_v0  ;;  %v398_v13 = vld [vmem:[%s7799_s8 + $0x60] sm:$0xff]  ;;  %v399_v14 = vld [vmem:[%s7799_s8 + $0x68] sm:$0xff] }
  0x23   : > { %210 = vst.msk [vmem:[#allocation2 + $0xc0] sm:$0xff] %vm184_vm0, %v7272_v0  ;;  %212 = vst.msk [vmem:[#allocation2 + $0xd0] sm:$0xff] %vm184_vm0, %v7272_v0  ;;  %v400_v15 = vld [vmem:[%s7799_s8 + $0x70] sm:$0xff]  ;;  %v401_v16 = vld [vmem:[%s7799_s8 + $0x78] sm:$0xff]  ;;  %s7283_s7 = smov 44   ;;  %vm2519_vm12 = vcmask 359744  }
  0x24   : > { %211 = vst.msk [vmem:[#allocation2 + $0xc8] sm:$0x3] %vm186_vm1, %v7272_v0  ;;  %213 = vst.msk [vmem:[#allocation2 + $0xd8] sm:$0x3] %vm186_vm1, %v7272_v0  ;;  %v402_v17 = vld [vmem:[%s7799_s8 + $0x80] sm:$0xff]  ;;  %v403_v18 = vld [vmem:[%s7799_s8 + $0x88] sm:$0xff] }
  0x25   : > { %214 = vst.msk [vmem:[#allocation2 + $0xe0] sm:$0xff] %vm184_vm0, %v7272_v0  ;;  %216 = vst.msk [vmem:[#allocation2 + $0xf0] sm:$0xff] %vm184_vm0, %v7272_v0  ;;  %v404_v19 = vld [vmem:[%s7799_s8 + $0x90] sm:$0xff]  ;;  %v405_v20 = vld [vmem:[%s7799_s8 + $0x98] sm:$0xff]  ;;  %vm2712_vm13 = vcmask 392544   ;;  %s7285_s9 = smov 52  }
  0x26   : > { %215 = vst.msk [vmem:[#allocation2 + $0xe8] sm:$0x3] %vm186_vm1, %v7272_v0  ;;  %217 = vst.msk [vmem:[#allocation2 + $0xf8] sm:$0x3] %vm186_vm1, %v7272_v0  ;;  %v406_v21 = vld [vmem:[%s7799_s8 + $0xa0] sm:$0xff]  ;;  %v407_v22 = vld [vmem:[%s7799_s8 + $0xa8] sm:$0xff] }
  0x27   : > { %218 = vst.msk [vmem:[#allocation2 + $0x100] sm:$0xff] %vm184_vm0, %v7272_v0  ;;  %220 = vst.msk [vmem:[#allocation2 + $0x110] sm:$0xff] %vm184_vm0, %v7272_v0  ;;  %v408_v23 = vld [vmem:[%s7799_s8 + $0xb0] sm:$0xff]  ;;  %v409_v24 = vld [vmem:[%s7799_s8 + $0xb8] sm:$0xff]  ;;  %vm2907_vm14 = vcmask 425344   ;;  %vm3100_vm15 = vcmask 458144  }
  0x28   : > { %219 = vst.msk [vmem:[#allocation2 + $0x108] sm:$0x3] %vm186_vm1, %v7272_v0  ;;  %221 = vst.msk [vmem:[#allocation2 + $0x118] sm:$0x3] %vm186_vm1, %v7272_v0  ;;  %v410_v25 = vld [vmem:[%s7799_s8 + $0xc0] sm:$0xff]  ;;  %v411_v26 = vld [vmem:[%s7799_s8 + $0xc8] sm:$0xff] }
  0x29   : > { %222 = vst.msk [vmem:[#allocation2 + $0x120] sm:$0xff] %vm184_vm0, %v7272_v0  ;;  %224 = vst.msk [vmem:[#allocation2 + $0x130] sm:$0xff] %vm184_vm0, %v7272_v0  ;;  %v412_v27 = vld [vmem:[%s7799_s8 + $0xd0] sm:$0xff]  ;;  %v413_v28 = vld [vmem:[%s7799_s8 + $0xd8] sm:$0xff] }
  0x2a   : > { %223 = vst.msk [vmem:[#allocation2 + $0x128] sm:$0x3] %vm186_vm1, %v7272_v0  ;;  %225 = vst.msk [vmem:[#allocation2 + $0x138] sm:$0x3] %vm186_vm1, %v7272_v0  ;;  %v414_v29 = vld [vmem:[%s7799_s8 + $0xe0] sm:$0xff]  ;;  %v415_v30 = vld [vmem:[%s7799_s8 + $0xe8] sm:$0xff] }
  0x2b   : > { %226 = vst.msk [vmem:[#allocation2 + $0x140] sm:$0xff] %vm184_vm0, %v7272_v0  ;;  %228 = vst.msk [vmem:[#allocation2 + $0x150] sm:$0xff] %vm184_vm0, %v7272_v0  ;;  %v416_v31 = vld [vmem:[%s7799_s8 + $0xf0] sm:$0xff]  ;;  %v417_v32 = vld [vmem:[%s7799_s8 + $0xf8] sm:$0xff] }
  0x2c   : > { %227 = vst.msk [vmem:[#allocation2 + $0x148] sm:$0x3] %vm186_vm1, %v7272_v0  ;;  %229 = vst.msk [vmem:[#allocation2 + $0x158] sm:$0x3] %vm186_vm1, %v7272_v0  ;;  %v418_v33 = vld [vmem:[%s7799_s8 + $0x100] sm:$0xff]  ;;  %v419_v34 = vld [vmem:[%s7799_s8 + $0x108] sm:$0xff] }
  0x2d   : > { %230 = vst.msk [vmem:[#allocation2 + $0x160] sm:$0xff] %vm184_vm0, %v7272_v0  ;;  %232 = vst.msk [vmem:[#allocation2 + $0x170] sm:$0xff] %vm184_vm0, %v7272_v0  ;;  %v420_v35 = vld [vmem:[%s7799_s8 + $0x110] sm:$0xff]  ;;  %v421_v36 = vld [vmem:[%s7799_s8 + $0x118] sm:$0xff] }
  0x2e   : > { %231 = vst.msk [vmem:[#allocation2 + $0x168] sm:$0x3] %vm186_vm1, %v7272_v0  ;;  %233 = vst.msk [vmem:[#allocation2 + $0x178] sm:$0x3] %vm186_vm1, %v7272_v0  ;;  %v422_v37 = vld [vmem:[%s7799_s8 + $0x120] sm:$0xff]  ;;  %v423_v38 = vld [vmem:[%s7799_s8 + $0x128] sm:$0xff] }
  0x2f   : > { %234 = vst.msk [vmem:[#allocation2 + $0x180] sm:$0xff] %vm184_vm0, %v7272_v0  ;;  %236 = vst.msk [vmem:[#allocation2 + $0x190] sm:$0xff] %vm184_vm0, %v7272_v0  ;;  %v424_v39 = vld [vmem:[%s7799_s8 + $0x130] sm:$0xff]  ;;  %v425_v40 = vld [vmem:[%s7799_s8 + $0x138] sm:$0xff] }
  0x30   : > { %235 = vst.msk [vmem:[#allocation2 + $0x188] sm:$0x3] %vm186_vm1, %v7272_v0  ;;  %237 = vst.msk [vmem:[#allocation2 + $0x198] sm:$0x3] %vm186_vm1, %v7272_v0  ;;  %v426_v41 = vld [vmem:[%s7799_s8 + $0x140] sm:$0xff]  ;;  %v427_v42 = vld [vmem:[%s7799_s8 + $0x148] sm:$0xff] }
  0x31   : > { %238 = vst.msk [vmem:[#allocation2 + $0x1a0] sm:$0xff] %vm184_vm0, %v7272_v0  ;;  %240 = vst.msk [vmem:[#allocation2 + $0x1b0] sm:$0xff] %vm184_vm0, %v7272_v0  ;;  %v428_v43 = vld [vmem:[%s7799_s8 + $0x150] sm:$0xff]  ;;  %v429_v44 = vld [vmem:[%s7799_s8 + $0x158] sm:$0xff] }
  0x32   : > { %239 = vst.msk [vmem:[#allocation2 + $0x1a8] sm:$0x3] %vm186_vm1, %v7272_v0  ;;  %241 = vst.msk [vmem:[#allocation2 + $0x1b8] sm:$0x3] %vm186_vm1, %v7272_v0  ;;  %v430_v45 = vld [vmem:[%s7799_s8 + $0x160] sm:$0xff]  ;;  %v431_v46 = vld [vmem:[%s7799_s8 + $0x168] sm:$0xff] }
  0x33   : > { %242 = vst.msk [vmem:[#allocation2 + $0x1c0] sm:$0xff] %vm184_vm0, %v7272_v0  ;;  %244 = vst.msk [vmem:[#allocation2 + $0x1d0] sm:$0xff] %vm184_vm0, %v7272_v0  ;;  %v432_v47 = vld [vmem:[%s7799_s8 + $0x170] sm:$0xff]  ;;  %v433_v48 = vld [vmem:[%s7799_s8 + $0x178] sm:$0xff] }
  0x34   : > { %243 = vst.msk [vmem:[#allocation2 + $0x1c8] sm:$0x3] %vm186_vm1, %v7272_v0  ;;  %245 = vst.msk [vmem:[#allocation2 + $0x1d8] sm:$0x3] %vm186_vm1, %v7272_v0  ;;  %v434_v49 = vld [vmem:[%s7799_s8 + $0x180] sm:$0xff]  ;;  %v435_v50 = vld [vmem:[%s7799_s8 + $0x188] sm:$0xff] }
  0x35   : > { %246 = vst.msk [vmem:[#allocation2 + $0x1e0] sm:$0xff] %vm184_vm0, %v7272_v0  ;;  %248 = vst.msk [vmem:[#allocation2 + $0x1f0] sm:$0xff] %vm184_vm0, %v7272_v0  ;;  %v436_v51 = vld [vmem:[%s7799_s8 + $0x190] sm:$0xff]  ;;  %v437_v52 = vld [vmem:[%s7799_s8 + $0x198] sm:$0xff] }
  0x36   : > { %247 = vst.msk [vmem:[#allocation2 + $0x1e8] sm:$0x3] %vm186_vm1, %v7272_v0  ;;  %249 = vst.msk [vmem:[#allocation2 + $0x1f8] sm:$0x3] %vm186_vm1, %v7272_v0  ;;  %v438_v53 = vld [vmem:[%s7799_s8 + $0x1a0] sm:$0xff]  ;;  %v439_v54 = vld [vmem:[%s7799_s8 + $0x1a8] sm:$0xff] }
  0x37   : > { %250 = vst.msk [vmem:[#allocation2 + $0x200] sm:$0xff] %vm184_vm0, %v7272_v0  ;;  %252 = vst.msk [vmem:[#allocation2 + $0x210] sm:$0xff] %vm184_vm0, %v7272_v0  ;;  %v440_v55 = vld [vmem:[%s7799_s8 + $0x1b0] sm:$0xff]  ;;  %v441_v56 = vld [vmem:[%s7799_s8 + $0x1b8] sm:$0xff] }
  0x38   : > { %251 = vst.msk [vmem:[#allocation2 + $0x208] sm:$0x3] %vm186_vm1, %v7272_v0  ;;  %253 = vst.msk [vmem:[#allocation2 + $0x218] sm:$0x3] %vm186_vm1, %v7272_v0  ;;  %v442_v57 = vld [vmem:[%s7799_s8 + $0x1c0] sm:$0xff]  ;;  %v443_v58 = vld [vmem:[%s7799_s8 + $0x1c8] sm:$0xff] }
  0x39   : > { %254 = vst.msk [vmem:[#allocation2 + $0x220] sm:$0xff] %vm184_vm0, %v7272_v0  ;;  %256 = vst.msk [vmem:[#allocation2 + $0x230] sm:$0xff] %vm184_vm0, %v7272_v0  ;;  %v444_v59 = vld [vmem:[%s7799_s8 + $0x1d0] sm:$0xff]  ;;  %v445_v60 = vld [vmem:[%s7799_s8 + $0x1d8] sm:$0xff] }
  0x3a   : > { %255 = vst.msk [vmem:[#allocation2 + $0x228] sm:$0x3] %vm186_vm1, %v7272_v0  ;;  %257 = vst.msk [vmem:[#allocation2 + $0x238] sm:$0x3] %vm186_vm1, %v7272_v0  ;;  %v446_v61 = vld [vmem:[%s7799_s8 + $0x1e0] sm:$0xff]  ;;  %v447_v62 = vld [vmem:[%s7799_s8 + $0x1e8] sm:$0xff] }
  0x3b   : > { %258 = vst.msk [vmem:[#allocation2 + $0x240] sm:$0xff] %vm184_vm0, %v7272_v0  ;;  %260 = vst.msk [vmem:[#allocation2 + $0x250] sm:$0xff] %vm184_vm0, %v7272_v0  ;;  %v448_v63 = vld [vmem:[%s7799_s8 + $0x1f0] sm:$0xff] }
  0x3c   : > { %259 = vst.msk [vmem:[#allocation2 + $0x248] sm:$0x3] %vm186_vm1, %v7272_v0  ;;  %261 = vst.msk [vmem:[#allocation2 + $0x258] sm:$0x3] %vm186_vm1, %v7272_v0 }
  0x3d   : > { %262 = vst.msk [vmem:[#allocation2 + $0x260] sm:$0xff] %vm184_vm0, %v7272_v0  ;;  %264 = vst.msk [vmem:[#allocation2 + $0x270] sm:$0xff] %vm184_vm0, %v7272_v0 }
  0x3e   : > { %263 = vst.msk [vmem:[#allocation2 + $0x268] sm:$0x3] %vm186_vm1, %v7272_v0  ;;  %265 = vst.msk [vmem:[#allocation2 + $0x278] sm:$0x3] %vm186_vm1, %v7272_v0 }
  0x3f   : > { %266 = vst.msk [vmem:[#allocation2 + $0x280] sm:$0xff] %vm184_vm0, %v7272_v0  ;;  %268 = vst.msk [vmem:[#allocation2 + $0x290] sm:$0xff] %vm184_vm0, %v7272_v0 }
  0x40   : > { %267 = vst.msk [vmem:[#allocation2 + $0x288] sm:$0x3] %vm186_vm1, %v7272_v0  ;;  %269 = vst.msk [vmem:[#allocation2 + $0x298] sm:$0x3] %vm186_vm1, %v7272_v0 }
  0x41   : > { %270 = vst.msk [vmem:[#allocation2 + $0x2a0] sm:$0xff] %vm184_vm0, %v7272_v0  ;;  %272 = vst.msk [vmem:[#allocation2 + $0x2b0] sm:$0xff] %vm184_vm0, %v7272_v0 }
  0x42   : > { %271 = vst.msk [vmem:[#allocation2 + $0x2a8] sm:$0x3] %vm186_vm1, %v7272_v0  ;;  %273 = vst.msk [vmem:[#allocation2 + $0x2b8] sm:$0x3] %vm186_vm1, %v7272_v0 }
  0x43   : > { %274 = vst.msk [vmem:[#allocation2 + $0x2c0] sm:$0xff] %vm184_vm0, %v7272_v0  ;;  %276 = vst.msk [vmem:[#allocation2 + $0x2d0] sm:$0xff] %vm184_vm0, %v7272_v0 }
  0x44   : > { %275 = vst.msk [vmem:[#allocation2 + $0x2c8] sm:$0x3] %vm186_vm1, %v7272_v0  ;;  %277 = vst.msk [vmem:[#allocation2 + $0x2d8] sm:$0x3] %vm186_vm1, %v7272_v0 }
  0x45   : > { %278 = vst.msk [vmem:[#allocation2 + $0x2e0] sm:$0xff] %vm184_vm0, %v7272_v0  ;;  %280 = vst.msk [vmem:[#allocation2 + $0x2f0] sm:$0xff] %vm184_vm0, %v7272_v0 }
  0x46   : > { %279 = vst.msk [vmem:[#allocation2 + $0x2e8] sm:$0x3] %vm186_vm1, %v7272_v0  ;;  %281 = vst.msk [vmem:[#allocation2 + $0x2f8] sm:$0x3] %vm186_vm1, %v7272_v0 }
  0x47   : > { %282 = vst.msk [vmem:[#allocation2 + $0x300] sm:$0xff] %vm184_vm0, %v7272_v0  ;;  %284 = vst.msk [vmem:[#allocation2 + $0x310] sm:$0xff] %vm184_vm0, %v7272_v0 }
  0x48   : > { %283 = vst.msk [vmem:[#allocation2 + $0x308] sm:$0x3] %vm186_vm1, %v7272_v0  ;;  %285 = vst.msk [vmem:[#allocation2 + $0x318] sm:$0x3] %vm186_vm1, %v7272_v0 }
  0x49   : > { %286 = vst.msk [vmem:[#allocation2 + $0x320] sm:$0xff] %vm184_vm0, %v7272_v0  ;;  %288 = vst.msk [vmem:[#allocation2 + $0x330] sm:$0xff] %vm184_vm0, %v7272_v0 }
  0x4a   : > { %287 = vst.msk [vmem:[#allocation2 + $0x328] sm:$0x3] %vm186_vm1, %v7272_v0  ;;  %289 = vst.msk [vmem:[#allocation2 + $0x338] sm:$0x3] %vm186_vm1, %v7272_v0 }
  0x4b   : > { %290 = vst.msk [vmem:[#allocation2 + $0x340] sm:$0xff] %vm184_vm0, %v7272_v0  ;;  %292 = vst.msk [vmem:[#allocation2 + $0x350] sm:$0xff] %vm184_vm0, %v7272_v0 }
  0x4c   : > { %291 = vst.msk [vmem:[#allocation2 + $0x348] sm:$0x3] %vm186_vm1, %v7272_v0  ;;  %293 = vst.msk [vmem:[#allocation2 + $0x358] sm:$0x3] %vm186_vm1, %v7272_v0 }
  0x4d   : > { %294 = vst.msk [vmem:[#allocation2 + $0x360] sm:$0xff] %vm184_vm0, %v7272_v0  ;;  %296 = vst.msk [vmem:[#allocation2 + $0x370] sm:$0xff] %vm184_vm0, %v7272_v0 }
  0x4e   : > { %295 = vst.msk [vmem:[#allocation2 + $0x368] sm:$0x3] %vm186_vm1, %v7272_v0  ;;  %297 = vst.msk [vmem:[#allocation2 + $0x378] sm:$0x3] %vm186_vm1, %v7272_v0 }
  0x4f   : > { %298 = vst.msk [vmem:[#allocation2 + $0x380] sm:$0xff] %vm184_vm0, %v7272_v0  ;;  %300 = vst.msk [vmem:[#allocation2 + $0x390] sm:$0xff] %vm184_vm0, %v7272_v0 }
  0x50   : > { %299 = vst.msk [vmem:[#allocation2 + $0x388] sm:$0x3] %vm186_vm1, %v7272_v0  ;;  %301 = vst.msk [vmem:[#allocation2 + $0x398] sm:$0x3] %vm186_vm1, %v7272_v0 }
  0x51   : > { %302 = vst.msk [vmem:[#allocation2 + $0x3a0] sm:$0xff] %vm184_vm0, %v7272_v0  ;;  %304 = vst.msk [vmem:[#allocation2 + $0x3b0] sm:$0xff] %vm184_vm0, %v7272_v0 }
  0x52   : > { %303 = vst.msk [vmem:[#allocation2 + $0x3a8] sm:$0x3] %vm186_vm1, %v7272_v0  ;;  %305 = vst.msk [vmem:[#allocation2 + $0x3b8] sm:$0x3] %vm186_vm1, %v7272_v0 }
  0x53   : > { %306 = vst.msk [vmem:[#allocation2 + $0x3c0] sm:$0xff] %vm184_vm0, %v7272_v0  ;;  %308 = vst.msk [vmem:[#allocation2 + $0x3d0] sm:$0xff] %vm184_vm0, %v7272_v0 }
  0x54   : > { %307 = vst.msk [vmem:[#allocation2 + $0x3c8] sm:$0x3] %vm186_vm1, %v7272_v0  ;;  %309 = vst.msk [vmem:[#allocation2 + $0x3d8] sm:$0x3] %vm186_vm1, %v7272_v0 }
  0x55   : > { %310 = vst.msk [vmem:[#allocation2 + $0x3e0] sm:$0xff] %vm184_vm0, %v7272_v0  ;;  %312 = vst.msk [vmem:[#allocation2 + $0x3f0] sm:$0xff] %vm184_vm0, %v7272_v0 }
  0x56   : > { %311 = vst.msk [vmem:[#allocation2 + $0x3e8] sm:$0x3] %vm186_vm1, %v7272_v0  ;;  %313 = vst.msk [vmem:[#allocation2 + $0x3f8] sm:$0x3] %vm186_vm1, %v7272_v0 }
  0x57   : > { %314 = vst.msk [vmem:[#allocation2 + $0x400] sm:$0xff] %vm184_vm0, %v7272_v0  ;;  %316 = vst.msk [vmem:[#allocation2 + $0x410] sm:$0xff] %vm184_vm0, %v7272_v0 }
  0x58   : > { %315 = vst.msk [vmem:[#allocation2 + $0x408] sm:$0x3] %vm186_vm1, %v7272_v0  ;;  %317 = vst.msk [vmem:[#allocation2 + $0x418] sm:$0x3] %vm186_vm1, %v7272_v0 }
  0x59   : > { %318 = vst.msk [vmem:[#allocation2 + $0x420] sm:$0xff] %vm184_vm0, %v7272_v0  ;;  %320 = vst.msk [vmem:[#allocation2 + $0x430] sm:$0xff] %vm184_vm0, %v7272_v0 }
  0x5a   : > { %319 = vst.msk [vmem:[#allocation2 + $0x428] sm:$0x3] %vm186_vm1, %v7272_v0  ;;  %321 = vst.msk [vmem:[#allocation2 + $0x438] sm:$0x3] %vm186_vm1, %v7272_v0 }
  0x5b   : > { %322 = vst.msk [vmem:[#allocation2 + $0x440] sm:$0xff] %vm184_vm0, %v7272_v0  ;;  %324 = vst.msk [vmem:[#allocation2 + $0x450] sm:$0xff] %vm184_vm0, %v7272_v0 }
  0x5c   : > { %323 = vst.msk [vmem:[#allocation2 + $0x448] sm:$0x3] %vm186_vm1, %v7272_v0  ;;  %325 = vst.msk [vmem:[#allocation2 + $0x458] sm:$0x3] %vm186_vm1, %v7272_v0 }
  0x5d   : > { %326 = vst.msk [vmem:[#allocation2 + $0x460] sm:$0xff] %vm184_vm0, %v7272_v0  ;;  %328 = vst.msk [vmem:[#allocation2 + $0x470] sm:$0xff] %vm184_vm0, %v7272_v0 }
  0x5e   : > { %327 = vst.msk [vmem:[#allocation2 + $0x468] sm:$0x3] %vm186_vm1, %v7272_v0  ;;  %329 = vst.msk [vmem:[#allocation2 + $0x478] sm:$0x3] %vm186_vm1, %v7272_v0 }
  0x5f   : > { %330 = vst.msk [vmem:[#allocation2 + $0x480] sm:$0xff] %vm184_vm0, %v7272_v0  ;;  %332 = vst.msk [vmem:[#allocation2 + $0x490] sm:$0xff] %vm184_vm0, %v7272_v0 }
  0x60   : > { %331 = vst.msk [vmem:[#allocation2 + $0x488] sm:$0x3] %vm186_vm1, %v7272_v0  ;;  %333 = vst.msk [vmem:[#allocation2 + $0x498] sm:$0x3] %vm186_vm1, %v7272_v0 }
  0x61   : > { %334 = vst.msk [vmem:[#allocation2 + $0x4a0] sm:$0xff] %vm184_vm0, %v7272_v0  ;;  %336 = vst.msk [vmem:[#allocation2 + $0x4b0] sm:$0xff] %vm184_vm0, %v7272_v0 }
  0x62   : > { %335 = vst.msk [vmem:[#allocation2 + $0x4a8] sm:$0x3] %vm186_vm1, %v7272_v0  ;;  %337 = vst.msk [vmem:[#allocation2 + $0x4b8] sm:$0x3] %vm186_vm1, %v7272_v0 }
  0x63   : > { %338 = vst.msk [vmem:[#allocation2 + $0x4c0] sm:$0xff] %vm184_vm0, %v7272_v0  ;;  %340 = vst.msk [vmem:[#allocation2 + $0x4d0] sm:$0xff] %vm184_vm0, %v7272_v0 }
  0x64   : > { %339 = vst.msk [vmem:[#allocation2 + $0x4c8] sm:$0x3] %vm186_vm1, %v7272_v0  ;;  %341 = vst.msk [vmem:[#allocation2 + $0x4d8] sm:$0x3] %vm186_vm1, %v7272_v0 }
  0x65   : > { %342 = vst.msk [vmem:[#allocation2 + $0x4e0] sm:$0xff] %vm184_vm0, %v7272_v0  ;;  %344 = vst.msk [vmem:[#allocation2 + $0x4f0] sm:$0xff] %vm184_vm0, %v7272_v0 }
  0x66   : > { %343 = vst.msk [vmem:[#allocation2 + $0x4e8] sm:$0x3] %vm186_vm1, %v7272_v0  ;;  %345 = vst.msk [vmem:[#allocation2 + $0x4f8] sm:$0x3] %vm186_vm1, %v7272_v0 }
  0x67   : > { %346 = vst.msk [vmem:[#allocation2 + $0x500] sm:$0xff] %vm184_vm0, %v7272_v0  ;;  %348 = vst.msk [vmem:[#allocation2 + $0x510] sm:$0xff] %vm184_vm0, %v7272_v0 }
  0x68   : > { %347 = vst.msk [vmem:[#allocation2 + $0x508] sm:$0x3] %vm186_vm1, %v7272_v0  ;;  %349 = vst.msk [vmem:[#allocation2 + $0x518] sm:$0x3] %vm186_vm1, %v7272_v0 }
  0x69   : > { %350 = vst.msk [vmem:[#allocation2 + $0x520] sm:$0xff] %vm184_vm0, %v7272_v0  ;;  %352 = vst.msk [vmem:[#allocation2 + $0x530] sm:$0xff] %vm184_vm0, %v7272_v0 }
  0x6a   : > { %351 = vst.msk [vmem:[#allocation2 + $0x528] sm:$0x3] %vm186_vm1, %v7272_v0  ;;  %353 = vst.msk [vmem:[#allocation2 + $0x538] sm:$0x3] %vm186_vm1, %v7272_v0 }
  0x6b   : > { %354 = vst.msk [vmem:[#allocation2 + $0x540] sm:$0xff] %vm184_vm0, %v7272_v0  ;;  %356 = vst.msk [vmem:[#allocation2 + $0x550] sm:$0xff] %vm184_vm0, %v7272_v0 }
  0x6c   : > { %355 = vst.msk [vmem:[#allocation2 + $0x548] sm:$0x3] %vm186_vm1, %v7272_v0  ;;  %357 = vst.msk [vmem:[#allocation2 + $0x558] sm:$0x3] %vm186_vm1, %v7272_v0 }
  0x6d   : > { %358 = vst.msk [vmem:[#allocation2 + $0x560] sm:$0xff] %vm184_vm0, %v7272_v0  ;;  %360 = vst.msk [vmem:[#allocation2 + $0x570] sm:$0xff] %vm184_vm0, %v7272_v0 }
  0x6e   : > { %359 = vst.msk [vmem:[#allocation2 + $0x568] sm:$0x3] %vm186_vm1, %v7272_v0  ;;  %361 = vst.msk [vmem:[#allocation2 + $0x578] sm:$0x3] %vm186_vm1, %v7272_v0 }
  0x6f   : > { %362 = vst.msk [vmem:[#allocation2 + $0x580] sm:$0xff] %vm184_vm0, %v7272_v0  ;;  %364 = vst.msk [vmem:[#allocation2 + $0x590] sm:$0xff] %vm184_vm0, %v7272_v0 }
  0x70   : > { %363 = vst.msk [vmem:[#allocation2 + $0x588] sm:$0x3] %vm186_vm1, %v7272_v0  ;;  %365 = vst.msk [vmem:[#allocation2 + $0x598] sm:$0x3] %vm186_vm1, %v7272_v0 }
  0x71   : > { %366 = vst.msk [vmem:[#allocation2 + $0x5a0] sm:$0xff] %vm184_vm0, %v7272_v0  ;;  %368 = vst.msk [vmem:[#allocation2 + $0x5b0] sm:$0xff] %vm184_vm0, %v7272_v0 }
  0x72   : > { %367 = vst.msk [vmem:[#allocation2 + $0x5a8] sm:$0x3] %vm186_vm1, %v7272_v0  ;;  %369 = vst.msk [vmem:[#allocation2 + $0x5b8] sm:$0x3] %vm186_vm1, %v7272_v0 }
  0x73   : > { %370 = vst.msk [vmem:[#allocation2 + $0x5c0] sm:$0xff] %vm184_vm0, %v7272_v0  ;;  %372 = vst.msk [vmem:[#allocation2 + $0x5d0] sm:$0xff] %vm184_vm0, %v7272_v0 }
  0x74   : > { %371 = vst.msk [vmem:[#allocation2 + $0x5c8] sm:$0x3] %vm186_vm1, %v7272_v0  ;;  %373 = vst.msk [vmem:[#allocation2 + $0x5d8] sm:$0x3] %vm186_vm1, %v7272_v0 }
  0x75   : > { %374 = vst.msk [vmem:[#allocation2 + $0x5e0] sm:$0xff] %vm184_vm0, %v7272_v0  ;;  %376 = vst.msk [vmem:[#allocation2 + $0x5f0] sm:$0xff] %vm184_vm0, %v7272_v0 }
  0x76   : > { %375 = vst.msk [vmem:[#allocation2 + $0x5e8] sm:$0x3] %vm186_vm1, %v7272_v0  ;;  %377 = vst.msk [vmem:[#allocation2 + $0x5f8] sm:$0x3] %vm186_vm1, %v7272_v0 }
  0x77   : > { %378 = vst.msk [vmem:[#allocation2 + $0x600] sm:$0xff] %vm184_vm0, %v7272_v0  ;;  %380 = vst.msk [vmem:[#allocation2 + $0x610] sm:$0xff] %vm184_vm0, %v7272_v0 }
  0x78   : > { %379 = vst.msk [vmem:[#allocation2 + $0x608] sm:$0x3] %vm186_vm1, %v7272_v0  ;;  %381 = vst.msk [vmem:[#allocation2 + $0x618] sm:$0x3] %vm186_vm1, %v7272_v0 }
  0x79   : > { %382 = vst.msk [vmem:[#allocation2 + $0x620] sm:$0xff] %vm184_vm0, %v7272_v0  ;;  %384 = vst.msk [vmem:[#allocation2 + $0x630] sm:$0xff] %vm184_vm0, %v7272_v0 }
  0x7a   : > { %383 = vst.msk [vmem:[#allocation2 + $0x628] sm:$0x3] %vm186_vm1, %v7272_v0  ;;  %385 = vst.msk [vmem:[#allocation2 + $0x638] sm:$0x3] %vm186_vm1, %v7272_v0  ;;  %vm3488_vm1 = vcmask 523744  }
  0x7b   : > { %451 = vst.msk [vmem:[#allocation2 + $0xb1] sm:$0xff] %vm184_vm0, %v386_v1  ;;  %452 = vst.msk [vmem:[#allocation2 + $0xc1] sm:$0xff] %vm184_vm0, %v387_v2 }
  0x7c   : > { %453 = vst.msk [vmem:[#allocation2 + $0xd1] sm:$0xff] %vm184_vm0, %v388_v3  ;;  %454 = vst.msk [vmem:[#allocation2 + $0xe1] sm:$0xff] %vm184_vm0, %v389_v4 }
  0x7d   : > { %455 = vst.msk [vmem:[#allocation2 + $0xf1] sm:$0xff] %vm184_vm0, %v390_v5  ;;  %456 = vst.msk [vmem:[#allocation2 + $0x101] sm:$0xff] %vm184_vm0, %v391_v6 }
  0x7e   : > { %457 = vst.msk [vmem:[#allocation2 + $0x111] sm:$0xff] %vm184_vm0, %v392_v7  ;;  %458 = vst.msk [vmem:[#allocation2 + $0x121] sm:$0xff] %vm184_vm0, %v393_v8 }
  0x7f   : > { %459 = vst.msk [vmem:[#allocation2 + $0x151] sm:$0xff] %vm184_vm0, %v394_v9  ;;  %460 = vst.msk [vmem:[#allocation2 + $0x161] sm:$0xff] %vm184_vm0, %v395_v10 }
  0x80   : > { %461 = vst.msk [vmem:[#allocation2 + $0x171] sm:$0xff] %vm184_vm0, %v396_v11  ;;  %462 = vst.msk [vmem:[#allocation2 + $0x181] sm:$0xff] %vm184_vm0, %v397_v12 }
  0x81   : > { %463 = vst.msk [vmem:[#allocation2 + $0x191] sm:$0xff] %vm184_vm0, %v398_v13  ;;  %464 = vst.msk [vmem:[#allocation2 + $0x1a1] sm:$0xff] %vm184_vm0, %v399_v14 }
  0x82   : > { %465 = vst.msk [vmem:[#allocation2 + $0x1b1] sm:$0xff] %vm184_vm0, %v400_v15  ;;  %466 = vst.msk [vmem:[#allocation2 + $0x1c1] sm:$0xff] %vm184_vm0, %v401_v16 }
  0x83   : > { %467 = vst.msk [vmem:[#allocation2 + $0x1f1] sm:$0xff] %vm184_vm0, %v402_v17  ;;  %468 = vst.msk [vmem:[#allocation2 + $0x201] sm:$0xff] %vm184_vm0, %v403_v18 }
  0x84   : > { %469 = vst.msk [vmem:[#allocation2 + $0x211] sm:$0xff] %vm184_vm0, %v404_v19  ;;  %470 = vst.msk [vmem:[#allocation2 + $0x221] sm:$0xff] %vm184_vm0, %v405_v20 }
  0x85   : > { %471 = vst.msk [vmem:[#allocation2 + $0x231] sm:$0xff] %vm184_vm0, %v406_v21  ;;  %472 = vst.msk [vmem:[#allocation2 + $0x241] sm:$0xff] %vm184_vm0, %v407_v22 }
  0x86   : > { %473 = vst.msk [vmem:[#allocation2 + $0x251] sm:$0xff] %vm184_vm0, %v408_v23  ;;  %474 = vst.msk [vmem:[#allocation2 + $0x261] sm:$0xff] %vm184_vm0, %v409_v24 }
  0x87   : > { %475 = vst.msk [vmem:[#allocation2 + $0x291] sm:$0xff] %vm184_vm0, %v410_v25  ;;  %476 = vst.msk [vmem:[#allocation2 + $0x2a1] sm:$0xff] %vm184_vm0, %v411_v26 }
  0x88   : > { %477 = vst.msk [vmem:[#allocation2 + $0x2b1] sm:$0xff] %vm184_vm0, %v412_v27  ;;  %478 = vst.msk [vmem:[#allocation2 + $0x2c1] sm:$0xff] %vm184_vm0, %v413_v28 }
  0x89   : > { %479 = vst.msk [vmem:[#allocation2 + $0x2d1] sm:$0xff] %vm184_vm0, %v414_v29  ;;  %480 = vst.msk [vmem:[#allocation2 + $0x2e1] sm:$0xff] %vm184_vm0, %v415_v30 }
  0x8a   : > { %481 = vst.msk [vmem:[#allocation2 + $0x2f1] sm:$0xff] %vm184_vm0, %v416_v31  ;;  %482 = vst.msk [vmem:[#allocation2 + $0x301] sm:$0xff] %vm184_vm0, %v417_v32 }
  0x8b   : > { %483 = vst.msk [vmem:[#allocation2 + $0x331] sm:$0xff] %vm184_vm0, %v418_v33  ;;  %484 = vst.msk [vmem:[#allocation2 + $0x341] sm:$0xff] %vm184_vm0, %v419_v34 }
  0x8c   : > { %485 = vst.msk [vmem:[#allocation2 + $0x351] sm:$0xff] %vm184_vm0, %v420_v35  ;;  %486 = vst.msk [vmem:[#allocation2 + $0x361] sm:$0xff] %vm184_vm0, %v421_v36 }
  0x8d   : > { %487 = vst.msk [vmem:[#allocation2 + $0x371] sm:$0xff] %vm184_vm0, %v422_v37  ;;  %488 = vst.msk [vmem:[#allocation2 + $0x381] sm:$0xff] %vm184_vm0, %v423_v38 }
  0x8e   : > { %489 = vst.msk [vmem:[#allocation2 + $0x391] sm:$0xff] %vm184_vm0, %v424_v39  ;;  %490 = vst.msk [vmem:[#allocation2 + $0x3a1] sm:$0xff] %vm184_vm0, %v425_v40 }
  0x8f   : > { %491 = vst.msk [vmem:[#allocation2 + $0x3d1] sm:$0xff] %vm184_vm0, %v426_v41  ;;  %492 = vst.msk [vmem:[#allocation2 + $0x3e1] sm:$0xff] %vm184_vm0, %v427_v42 }
  0x90   : > { %493 = vst.msk [vmem:[#allocation2 + $0x3f1] sm:$0xff] %vm184_vm0, %v428_v43  ;;  %494 = vst.msk [vmem:[#allocation2 + $0x401] sm:$0xff] %vm184_vm0, %v429_v44 }
  0x91   : > { %495 = vst.msk [vmem:[#allocation2 + $0x411] sm:$0xff] %vm184_vm0, %v430_v45  ;;  %496 = vst.msk [vmem:[#allocation2 + $0x421] sm:$0xff] %vm184_vm0, %v431_v46 }
  0x92   : > { %518 = vst.msk [vmem:[#allocation3 + $0x10] sm:$0xff] %vm515_vm2, %v7272_v0  ;;  %516 = vst.msk [vmem:[#allocation3] sm:$0xff] %vm515_vm2, %v7272_v0 }
  0x93   : > { %517 = vst.msk [vmem:[#allocation3 + $0x8] sm:$0xff] %vm515_vm2, %v7272_v0  ;;  %519 = vst.msk [vmem:[#allocation3 + $0x18] sm:$0xff] %vm515_vm2, %v7272_v0 }
  0x94   : > { %520 = vst.msk [vmem:[#allocation3 + $0x20] sm:$0xff] %vm515_vm2, %v7272_v0  ;;  %521 = vst.msk [vmem:[#allocation3 + $0x28] sm:$0xff] %vm515_vm2, %v7272_v0 }
  0x95   : > { %522 = vst.msk [vmem:[#allocation3 + $0x30] sm:$0xff] %vm515_vm2, %v7272_v0  ;;  %523 = vst.msk [vmem:[#allocation3 + $0x38] sm:$0xff] %vm515_vm2, %v7272_v0 }
  0x96   : > { %524 = vst.msk [vmem:[#allocation3 + $0x40] sm:$0xff] %vm515_vm2, %v7272_v0  ;;  %525 = vst.msk [vmem:[#allocation3 + $0x48] sm:$0xff] %vm515_vm2, %v7272_v0 }
  0x97   : > { %526 = vst.msk [vmem:[#allocation3 + $0x50] sm:$0xff] %vm515_vm2, %v7272_v0  ;;  %527 = vst.msk [vmem:[#allocation3 + $0x58] sm:$0xff] %vm515_vm2, %v7272_v0 }
  0x98   : > { %528 = vst.msk [vmem:[#allocation3 + $0x60] sm:$0xff] %vm515_vm2, %v7272_v0  ;;  %529 = vst.msk [vmem:[#allocation3 + $0x68] sm:$0xff] %vm515_vm2, %v7272_v0 }
  0x99   : > { %530 = vst.msk [vmem:[#allocation3 + $0x70] sm:$0xff] %vm515_vm2, %v7272_v0  ;;  %531 = vst.msk [vmem:[#allocation3 + $0x78] sm:$0xff] %vm515_vm2, %v7272_v0 }
  0x9a   : > { %532 = vst.msk [vmem:[#allocation3 + $0x80] sm:$0xff] %vm515_vm2, %v7272_v0  ;;  %533 = vst.msk [vmem:[#allocation3 + $0x88] sm:$0xff] %vm515_vm2, %v7272_v0 }
  0x9b   : > { %534 = vst.msk [vmem:[#allocation3 + $0x90] sm:$0xff] %vm515_vm2, %v7272_v0  ;;  %535 = vst.msk [vmem:[#allocation3 + $0x98] sm:$0xff] %vm515_vm2, %v7272_v0 }
  0x9c   : > { %536 = vst.msk [vmem:[#allocation3 + $0xa0] sm:$0xff] %vm515_vm2, %v7272_v0  ;;  %537 = vst.msk [vmem:[#allocation3 + $0xa8] sm:$0xff] %vm515_vm2, %v7272_v0 }
  0x9d   : > { %538 = vst.msk [vmem:[#allocation3 + $0xb0] sm:$0xff] %vm515_vm2, %v7272_v0  ;;  %539 = vst.msk [vmem:[#allocation3 + $0xb8] sm:$0xff] %vm515_vm2, %v7272_v0 }
  0x9e   : > { %540 = vst.msk [vmem:[#allocation3 + $0xc0] sm:$0xff] %vm515_vm2, %v7272_v0  ;;  %541 = vst.msk [vmem:[#allocation3 + $0xc8] sm:$0xff] %vm515_vm2, %v7272_v0 }
  0x9f   : > { %542 = vst.msk [vmem:[#allocation3 + $0xd0] sm:$0xff] %vm515_vm2, %v7272_v0  ;;  %543 = vst.msk [vmem:[#allocation3 + $0xd8] sm:$0xff] %vm515_vm2, %v7272_v0 }
  0xa0   : > { %544 = vst.msk [vmem:[#allocation3 + $0xe0] sm:$0xff] %vm515_vm2, %v7272_v0  ;;  %545 = vst.msk [vmem:[#allocation3 + $0xe8] sm:$0xff] %vm515_vm2, %v7272_v0 }
  0xa1   : > { %546 = vst.msk [vmem:[#allocation3 + $0xf0] sm:$0xff] %vm515_vm2, %v7272_v0  ;;  %547 = vst.msk [vmem:[#allocation3 + $0xf8] sm:$0xff] %vm515_vm2, %v7272_v0  ;;  %v449_v0 = vld [vmem:[%s7799_s8 + $0x1f8] sm:$0xff]  ;;  %s7284_s8 = smov 48   ;;  %vm3681_vm2 = vcmask 556544  }
  0xa2   : > { %497 = vst.msk [vmem:[#allocation2 + $0x431] sm:$0xff] %vm184_vm0, %v432_v47  ;;  %498 = vst.msk [vmem:[#allocation2 + $0x441] sm:$0xff] %vm184_vm0, %v433_v48 }
  0xa3   : > { %499 = vst.msk [vmem:[#allocation2 + $0x471] sm:$0xff] %vm184_vm0, %v434_v49  ;;  %500 = vst.msk [vmem:[#allocation2 + $0x481] sm:$0xff] %vm184_vm0, %v435_v50 }
  0xa4   : > { %501 = vst.msk [vmem:[#allocation2 + $0x491] sm:$0xff] %vm184_vm0, %v436_v51  ;;  %502 = vst.msk [vmem:[#allocation2 + $0x4a1] sm:$0xff] %vm184_vm0, %v437_v52 }
  0xa5   : > { %503 = vst.msk [vmem:[#allocation2 + $0x4b1] sm:$0xff] %vm184_vm0, %v438_v53  ;;  %504 = vst.msk [vmem:[#allocation2 + $0x4c1] sm:$0xff] %vm184_vm0, %v439_v54 }
  0xa6   : > { %505 = vst.msk [vmem:[#allocation2 + $0x4d1] sm:$0xff] %vm184_vm0, %v440_v55  ;;  %506 = vst.msk [vmem:[#allocation2 + $0x4e1] sm:$0xff] %vm184_vm0, %v441_v56 }
  0xa7   : > { %507 = vst.msk [vmem:[#allocation2 + $0x511] sm:$0xff] %vm184_vm0, %v442_v57  ;;  %508 = vst.msk [vmem:[#allocation2 + $0x521] sm:$0xff] %vm184_vm0, %v443_v58 }
  0xa8   : > { %509 = vst.msk [vmem:[#allocation2 + $0x531] sm:$0xff] %vm184_vm0, %v444_v59  ;;  %510 = vst.msk [vmem:[#allocation2 + $0x541] sm:$0xff] %vm184_vm0, %v445_v60 }
  0xa9   : > { %511 = vst.msk [vmem:[#allocation2 + $0x551] sm:$0xff] %vm184_vm0, %v446_v61  ;;  %512 = vst.msk [vmem:[#allocation2 + $0x561] sm:$0xff] %vm184_vm0, %v447_v62 }
  0xaa   : > { %513 = vst.msk [vmem:[#allocation2 + $0x571] sm:$0xff] %vm184_vm0, %v448_v63  ;;  %514 = vst.msk [vmem:[#allocation2 + $0x581] sm:$0xff] %vm184_vm0, %v449_v0 }
  0xb1   : > { %v7997_v1 = vld [vmem:[%s7994_s10 + $0x21] sm:$0xff]  ;;  %v8004_v3 = vld [vmem:[%s7994_s10 + $0x31] sm:$0xff] }
  0xb2   : > { %v615_v2 = vld [vmem:[%s7994_s10 + $0x1] sm:$0xff]  ;;  %683 = vrot.lane.b32.xlu1 %v7997_v1, %s7273_s11  ;;  %v8007_v4 = vld [vmem:[%s7994_s10 + $0x11] sm:$0xff] }
  0xb3   : > { %679 = vrot.lane.b32.xlu0 %v615_v2, %s7273_s11  ;;  %v8014_v5 = vld [vmem:[%s7994_s10 + $0x51] sm:$0xff]  ;;  %v8017_v6 = vld [vmem:[%s7994_s10 + $0x41] sm:$0xff] }
  0xb4   : > { %v8024_v7 = vld [vmem:[%s7994_s10 + $0x71] sm:$0xff]  ;;  %v8027_v8 = vld [vmem:[%s7994_s10 + $0x61] sm:$0xff] }
  0xb5   : > { %v8034_v9 = vld [vmem:[%s7994_s10 + $0xb1] sm:$0xff]  ;;  %v623_v10 = vld [vmem:[%s7994_s10 + $0xa1] sm:$0xff] }
  0xb6   : > { %685 = vrot.lane.b32.xlu1 %v8004_v3, %s7273_s11  ;;  %v8041_v11 = vld [vmem:[%s7994_s10 + $0xd1] sm:$0xff]  ;;  %v8044_v12 = vld [vmem:[%s7994_s10 + $0xc1] sm:$0xff] }
  0xb7   : > { %681 = vrot.lane.b32.xlu0 %v8007_v4, %s7273_s11  ;;  %v8051_v13 = vld [vmem:[%s7994_s10 + $0x20] sm:$0xff]  ;;  %v8055_v15 = vld [vmem:[%s7994_s10 + $0xf1] sm:$0xff] }
  0xb8   : > { %v551_v14 = vld [vmem:[%s7994_s10] sm:$0xff]  ;;  %585 = vst.msk [vmem:[#allocation3 + $0x10] sm:$0xff] %vm184_vm0, %v8051_v13  ;;  %v8064_v17 = vld [vmem:[%s7994_s10 + $0x30] sm:$0xff] }
  0xb9   : > { %v8058_v16 = vld [vmem:[%s7994_s10 + $0xe1] sm:$0xff]  ;;  %583 = vst.msk [vmem:[#allocation3] sm:$0xff] %vm184_vm0, %v551_v14  ;;  %586 = vst.msk [vmem:[#allocation3 + $0x18] sm:$0xff] %vm184_vm0, %v8064_v17  ;;  %v8069_v18 = vld [vmem:[%s7994_s10 + $0x10] sm:$0xff] }
  0xba   : > { %689 = vrot.lane.b32.xlu1 %v8014_v5, %s7273_s11  ;;  %v8072_v19 = vld [vmem:[%s7994_s10 + $0x111] sm:$0xff]  ;;  %584 = vst.msk [vmem:[#allocation3 + $0x8] sm:$0xff] %vm184_vm0, %v8069_v18  ;;  %v8080_v21 = vld [vmem:[%s7994_s10 + $0x40] sm:$0xff] }
  0xbb   : > { %687 = vrot.lane.b32.xlu0 %v8017_v6, %s7273_s11  ;;  %v8077_v20 = vld [vmem:[%s7994_s10 + $0x50] sm:$0xff]  ;;  %v8087_v22 = vld [vmem:[%s7994_s10 + $0x101] sm:$0xff]  ;;  %587 = vst.msk [vmem:[#allocation3 + $0x20] sm:$0xff] %vm184_vm0, %v8080_v21 }
  0xbc   : > { %588 = vst.msk [vmem:[#allocation3 + $0x28] sm:$0xff] %vm184_vm0, %v8077_v20  ;;  %v8094_v23 = vld [vmem:[%s7994_s10 + $0x70] sm:$0xff]  ;;  %v8099_v24 = vld [vmem:[%s7994_s10 + $0x60] sm:$0xff] }
  0xbd   : > { %590 = vst.msk [vmem:[#allocation3 + $0x38] sm:$0xff] %vm184_vm0, %v8094_v23  ;;  %v8102_v25 = vld [vmem:[%s7994_s10 + $0xb0] sm:$0xff]  ;;  %v559_v26 = vld [vmem:[%s7994_s10 + $0xa0] sm:$0xff]  ;;  %589 = vst.msk [vmem:[#allocation3 + $0x30] sm:$0xff] %vm184_vm0, %v8099_v24 }
  0xbe   : > { %693 = vrot.lane.b32.xlu1 %v8024_v7, %s7273_s11  ;;  %592 = vst.msk [vmem:[#allocation3 + $0x48] sm:$0xff] %vm184_vm0, %v8102_v25  ;;  %591 = vst.msk [vmem:[#allocation3 + $0x40] sm:$0xff] %vm184_vm0, %v559_v26  ;;  %v8111_v27 = vld [vmem:[%s7994_s10 + $0xd0] sm:$0xff]  ;;  %v8114_v28 = vld [vmem:[%s7994_s10 + $0xc0] sm:$0xff] }
  0xbf   : > { %691 = vrot.lane.b32.xlu0 %v8027_v8, %s7273_s11  ;;  %v8117_v29 = vld [vmem:[%s7994_s10 + $0xf0] sm:$0xff]  ;;  %v631_v31 = vld [vmem:[%s7994_s10 + $0x141] sm:$0xff]  ;;  %594 = vst.msk [vmem:[#allocation3 + $0x58] sm:$0xff] %vm184_vm0, %v8111_v27  ;;  %593 = vst.msk [vmem:[#allocation3 + $0x50] sm:$0xff] %vm184_vm0, %v8114_v28 }
  0xc0   : > { %v8120_v30 = vld [vmem:[%s7994_s10 + $0x151] sm:$0xff]  ;;  %596 = vst.msk [vmem:[#allocation3 + $0x68] sm:$0xff] %vm184_vm0, %v8117_v29  ;;  %v8130_v32 = vld [vmem:[%s7994_s10 + $0xe0] sm:$0xff] }
  0xc1   : > { %v8133_v33 = vld [vmem:[%s7994_s10 + $0x110] sm:$0xff]  ;;  %595 = vst.msk [vmem:[#allocation3 + $0x60] sm:$0xff] %vm184_vm0, %v8130_v32  ;;  %v8144_v34 = vld [vmem:[%s7994_s10 + $0x100] sm:$0xff] }
  0xc2   : > { %697 = vrot.lane.b32.xlu1 %v8034_v9, %s7273_s11  ;;  %598 = vst.msk [vmem:[#allocation3 + $0x78] sm:$0xff] %vm184_vm0, %v8133_v33  ;;  %v8147_v35 = vld [vmem:[%s7994_s10 + $0x150] sm:$0xff]  ;;  %597 = vst.msk [vmem:[#allocation3 + $0x70] sm:$0xff] %vm184_vm0, %v8144_v34  ;;  %v567_v36 = vld [vmem:[%s7994_s10 + $0x140] sm:$0xff] }
  0xc3   : > { %695 = vrot.lane.b32.xlu0 %v623_v10, %s7273_s11  ;;  %600 = vst.msk [vmem:[#allocation3 + $0x88] sm:$0xff] %vm184_vm0, %v8147_v35  ;;  %v8155_v37 = vld [vmem:[%s7994_s10 + $0x170] sm:$0xff]  ;;  %v8158_v38 = vld [vmem:[%s7994_s10 + $0x160] sm:$0xff]  ;;  %599 = vst.msk [vmem:[#allocation3 + $0x80] sm:$0xff] %vm184_vm0, %v567_v36 }
  0xc4   : > { %602 = vst.msk [vmem:[#allocation3 + $0x98] sm:$0xff] %vm184_vm0, %v8155_v37  ;;  %601 = vst.msk [vmem:[#allocation3 + $0x90] sm:$0xff] %vm184_vm0, %v8158_v38  ;;  %v8166_v39 = vld [vmem:[%s7994_s10 + $0x190] sm:$0xff]  ;;  %v8169_v40 = vld [vmem:[%s7994_s10 + $0x180] sm:$0xff] }
  0xc5   : > { %604 = vst.msk [vmem:[#allocation3 + $0xa8] sm:$0xff] %vm184_vm0, %v8166_v39  ;;  %603 = vst.msk [vmem:[#allocation3 + $0xa0] sm:$0xff] %vm184_vm0, %v8169_v40  ;;  %v8176_v41 = vld [vmem:[%s7994_s10 + $0x1b0] sm:$0xff]  ;;  %v8179_v42 = vld [vmem:[%s7994_s10 + $0x1a0] sm:$0xff] }
  0xc6   : > { %701 = vrot.lane.b32.xlu1 %v8041_v11, %s7273_s11  ;;  %v8185_v43 = vld [vmem:[%s7994_s10 + $0x171] sm:$0xff]  ;;  %606 = vst.msk [vmem:[#allocation3 + $0xb8] sm:$0xff] %vm184_vm0, %v8176_v41  ;;  %605 = vst.msk [vmem:[#allocation3 + $0xb0] sm:$0xff] %vm184_vm0, %v8179_v42  ;;  %v8192_v44 = vld [vmem:[%s7994_s10 + $0x161] sm:$0xff] }
  0xc7   : > { %699 = vrot.lane.b32.xlu0 %v8044_v12, %s7273_s11  ;;  %v8195_v45 = vld [vmem:[%s7994_s10 + $0x1f0] sm:$0xff]  ;;  %v575_v46 = vld [vmem:[%s7994_s10 + $0x1e0] sm:$0xff] }
  0xc8   : > { %608 = vst.msk [vmem:[#allocation3 + $0xc8] sm:$0xff] %vm184_vm0, %v8195_v45  ;;  %607 = vst.msk [vmem:[#allocation3 + $0xc0] sm:$0xff] %vm184_vm0, %v575_v46  ;;  %v8206_v47 = vld [vmem:[%s7994_s10 + $0x191] sm:$0xff]  ;;  %v8209_v48 = vld [vmem:[%s7994_s10 + $0x181] sm:$0xff] }
  0xc9   : > { %v8212_v49 = vld [vmem:[%s7994_s10 + $0x210] sm:$0xff]  ;;  %v8215_v50 = vld [vmem:[%s7994_s10 + $0x200] sm:$0xff] }
  0xca   : > { %705 = vrot.lane.b32.xlu1 %v8055_v15, %s7273_s11  ;;  %610 = vst.msk [vmem:[#allocation3 + $0xd8] sm:$0xff] %vm184_vm0, %v8212_v49  ;;  %609 = vst.msk [vmem:[#allocation3 + $0xd0] sm:$0xff] %vm184_vm0, %v8215_v50  ;;  %v8226_v51 = vld [vmem:[%s7994_s10 + $0x1b1] sm:$0xff]  ;;  %v8229_v52 = vld [vmem:[%s7994_s10 + $0x1a1] sm:$0xff] }
  0xcb   : > { %703 = vrot.lane.b32.xlu0 %v8058_v16, %s7273_s11  ;;  %v8232_v53 = vld [vmem:[%s7994_s10 + $0x230] sm:$0xff]  ;;  %v8235_v54 = vld [vmem:[%s7994_s10 + $0x220] sm:$0xff] }
  0xcc   : > { %612 = vst.msk [vmem:[#allocation3 + $0xe8] sm:$0xff] %vm184_vm0, %v8232_v53  ;;  %611 = vst.msk [vmem:[#allocation3 + $0xe0] sm:$0xff] %vm184_vm0, %v8235_v54  ;;  %v8246_v55 = vld [vmem:[%s7994_s10 + $0x1f1] sm:$0xff]  ;;  %v639_v56 = vld [vmem:[%s7994_s10 + $0x1e1] sm:$0xff] }
  0xcd   : > { %v8250_v57 = vld [vmem:[%s7994_s10 + $0x250] sm:$0xff]  ;;  %v8253_v58 = vld [vmem:[%s7994_s10 + $0x240] sm:$0xff] }
  0xce   : > { %709 = vrot.lane.b32.xlu1 %v8072_v19, %s7273_s11  ;;  %614 = vst.msk [vmem:[#allocation3 + $0xf8] sm:$0xff] %vm184_vm0, %v8250_v57  ;;  %613 = vst.msk [vmem:[#allocation3 + $0xf0] sm:$0xff] %vm184_vm0, %v8253_v58  ;;  %v8263_v59 = vld [vmem:[%s7994_s10 + $0x211] sm:$0xff]  ;;  %v8266_v60 = vld [vmem:[%s7994_s10 + $0x201] sm:$0xff]  ;;  %vm3293_vm0 = vcmask 490944  }
  0xcf   : > { %707 = vrot.lane.b32.xlu0 %v8087_v22, %s7273_s11  ;;  %v8273_v61 = vld [vmem:[%s7994_s10 + $0x231] sm:$0xff]  ;;  %v8276_v62 = vld [vmem:[%s7994_s10 + $0x221] sm:$0xff] }
  0xd0   : > { %v8283_v63 = vld [vmem:[%s7994_s10 + $0x251] sm:$0xff]  ;;  %v8286_v0 = vld [vmem:[%s7994_s10 + $0x241] sm:$0xff] }
  0xd1   : > { %v8293_v2 = vld [vmem:[%s7994_s10 + $0x12] sm:$0xff]  ;;  %v808_v10 = vld [vmem:[%s7994_s10 + $0x2] sm:$0xff] }
  0xd2   : > { %713 = vrot.lane.b32.xlu1 %v8120_v30, %s7273_s11  ;;  %11655 = vst [vmem:[#allocation7_spill] sm:$0xff] %v8293_v2  ;;  %v8300_v14 = vld [vmem:[%s7994_s10 + $0x32] sm:$0xff]  ;;  %v8303_v26 = vld [vmem:[%s7994_s10 + $0x22] sm:$0xff] }
  0xd3   : > { %711 = vrot.lane.b32.xlu0 %v631_v31, %s7273_s11  ;;  %11656 = vst [vmem:[#allocation8_spill] sm:$0xff] %v8300_v14  ;;  %11657 = vst [vmem:[#allocation9_spill] sm:$0xff] %v8303_v26  ;;  %v8310_v31 = vld [vmem:[%s7994_s10 + $0x52] sm:$0xff]  ;;  %v8313_v36 = vld [vmem:[%s7994_s10 + $0x42] sm:$0xff] }
  0xd4   : > { %11658 = vst [vmem:[#allocation10_spill] sm:$0xff] %v8310_v31  ;;  %11659 = vst [vmem:[#allocation11_spill] sm:$0xff] %v8313_v36  ;;  %v8320_v46 = vld [vmem:[%s7994_s10 + $0x72] sm:$0xff] }
  0xd5   : > { %11660 = vst [vmem:[#allocation12_spill] sm:$0xff] %v8320_v46 }
  0xd6   : > { %717 = vrot.lane.b32.xlu1 %v8185_v43, %s7273_s11 }
  0xd7   : > { %715 = vrot.lane.b32.xlu0 %v8192_v44, %s7273_s11 }
  0xda   : > { %721 = vrot.lane.b32.xlu1 %v8206_v47, %s7273_s11 }
  0xdb   : > { %719 = vrot.lane.b32.xlu0 %v8209_v48, %s7273_s11 }
  0xde   : > { %725 = vrot.lane.b32.xlu1 %v8226_v51, %s7273_s11 }
  0xdf   : > { %723 = vrot.lane.b32.xlu0 %v8229_v52, %s7273_s11 }
  0xe2   : > { %729 = vrot.lane.b32.xlu1 %v8246_v55, %s7273_s11 }
  0xe3   : > { %727 = vrot.lane.b32.xlu0 %v639_v56, %s7273_s11  ;;  %v8323_v56 = vld [vmem:[%s7994_s10 + $0x62] sm:$0xff] }
  0xe4   : > { %11661 = vst [vmem:[#allocation13_spill] sm:$0xff] %v8323_v56 }
  0xe6   : > { %733 = vrot.lane.b32.xlu1 %v8263_v59, %s7273_s11 }
  0xe7   : > { %731 = vrot.lane.b32.xlu0 %v8266_v60, %s7273_s11 }
  0xea   : > { %737 = vrot.lane.b32.xlu1 %v8273_v61, %s7273_s11 }
  0xeb   : > { %735 = vrot.lane.b32.xlu0 %v8276_v62, %s7273_s11 }
  0xee   : > { %741 = vrot.lane.b32.xlu1 %v8283_v63, %s7273_s11 }
  0xef   : > { %739 = vrot.lane.b32.xlu0 %v8286_v0, %s7273_s11  ;;  %s7286_s11 = smov 56  }
  0xf2   : > { %874 = vrot.lane.b32.xlu1 %v8293_v2, %s7274_s20 }
  0xf3   : > { %872 = vrot.lane.b32.xlu0 %v808_v10, %s7274_s20  ;;  %v8330_v10 = vld [vmem:[%s7994_s10 + $0xb2] sm:$0xff] }
  0xf4   : > { %11662 = vst [vmem:[#allocation14_spill] sm:$0xff] %v8330_v10 }
  0xf6   : > { %878 = vrot.lane.b32.xlu1 %v8300_v14, %s7274_s20  ;;  %v816_v14 = vld [vmem:[%s7994_s10 + $0xa2] sm:$0xff] }
  0xf7   : > { %876 = vrot.lane.b32.xlu0 %v8303_v26, %s7274_s20 }
  0xfa   : > { %882 = vrot.lane.b32.xlu1 %v8310_v31, %s7274_s20  ;;  %v8337_v31 = vld [vmem:[%s7994_s10 + $0xd2] sm:$0xff] }
  0xfb   : > { %880 = vrot.lane.b32.xlu0 %v8313_v36, %s7274_s20  ;;  %11663 = vst [vmem:[#allocation15_spill] sm:$0xff] %v8337_v31  ;;  %v8340_v36 = vld [vmem:[%s7994_s10 + $0xc2] sm:$0xff] }
  0xfc   : > { %11664 = vst [vmem:[#allocation16_spill] sm:$0xff] %v8340_v36 }
  0xfe   : > { %886 = vrot.lane.b32.xlu1 %v8320_v46, %s7274_s20  ;;  %v8347_v46 = vld [vmem:[%s7994_s10 + $0xf2] sm:$0xff] }
  0xff   : > { %884 = vrot.lane.b32.xlu0 %v8323_v56, %s7274_s20  ;;  %11665 = vst [vmem:[#allocation17_spill] sm:$0xff] %v8347_v46  ;;  %v8350_v56 = vld [vmem:[%s7994_s10 + $0xe2] sm:$0xff] }
 0x100   : > { %11666 = vst [vmem:[#allocation18_spill] sm:$0xff] %v8350_v56 }
 0x102   : > { %890 = vrot.lane.b32.xlu1 %v8330_v10, %s7274_s20  ;;  %v8360_v10 = vld [vmem:[%s7994_s10 + $0x102] sm:$0xff] }
 0x103   : > { %888 = vrot.lane.b32.xlu0 %v816_v14, %s7274_s20  ;;  %v8357_v14 = vld [vmem:[%s7994_s10 + $0x112] sm:$0xff]  ;;  %11668 = vst [vmem:[#allocation20_spill] sm:$0xff] %v8360_v10 }
 0x104   : > { %11667 = vst [vmem:[#allocation19_spill] sm:$0xff] %v8357_v14 }
 0x106   : > { %894 = vrot.lane.b32.xlu1 %v8337_v31, %s7274_s20  ;;  %v8367_v31 = vld [vmem:[%s7994_s10 + $0x152] sm:$0xff] }
 0x107   : > { %892 = vrot.lane.b32.xlu0 %v8340_v36, %s7274_s20  ;;  %11669 = vst [vmem:[#allocation21_spill] sm:$0xff] %v8367_v31  ;;  %v824_v36 = vld [vmem:[%s7994_s10 + $0x142] sm:$0xff] }
 0x10a   : > { %898 = vrot.lane.b32.xlu1 %v8347_v46, %s7274_s20  ;;  %v8374_v46 = vld [vmem:[%s7994_s10 + $0x172] sm:$0xff] }
 0x10b   : > { %896 = vrot.lane.b32.xlu0 %v8350_v56, %s7274_s20  ;;  %11670 = vst [vmem:[#allocation22_spill] sm:$0xff] %v8374_v46  ;;  %v8377_v56 = vld [vmem:[%s7994_s10 + $0x162] sm:$0xff] }
 0x10c   : > { %11671 = vst [vmem:[#allocation23_spill] sm:$0xff] %v8377_v56 }
 0x10e   : > { %902 = vrot.lane.b32.xlu1 %v8357_v14, %s7274_s20  ;;  %v8384_v14 = vld [vmem:[%s7994_s10 + $0x192] sm:$0xff] }
 0x10f   : > { %900 = vrot.lane.b32.xlu0 %v8360_v10, %s7274_s20  ;;  %11672 = vst [vmem:[#allocation24_spill] sm:$0xff] %v8384_v14  ;;  %v8387_v10 = vld [vmem:[%s7994_s10 + $0x182] sm:$0xff] }
 0x110   : > { %11673 = vst [vmem:[#allocation25_spill] sm:$0xff] %v8387_v10 }
 0x112   : > { %906 = vrot.lane.b32.xlu1 %v8367_v31, %s7274_s20  ;;  %v8397_v31 = vld [vmem:[%s7994_s10 + $0x1a2] sm:$0xff] }
 0x113   : > { %904 = vrot.lane.b32.xlu0 %v824_v36, %s7274_s20  ;;  %v8394_v36 = vld [vmem:[%s7994_s10 + $0x1b2] sm:$0xff]  ;;  %11675 = vst [vmem:[#allocation27_spill] sm:$0xff] %v8397_v31 }
 0x114   : > { %11674 = vst [vmem:[#allocation26_spill] sm:$0xff] %v8394_v36 }
 0x116   : > { %910 = vrot.lane.b32.xlu1 %v8374_v46, %s7274_s20  ;;  %v8404_v46 = vld [vmem:[%s7994_s10 + $0x1f2] sm:$0xff] }
 0x117   : > { %908 = vrot.lane.b32.xlu0 %v8377_v56, %s7274_s20  ;;  %11676 = vst [vmem:[#allocation28_spill] sm:$0xff] %v8404_v46  ;;  %v832_v56 = vld [vmem:[%s7994_s10 + $0x1e2] sm:$0xff] }
 0x11a   : > { %914 = vrot.lane.b32.xlu1 %v8384_v14, %s7274_s20  ;;  %v8411_v14 = vld [vmem:[%s7994_s10 + $0x212] sm:$0xff] }
 0x11b   : > { %912 = vrot.lane.b32.xlu0 %v8387_v10, %s7274_s20  ;;  %11677 = vst [vmem:[#allocation29_spill] sm:$0xff] %v8411_v14  ;;  %v8414_v10 = vld [vmem:[%s7994_s10 + $0x202] sm:$0xff] }
 0x11c   : > { %11678 = vst [vmem:[#allocation30_spill] sm:$0xff] %v8414_v10 }
 0x11e   : > { %918 = vrot.lane.b32.xlu1 %v8394_v36, %s7274_s20 }
 0x11f   : > { %916 = vrot.lane.b32.xlu0 %v8397_v31, %s7274_s20 }
 0x122   : > { %922 = vrot.lane.b32.xlu1 %v8404_v46, %s7274_s20  ;;  %v8426_v46 = vld [vmem:[%s7994_s10 + $0x222] sm:$0xff] }
 0x123   : > { %920 = vrot.lane.b32.xlu0 %v832_v56, %s7274_s20  ;;  %v8423_v56 = vld [vmem:[%s7994_s10 + $0x232] sm:$0xff] }
 0x124   : > { %v684_v36 = vpop.permute.xlu1 %683 }
 0x125   : > { %v680_v2 = vpop.permute.xlu0 %679  ;;  %778 = vst.msk [vmem:[#allocation3 + $0x10] sm:$0xff] %vm775_vm3, %v684_v36  ;;  %v8438_v36 = vld [vmem:[%s7994_s10 + $0x242] sm:$0xff] }
 0x126   : > { %776 = vst.msk [vmem:[#allocation3] sm:$0xff] %vm775_vm3, %v680_v2  ;;  %926 = vrot.lane.b32.xlu1 %v8411_v14, %s7274_s20  ;;  %v8435_v2 = vld [vmem:[%s7994_s10 + $0x252] sm:$0xff] }
 0x127   : > { %924 = vrot.lane.b32.xlu0 %v8414_v10, %s7274_s20 }
 0x128   : > { %v686_v31 = vpop.permute.xlu1 %685 }
 0x129   : > { %v682_v26 = vpop.permute.xlu0 %681  ;;  %779 = vst.msk [vmem:[#allocation3 + $0x18] sm:$0xff] %vm775_vm3, %v686_v31 }
 0x12a   : > { %777 = vst.msk [vmem:[#allocation3 + $0x8] sm:$0xff] %vm775_vm3, %v682_v26  ;;  %930 = vrot.lane.b32.xlu1 %v8423_v56, %s7274_s20 }
 0x12b   : > { %928 = vrot.lane.b32.xlu0 %v8426_v46, %s7274_s20 }
 0x12c   : > { %v690_v14 = vpop.permute.xlu1 %689 }
 0x12d   : > { %v688_v10 = vpop.permute.xlu0 %687  ;;  %781 = vst.msk [vmem:[#allocation3 + $0x28] sm:$0xff] %vm775_vm3, %v690_v14 }
 0x12e   : > { %780 = vst.msk [vmem:[#allocation3 + $0x20] sm:$0xff] %vm775_vm3, %v688_v10  ;;  %934 = vrot.lane.b32.xlu1 %v8435_v2, %s7274_s20 }
 0x12f   : > { %932 = vrot.lane.b32.xlu0 %v8438_v36, %s7274_s20 }
 0x130   : > { %v694_v26 = vpop.permute.xlu1 %693 }
 0x131   : > { %v692_v31 = vpop.permute.xlu0 %691  ;;  %783 = vst.msk [vmem:[#allocation3 + $0x38] sm:$0xff] %vm775_vm3, %v694_v26 }
 0x132   : > { %782 = vst.msk [vmem:[#allocation3 + $0x30] sm:$0xff] %vm775_vm3, %v692_v31  ;;  %1069 = vrot.lane.b32.xlu1 %v8051_v13, %s7275_s21  ;;  %v8465_v13 = vld [vmem:[%s7994_s10 + $0x80] sm:$0xff] }
 0x133   : > { %1067 = vrot.lane.b32.xlu0 %v8069_v18, %s7275_s21 }
 0x134   : > { %v698_v10 = vpop.permute.xlu1 %697 }
 0x135   : > { %v696_v14 = vpop.permute.xlu0 %695  ;;  %785 = vst.msk [vmem:[#allocation3 + $0x48] sm:$0xff] %vm775_vm3, %v698_v10 }
 0x136   : > { %784 = vst.msk [vmem:[#allocation3 + $0x40] sm:$0xff] %vm775_vm3, %v696_v14  ;;  %1073 = vrot.lane.b32.xlu1 %v8080_v21, %s7275_s21 }
 0x137   : > { %1071 = vrot.lane.b32.xlu0 %v8064_v17, %s7275_s21 }
 0x138   : > { %v702_v26 = vpop.permute.xlu1 %701 }
 0x139   : > { %v700_v31 = vpop.permute.xlu0 %699  ;;  %787 = vst.msk [vmem:[#allocation3 + $0x58] sm:$0xff] %vm775_vm3, %v702_v26 }
 0x13a   : > { %786 = vst.msk [vmem:[#allocation3 + $0x50] sm:$0xff] %vm775_vm3, %v700_v31  ;;  %1077 = vrot.lane.b32.xlu1 %v8099_v24, %s7275_s21 }
 0x13b   : > { %1075 = vrot.lane.b32.xlu0 %v8077_v20, %s7275_s21 }
 0x13c   : > { %v706_v18 = vpop.permute.xlu1 %705 }
 0x13d   : > { %v704_v10 = vpop.permute.xlu0 %703  ;;  %789 = vst.msk [vmem:[#allocation3 + $0x68] sm:$0xff] %vm775_vm3, %v706_v18 }
 0x13e   : > { %788 = vst.msk [vmem:[#allocation3 + $0x60] sm:$0xff] %vm775_vm3, %v704_v10  ;;  %1081 = vrot.lane.b32.xlu1 %v8465_v13, %s7275_s21 }
 0x13f   : > { %1079 = vrot.lane.b32.xlu0 %v8094_v23, %s7275_s21 }
 0x140   : > { %v710_v14 = vpop.permute.xlu1 %709 }
 0x141   : > { %v708_v26 = vpop.permute.xlu0 %707  ;;  %791 = vst.msk [vmem:[#allocation3 + $0x78] sm:$0xff] %vm775_vm3, %v710_v14 }
 0x142   : > { %790 = vst.msk [vmem:[#allocation3 + $0x70] sm:$0xff] %vm775_vm3, %v708_v26  ;;  %1085 = vrot.lane.b32.xlu1 %v8114_v28, %s7275_s21 }
 0x143   : > { %1083 = vrot.lane.b32.xlu0 %v8102_v25, %s7275_s21  ;;  %v8492_v25 = vld [vmem:[%s7994_s10 + $0x120] sm:$0xff] }
 0x144   : > { %v714_v31 = vpop.permute.xlu1 %713 }
 0x145   : > { %v712_v18 = vpop.permute.xlu0 %711  ;;  %793 = vst.msk [vmem:[#allocation3 + $0x88] sm:$0xff] %vm775_vm3, %v714_v31 }
 0x146   : > { %792 = vst.msk [vmem:[#allocation3 + $0x80] sm:$0xff] %vm775_vm3, %v712_v18  ;;  %1089 = vrot.lane.b32.xlu1 %v8130_v32, %s7275_s21 }
 0x147   : > { %1087 = vrot.lane.b32.xlu0 %v8111_v27, %s7275_s21 }
 0x148   : > { %v718_v10 = vpop.permute.xlu1 %717 }
 0x149   : > { %v716_v14 = vpop.permute.xlu0 %715  ;;  %795 = vst.msk [vmem:[#allocation3 + $0x98] sm:$0xff] %vm775_vm3, %v718_v10 }
 0x14a   : > { %794 = vst.msk [vmem:[#allocation3 + $0x90] sm:$0xff] %vm775_vm3, %v716_v14  ;;  %1093 = vrot.lane.b32.xlu1 %v8144_v34, %s7275_s21 }
 0x14b   : > { %1091 = vrot.lane.b32.xlu0 %v8117_v29, %s7275_s21 }
 0x14c   : > { %v722_v26 = vpop.permute.xlu1 %721 }
 0x14d   : > { %v720_v31 = vpop.permute.xlu0 %719  ;;  %797 = vst.msk [vmem:[#allocation3 + $0xa8] sm:$0xff] %vm775_vm3, %v722_v26 }
 0x14e   : > { %796 = vst.msk [vmem:[#allocation3 + $0xa0] sm:$0xff] %vm775_vm3, %v720_v31  ;;  %1097 = vrot.lane.b32.xlu1 %v8492_v25, %s7275_s21 }
 0x14f   : > { %1095 = vrot.lane.b32.xlu0 %v8133_v33, %s7275_s21 }
 0x150   : > { %v726_v18 = vpop.permute.xlu1 %725 }
 0x151   : > { %v724_v10 = vpop.permute.xlu0 %723  ;;  %799 = vst.msk [vmem:[#allocation3 + $0xb8] sm:$0xff] %vm775_vm3, %v726_v18 }
 0x152   : > { %798 = vst.msk [vmem:[#allocation3 + $0xb0] sm:$0xff] %vm775_vm3, %v724_v10  ;;  %1101 = vrot.lane.b32.xlu1 %v8158_v38, %s7275_s21 }
 0x153   : > { %1099 = vrot.lane.b32.xlu0 %v8147_v35, %s7275_s21  ;;  %v8519_v35 = vld [vmem:[%s7994_s10 + $0x1c0] sm:$0xff] }
 0x154   : > { %v730_v14 = vpop.permute.xlu1 %729 }
 0x155   : > { %v728_v26 = vpop.permute.xlu0 %727  ;;  %801 = vst.msk [vmem:[#allocation3 + $0xc8] sm:$0xff] %vm775_vm3, %v730_v14 }
 0x156   : > { %800 = vst.msk [vmem:[#allocation3 + $0xc0] sm:$0xff] %vm775_vm3, %v728_v26  ;;  %1105 = vrot.lane.b32.xlu1 %v8169_v40, %s7275_s21 }
 0x157   : > { %1103 = vrot.lane.b32.xlu0 %v8155_v37, %s7275_s21 }
 0x158   : > { %v734_v31 = vpop.permute.xlu1 %733 }
 0x159   : > { %v732_v18 = vpop.permute.xlu0 %731  ;;  %803 = vst.msk [vmem:[#allocation3 + $0xd8] sm:$0xff] %vm775_vm3, %v734_v31 }
 0x15a   : > { %802 = vst.msk [vmem:[#allocation3 + $0xd0] sm:$0xff] %vm775_vm3, %v732_v18  ;;  %1109 = vrot.lane.b32.xlu1 %v8179_v42, %s7275_s21 }
 0x15b   : > { %1107 = vrot.lane.b32.xlu0 %v8166_v39, %s7275_s21 }
 0x15c   : > { %v738_v10 = vpop.permute.xlu1 %737 }
 0x15d   : > { %v736_v14 = vpop.permute.xlu0 %735  ;;  %805 = vst.msk [vmem:[#allocation3 + $0xe8] sm:$0xff] %vm775_vm3, %v738_v10 }
 0x15e   : > { %804 = vst.msk [vmem:[#allocation3 + $0xe0] sm:$0xff] %vm775_vm3, %v736_v14  ;;  %1113 = vrot.lane.b32.xlu1 %v8519_v35, %s7275_s21 }
 0x15f   : > { %1111 = vrot.lane.b32.xlu0 %v8176_v41, %s7275_s21 }
 0x160   : > { %v742_v26 = vpop.permute.xlu1 %741 }
 0x161   : > { %v740_v31 = vpop.permute.xlu0 %739  ;;  %807 = vst.msk [vmem:[#allocation3 + $0xf8] sm:$0xff] %vm775_vm3, %v742_v26 }
 0x162   : > { %806 = vst.msk [vmem:[#allocation3 + $0xf0] sm:$0xff] %vm775_vm3, %v740_v31  ;;  %1117 = vrot.lane.b32.xlu1 %v8215_v50, %s7275_s21  ;;  %vm3874_vm3 = vcmask 589344  }
 0x163   : > { %1115 = vrot.lane.b32.xlu0 %v8195_v45, %s7275_s21  ;;  %v8546_v45 = vld [vmem:[%s7994_s10 + $0x260] sm:$0xff] }
 0x164   : > { %v875_v18 = vpop.permute.xlu1 %874 }
 0x165   : > { %v873_v10 = vpop.permute.xlu0 %872  ;;  %970 = vst.msk [vmem:[#allocation3 + $0x8] sm:$0xff] %vm968_vm4, %v875_v18 }
 0x166   : > { %969 = vst.msk [vmem:[#allocation3] sm:$0xff] %vm968_vm4, %v873_v10  ;;  %1121 = vrot.lane.b32.xlu1 %v8235_v54, %s7275_s21 }
 0x167   : > { %1119 = vrot.lane.b32.xlu0 %v8212_v49, %s7275_s21 }
 0x168   : > { %v879_v14 = vpop.permute.xlu1 %878 }
 0x169   : > { %v877_v26 = vpop.permute.xlu0 %876  ;;  %972 = vst.msk [vmem:[#allocation3 + $0x18] sm:$0xff] %vm968_vm4, %v879_v14 }
 0x16a   : > { %971 = vst.msk [vmem:[#allocation3 + $0x10] sm:$0xff] %vm968_vm4, %v877_v26  ;;  %1125 = vrot.lane.b32.xlu1 %v8253_v58, %s7275_s21 }
 0x16b   : > { %1123 = vrot.lane.b32.xlu0 %v8232_v53, %s7275_s21 }
 0x16c   : > { %v883_v31 = vpop.permute.xlu1 %882 }
 0x16d   : > { %v881_v18 = vpop.permute.xlu0 %880  ;;  %974 = vst.msk [vmem:[#allocation3 + $0x28] sm:$0xff] %vm968_vm4, %v883_v31 }
 0x16e   : > { %973 = vst.msk [vmem:[#allocation3 + $0x20] sm:$0xff] %vm968_vm4, %v881_v18  ;;  %1129 = vrot.lane.b32.xlu1 %v8546_v45, %s7275_s21 }
 0x16f   : > { %1127 = vrot.lane.b32.xlu0 %v8250_v57, %s7275_s21  ;;  %s7287_s21 = smov 60  }
 0x170   : > { %v887_v10 = vpop.permute.xlu1 %886 }
 0x171   : > { %v885_v14 = vpop.permute.xlu0 %884  ;;  %976 = vst.msk [vmem:[#allocation3 + $0x38] sm:$0xff] %vm968_vm4, %v887_v10 }
 0x172   : > { %975 = vst.msk [vmem:[#allocation3 + $0x30] sm:$0xff] %vm968_vm4, %v885_v14  ;;  %1262 = vrot.lane.b32.xlu1 %v7997_v1, %s7276_s24  ;;  %v8573_v1 = vld [vmem:[%s7994_s10 + $0x81] sm:$0xff] }
 0x173   : > { %1260 = vrot.lane.b32.xlu0 %v8007_v4, %s7276_s24 }
 0x174   : > { %v891_v26 = vpop.permute.xlu1 %890 }
 0x175   : > { %v889_v31 = vpop.permute.xlu0 %888  ;;  %978 = vst.msk [vmem:[#allocation3 + $0x48] sm:$0xff] %vm968_vm4, %v891_v26 }
 0x176   : > { %977 = vst.msk [vmem:[#allocation3 + $0x40] sm:$0xff] %vm968_vm4, %v889_v31  ;;  %1266 = vrot.lane.b32.xlu1 %v8017_v6, %s7276_s24 }
 0x177   : > { %1264 = vrot.lane.b32.xlu0 %v8004_v3, %s7276_s24 }
 0x178   : > { %v895_v18 = vpop.permute.xlu1 %894 }
 0x179   : > { %v893_v10 = vpop.permute.xlu0 %892  ;;  %980 = vst.msk [vmem:[#allocation3 + $0x58] sm:$0xff] %vm968_vm4, %v895_v18 }
 0x17a   : > { %979 = vst.msk [vmem:[#allocation3 + $0x50] sm:$0xff] %vm968_vm4, %v893_v10  ;;  %1270 = vrot.lane.b32.xlu1 %v8027_v8, %s7276_s24 }
 0x17b   : > { %1268 = vrot.lane.b32.xlu0 %v8014_v5, %s7276_s24 }
 0x17c   : > { %v899_v4 = vpop.permute.xlu1 %898 }
 0x17d   : > { %v897_v14 = vpop.permute.xlu0 %896  ;;  %982 = vst.msk [vmem:[#allocation3 + $0x68] sm:$0xff] %vm968_vm4, %v899_v4 }
 0x17e   : > { %981 = vst.msk [vmem:[#allocation3 + $0x60] sm:$0xff] %vm968_vm4, %v897_v14  ;;  %1274 = vrot.lane.b32.xlu1 %v8573_v1, %s7276_s24 }
 0x17f   : > { %1272 = vrot.lane.b32.xlu0 %v8024_v7, %s7276_s24 }
 0x180   : > { %v903_v3 = vpop.permute.xlu1 %902 }
 0x181   : > { %v901_v6 = vpop.permute.xlu0 %900  ;;  %984 = vst.msk [vmem:[#allocation3 + $0x78] sm:$0xff] %vm968_vm4, %v903_v3 }
 0x182   : > { %983 = vst.msk [vmem:[#allocation3 + $0x70] sm:$0xff] %vm968_vm4, %v901_v6  ;;  %1278 = vrot.lane.b32.xlu1 %v8044_v12, %s7276_s24 }
 0x183   : > { %1276 = vrot.lane.b32.xlu0 %v8034_v9, %s7276_s24  ;;  %v8600_v9 = vld [vmem:[%s7994_s10 + $0x121] sm:$0xff] }
 0x184   : > { %v907_v5 = vpop.permute.xlu1 %906 }
 0x185   : > { %v905_v8 = vpop.permute.xlu0 %904  ;;  %986 = vst.msk [vmem:[#allocation3 + $0x88] sm:$0xff] %vm968_vm4, %v907_v5  ;;  %v11682_v5 = vld [vmem:[#allocation8_spill] sm:$0xff] }
 0x186   : > { %985 = vst.msk [vmem:[#allocation3 + $0x80] sm:$0xff] %vm968_vm4, %v905_v8  ;;  %1282 = vrot.lane.b32.xlu1 %v8058_v16, %s7276_s24 }
 0x187   : > { %1280 = vrot.lane.b32.xlu0 %v8041_v11, %s7276_s24 }
 0x188   : > { %v911_v7 = vpop.permute.xlu1 %910 }
 0x189   : > { %v909_v26 = vpop.permute.xlu0 %908  ;;  %988 = vst.msk [vmem:[#allocation3 + $0x98] sm:$0xff] %vm968_vm4, %v911_v7 }
 0x18a   : > { %987 = vst.msk [vmem:[#allocation3 + $0x90] sm:$0xff] %vm968_vm4, %v909_v26  ;;  %1286 = vrot.lane.b32.xlu1 %v8087_v22, %s7276_s24  ;;  %v11683_v26 = vld [vmem:[#allocation13_spill] sm:$0xff] }
 0x18b   : > { %1284 = vrot.lane.b32.xlu0 %v8055_v15, %s7276_s24 }
 0x18c   : > { %v915_v12 = vpop.permute.xlu1 %914 }
 0x18d   : > { %v913_v31 = vpop.permute.xlu0 %912  ;;  %990 = vst.msk [vmem:[#allocation3 + $0xa8] sm:$0xff] %vm968_vm4, %v915_v12  ;;  %v11684_v12 = vld [vmem:[#allocation10_spill] sm:$0xff] }
 0x18e   : > { %989 = vst.msk [vmem:[#allocation3 + $0xa0] sm:$0xff] %vm968_vm4, %v913_v31  ;;  %1290 = vrot.lane.b32.xlu1 %v8600_v9, %s7276_s24  ;;  %v8681_v31 = vld [vmem:[%s7994_s10 + $0x82] sm:$0xff] }
 0x18f   : > { %1288 = vrot.lane.b32.xlu0 %v8072_v19, %s7276_s24 }
 0x190   : > { %v919_v11 = vpop.permute.xlu1 %918 }
 0x191   : > { %v917_v16 = vpop.permute.xlu0 %916  ;;  %992 = vst.msk [vmem:[#allocation3 + $0xb8] sm:$0xff] %vm968_vm4, %v919_v11 }
 0x192   : > { %991 = vst.msk [vmem:[#allocation3 + $0xb0] sm:$0xff] %vm968_vm4, %v917_v16  ;;  %1294 = vrot.lane.b32.xlu1 %v8192_v44, %s7276_s24 }
 0x193   : > { %1292 = vrot.lane.b32.xlu0 %v8120_v30, %s7276_s24  ;;  %v8627_v30 = vld [vmem:[%s7994_s10 + $0x1c1] sm:$0xff] }
 0x194   : > { %v923_v15 = vpop.permute.xlu1 %922 }
 0x195   : > { %v921_v22 = vpop.permute.xlu0 %920  ;;  %994 = vst.msk [vmem:[#allocation3 + $0xc8] sm:$0xff] %vm968_vm4, %v923_v15  ;;  %v11685_v15 = vld [vmem:[#allocation12_spill] sm:$0xff] }
 0x196   : > { %993 = vst.msk [vmem:[#allocation3 + $0xc0] sm:$0xff] %vm968_vm4, %v921_v22  ;;  %1298 = vrot.lane.b32.xlu1 %v8209_v48, %s7276_s24 }
 0x197   : > { %1296 = vrot.lane.b32.xlu0 %v8185_v43, %s7276_s24 }
 0x198   : > { %v927_v19 = vpop.permute.xlu1 %926 }
 0x199   : > { %v925_v18 = vpop.permute.xlu0 %924  ;;  %996 = vst.msk [vmem:[#allocation3 + $0xd8] sm:$0xff] %vm968_vm4, %v927_v19 }
 0x19a   : > { %995 = vst.msk [vmem:[#allocation3 + $0xd0] sm:$0xff] %vm968_vm4, %v925_v18  ;;  %1302 = vrot.lane.b32.xlu1 %v8229_v52, %s7276_s24  ;;  %v11686_v18 = vld [vmem:[#allocation16_spill] sm:$0xff] }
 0x19b   : > { %1300 = vrot.lane.b32.xlu0 %v8206_v47, %s7276_s24 }
 0x19c   : > { %v931_v44 = vpop.permute.xlu1 %930 }
 0x19d   : > { %v929_v10 = vpop.permute.xlu0 %928  ;;  %998 = vst.msk [vmem:[#allocation3 + $0xe8] sm:$0xff] %vm968_vm4, %v931_v44  ;;  %v11687_v44 = vld [vmem:[#allocation14_spill] sm:$0xff] }
 0x19e   : > { %997 = vst.msk [vmem:[#allocation3 + $0xe0] sm:$0xff] %vm968_vm4, %v929_v10  ;;  %1306 = vrot.lane.b32.xlu1 %v8627_v30, %s7276_s24 }
 0x19f   : > { %1304 = vrot.lane.b32.xlu0 %v8226_v51, %s7276_s24 }
 0x1a0   : > { %v935_v43 = vpop.permute.xlu1 %934 }
 0x1a1   : > { %v933_v48 = vpop.permute.xlu0 %932  ;;  %1000 = vst.msk [vmem:[#allocation3 + $0xf8] sm:$0xff] %vm968_vm4, %v935_v43 }
 0x1a2   : > { %999 = vst.msk [vmem:[#allocation3 + $0xf0] sm:$0xff] %vm968_vm4, %v933_v48  ;;  %1310 = vrot.lane.b32.xlu1 %v8266_v60, %s7276_s24  ;;  %v11688_v48 = vld [vmem:[#allocation18_spill] sm:$0xff]  ;;  %vm4070_vm4 = vcmask 622144  }
 0x1a3   : > { %1308 = vrot.lane.b32.xlu0 %v8246_v55, %s7276_s24  ;;  %v8654_v55 = vld [vmem:[%s7994_s10 + $0x261] sm:$0xff] }
 0x1a4   : > { %v1070_v47 = vpop.permute.xlu1 %1069 }
 0x1a5   : > { %v1068_v52 = vpop.permute.xlu0 %1067  ;;  %1165 = vst.msk [vmem:[#allocation3 + $0x8] sm:$0xff] %vm1163_vm5, %v1070_v47  ;;  %v11689_v47 = vld [vmem:[#allocation15_spill] sm:$0xff] }
 0x1a6   : > { %1164 = vst.msk [vmem:[#allocation3] sm:$0xff] %vm1163_vm5, %v1068_v52  ;;  %1314 = vrot.lane.b32.xlu1 %v8276_v62, %s7276_s24 }
 0x1a7   : > { %1312 = vrot.lane.b32.xlu0 %v8263_v59, %s7276_s24 }
 0x1a8   : > { %v1074_v51 = vpop.permute.xlu1 %1073 }
 0x1a9   : > { %v1072_v4 = vpop.permute.xlu0 %1071  ;;  %1167 = vst.msk [vmem:[#allocation3 + $0x18] sm:$0xff] %vm1163_vm5, %v1074_v51 }
 0x1aa   : > { %1166 = vst.msk [vmem:[#allocation3 + $0x10] sm:$0xff] %vm1163_vm5, %v1072_v4  ;;  %1318 = vrot.lane.b32.xlu1 %v8286_v0, %s7276_s24  ;;  %v11680_v0 = vld [vmem:[#allocation7_spill] sm:$0xff]  ;;  %v11690_v4 = vld [vmem:[#allocation20_spill] sm:$0xff] }
 0x1ab   : > { %1316 = vrot.lane.b32.xlu0 %v8273_v61, %s7276_s24  ;;  %v11679_v61 = vld [vmem:[#allocation9_spill] sm:$0xff] }
 0x1ac   : > { %v1078_v60 = vpop.permute.xlu1 %1077 }
 0x1ad   : > { %v1076_v14 = vpop.permute.xlu0 %1075  ;;  %1169 = vst.msk [vmem:[#allocation3 + $0x28] sm:$0xff] %vm1163_vm5, %v1078_v60  ;;  %v11691_v60 = vld [vmem:[#allocation17_spill] sm:$0xff] }
 0x1ae   : > { %1168 = vst.msk [vmem:[#allocation3 + $0x20] sm:$0xff] %vm1163_vm5, %v1076_v14  ;;  %1322 = vrot.lane.b32.xlu1 %v8654_v55, %s7276_s24  ;;  %v8708_v14 = vld [vmem:[%s7994_s10 + $0x122] sm:$0xff] }
 0x1af   : > { %1320 = vrot.lane.b32.xlu0 %v8283_v63, %s7276_s24  ;;  %v11681_v63 = vld [vmem:[#allocation11_spill] sm:$0xff]  ;;  %s7288_s24 = smov 64  }
 0x1b0   : > { %v1082_v59 = vpop.permute.xlu1 %1081 }
 0x1b1   : > { %v1080_v62 = vpop.permute.xlu0 %1079  ;;  %1171 = vst.msk [vmem:[#allocation3 + $0x38] sm:$0xff] %vm1163_vm5, %v1082_v59 }
 0x1b2   : > { %1170 = vst.msk [vmem:[#allocation3 + $0x30] sm:$0xff] %vm1163_vm5, %v1080_v62  ;;  %1455 = vrot.lane.b32.xlu1 %v11679_v61, %s7277_s27  ;;  %v11692_v61 = vld [vmem:[#allocation19_spill] sm:$0xff] }
 0x1b3   : > { %1453 = vrot.lane.b32.xlu0 %v11680_v0, %s7277_s27 }
 0x1b4   : > { %v1086_v3 = vpop.permute.xlu1 %1085 }
 0x1b5   : > { %v1084_v6 = vpop.permute.xlu0 %1083  ;;  %1173 = vst.msk [vmem:[#allocation3 + $0x48] sm:$0xff] %vm1163_vm5, %v1086_v3 }
 0x1b6   : > { %1172 = vst.msk [vmem:[#allocation3 + $0x40] sm:$0xff] %vm1163_vm5, %v1084_v6  ;;  %1459 = vrot.lane.b32.xlu1 %v11681_v63, %s7277_s27  ;;  %v11693_v6 = vld [vmem:[#allocation23_spill] sm:$0xff]  ;;  %v11694_v63 = vld [vmem:[#allocation21_spill] sm:$0xff] }
 0x1b7   : > { %1457 = vrot.lane.b32.xlu0 %v11682_v5, %s7277_s27 }
 0x1b8   : > { %v1090_v8 = vpop.permute.xlu1 %1089 }
 0x1b9   : > { %v1088_v7 = vpop.permute.xlu0 %1087  ;;  %1175 = vst.msk [vmem:[#allocation3 + $0x58] sm:$0xff] %vm1163_vm5, %v1090_v8 }
 0x1ba   : > { %1174 = vst.msk [vmem:[#allocation3 + $0x50] sm:$0xff] %vm1163_vm5, %v1088_v7  ;;  %1463 = vrot.lane.b32.xlu1 %v11683_v26, %s7277_s27  ;;  %v11695_v7 = vld [vmem:[#allocation25_spill] sm:$0xff]  ;;  %v11696_v26 = vld [vmem:[#allocation22_spill] sm:$0xff] }
 0x1bb   : > { %1461 = vrot.lane.b32.xlu0 %v11684_v12, %s7277_s27 }
 0x1bc   : > { %v1094_v11 = vpop.permute.xlu1 %1093 }
 0x1bd   : > { %v1092_v16 = vpop.permute.xlu0 %1091  ;;  %1177 = vst.msk [vmem:[#allocation3 + $0x68] sm:$0xff] %vm1163_vm5, %v1094_v11 }
 0x1be   : > { %1176 = vst.msk [vmem:[#allocation3 + $0x60] sm:$0xff] %vm1163_vm5, %v1092_v16  ;;  %1467 = vrot.lane.b32.xlu1 %v8681_v31, %s7277_s27  ;;  %v11697_v16 = vld [vmem:[#allocation27_spill] sm:$0xff] }
 0x1bf   : > { %1465 = vrot.lane.b32.xlu0 %v11685_v15, %s7277_s27  ;;  %v11698_v15 = vld [vmem:[#allocation24_spill] sm:$0xff] }
 0x1c0   : > { %v1098_v22 = vpop.permute.xlu1 %1097 }
 0x1c1   : > { %v1096_v19 = vpop.permute.xlu0 %1095  ;;  %1179 = vst.msk [vmem:[#allocation3 + $0x78] sm:$0xff] %vm1163_vm5, %v1098_v22  ;;  %v8735_v22 = vld [vmem:[%s7994_s10 + $0x1c2] sm:$0xff] }
 0x1c2   : > { %1178 = vst.msk [vmem:[#allocation3 + $0x70] sm:$0xff] %vm1163_vm5, %v1096_v19  ;;  %1471 = vrot.lane.b32.xlu1 %v11686_v18, %s7277_s27 }
 0x1c3   : > { %1469 = vrot.lane.b32.xlu0 %v11687_v44, %s7277_s27  ;;  %v11699_v44 = vld [vmem:[#allocation26_spill] sm:$0xff] }
 0x1c4   : > { %v1102_v10 = vpop.permute.xlu1 %1101 }
 0x1c5   : > { %v1100_v43 = vpop.permute.xlu0 %1099  ;;  %1181 = vst.msk [vmem:[#allocation3 + $0x88] sm:$0xff] %vm1163_vm5, %v1102_v10 }
 0x1c6   : > { %1180 = vst.msk [vmem:[#allocation3 + $0x80] sm:$0xff] %vm1163_vm5, %v1100_v43  ;;  %1475 = vrot.lane.b32.xlu1 %v11688_v48, %s7277_s27  ;;  %v11700_v48 = vld [vmem:[#allocation30_spill] sm:$0xff] }
 0x1c7   : > { %1473 = vrot.lane.b32.xlu0 %v11689_v47, %s7277_s27  ;;  %v11701_v47 = vld [vmem:[#allocation28_spill] sm:$0xff] }
 0x1c8   : > { %v1106_v52 = vpop.permute.xlu1 %1105 }
 0x1c9   : > { %v1104_v51 = vpop.permute.xlu0 %1103  ;;  %1183 = vst.msk [vmem:[#allocation3 + $0x98] sm:$0xff] %vm1163_vm5, %v1106_v52 }
 0x1ca   : > { %1182 = vst.msk [vmem:[#allocation3 + $0x90] sm:$0xff] %vm1163_vm5, %v1104_v51  ;;  %1479 = vrot.lane.b32.xlu1 %v11690_v4, %s7277_s27  ;;  %v11702_v4 = vld [vmem:[#allocation29_spill] sm:$0xff] }
 0x1cb   : > { %1477 = vrot.lane.b32.xlu0 %v11691_v60, %s7277_s27 }
 0x1cc   : > { %v1110_v59 = vpop.permute.xlu1 %1109 }
 0x1cd   : > { %v1108_v62 = vpop.permute.xlu0 %1107  ;;  %1185 = vst.msk [vmem:[#allocation3 + $0xa8] sm:$0xff] %vm1163_vm5, %v1110_v59 }
 0x1ce   : > { %1184 = vst.msk [vmem:[#allocation3 + $0xa0] sm:$0xff] %vm1163_vm5, %v1108_v62  ;;  %1483 = vrot.lane.b32.xlu1 %v8708_v14, %s7277_s27  ;;  %v8762_v62 = vld [vmem:[%s7994_s10 + $0x262] sm:$0xff] }
 0x1cf   : > { %1481 = vrot.lane.b32.xlu0 %v11692_v61, %s7277_s27 }
 0x1d0   : > { %v1114_v0 = vpop.permute.xlu1 %1113 }
 0x1d1   : > { %v1112_v3 = vpop.permute.xlu0 %1111  ;;  %1187 = vst.msk [vmem:[#allocation3 + $0xb8] sm:$0xff] %vm1163_vm5, %v1114_v0 }
 0x1d2   : > { %1186 = vst.msk [vmem:[#allocation3 + $0xb0] sm:$0xff] %vm1163_vm5, %v1112_v3  ;;  %1487 = vrot.lane.b32.xlu1 %v11693_v6, %s7277_s27 }
 0x1d3   : > { %1485 = vrot.lane.b32.xlu0 %v11694_v63, %s7277_s27 }
 0x1d4   : > { %v1118_v5 = vpop.permute.xlu1 %1117 }
 0x1d5   : > { %v1116_v8 = vpop.permute.xlu0 %1115  ;;  %1189 = vst.msk [vmem:[#allocation3 + $0xc8] sm:$0xff] %vm1163_vm5, %v1118_v5 }
 0x1d6   : > { %1188 = vst.msk [vmem:[#allocation3 + $0xc0] sm:$0xff] %vm1163_vm5, %v1116_v8  ;;  %1491 = vrot.lane.b32.xlu1 %v11695_v7, %s7277_s27 }
 0x1d7   : > { %1489 = vrot.lane.b32.xlu0 %v11696_v26, %s7277_s27 }
 0x1d8   : > { %v1122_v12 = vpop.permute.xlu1 %1121 }
 0x1d9   : > { %v1120_v11 = vpop.permute.xlu0 %1119  ;;  %1191 = vst.msk [vmem:[#allocation3 + $0xd8] sm:$0xff] %vm1163_vm5, %v1122_v12 }
 0x1da   : > { %1190 = vst.msk [vmem:[#allocation3 + $0xd0] sm:$0xff] %vm1163_vm5, %v1120_v11  ;;  %1495 = vrot.lane.b32.xlu1 %v11697_v16, %s7277_s27 }
 0x1db   : > { %1493 = vrot.lane.b32.xlu0 %v11698_v15, %s7277_s27  ;;  %v6257_v15 = vld [vmem:[%s7994_s10 + $0x21] sm:$0xff] }
 0x1dc   : > { %v1126_v19 = vpop.permute.xlu1 %1125 }
 0x1dd   : > { %v1124_v18 = vpop.permute.xlu0 %1123  ;;  %1193 = vst.msk [vmem:[#allocation3 + $0xe8] sm:$0xff] %vm1163_vm5, %v1126_v19  ;;  %v6260_v19 = vld [vmem:[%s7994_s10 + $0x51] sm:$0xff] }
 0x1de   : > { %1192 = vst.msk [vmem:[#allocation3 + $0xe0] sm:$0xff] %vm1163_vm5, %v1124_v18  ;;  %1499 = vrot.lane.b32.xlu1 %v8735_v22, %s7277_s27  ;;  %v6259_v18 = vld [vmem:[%s7994_s10 + $0x41] sm:$0xff] }
 0x1df   : > { %1497 = vrot.lane.b32.xlu0 %v11699_v44, %s7277_s27 }
 0x1e0   : > { %v1130_v10 = vpop.permute.xlu1 %1129 }
 0x1e1   : > { %v1128_v43 = vpop.permute.xlu0 %1127  ;;  %1195 = vst.msk [vmem:[#allocation3 + $0xf8] sm:$0xff] %vm1163_vm5, %v1130_v10  ;;  %v6262_v10 = vld [vmem:[%s7994_s10 + $0x71] sm:$0xff] }
 0x1e2   : > { %1194 = vst.msk [vmem:[#allocation3 + $0xf0] sm:$0xff] %vm1163_vm5, %v1128_v43  ;;  %1503 = vrot.lane.b32.xlu1 %v11700_v48, %s7277_s27  ;;  %v6261_v43 = vld [vmem:[%s7994_s10 + $0x61] sm:$0xff]  ;;  %vm4263_vm5 = vcmask 654944  }
 0x1e3   : > { %1501 = vrot.lane.b32.xlu0 %v11701_v47, %s7277_s27 }
 0x1e4   : > { %v1263_v52 = vpop.permute.xlu1 %1262 }
 0x1e5   : > { %v1261_v51 = vpop.permute.xlu0 %1260  ;;  %1358 = vst.msk [vmem:[#allocation3 + $0x8] sm:$0xff] %vm1356_vm6, %v1263_v52  ;;  %v6264_v52 = vld [vmem:[%s7994_s10 + $0x91] sm:$0xff] }
 0x1e6   : > { %1357 = vst.msk [vmem:[#allocation3] sm:$0xff] %vm1356_vm6, %v1261_v51  ;;  %1507 = vrot.lane.b32.xlu1 %v8426_v46, %s7277_s27  ;;  %v6225_v46 = vld [vmem:[%s7994_s10 + $0x20] sm:$0xff] }
 0x1e7   : > { %1505 = vrot.lane.b32.xlu0 %v11702_v4, %s7277_s27 }
 0x1e8   : > { %v1267_v60 = vpop.permute.xlu1 %1266 }
 0x1e9   : > { %v1265_v59 = vpop.permute.xlu0 %1264  ;;  %1360 = vst.msk [vmem:[#allocation3 + $0x18] sm:$0xff] %vm1356_vm6, %v1267_v60  ;;  %v8891_v60 = vld [vmem:[%s7994_s10 + $0xd1] sm:$0xff] }
 0x1ea   : > { %1359 = vst.msk [vmem:[#allocation3 + $0x10] sm:$0xff] %vm1356_vm6, %v1265_v59  ;;  %1511 = vrot.lane.b32.xlu1 %v8438_v36, %s7277_s27  ;;  %v8894_v59 = vld [vmem:[%s7994_s10 + $0xc1] sm:$0xff] }
 0x1eb   : > { %1509 = vrot.lane.b32.xlu0 %v8423_v56, %s7277_s27 }
 0x1ec   : > { %v1271_v61 = vpop.permute.xlu1 %1270 }
 0x1ed   : > { %v1269_v0 = vpop.permute.xlu0 %1268  ;;  %1362 = vst.msk [vmem:[#allocation3 + $0x28] sm:$0xff] %vm1356_vm6, %v1271_v61 }
 0x1ee   : > { %1361 = vst.msk [vmem:[#allocation3 + $0x20] sm:$0xff] %vm1356_vm6, %v1269_v0  ;;  %1515 = vrot.lane.b32.xlu1 %v8762_v62, %s7277_s27 }
 0x1ef   : > { %1513 = vrot.lane.b32.xlu0 %v8435_v2, %s7277_s27  ;;  %s7289_s27 = smov 68  }
 0x1f0   : > { %v1275_v3 = vpop.permute.xlu1 %1274 }
 0x1f1   : > { %v1273_v36 = vpop.permute.xlu0 %1272  ;;  %1364 = vst.msk [vmem:[#allocation3 + $0x38] sm:$0xff] %vm1356_vm6, %v1275_v3 }
 0x1f2   : > { %1363 = vst.msk [vmem:[#allocation3 + $0x30] sm:$0xff] %vm1356_vm6, %v1273_v36  ;;  %1650 = vrot.lane.b32.xlu1 %v8064_v17, %s7278_s28  ;;  %v6232_v17 = vld [vmem:[%s7994_s10 + $0x90] sm:$0xff] }
 0x1f3   : > { %1648 = vrot.lane.b32.xlu0 %v6225_v46, %s7278_s28  ;;  %v8903_v46 = vld [vmem:[%s7994_s10 + $0xf1] sm:$0xff] }
 0x1f4   : > { %v1279_v56 = vpop.permute.xlu1 %1278 }
 0x1f5   : > { %v1277_v6 = vpop.permute.xlu0 %1276  ;;  %1366 = vst.msk [vmem:[#allocation3 + $0x48] sm:$0xff] %vm1356_vm6, %v1279_v56  ;;  %v8915_v56 = vld [vmem:[%s7994_s10 + $0x111] sm:$0xff] }
 0x1f6   : > { %1365 = vst.msk [vmem:[#allocation3 + $0x40] sm:$0xff] %vm1356_vm6, %v1277_v6  ;;  %1654 = vrot.lane.b32.xlu1 %v8077_v20, %s7278_s28  ;;  %v8918_v6 = vld [vmem:[%s7994_s10 + $0x101] sm:$0xff] }
 0x1f7   : > { %1652 = vrot.lane.b32.xlu0 %v8080_v21, %s7278_s28 }
 0x1f8   : > { %v1283_v2 = vpop.permute.xlu1 %1282 }
 0x1f9   : > { %v1281_v63 = vpop.permute.xlu0 %1280  ;;  %1368 = vst.msk [vmem:[#allocation3 + $0x58] sm:$0xff] %vm1356_vm6, %v1283_v2 }
 0x1fa   : > { %1367 = vst.msk [vmem:[#allocation3 + $0x50] sm:$0xff] %vm1356_vm6, %v1281_v63  ;;  %1658 = vrot.lane.b32.xlu1 %v8094_v23, %s7278_s28 }
 0x1fb   : > { %1656 = vrot.lane.b32.xlu0 %v8099_v24, %s7278_s28 }
 0x1fc   : > { %v1287_v5 = vpop.permute.xlu1 %1286 }
 0x1fd   : > { %v1285_v8 = vpop.permute.xlu0 %1284  ;;  %1370 = vst.msk [vmem:[#allocation3 + $0x68] sm:$0xff] %vm1356_vm6, %v1287_v5 }
 0x1fe   : > { %1369 = vst.msk [vmem:[#allocation3 + $0x60] sm:$0xff] %vm1356_vm6, %v1285_v8  ;;  %1662 = vrot.lane.b32.xlu1 %v6232_v17, %s7278_s28  ;;  %v6272_v17 = vld [vmem:[%s7994_s10 + $0x131] sm:$0xff] }
 0x1ff   : > { %1660 = vrot.lane.b32.xlu0 %v8465_v13, %s7278_s28 }
 0x200   : > { %v1291_v20 = vpop.permute.xlu1 %1290 }
 0x201   : > { %v1289_v21 = vpop.permute.xlu0 %1288  ;;  %1372 = vst.msk [vmem:[#allocation3 + $0x78] sm:$0xff] %vm1356_vm6, %v1291_v20  ;;  %v8933_v20 = vld [vmem:[%s7994_s10 + $0x171] sm:$0xff] }
 0x202   : > { %1371 = vst.msk [vmem:[#allocation3 + $0x70] sm:$0xff] %vm1356_vm6, %v1289_v21  ;;  %1666 = vrot.lane.b32.xlu1 %v8111_v27, %s7278_s28  ;;  %v6240_v27 = vld [vmem:[%s7994_s10 + $0x130] sm:$0xff]  ;;  %v8936_v21 = vld [vmem:[%s7994_s10 + $0x161] sm:$0xff] }
 0x203   : > { %1664 = vrot.lane.b32.xlu0 %v8114_v28, %s7278_s28 }
 0x204   : > { %v1295_v23 = vpop.permute.xlu1 %1294 }
 0x205   : > { %v1293_v24 = vpop.permute.xlu0 %1292  ;;  %1374 = vst.msk [vmem:[#allocation3 + $0x88] sm:$0xff] %vm1356_vm6, %v1295_v23 }
 0x206   : > { %1373 = vst.msk [vmem:[#allocation3 + $0x80] sm:$0xff] %vm1356_vm6, %v1293_v24  ;;  %1670 = vrot.lane.b32.xlu1 %v8117_v29, %s7278_s28 }
 0x207   : > { %1668 = vrot.lane.b32.xlu0 %v8130_v32, %s7278_s28 }
 0x208   : > { %v1299_v13 = vpop.permute.xlu1 %1298 }
 0x209   : > { %v1297_v7 = vpop.permute.xlu0 %1296  ;;  %1376 = vst.msk [vmem:[#allocation3 + $0x98] sm:$0xff] %vm1356_vm6, %v1299_v13  ;;  %v8945_v13 = vld [vmem:[%s7994_s10 + $0x191] sm:$0xff] }
 0x20a   : > { %1375 = vst.msk [vmem:[#allocation3 + $0x90] sm:$0xff] %vm1356_vm6, %v1297_v7  ;;  %1674 = vrot.lane.b32.xlu1 %v8133_v33, %s7278_s28 }
 0x20b   : > { %1672 = vrot.lane.b32.xlu0 %v8144_v34, %s7278_s28 }
 0x20c   : > { %v1303_v28 = vpop.permute.xlu1 %1302 }
 0x20d   : > { %v1301_v26 = vpop.permute.xlu0 %1300  ;;  %1378 = vst.msk [vmem:[#allocation3 + $0xa8] sm:$0xff] %vm1356_vm6, %v1303_v28  ;;  %v8957_v28 = vld [vmem:[%s7994_s10 + $0x1b1] sm:$0xff] }
 0x20e   : > { %1377 = vst.msk [vmem:[#allocation3 + $0xa0] sm:$0xff] %vm1356_vm6, %v1301_v26  ;;  %1678 = vrot.lane.b32.xlu1 %v6240_v27, %s7278_s28  ;;  %v8960_v26 = vld [vmem:[%s7994_s10 + $0x1a1] sm:$0xff] }
 0x20f   : > { %1676 = vrot.lane.b32.xlu0 %v8492_v25, %s7278_s28 }
 0x210   : > { %v1307_v29 = vpop.permute.xlu1 %1306 }
 0x211   : > { %v1305_v32 = vpop.permute.xlu0 %1304  ;;  %1380 = vst.msk [vmem:[#allocation3 + $0xb8] sm:$0xff] %vm1356_vm6, %v1307_v29 }
 0x212   : > { %1379 = vst.msk [vmem:[#allocation3 + $0xb0] sm:$0xff] %vm1356_vm6, %v1305_v32  ;;  %1682 = vrot.lane.b32.xlu1 %v8155_v37, %s7278_s28  ;;  %v6248_v37 = vld [vmem:[%s7994_s10 + $0x1d0] sm:$0xff] }
 0x213   : > { %1680 = vrot.lane.b32.xlu0 %v8158_v38, %s7278_s28 }
 0x214   : > { %v1311_v33 = vpop.permute.xlu1 %1310 }
 0x215   : > { %v1309_v34 = vpop.permute.xlu0 %1308  ;;  %1382 = vst.msk [vmem:[#allocation3 + $0xc8] sm:$0xff] %vm1356_vm6, %v1311_v33  ;;  %v6280_v33 = vld [vmem:[%s7994_s10 + $0x1d1] sm:$0xff] }
 0x216   : > { %1381 = vst.msk [vmem:[#allocation3 + $0xc0] sm:$0xff] %vm1356_vm6, %v1309_v34  ;;  %1686 = vrot.lane.b32.xlu1 %v8166_v39, %s7278_s28 }
 0x217   : > { %1684 = vrot.lane.b32.xlu0 %v8169_v40, %s7278_s28 }
 0x218   : > { %v1315_v25 = vpop.permute.xlu1 %1314 }
 0x219   : > { %v1313_v12 = vpop.permute.xlu0 %1312  ;;  %1384 = vst.msk [vmem:[#allocation3 + $0xd8] sm:$0xff] %vm1356_vm6, %v1315_v25 }
 0x21a   : > { %1383 = vst.msk [vmem:[#allocation3 + $0xd0] sm:$0xff] %vm1356_vm6, %v1313_v12  ;;  %1690 = vrot.lane.b32.xlu1 %v8176_v41, %s7278_s28  ;;  %v8975_v12 = vld [vmem:[%s7994_s10 + $0x211] sm:$0xff] }
 0x21b   : > { %1688 = vrot.lane.b32.xlu0 %v8179_v42, %s7278_s28 }
 0x21c   : > { %v1319_v38 = vpop.permute.xlu1 %1318 }
 0x21d   : > { %v1317_v11 = vpop.permute.xlu0 %1316  ;;  %1386 = vst.msk [vmem:[#allocation3 + $0xe8] sm:$0xff] %vm1356_vm6, %v1319_v38 }
 0x21e   : > { %1385 = vst.msk [vmem:[#allocation3 + $0xe0] sm:$0xff] %vm1356_vm6, %v1317_v11  ;;  %1694 = vrot.lane.b32.xlu1 %v6248_v37, %s7278_s28  ;;  %v8978_v37 = vld [vmem:[%s7994_s10 + $0x201] sm:$0xff] }
 0x21f   : > { %1692 = vrot.lane.b32.xlu0 %v8519_v35, %s7278_s28 }
 0x220   : > { %v1323_v39 = vpop.permute.xlu1 %1322 }
 0x221   : > { %v1321_v40 = vpop.permute.xlu0 %1320  ;;  %1388 = vst.msk [vmem:[#allocation3 + $0xf8] sm:$0xff] %vm1356_vm6, %v1323_v39  ;;  %v8990_v39 = vld [vmem:[%s7994_s10 + $0x221] sm:$0xff] }
 0x222   : > { %1387 = vst.msk [vmem:[#allocation3 + $0xf0] sm:$0xff] %vm1356_vm6, %v1321_v40  ;;  %1698 = vrot.lane.b32.xlu1 %v8212_v49, %s7278_s28  ;;  %vm4456_vm6 = vcmask 687744  }
 0x223   : > { %1696 = vrot.lane.b32.xlu0 %v8215_v50, %s7278_s28  ;;  %v6256_v50 = vld [vmem:[%s7994_s10 + $0x270] sm:$0xff] }
 0x224   : > { %v1456_v41 = vpop.permute.xlu1 %1455 }
 0x225   : > { %v1454_v42 = vpop.permute.xlu0 %1453  ;;  %1551 = vst.msk [vmem:[#allocation3 + $0x8] sm:$0xff] %vm1549_vm7, %v1456_v41 }
 0x226   : > { %1550 = vst.msk [vmem:[#allocation3] sm:$0xff] %vm1549_vm7, %v1454_v42  ;;  %1702 = vrot.lane.b32.xlu1 %v8232_v53, %s7278_s28  ;;  %v8999_v42 = vld [vmem:[%s7994_s10 + $0x251] sm:$0xff] }
 0x227   : > { %1700 = vrot.lane.b32.xlu0 %v8235_v54, %s7278_s28  ;;  %v6258_v54 = vld [vmem:[%s7994_s10 + $0x31] sm:$0xff] }
 0x228   : > { %v1460_v35 = vpop.permute.xlu1 %1459 }
 0x229   : > { %v1458_v49 = vpop.permute.xlu0 %1457  ;;  %1553 = vst.msk [vmem:[#allocation3 + $0x18] sm:$0xff] %vm1549_vm7, %v1460_v35  ;;  %v9002_v35 = vld [vmem:[%s7994_s10 + $0x241] sm:$0xff] }
 0x22a   : > { %1552 = vst.msk [vmem:[#allocation3 + $0x10] sm:$0xff] %vm1549_vm7, %v1458_v49  ;;  %1706 = vrot.lane.b32.xlu1 %v8250_v57, %s7278_s28 }
 0x22b   : > { %1704 = vrot.lane.b32.xlu0 %v8253_v58, %s7278_s28 }
 0x22c   : > { %v1464_v16 = vpop.permute.xlu1 %1463 }
 0x22d   : > { %v1462_v53 = vpop.permute.xlu0 %1461  ;;  %1555 = vst.msk [vmem:[#allocation3 + $0x28] sm:$0xff] %vm1549_vm7, %v1464_v16  ;;  %v6288_v16 = vld [vmem:[%s7994_s10 + $0x271] sm:$0xff] }
 0x22e   : > { %1554 = vst.msk [vmem:[#allocation3 + $0x20] sm:$0xff] %vm1549_vm7, %v1462_v53  ;;  %1710 = vrot.lane.b32.xlu1 %v6256_v50, %s7278_s28 }
 0x22f   : > { %1708 = vrot.lane.b32.xlu0 %v8546_v45, %s7278_s28  ;;  %s7290_s28 = smov 72  }
 0x230   : > { %v1468_v57 = vpop.permute.xlu1 %1467 }
 0x231   : > { %v1466_v58 = vpop.permute.xlu0 %1465  ;;  %1557 = vst.msk [vmem:[#allocation3 + $0x38] sm:$0xff] %vm1549_vm7, %v1468_v57  ;;  %v6289_v57 = vld [vmem:[%s7994_s10 + $0x22] sm:$0xff] }
 0x232   : > { %1556 = vst.msk [vmem:[#allocation3 + $0x30] sm:$0xff] %vm1549_vm7, %v1466_v58  ;;  %1843 = vrot.lane.b32.xlu1 %v6258_v54, %s7279_s29 }
 0x233   : > { %1841 = vrot.lane.b32.xlu0 %v6257_v15, %s7279_s29  ;;  %v6290_v15 = vld [vmem:[%s7994_s10 + $0x32] sm:$0xff] }
 0x234   : > { %v1472_v44 = vpop.permute.xlu1 %1471 }
 0x235   : > { %v1470_v45 = vpop.permute.xlu0 %1469  ;;  %1559 = vst.msk [vmem:[#allocation3 + $0x48] sm:$0xff] %vm1549_vm7, %v1472_v44  ;;  %v6291_v44 = vld [vmem:[%s7994_s10 + $0x42] sm:$0xff] }
 0x236   : > { %1558 = vst.msk [vmem:[#allocation3 + $0x40] sm:$0xff] %vm1549_vm7, %v1470_v45  ;;  %1847 = vrot.lane.b32.xlu1 %v6260_v19, %s7279_s29 }
 0x237   : > { %1845 = vrot.lane.b32.xlu0 %v6259_v18, %s7279_s29  ;;  %v6292_v18 = vld [vmem:[%s7994_s10 + $0x52] sm:$0xff] }
 0x238   : > { %v1476_v48 = vpop.permute.xlu1 %1475 }
 0x239   : > { %v1474_v47 = vpop.permute.xlu0 %1473  ;;  %1561 = vst.msk [vmem:[#allocation3 + $0x58] sm:$0xff] %vm1549_vm7, %v1476_v48 }
 0x23a   : > { %1560 = vst.msk [vmem:[#allocation3 + $0x50] sm:$0xff] %vm1549_vm7, %v1474_v47  ;;  %1851 = vrot.lane.b32.xlu1 %v6262_v10, %s7279_s29  ;;  %v6294_v10 = vld [vmem:[%s7994_s10 + $0x72] sm:$0xff] }
 0x23b   : > { %1849 = vrot.lane.b32.xlu0 %v6261_v43, %s7279_s29  ;;  %v6293_v43 = vld [vmem:[%s7994_s10 + $0x62] sm:$0xff] }
 0x23c   : > { %v1480_v51 = vpop.permute.xlu1 %1479 }
 0x23d   : > { %v1478_v4 = vpop.permute.xlu0 %1477  ;;  %1563 = vst.msk [vmem:[#allocation3 + $0x68] sm:$0xff] %vm1549_vm7, %v1480_v51 }
 0x23e   : > { %1562 = vst.msk [vmem:[#allocation3 + $0x60] sm:$0xff] %vm1549_vm7, %v1478_v4  ;;  %1855 = vrot.lane.b32.xlu1 %v6264_v52, %s7279_s29  ;;  %v6296_v52 = vld [vmem:[%s7994_s10 + $0x92] sm:$0xff] }
 0x23f   : > { %1853 = vrot.lane.b32.xlu0 %v8573_v1, %s7279_s29  ;;  %v8906_v1 = vld [vmem:[%s7994_s10 + $0xe1] sm:$0xff] }
 0x240   : > { %v1484_v61 = vpop.permute.xlu1 %1483 }
 0x241   : > { %v1482_v0 = vpop.permute.xlu0 %1481  ;;  %1565 = vst.msk [vmem:[#allocation3 + $0x78] sm:$0xff] %vm1549_vm7, %v1484_v61  ;;  %v9041_v61 = vld [vmem:[%s7994_s10 + $0xd2] sm:$0xff] }
 0x242   : > { %1564 = vst.msk [vmem:[#allocation3 + $0x70] sm:$0xff] %vm1549_vm7, %v1482_v0  ;;  %1859 = vrot.lane.b32.xlu1 %v8891_v60, %s7279_s29  ;;  %v9044_v0 = vld [vmem:[%s7994_s10 + $0xc2] sm:$0xff] }
 0x243   : > { %1857 = vrot.lane.b32.xlu0 %v8894_v59, %s7279_s29 }
 0x244   : > { %v1488_v3 = vpop.permute.xlu1 %1487 }
 0x245   : > { %v1486_v36 = vpop.permute.xlu0 %1485  ;;  %1567 = vst.msk [vmem:[#allocation3 + $0x88] sm:$0xff] %vm1549_vm7, %v1488_v3 }
 0x246   : > { %1566 = vst.msk [vmem:[#allocation3 + $0x80] sm:$0xff] %vm1549_vm7, %v1486_v36  ;;  %1863 = vrot.lane.b32.xlu1 %v8903_v46, %s7279_s29 }
 0x247   : > { %1861 = vrot.lane.b32.xlu0 %v8906_v1, %s7279_s29 }
 0x248   : > { %v1492_v2 = vpop.permute.xlu1 %1491 }
 0x249   : > { %v1490_v63 = vpop.permute.xlu0 %1489  ;;  %1569 = vst.msk [vmem:[#allocation3 + $0x98] sm:$0xff] %vm1549_vm7, %v1492_v2  ;;  %v9053_v2 = vld [vmem:[%s7994_s10 + $0xf2] sm:$0xff] }
 0x24a   : > { %1568 = vst.msk [vmem:[#allocation3 + $0x90] sm:$0xff] %vm1549_vm7, %v1490_v63  ;;  %1867 = vrot.lane.b32.xlu1 %v8915_v56, %s7279_s29 }
 0x24b   : > { %1865 = vrot.lane.b32.xlu0 %v8918_v6, %s7279_s29 }
 0x24c   : > { %v1496_v5 = vpop.permute.xlu1 %1495 }
 0x24d   : > { %v1494_v8 = vpop.permute.xlu0 %1493  ;;  %1571 = vst.msk [vmem:[#allocation3 + $0xa8] sm:$0xff] %vm1549_vm7, %v1496_v5  ;;  %v9065_v5 = vld [vmem:[%s7994_s10 + $0x112] sm:$0xff] }
 0x24e   : > { %1570 = vst.msk [vmem:[#allocation3 + $0xa0] sm:$0xff] %vm1549_vm7, %v1494_v8  ;;  %1871 = vrot.lane.b32.xlu1 %v6272_v17, %s7279_s29  ;;  %v9068_v8 = vld [vmem:[%s7994_s10 + $0x102] sm:$0xff] }
 0x24f   : > { %1869 = vrot.lane.b32.xlu0 %v8600_v9, %s7279_s29  ;;  %v8948_v9 = vld [vmem:[%s7994_s10 + $0x181] sm:$0xff] }
 0x250   : > { %v1500_v23 = vpop.permute.xlu1 %1499 }
 0x251   : > { %v1498_v24 = vpop.permute.xlu0 %1497  ;;  %1573 = vst.msk [vmem:[#allocation3 + $0xb8] sm:$0xff] %vm1549_vm7, %v1500_v23 }
 0x252   : > { %1572 = vst.msk [vmem:[#allocation3 + $0xb0] sm:$0xff] %vm1549_vm7, %v1498_v24  ;;  %1875 = vrot.lane.b32.xlu1 %v8933_v20, %s7279_s29 }
 0x253   : > { %1873 = vrot.lane.b32.xlu0 %v8936_v21, %s7279_s29 }
 0x254   : > { %v1504_v7 = vpop.permute.xlu1 %1503 }
 0x255   : > { %v1502_v27 = vpop.permute.xlu0 %1501  ;;  %1575 = vst.msk [vmem:[#allocation3 + $0xc8] sm:$0xff] %vm1549_vm7, %v1504_v7  ;;  %v6304_v7 = vld [vmem:[%s7994_s10 + $0x132] sm:$0xff] }
 0x256   : > { %1574 = vst.msk [vmem:[#allocation3 + $0xc0] sm:$0xff] %vm1549_vm7, %v1502_v27  ;;  %1879 = vrot.lane.b32.xlu1 %v8945_v13, %s7279_s29 }
 0x257   : > { %1877 = vrot.lane.b32.xlu0 %v8948_v9, %s7279_s29 }
 0x258   : > { %v1508_v29 = vpop.permute.xlu1 %1507 }
 0x259   : > { %v1506_v32 = vpop.permute.xlu0 %1505  ;;  %1577 = vst.msk [vmem:[#allocation3 + $0xd8] sm:$0xff] %vm1549_vm7, %v1508_v29 }
 0x25a   : > { %1576 = vst.msk [vmem:[#allocation3 + $0xd0] sm:$0xff] %vm1549_vm7, %v1506_v32  ;;  %1883 = vrot.lane.b32.xlu1 %v8957_v28, %s7279_s29  ;;  %v9083_v32 = vld [vmem:[%s7994_s10 + $0x172] sm:$0xff] }
 0x25b   : > { %1881 = vrot.lane.b32.xlu0 %v8960_v26, %s7279_s29 }
 0x25c   : > { %v1512_v34 = vpop.permute.xlu1 %1511 }
 0x25d   : > { %v1510_v25 = vpop.permute.xlu0 %1509  ;;  %1579 = vst.msk [vmem:[#allocation3 + $0xe8] sm:$0xff] %vm1549_vm7, %v1512_v34 }
 0x25e   : > { %1578 = vst.msk [vmem:[#allocation3 + $0xe0] sm:$0xff] %vm1549_vm7, %v1510_v25  ;;  %1887 = vrot.lane.b32.xlu1 %v6280_v33, %s7279_s29  ;;  %v9086_v33 = vld [vmem:[%s7994_s10 + $0x162] sm:$0xff] }
 0x25f   : > { %1885 = vrot.lane.b32.xlu0 %v8627_v30, %s7279_s29  ;;  %v8987_v30 = vld [vmem:[%s7994_s10 + $0x231] sm:$0xff] }
 0x260   : > { %v1516_v38 = vpop.permute.xlu1 %1515 }
 0x261   : > { %v1514_v11 = vpop.permute.xlu0 %1513  ;;  %1581 = vst.msk [vmem:[#allocation3 + $0xf8] sm:$0xff] %vm1549_vm7, %v1516_v38  ;;  %v9095_v38 = vld [vmem:[%s7994_s10 + $0x192] sm:$0xff] }
 0x262   : > { %1580 = vst.msk [vmem:[#allocation3 + $0xf0] sm:$0xff] %vm1549_vm7, %v1514_v11  ;;  %1891 = vrot.lane.b32.xlu1 %v8975_v12, %s7279_s29  ;;  %vm4651_vm7 = vcmask 720544  }
 0x263   : > { %1889 = vrot.lane.b32.xlu0 %v8978_v37, %s7279_s29 }
 0x264   : > { %v1651_v40 = vpop.permute.xlu1 %1650 }
 0x265   : > { %v1649_v41 = vpop.permute.xlu0 %1648  ;;  %1746 = vst.msk [vmem:[#allocation3 + $0x8] sm:$0xff] %vm1744_vm8, %v1651_v40 }
 0x266   : > { %1745 = vst.msk [vmem:[#allocation3] sm:$0xff] %vm1744_vm8, %v1649_v41  ;;  %1895 = vrot.lane.b32.xlu1 %v8987_v30, %s7279_s29  ;;  %v9107_v41 = vld [vmem:[%s7994_s10 + $0x1b2] sm:$0xff] }
 0x267   : > { %1893 = vrot.lane.b32.xlu0 %v8990_v39, %s7279_s29 }
 0x268   : > { %v1655_v49 = vpop.permute.xlu1 %1654 }
 0x269   : > { %v1653_v50 = vpop.permute.xlu0 %1652  ;;  %1748 = vst.msk [vmem:[#allocation3 + $0x18] sm:$0xff] %vm1744_vm8, %v1655_v49  ;;  %v9110_v49 = vld [vmem:[%s7994_s10 + $0x1a2] sm:$0xff] }
 0x26a   : > { %1747 = vst.msk [vmem:[#allocation3 + $0x10] sm:$0xff] %vm1744_vm8, %v1653_v50  ;;  %1899 = vrot.lane.b32.xlu1 %v8999_v42, %s7279_s29 }
 0x26b   : > { %1897 = vrot.lane.b32.xlu0 %v9002_v35, %s7279_s29 }
 0x26c   : > { %v1659_v53 = vpop.permute.xlu1 %1658 }
 0x26d   : > { %v1657_v54 = vpop.permute.xlu0 %1656  ;;  %1750 = vst.msk [vmem:[#allocation3 + $0x28] sm:$0xff] %vm1744_vm8, %v1659_v53  ;;  %v6312_v53 = vld [vmem:[%s7994_s10 + $0x1d2] sm:$0xff] }
 0x26e   : > { %1749 = vst.msk [vmem:[#allocation3 + $0x20] sm:$0xff] %vm1744_vm8, %v1657_v54  ;;  %1903 = vrot.lane.b32.xlu1 %v6288_v16, %s7279_s29 }
 0x26f   : > { %1901 = vrot.lane.b32.xlu0 %v8654_v55, %s7279_s29  ;;  %s7291_s29 = smov 76  }
 0x270   : > { %v1663_v58 = vpop.permute.xlu1 %1662 }
 0x271   : > { %v1661_v19 = vpop.permute.xlu0 %1660  ;;  %1752 = vst.msk [vmem:[#allocation3 + $0x38] sm:$0xff] %vm1744_vm8, %v1663_v58  ;;  %v9128_v58 = vld [vmem:[%s7994_s10 + $0x202] sm:$0xff] }
 0x272   : > { %1751 = vst.msk [vmem:[#allocation3 + $0x30] sm:$0xff] %vm1744_vm8, %v1661_v19  ;;  %2036 = vrot.lane.b32.xlu1 %v6290_v15, %s7280_s4 }
 0x273   : > { %2034 = vrot.lane.b32.xlu0 %v6289_v57, %s7280_s4  ;;  %v9125_v57 = vld [vmem:[%s7994_s10 + $0x212] sm:$0xff] }
 0x274   : > { %v1667_v45 = vpop.permute.xlu1 %1666 }
 0x275   : > { %v1665_v55 = vpop.permute.xlu0 %1664  ;;  %1754 = vst.msk [vmem:[#allocation3 + $0x48] sm:$0xff] %vm1744_vm8, %v1667_v45 }
 0x276   : > { %1753 = vst.msk [vmem:[#allocation3 + $0x40] sm:$0xff] %vm1744_vm8, %v1665_v55  ;;  %2040 = vrot.lane.b32.xlu1 %v6292_v18, %s7280_s4 }
 0x277   : > { %2038 = vrot.lane.b32.xlu0 %v6291_v44, %s7280_s4  ;;  %v9140_v44 = vld [vmem:[%s7994_s10 + $0x222] sm:$0xff] }
 0x278   : > { %v1671_v48 = vpop.permute.xlu1 %1670 }
 0x279   : > { %v1669_v47 = vpop.permute.xlu0 %1668  ;;  %1756 = vst.msk [vmem:[#allocation3 + $0x58] sm:$0xff] %vm1744_vm8, %v1671_v48 }
 0x27a   : > { %1755 = vst.msk [vmem:[#allocation3 + $0x50] sm:$0xff] %vm1744_vm8, %v1669_v47  ;;  %2044 = vrot.lane.b32.xlu1 %v6294_v10, %s7280_s4  ;;  %v9149_v10 = vld [vmem:[%s7994_s10 + $0x252] sm:$0xff] }
 0x27b   : > { %2042 = vrot.lane.b32.xlu0 %v6293_v43, %s7280_s4  ;;  %v9152_v43 = vld [vmem:[%s7994_s10 + $0x242] sm:$0xff] }
 0x27c   : > { %v1675_v51 = vpop.permute.xlu1 %1674 }
 0x27d   : > { %v1673_v4 = vpop.permute.xlu0 %1672  ;;  %1758 = vst.msk [vmem:[#allocation3 + $0x68] sm:$0xff] %vm1744_vm8, %v1675_v51 }
 0x27e   : > { %1757 = vst.msk [vmem:[#allocation3 + $0x60] sm:$0xff] %vm1744_vm8, %v1673_v4  ;;  %2048 = vrot.lane.b32.xlu1 %v6296_v52, %s7280_s4  ;;  %v6320_v52 = vld [vmem:[%s7994_s10 + $0x272] sm:$0xff] }
 0x27f   : > { %2046 = vrot.lane.b32.xlu0 %v8681_v31, %s7280_s4  ;;  %v9056_v31 = vld [vmem:[%s7994_s10 + $0xe2] sm:$0xff] }
 0x280   : > { %v1679_v3 = vpop.permute.xlu1 %1678 }
 0x281   : > { %v1677_v36 = vpop.permute.xlu0 %1676  ;;  %1760 = vst.msk [vmem:[#allocation3 + $0x78] sm:$0xff] %vm1744_vm8, %v1679_v3  ;;  %v9167_v3 = vld [vmem:[%s7994_s10 + $0xb0] sm:$0xff] }
 0x282   : > { %1759 = vst.msk [vmem:[#allocation3 + $0x70] sm:$0xff] %vm1744_vm8, %v1677_v36  ;;  %2052 = vrot.lane.b32.xlu1 %v9041_v61, %s7280_s4  ;;  %v6323_v36 = vld [vmem:[%s7994_s10 + $0xa0] sm:$0xff] }
 0x283   : > { %2050 = vrot.lane.b32.xlu0 %v9044_v0, %s7280_s4 }
 0x284   : > { %v1683_v63 = vpop.permute.xlu1 %1682 }
 0x285   : > { %v1681_v17 = vpop.permute.xlu0 %1680  ;;  %1762 = vst.msk [vmem:[#allocation3 + $0x88] sm:$0xff] %vm1744_vm8, %v1683_v63 }
 0x286   : > { %1761 = vst.msk [vmem:[#allocation3 + $0x80] sm:$0xff] %vm1744_vm8, %v1681_v17  ;;  %2056 = vrot.lane.b32.xlu1 %v9053_v2, %s7280_s4 }
 0x287   : > { %2054 = vrot.lane.b32.xlu0 %v9056_v31, %s7280_s4 }
 0x288   : > { %v1687_v23 = vpop.permute.xlu1 %1686 }
 0x289   : > { %v1685_v24 = vpop.permute.xlu0 %1684  ;;  %1764 = vst.msk [vmem:[#allocation3 + $0x98] sm:$0xff] %vm1744_vm8, %v1687_v23  ;;  %v9176_v23 = vld [vmem:[%s7994_s10 + $0xd0] sm:$0xff] }
 0x28a   : > { %1763 = vst.msk [vmem:[#allocation3 + $0x90] sm:$0xff] %vm1744_vm8, %v1685_v24  ;;  %2060 = vrot.lane.b32.xlu1 %v9065_v5, %s7280_s4 }
 0x28b   : > { %2058 = vrot.lane.b32.xlu0 %v9068_v8, %s7280_s4 }
 0x28c   : > { %v1691_v27 = vpop.permute.xlu1 %1690 }
 0x28d   : > { %v1689_v29 = vpop.permute.xlu0 %1688  ;;  %1766 = vst.msk [vmem:[#allocation3 + $0xa8] sm:$0xff] %vm1744_vm8, %v1691_v27  ;;  %v9188_v27 = vld [vmem:[%s7994_s10 + $0xf0] sm:$0xff] }
 0x28e   : > { %1765 = vst.msk [vmem:[#allocation3 + $0xa0] sm:$0xff] %vm1744_vm8, %v1689_v29  ;;  %2064 = vrot.lane.b32.xlu1 %v6304_v7, %s7280_s4  ;;  %v9191_v29 = vld [vmem:[%s7994_s10 + $0xe0] sm:$0xff] }
 0x28f   : > { %2062 = vrot.lane.b32.xlu0 %v8708_v14, %s7280_s4  ;;  %v9098_v14 = vld [vmem:[%s7994_s10 + $0x182] sm:$0xff] }
 0x290   : > { %v1695_v34 = vpop.permute.xlu1 %1694 }
 0x291   : > { %v1693_v25 = vpop.permute.xlu0 %1692  ;;  %1768 = vst.msk [vmem:[#allocation3 + $0xb8] sm:$0xff] %vm1744_vm8, %v1695_v34 }
 0x292   : > { %1767 = vst.msk [vmem:[#allocation3 + $0xb0] sm:$0xff] %vm1744_vm8, %v1693_v25  ;;  %2068 = vrot.lane.b32.xlu1 %v9083_v32, %s7280_s4 }
 0x293   : > { %2066 = vrot.lane.b32.xlu0 %v9086_v33, %s7280_s4 }
 0x294   : > { %v1699_v11 = vpop.permute.xlu1 %1698 }
 0x295   : > { %v1697_v40 = vpop.permute.xlu0 %1696  ;;  %1770 = vst.msk [vmem:[#allocation3 + $0xc8] sm:$0xff] %vm1744_vm8, %v1699_v11  ;;  %v9200_v11 = vld [vmem:[%s7994_s10 + $0x110] sm:$0xff] }
 0x296   : > { %1769 = vst.msk [vmem:[#allocation3 + $0xc0] sm:$0xff] %vm1744_vm8, %v1697_v40  ;;  %2072 = vrot.lane.b32.xlu1 %v9095_v38, %s7280_s4  ;;  %v9203_v40 = vld [vmem:[%s7994_s10 + $0x100] sm:$0xff] }
 0x297   : > { %2070 = vrot.lane.b32.xlu0 %v9098_v14, %s7280_s4 }
 0x298   : > { %v1703_v50 = vpop.permute.xlu1 %1702 }
 0x299   : > { %v1701_v16 = vpop.permute.xlu0 %1700  ;;  %1772 = vst.msk [vmem:[#allocation3 + $0xd8] sm:$0xff] %vm1744_vm8, %v1703_v50 }
 0x29a   : > { %1771 = vst.msk [vmem:[#allocation3 + $0xd0] sm:$0xff] %vm1744_vm8, %v1701_v16  ;;  %2076 = vrot.lane.b32.xlu1 %v9107_v41, %s7280_s4 }
 0x29b   : > { %2074 = vrot.lane.b32.xlu0 %v9110_v49, %s7280_s4 }
 0x29c   : > { %v1707_v54 = vpop.permute.xlu1 %1706 }
 0x29d   : > { %v1705_v15 = vpop.permute.xlu0 %1704  ;;  %1774 = vst.msk [vmem:[#allocation3 + $0xe8] sm:$0xff] %vm1744_vm8, %v1707_v54  ;;  %v6331_v54 = vld [vmem:[%s7994_s10 + $0x140] sm:$0xff] }
 0x29e   : > { %1773 = vst.msk [vmem:[#allocation3 + $0xe0] sm:$0xff] %vm1744_vm8, %v1705_v15  ;;  %2080 = vrot.lane.b32.xlu1 %v6312_v53, %s7280_s4  ;;  %v9212_v53 = vld [vmem:[%s7994_s10 + $0x150] sm:$0xff] }
 0x29f   : > { %2078 = vrot.lane.b32.xlu0 %v8735_v22, %s7280_s4  ;;  %v9137_v22 = vld [vmem:[%s7994_s10 + $0x232] sm:$0xff] }
 0x2a0   : > { %v1711_v19 = vpop.permute.xlu1 %1710 }
 0x2a1   : > { %v1709_v18 = vpop.permute.xlu0 %1708  ;;  %1776 = vst.msk [vmem:[#allocation3 + $0xf8] sm:$0xff] %vm1744_vm8, %v1711_v19 }
 0x2a2   : > { %1775 = vst.msk [vmem:[#allocation3 + $0xf0] sm:$0xff] %vm1744_vm8, %v1709_v18  ;;  %2084 = vrot.lane.b32.xlu1 %v9125_v57, %s7280_s4  ;;  %v9221_v18 = vld [vmem:[%s7994_s10 + $0x170] sm:$0xff]  ;;  %vm4844_vm8 = vcmask 753344  }
 0x2a3   : > { %2082 = vrot.lane.b32.xlu0 %v9128_v58, %s7280_s4 }
 0x2a4   : > { %v1844_v45 = vpop.permute.xlu1 %1843 }
 0x2a5   : > { %v1842_v55 = vpop.permute.xlu0 %1841  ;;  %1939 = vst.msk [vmem:[#allocation3 + $0x8] sm:$0xff] %vm1937_vm9, %v1844_v45  ;;  %v9224_v45 = vld [vmem:[%s7994_s10 + $0x160] sm:$0xff] }
 0x2a6   : > { %1938 = vst.msk [vmem:[#allocation3] sm:$0xff] %vm1937_vm9, %v1842_v55  ;;  %2088 = vrot.lane.b32.xlu1 %v9137_v22, %s7280_s4 }
 0x2a7   : > { %2086 = vrot.lane.b32.xlu0 %v9140_v44, %s7280_s4 }
 0x2a8   : > { %v1848_v48 = vpop.permute.xlu1 %1847 }
 0x2a9   : > { %v1846_v47 = vpop.permute.xlu0 %1845  ;;  %1941 = vst.msk [vmem:[#allocation3 + $0x18] sm:$0xff] %vm1937_vm9, %v1848_v48 }
 0x2aa   : > { %1940 = vst.msk [vmem:[#allocation3 + $0x10] sm:$0xff] %vm1937_vm9, %v1846_v47  ;;  %2092 = vrot.lane.b32.xlu1 %v9149_v10, %s7280_s4  ;;  %v9233_v47 = vld [vmem:[%s7994_s10 + $0x190] sm:$0xff] }
 0x2ab   : > { %2090 = vrot.lane.b32.xlu0 %v9152_v43, %s7280_s4 }
 0x2ac   : > { %v1852_v51 = vpop.permute.xlu1 %1851 }
 0x2ad   : > { %v1850_v4 = vpop.permute.xlu0 %1849  ;;  %1943 = vst.msk [vmem:[#allocation3 + $0x28] sm:$0xff] %vm1937_vm9, %v1852_v51 }
 0x2ae   : > { %1942 = vst.msk [vmem:[#allocation3 + $0x20] sm:$0xff] %vm1937_vm9, %v1850_v4  ;;  %2096 = vrot.lane.b32.xlu1 %v6320_v52, %s7280_s4  ;;  %v9236_v52 = vld [vmem:[%s7994_s10 + $0x180] sm:$0xff] }
 0x2af   : > { %2094 = vrot.lane.b32.xlu0 %v8762_v62, %s7280_s4  ;;  %v9179_v62 = vld [vmem:[%s7994_s10 + $0xc0] sm:$0xff]  ;;  %s7292_s4 = smov 80  }
 0x2b0   : > { %v1856_v63 = vpop.permute.xlu1 %1855 }
 0x2b1   : > { %v1854_v17 = vpop.permute.xlu0 %1853  ;;  %1945 = vst.msk [vmem:[#allocation3 + $0x38] sm:$0xff] %vm1937_vm9, %v1856_v63  ;;  %v9248_v63 = vld [vmem:[%s7994_s10 + $0x1a0] sm:$0xff] }
 0x2b2   : > { %1944 = vst.msk [vmem:[#allocation3 + $0x30] sm:$0xff] %vm1937_vm9, %v1854_v17  ;;  %2232 = vrot.lane.b32.xlu1 %v9167_v3, %s7281_s5 }
 0x2b3   : > { %2230 = vrot.lane.b32.xlu0 %v6323_v36, %s7281_s5  ;;  %v9245_v36 = vld [vmem:[%s7994_s10 + $0x1b0] sm:$0xff] }
 0x2b4   : > { %v1860_v24 = vpop.permute.xlu1 %1859 }
 0x2b5   : > { %v1858_v7 = vpop.permute.xlu0 %1857  ;;  %1947 = vst.msk [vmem:[#allocation3 + $0x48] sm:$0xff] %vm1937_vm9, %v1860_v24 }
 0x2b6   : > { %1946 = vst.msk [vmem:[#allocation3 + $0x40] sm:$0xff] %vm1937_vm9, %v1858_v7  ;;  %2236 = vrot.lane.b32.xlu1 %v9176_v23, %s7281_s5  ;;  %v9257_v7 = vld [vmem:[%s7994_s10 + $0x1f0] sm:$0xff] }
 0x2b7   : > { %2234 = vrot.lane.b32.xlu0 %v9179_v62, %s7281_s5 }
 0x2b8   : > { %v1864_v34 = vpop.permute.xlu1 %1863 }
 0x2b9   : > { %v1862_v25 = vpop.permute.xlu0 %1861  ;;  %1949 = vst.msk [vmem:[#allocation3 + $0x58] sm:$0xff] %vm1937_vm9, %v1864_v34  ;;  %v6339_v34 = vld [vmem:[%s7994_s10 + $0x1e0] sm:$0xff] }
 0x2ba   : > { %1948 = vst.msk [vmem:[#allocation3 + $0x50] sm:$0xff] %vm1937_vm9, %v1862_v25  ;;  %2240 = vrot.lane.b32.xlu1 %v9188_v27, %s7281_s5 }
 0x2bb   : > { %2238 = vrot.lane.b32.xlu0 %v9191_v29, %s7281_s5 }
 0x2bc   : > { %v1868_v50 = vpop.permute.xlu1 %1867 }
 0x2bd   : > { %v1866_v16 = vpop.permute.xlu0 %1865  ;;  %1951 = vst.msk [vmem:[#allocation3 + $0x68] sm:$0xff] %vm1937_vm9, %v1868_v50 }
 0x2be   : > { %1950 = vst.msk [vmem:[#allocation3 + $0x60] sm:$0xff] %vm1937_vm9, %v1866_v16  ;;  %2244 = vrot.lane.b32.xlu1 %v9200_v11, %s7281_s5  ;;  %v9266_v16 = vld [vmem:[%s7994_s10 + $0x210] sm:$0xff] }
 0x2bf   : > { %2242 = vrot.lane.b32.xlu0 %v9203_v40, %s7281_s5 }
 0x2c0   : > { %v1872_v15 = vpop.permute.xlu1 %1871 }
 0x2c1   : > { %v1870_v19 = vpop.permute.xlu0 %1869  ;;  %1953 = vst.msk [vmem:[#allocation3 + $0x78] sm:$0xff] %vm1937_vm9, %v1872_v15 }
 0x2c2   : > { %1952 = vst.msk [vmem:[#allocation3 + $0x70] sm:$0xff] %vm1937_vm9, %v1870_v19  ;;  %2248 = vrot.lane.b32.xlu1 %v9212_v53, %s7281_s5 }
 0x2c3   : > { %2246 = vrot.lane.b32.xlu0 %v6331_v54, %s7281_s5  ;;  %v9269_v54 = vld [vmem:[%s7994_s10 + $0x200] sm:$0xff] }
 0x2c4   : > { %v1876_v55 = vpop.permute.xlu1 %1875 }
 0x2c5   : > { %v1874_v48 = vpop.permute.xlu0 %1873  ;;  %1955 = vst.msk [vmem:[#allocation3 + $0x88] sm:$0xff] %vm1937_vm9, %v1876_v55  ;;  %v9278_v55 = vld [vmem:[%s7994_s10 + $0x230] sm:$0xff] }
 0x2c6   : > { %1954 = vst.msk [vmem:[#allocation3 + $0x80] sm:$0xff] %vm1937_vm9, %v1874_v48  ;;  %2252 = vrot.lane.b32.xlu1 %v9221_v18, %s7281_s5  ;;  %v9281_v48 = vld [vmem:[%s7994_s10 + $0x220] sm:$0xff] }
 0x2c7   : > { %2250 = vrot.lane.b32.xlu0 %v9224_v45, %s7281_s5 }
 0x2c8   : > { %v1880_v51 = vpop.permute.xlu1 %1879 }
 0x2c9   : > { %v1878_v4 = vpop.permute.xlu0 %1877  ;;  %1957 = vst.msk [vmem:[#allocation3 + $0x98] sm:$0xff] %vm1937_vm9, %v1880_v51 }
 0x2ca   : > { %1956 = vst.msk [vmem:[#allocation3 + $0x90] sm:$0xff] %vm1937_vm9, %v1878_v4  ;;  %2256 = vrot.lane.b32.xlu1 %v9233_v47, %s7281_s5 }
 0x2cb   : > { %2254 = vrot.lane.b32.xlu0 %v9236_v52, %s7281_s5 }
 0x2cc   : > { %v1884_v17 = vpop.permute.xlu1 %1883 }
 0x2cd   : > { %v1882_v24 = vpop.permute.xlu0 %1881  ;;  %1959 = vst.msk [vmem:[#allocation3 + $0xa8] sm:$0xff] %vm1937_vm9, %v1884_v17  ;;  %v9290_v17 = vld [vmem:[%s7994_s10 + $0x250] sm:$0xff] }
 0x2ce   : > { %1958 = vst.msk [vmem:[#allocation3 + $0xa0] sm:$0xff] %vm1937_vm9, %v1882_v24  ;;  %2260 = vrot.lane.b32.xlu1 %v9245_v36, %s7281_s5  ;;  %11703 = vst [vmem:[#allocation9_spill] sm:$0xff] %v9290_v17  ;;  %v9293_v24 = vld [vmem:[%s7994_s10 + $0x240] sm:$0xff] }
 0x2cf   : > { %2258 = vrot.lane.b32.xlu0 %v9248_v63, %s7281_s5 }
 0x2d0   : > { %v1888_v25 = vpop.permute.xlu1 %1887 }
 0x2d1   : > { %v1886_v50 = vpop.permute.xlu0 %1885  ;;  %1961 = vst.msk [vmem:[#allocation3 + $0xb8] sm:$0xff] %vm1937_vm9, %v1888_v25 }
 0x2d2   : > { %1960 = vst.msk [vmem:[#allocation3 + $0xb0] sm:$0xff] %vm1937_vm9, %v1886_v50  ;;  %2264 = vrot.lane.b32.xlu1 %v9257_v7, %s7281_s5  ;;  %v9302_v50 = vld [vmem:[%s7994_s10 + $0x290] sm:$0xff] }
 0x2d3   : > { %2262 = vrot.lane.b32.xlu0 %v6339_v34, %s7281_s5  ;;  %11704 = vst [vmem:[#allocation7_spill] sm:$0xff] %v9302_v50 }
 0x2d4   : > { %v1892_v15 = vpop.permute.xlu1 %1891 }
 0x2d5   : > { %v1890_v19 = vpop.permute.xlu0 %1889  ;;  %1963 = vst.msk [vmem:[#allocation3 + $0xc8] sm:$0xff] %vm1937_vm9, %v1892_v15  ;;  %v6347_v15 = vld [vmem:[%s7994_s10 + $0x280] sm:$0xff] }
 0x2d6   : > { %1962 = vst.msk [vmem:[#allocation3 + $0xc0] sm:$0xff] %vm1937_vm9, %v1890_v19  ;;  %2268 = vrot.lane.b32.xlu1 %v9266_v16, %s7281_s5 }
 0x2d7   : > { %2266 = vrot.lane.b32.xlu0 %v9269_v54, %s7281_s5 }
 0x2d8   : > { %v1896_v51 = vpop.permute.xlu1 %1895 }
 0x2d9   : > { %v1894_v4 = vpop.permute.xlu0 %1893  ;;  %1965 = vst.msk [vmem:[#allocation3 + $0xd8] sm:$0xff] %vm1937_vm9, %v1896_v51 }
 0x2da   : > { %1964 = vst.msk [vmem:[#allocation3 + $0xd0] sm:$0xff] %vm1937_vm9, %v1894_v4  ;;  %2272 = vrot.lane.b32.xlu1 %v9278_v55, %s7281_s5  ;;  %v9311_v4 = vld [vmem:[%s7994_s10 + $0x2b0] sm:$0xff] }
 0x2db   : > { %2270 = vrot.lane.b32.xlu0 %v9281_v48, %s7281_s5  ;;  %11705 = vst [vmem:[#allocation11_spill] sm:$0xff] %v9311_v4 }
 0x2dc   : > { %v1900_v34 = vpop.permute.xlu1 %1899 }
 0x2dd   : > { %v1898_v25 = vpop.permute.xlu0 %1897  ;;  %1967 = vst.msk [vmem:[#allocation3 + $0xe8] sm:$0xff] %vm1937_vm9, %v1900_v34  ;;  %v9314_v34 = vld [vmem:[%s7994_s10 + $0x2a0] sm:$0xff] }
 0x2de   : > { %1966 = vst.msk [vmem:[#allocation3 + $0xe0] sm:$0xff] %vm1937_vm9, %v1898_v25  ;;  %2276 = vrot.lane.b32.xlu1 %v9290_v17, %s7281_s5  ;;  %11706 = vst [vmem:[#allocation8_spill] sm:$0xff] %v9314_v34 }
 0x2df   : > { %2274 = vrot.lane.b32.xlu0 %v9293_v24, %s7281_s5 }
 0x2e0   : > { %v1904_v19 = vpop.permute.xlu1 %1903 }
 0x2e1   : > { %v1902_v51 = vpop.permute.xlu0 %1901  ;;  %1969 = vst.msk [vmem:[#allocation3 + $0xf8] sm:$0xff] %vm1937_vm9, %v1904_v19  ;;  %v9326_v19 = vld [vmem:[%s7994_s10 + $0x2c0] sm:$0xff] }
 0x2e2   : > { %1968 = vst.msk [vmem:[#allocation3 + $0xf0] sm:$0xff] %vm1937_vm9, %v1902_v51  ;;  %2280 = vrot.lane.b32.xlu1 %v9302_v50, %s7281_s5  ;;  %11708 = vst [vmem:[#allocation10_spill] sm:$0xff] %v9326_v19  ;;  %vm5037_vm9 = vcmask 786144  }
 0x2e3   : > { %2278 = vrot.lane.b32.xlu0 %v6347_v15, %s7281_s5  ;;  %v9323_v15 = vld [vmem:[%s7994_s10 + $0x2d0] sm:$0xff] }
 0x2e4   : > { %v2037_v25 = vpop.permute.xlu1 %2036  ;;  %11707 = vst [vmem:[#allocation13_spill] sm:$0xff] %v9323_v15 }
 0x2e5   : > { %v2035_v17 = vpop.permute.xlu0 %2034  ;;  %2132 = vst.msk [vmem:[#allocation3 + $0x8] sm:$0xff] %vm2130_vm10, %v2037_v25  ;;  %v9338_v25 = vld [vmem:[%s7994_s10 + $0x2e0] sm:$0xff] }
 0x2e6   : > { %2131 = vst.msk [vmem:[#allocation3] sm:$0xff] %vm2130_vm10, %v2035_v17  ;;  %2284 = vrot.lane.b32.xlu1 %v9311_v4, %s7281_s5  ;;  %v9335_v17 = vld [vmem:[%s7994_s10 + $0x2f0] sm:$0xff] }
 0x2e7   : > { %2282 = vrot.lane.b32.xlu0 %v9314_v34, %s7281_s5 }
 0x2e8   : > { %v2041_v51 = vpop.permute.xlu1 %2040 }
 0x2e9   : > { %v2039_v50 = vpop.permute.xlu0 %2038  ;;  %2134 = vst.msk [vmem:[#allocation3 + $0x18] sm:$0xff] %vm2130_vm10, %v2041_v51  ;;  %v6355_v51 = vld [vmem:[%s7994_s10 + $0xa1] sm:$0xff] }
 0x2ea   : > { %2133 = vst.msk [vmem:[#allocation3 + $0x10] sm:$0xff] %vm2130_vm10, %v2039_v50  ;;  %2288 = vrot.lane.b32.xlu1 %v9323_v15, %s7281_s5  ;;  %v9347_v50 = vld [vmem:[%s7994_s10 + $0xb1] sm:$0xff] }
 0x2eb   : > { %2286 = vrot.lane.b32.xlu0 %v9326_v19, %s7281_s5 }
 0x2ec   : > { %v2045_v4 = vpop.permute.xlu1 %2044 }
 0x2ed   : > { %v2043_v34 = vpop.permute.xlu0 %2042  ;;  %2136 = vst.msk [vmem:[#allocation3 + $0x28] sm:$0xff] %vm2130_vm10, %v2045_v4 }
 0x2ee   : > { %2135 = vst.msk [vmem:[#allocation3 + $0x20] sm:$0xff] %vm2130_vm10, %v2043_v34  ;;  %2292 = vrot.lane.b32.xlu1 %v9335_v17, %s7281_s5 }
 0x2ef   : > { %2290 = vrot.lane.b32.xlu0 %v9338_v25, %s7281_s5  ;;  %s7293_s5 = smov 84  }
 0x2f0   : > { %v2049_v15 = vpop.permute.xlu1 %2048 }
 0x2f1   : > { %v2047_v19 = vpop.permute.xlu0 %2046  ;;  %2138 = vst.msk [vmem:[#allocation3 + $0x38] sm:$0xff] %vm2130_vm10, %v2049_v15 }
 0x2f2   : > { %2137 = vst.msk [vmem:[#allocation3 + $0x30] sm:$0xff] %vm2130_vm10, %v2047_v19  ;;  %2425 = vrot.lane.b32.xlu1 %v9347_v50, %s7282_s6 }
 0x2f3   : > { %2423 = vrot.lane.b32.xlu0 %v6355_v51, %s7282_s6 }
 0x2f4   : > { %v2053_v4 = vpop.permute.xlu1 %2052 }
 0x2f5   : > { %v2051_v34 = vpop.permute.xlu0 %2050  ;;  %2140 = vst.msk [vmem:[#allocation3 + $0x48] sm:$0xff] %vm2130_vm10, %v2053_v4 }
 0x2f6   : > { %2139 = vst.msk [vmem:[#allocation3 + $0x40] sm:$0xff] %vm2130_vm10, %v2051_v34  ;;  %2429 = vrot.lane.b32.xlu1 %v8891_v60, %s7282_s6  ;;  %v9374_v60 = vld [vmem:[%s7994_s10 + $0x151] sm:$0xff] }
 0x2f7   : > { %2427 = vrot.lane.b32.xlu0 %v8894_v59, %s7282_s6  ;;  %v6363_v59 = vld [vmem:[%s7994_s10 + $0x141] sm:$0xff] }
 0x2f8   : > { %v2057_v15 = vpop.permute.xlu1 %2056 }
 0x2f9   : > { %v2055_v19 = vpop.permute.xlu0 %2054  ;;  %2142 = vst.msk [vmem:[#allocation3 + $0x58] sm:$0xff] %vm2130_vm10, %v2057_v15 }
 0x2fa   : > { %2141 = vst.msk [vmem:[#allocation3 + $0x50] sm:$0xff] %vm2130_vm10, %v2055_v19  ;;  %2433 = vrot.lane.b32.xlu1 %v8903_v46, %s7282_s6 }
 0x2fb   : > { %2431 = vrot.lane.b32.xlu0 %v8906_v1, %s7282_s6 }
 0x2fc   : > { %v2061_v51 = vpop.permute.xlu1 %2060 }
 0x2fd   : > { %v2059_v4 = vpop.permute.xlu0 %2058  ;;  %2144 = vst.msk [vmem:[#allocation3 + $0x68] sm:$0xff] %vm2130_vm10, %v2061_v51 }
 0x2fe   : > { %2143 = vst.msk [vmem:[#allocation3 + $0x60] sm:$0xff] %vm2130_vm10, %v2059_v4  ;;  %2437 = vrot.lane.b32.xlu1 %v8915_v56, %s7282_s6 }
 0x2ff   : > { %2435 = vrot.lane.b32.xlu0 %v8918_v6, %s7282_s6 }
 0x300   : > { %v2065_v34 = vpop.permute.xlu1 %2064 }
 0x301   : > { %v2063_v46 = vpop.permute.xlu0 %2062  ;;  %2146 = vst.msk [vmem:[#allocation3 + $0x78] sm:$0xff] %vm2130_vm10, %v2065_v34 }
 0x302   : > { %2145 = vst.msk [vmem:[#allocation3 + $0x70] sm:$0xff] %vm2130_vm10, %v2063_v46  ;;  %2441 = vrot.lane.b32.xlu1 %v9374_v60, %s7282_s6 }
 0x303   : > { %2439 = vrot.lane.b32.xlu0 %v6363_v59, %s7282_s6 }
 0x304   : > { %v2069_v1 = vpop.permute.xlu1 %2068 }
 0x305   : > { %v2067_v15 = vpop.permute.xlu0 %2066  ;;  %2148 = vst.msk [vmem:[#allocation3 + $0x88] sm:$0xff] %vm2130_vm10, %v2069_v1 }
 0x306   : > { %2147 = vst.msk [vmem:[#allocation3 + $0x80] sm:$0xff] %vm2130_vm10, %v2067_v15  ;;  %2445 = vrot.lane.b32.xlu1 %v8933_v20, %s7282_s6  ;;  %v9401_v20 = vld [vmem:[%s7994_s10 + $0x1f1] sm:$0xff] }
 0x307   : > { %2443 = vrot.lane.b32.xlu0 %v8936_v21, %s7282_s6  ;;  %v6371_v21 = vld [vmem:[%s7994_s10 + $0x1e1] sm:$0xff] }
 0x308   : > { %v2073_v56 = vpop.permute.xlu1 %2072 }
 0x309   : > { %v2071_v6 = vpop.permute.xlu0 %2070  ;;  %2150 = vst.msk [vmem:[#allocation3 + $0x98] sm:$0xff] %vm2130_vm10, %v2073_v56  ;;  %v9449_v56 = vld [vmem:[%s7994_s10 + $0x2d1] sm:$0xff] }
 0x30a   : > { %2149 = vst.msk [vmem:[#allocation3 + $0x90] sm:$0xff] %vm2130_vm10, %v2071_v6  ;;  %2449 = vrot.lane.b32.xlu1 %v8945_v13, %s7282_s6  ;;  %v9452_v6 = vld [vmem:[%s7994_s10 + $0x2c1] sm:$0xff] }
 0x30b   : > { %2447 = vrot.lane.b32.xlu0 %v8948_v9, %s7282_s6 }
 0x30c   : > { %v2077_v19 = vpop.permute.xlu1 %2076 }
 0x30d   : > { %v2075_v51 = vpop.permute.xlu0 %2074  ;;  %2152 = vst.msk [vmem:[#allocation3 + $0xa8] sm:$0xff] %vm2130_vm10, %v2077_v19 }
 0x30e   : > { %2151 = vst.msk [vmem:[#allocation3 + $0xa0] sm:$0xff] %vm2130_vm10, %v2075_v51  ;;  %2453 = vrot.lane.b32.xlu1 %v8957_v28, %s7282_s6 }
 0x30f   : > { %2451 = vrot.lane.b32.xlu0 %v8960_v26, %s7282_s6 }
 0x310   : > { %v2081_v4 = vpop.permute.xlu1 %2080 }
 0x311   : > { %v2079_v13 = vpop.permute.xlu0 %2078  ;;  %2154 = vst.msk [vmem:[#allocation3 + $0xb8] sm:$0xff] %vm2130_vm10, %v2081_v4  ;;  %v9464_v4 = vld [vmem:[%s7994_s10 + $0x2e1] sm:$0xff] }
 0x312   : > { %2153 = vst.msk [vmem:[#allocation3 + $0xb0] sm:$0xff] %vm2130_vm10, %v2079_v13  ;;  %2457 = vrot.lane.b32.xlu1 %v9401_v20, %s7282_s6 }
 0x313   : > { %2455 = vrot.lane.b32.xlu0 %v6371_v21, %s7282_s6  ;;  %v9461_v21 = vld [vmem:[%s7994_s10 + $0x2f1] sm:$0xff] }
 0x314   : > { %v2085_v9 = vpop.permute.xlu1 %2084 }
 0x315   : > { %v2083_v59 = vpop.permute.xlu0 %2082  ;;  %2156 = vst.msk [vmem:[#allocation3 + $0xc8] sm:$0xff] %vm2130_vm10, %v2085_v9 }
 0x316   : > { %2155 = vst.msk [vmem:[#allocation3 + $0xc0] sm:$0xff] %vm2130_vm10, %v2083_v59  ;;  %2461 = vrot.lane.b32.xlu1 %v8975_v12, %s7282_s6  ;;  %v9428_v12 = vld [vmem:[%s7994_s10 + $0x291] sm:$0xff] }
 0x317   : > { %2459 = vrot.lane.b32.xlu0 %v8978_v37, %s7282_s6  ;;  %v6379_v37 = vld [vmem:[%s7994_s10 + $0x281] sm:$0xff]  ;;  %v9473_v59 = vld [vmem:[%s7994_s10 + $0xb2] sm:$0xff] }
 0x318   : > { %v2089_v28 = vpop.permute.xlu1 %2088 }
 0x319   : > { %v2087_v26 = vpop.permute.xlu0 %2086  ;;  %2158 = vst.msk [vmem:[#allocation3 + $0xd8] sm:$0xff] %vm2130_vm10, %v2089_v28  ;;  %v6387_v28 = vld [vmem:[%s7994_s10 + $0xa2] sm:$0xff] }
 0x31a   : > { %2157 = vst.msk [vmem:[#allocation3 + $0xd0] sm:$0xff] %vm2130_vm10, %v2087_v26  ;;  %2465 = vrot.lane.b32.xlu1 %v8987_v30, %s7282_s6 }
 0x31b   : > { %2463 = vrot.lane.b32.xlu0 %v8990_v39, %s7282_s6 }
 0x31c   : > { %v2093_v34 = vpop.permute.xlu1 %2092 }
 0x31d   : > { %v2091_v46 = vpop.permute.xlu0 %2090  ;;  %2160 = vst.msk [vmem:[#allocation3 + $0xe8] sm:$0xff] %vm2130_vm10, %v2093_v34 }
 0x31e   : > { %2159 = vst.msk [vmem:[#allocation3 + $0xe0] sm:$0xff] %vm2130_vm10, %v2091_v46  ;;  %2469 = vrot.lane.b32.xlu1 %v8999_v42, %s7282_s6  ;;  %v9437_v42 = vld [vmem:[%s7994_s10 + $0x2b1] sm:$0xff] }
 0x31f   : > { %2467 = vrot.lane.b32.xlu0 %v9002_v35, %s7282_s6  ;;  %v9440_v35 = vld [vmem:[%s7994_s10 + $0x2a1] sm:$0xff] }
 0x320   : > { %v2097_v30 = vpop.permute.xlu1 %2096 }
 0x321   : > { %v2095_v39 = vpop.permute.xlu0 %2094  ;;  %2162 = vst.msk [vmem:[#allocation3 + $0xf8] sm:$0xff] %vm2130_vm10, %v2097_v30 }
 0x322   : > { %2161 = vst.msk [vmem:[#allocation3 + $0xf0] sm:$0xff] %vm2130_vm10, %v2095_v39  ;;  %2473 = vrot.lane.b32.xlu1 %v9428_v12, %s7282_s6  ;;  %vm5232_vm10 = vcmask 818944  }
 0x323   : > { %2471 = vrot.lane.b32.xlu0 %v6379_v37, %s7282_s6 }
 0x324   : > { %v2233_v1 = vpop.permute.xlu1 %2232 }
 0x325   : > { %v2231_v15 = vpop.permute.xlu0 %2230  ;;  %2328 = vst.msk [vmem:[#allocation3 + $0x8] sm:$0xff] %vm2326_vm11, %v2233_v1 }
 0x326   : > { %2327 = vst.msk [vmem:[#allocation3] sm:$0xff] %vm2326_vm11, %v2231_v15  ;;  %2477 = vrot.lane.b32.xlu1 %v9437_v42, %s7282_s6 }
 0x327   : > { %2475 = vrot.lane.b32.xlu0 %v9440_v35, %s7282_s6 }
 0x328   : > { %v2237_v19 = vpop.permute.xlu1 %2236 }
 0x329   : > { %v2235_v51 = vpop.permute.xlu0 %2234  ;;  %2330 = vst.msk [vmem:[#allocation3 + $0x18] sm:$0xff] %vm2326_vm11, %v2237_v19 }
 0x32a   : > { %2329 = vst.msk [vmem:[#allocation3 + $0x10] sm:$0xff] %vm2326_vm11, %v2235_v51  ;;  %2481 = vrot.lane.b32.xlu1 %v9449_v56, %s7282_s6 }
 0x32b   : > { %2479 = vrot.lane.b32.xlu0 %v9452_v6, %s7282_s6 }
 0x32c   : > { %v2241_v13 = vpop.permute.xlu1 %2240 }
 0x32d   : > { %v2239_v9 = vpop.permute.xlu0 %2238  ;;  %2332 = vst.msk [vmem:[#allocation3 + $0x28] sm:$0xff] %vm2326_vm11, %v2241_v13 }
 0x32e   : > { %2331 = vst.msk [vmem:[#allocation3 + $0x20] sm:$0xff] %vm2326_vm11, %v2239_v9  ;;  %2485 = vrot.lane.b32.xlu1 %v9461_v21, %s7282_s6 }
 0x32f   : > { %2483 = vrot.lane.b32.xlu0 %v9464_v4, %s7282_s6  ;;  %s7294_s6 = smov 88  }
 0x330   : > { %v2245_v26 = vpop.permute.xlu1 %2244 }
 0x331   : > { %v2243_v34 = vpop.permute.xlu0 %2242  ;;  %2334 = vst.msk [vmem:[#allocation3 + $0x38] sm:$0xff] %vm2326_vm11, %v2245_v26 }
 0x332   : > { %2333 = vst.msk [vmem:[#allocation3 + $0x30] sm:$0xff] %vm2326_vm11, %v2243_v34  ;;  %2618 = vrot.lane.b32.xlu1 %v9473_v59, %s7283_s7 }
 0x333   : > { %2616 = vrot.lane.b32.xlu0 %v6387_v28, %s7283_s7 }
 0x334   : > { %v2249_v46 = vpop.permute.xlu1 %2248 }
 0x335   : > { %v2247_v37 = vpop.permute.xlu0 %2246  ;;  %2336 = vst.msk [vmem:[#allocation3 + $0x48] sm:$0xff] %vm2326_vm11, %v2249_v46 }
 0x336   : > { %2335 = vst.msk [vmem:[#allocation3 + $0x40] sm:$0xff] %vm2326_vm11, %v2247_v37  ;;  %2622 = vrot.lane.b32.xlu1 %v9041_v61, %s7283_s7  ;;  %v9500_v61 = vld [vmem:[%s7994_s10 + $0x152] sm:$0xff] }
 0x337   : > { %2620 = vrot.lane.b32.xlu0 %v9044_v0, %s7283_s7  ;;  %v6395_v0 = vld [vmem:[%s7994_s10 + $0x142] sm:$0xff] }
 0x338   : > { %v2253_v30 = vpop.permute.xlu1 %2252 }
 0x339   : > { %v2251_v39 = vpop.permute.xlu0 %2250  ;;  %2338 = vst.msk [vmem:[#allocation3 + $0x58] sm:$0xff] %vm2326_vm11, %v2253_v30 }
 0x33a   : > { %2337 = vst.msk [vmem:[#allocation3 + $0x50] sm:$0xff] %vm2326_vm11, %v2251_v39  ;;  %2626 = vrot.lane.b32.xlu1 %v9053_v2, %s7283_s7  ;;  %v9575_v39 = vld [vmem:[%s7994_s10 + $0x2d2] sm:$0xff] }
 0x33b   : > { %2624 = vrot.lane.b32.xlu0 %v9056_v31, %s7283_s7 }
 0x33c   : > { %v2257_v1 = vpop.permute.xlu1 %2256 }
 0x33d   : > { %v2255_v15 = vpop.permute.xlu0 %2254  ;;  %2340 = vst.msk [vmem:[#allocation3 + $0x68] sm:$0xff] %vm2326_vm11, %v2257_v1  ;;  %v9578_v1 = vld [vmem:[%s7994_s10 + $0x2c2] sm:$0xff] }
 0x33e   : > { %2339 = vst.msk [vmem:[#allocation3 + $0x60] sm:$0xff] %vm2326_vm11, %v2255_v15  ;;  %2630 = vrot.lane.b32.xlu1 %v9065_v5, %s7283_s7 }
 0x33f   : > { %2628 = vrot.lane.b32.xlu0 %v9068_v8, %s7283_s7 }
 0x340   : > { %v2261_v19 = vpop.permute.xlu1 %2260 }
 0x341   : > { %v2259_v2 = vpop.permute.xlu0 %2258  ;;  %2342 = vst.msk [vmem:[#allocation3 + $0x78] sm:$0xff] %vm2326_vm11, %v2261_v19  ;;  %v9587_v19 = vld [vmem:[%s7994_s10 + $0x2f2] sm:$0xff] }
 0x342   : > { %2341 = vst.msk [vmem:[#allocation3 + $0x70] sm:$0xff] %vm2326_vm11, %v2259_v2  ;;  %2634 = vrot.lane.b32.xlu1 %v9500_v61, %s7283_s7  ;;  %v9590_v2 = vld [vmem:[%s7994_s10 + $0x2e2] sm:$0xff] }
 0x343   : > { %2632 = vrot.lane.b32.xlu0 %v6395_v0, %s7283_s7 }
 0x344   : > { %v2265_v31 = vpop.permute.xlu1 %2264 }
 0x345   : > { %v2263_v51 = vpop.permute.xlu0 %2262  ;;  %2344 = vst.msk [vmem:[#allocation3 + $0x88] sm:$0xff] %vm2326_vm11, %v2265_v31 }
 0x346   : > { %2343 = vst.msk [vmem:[#allocation3 + $0x80] sm:$0xff] %vm2326_vm11, %v2263_v51  ;;  %2638 = vrot.lane.b32.xlu1 %v9083_v32, %s7283_s7  ;;  %v9527_v32 = vld [vmem:[%s7994_s10 + $0x1f2] sm:$0xff] }
 0x347   : > { %2636 = vrot.lane.b32.xlu0 %v9086_v33, %s7283_s7  ;;  %v6403_v33 = vld [vmem:[%s7994_s10 + $0x1e2] sm:$0xff] }
 0x348   : > { %v2269_v5 = vpop.permute.xlu1 %2268 }
 0x349   : > { %v2267_v8 = vpop.permute.xlu0 %2266  ;;  %2346 = vst.msk [vmem:[#allocation3 + $0x98] sm:$0xff] %vm2326_vm11, %v2269_v5 }
 0x34a   : > { %2345 = vst.msk [vmem:[#allocation3 + $0x90] sm:$0xff] %vm2326_vm11, %v2267_v8  ;;  %2642 = vrot.lane.b32.xlu1 %v9095_v38, %s7283_s7 }
 0x34b   : > { %2640 = vrot.lane.b32.xlu0 %v9098_v14, %s7283_s7 }
 0x34c   : > { %v2273_v13 = vpop.permute.xlu1 %2272 }
 0x34d   : > { %v2271_v9 = vpop.permute.xlu0 %2270  ;;  %2348 = vst.msk [vmem:[#allocation3 + $0xa8] sm:$0xff] %vm2326_vm11, %v2273_v13 }
 0x34e   : > { %2347 = vst.msk [vmem:[#allocation3 + $0xa0] sm:$0xff] %vm2326_vm11, %v2271_v9  ;;  %2646 = vrot.lane.b32.xlu1 %v9107_v41, %s7283_s7 }
 0x34f   : > { %2644 = vrot.lane.b32.xlu0 %v9110_v49, %s7283_s7 }
 0x350   : > { %v2277_v28 = vpop.permute.xlu1 %2276 }
 0x351   : > { %v2275_v38 = vpop.permute.xlu0 %2274  ;;  %2350 = vst.msk [vmem:[#allocation3 + $0xb8] sm:$0xff] %vm2326_vm11, %v2277_v28 }
 0x352   : > { %2349 = vst.msk [vmem:[#allocation3 + $0xb0] sm:$0xff] %vm2326_vm11, %v2275_v38  ;;  %2650 = vrot.lane.b32.xlu1 %v9527_v32, %s7283_s7 }
 0x353   : > { %2648 = vrot.lane.b32.xlu0 %v6403_v33, %s7283_s7 }
 0x354   : > { %v2281_v14 = vpop.permute.xlu1 %2280 }
 0x355   : > { %v2279_v26 = vpop.permute.xlu0 %2278  ;;  %2352 = vst.msk [vmem:[#allocation3 + $0xc8] sm:$0xff] %vm2326_vm11, %v2281_v14 }
 0x356   : > { %2351 = vst.msk [vmem:[#allocation3 + $0xc0] sm:$0xff] %vm2326_vm11, %v2279_v26  ;;  %2654 = vrot.lane.b32.xlu1 %v9125_v57, %s7283_s7  ;;  %v9554_v57 = vld [vmem:[%s7994_s10 + $0x292] sm:$0xff] }
 0x357   : > { %2652 = vrot.lane.b32.xlu0 %v9128_v58, %s7283_s7  ;;  %v6411_v58 = vld [vmem:[%s7994_s10 + $0x282] sm:$0xff] }
 0x358   : > { %v2285_v41 = vpop.permute.xlu1 %2284 }
 0x359   : > { %v2283_v49 = vpop.permute.xlu0 %2282  ;;  %2354 = vst.msk [vmem:[#allocation3 + $0xd8] sm:$0xff] %vm2326_vm11, %v2285_v41 }
 0x35a   : > { %2353 = vst.msk [vmem:[#allocation3 + $0xd0] sm:$0xff] %vm2326_vm11, %v2283_v49  ;;  %2658 = vrot.lane.b32.xlu1 %v9137_v22, %s7283_s7 }
 0x35b   : > { %2656 = vrot.lane.b32.xlu0 %v9140_v44, %s7283_s7 }
 0x35c   : > { %v2289_v34 = vpop.permute.xlu1 %2288 }
 0x35d   : > { %v2287_v46 = vpop.permute.xlu0 %2286  ;;  %2356 = vst.msk [vmem:[#allocation3 + $0xe8] sm:$0xff] %vm2326_vm11, %v2289_v34 }
 0x35e   : > { %2355 = vst.msk [vmem:[#allocation3 + $0xe0] sm:$0xff] %vm2326_vm11, %v2287_v46  ;;  %2662 = vrot.lane.b32.xlu1 %v9149_v10, %s7283_s7  ;;  %v9563_v10 = vld [vmem:[%s7994_s10 + $0x2b2] sm:$0xff] }
 0x35f   : > { %2660 = vrot.lane.b32.xlu0 %v9152_v43, %s7283_s7  ;;  %v9566_v43 = vld [vmem:[%s7994_s10 + $0x2a2] sm:$0xff] }
 0x360   : > { %v2293_v22 = vpop.permute.xlu1 %2292 }
 0x361   : > { %v2291_v44 = vpop.permute.xlu0 %2290  ;;  %2358 = vst.msk [vmem:[#allocation3 + $0xf8] sm:$0xff] %vm2326_vm11, %v2293_v22  ;;  %v11712_v22 = vld [vmem:[#allocation10_spill] sm:$0xff] }
 0x362   : > { %2357 = vst.msk [vmem:[#allocation3 + $0xf0] sm:$0xff] %vm2326_vm11, %v2291_v44  ;;  %2666 = vrot.lane.b32.xlu1 %v9554_v57, %s7283_s7  ;;  %v11713_v44 = vld [vmem:[#allocation11_spill] sm:$0xff]  ;;  %vm5425_vm11 = vcmask 851744  }
 0x363   : > { %2664 = vrot.lane.b32.xlu0 %v6411_v58, %s7283_s7 }
 0x364   : > { %v2426_v37 = vpop.permute.xlu1 %2425 }
 0x365   : > { %v2424_v30 = vpop.permute.xlu0 %2423  ;;  %2521 = vst.msk [vmem:[#allocation3 + $0x8] sm:$0xff] %vm2519_vm12, %v2426_v37 }
 0x366   : > { %2520 = vst.msk [vmem:[#allocation3] sm:$0xff] %vm2519_vm12, %v2424_v30  ;;  %2670 = vrot.lane.b32.xlu1 %v9563_v10, %s7283_s7 }
 0x367   : > { %2668 = vrot.lane.b32.xlu0 %v9566_v43, %s7283_s7 }
 0x368   : > { %v2430_v15 = vpop.permute.xlu1 %2429 }
 0x369   : > { %v2428_v0 = vpop.permute.xlu0 %2427  ;;  %2523 = vst.msk [vmem:[#allocation3 + $0x18] sm:$0xff] %vm2519_vm12, %v2430_v15  ;;  %v11714_v15 = vld [vmem:[#allocation13_spill] sm:$0xff] }
 0x36a   : > { %2522 = vst.msk [vmem:[#allocation3 + $0x10] sm:$0xff] %vm2519_vm12, %v2428_v0  ;;  %2674 = vrot.lane.b32.xlu1 %v9575_v39, %s7283_s7  ;;  %v9698_v0 = vld [vmem:[%s7994_s10 + $0x300] sm:$0xff] }
 0x36b   : > { %2672 = vrot.lane.b32.xlu0 %v9578_v1, %s7283_s7 }
 0x36c   : > { %v2434_v31 = vpop.permute.xlu1 %2433 }
 0x36d   : > { %v2432_v51 = vpop.permute.xlu0 %2431  ;;  %2525 = vst.msk [vmem:[#allocation3 + $0x28] sm:$0xff] %vm2519_vm12, %v2434_v31 }
 0x36e   : > { %2524 = vst.msk [vmem:[#allocation3 + $0x20] sm:$0xff] %vm2519_vm12, %v2432_v51  ;;  %2678 = vrot.lane.b32.xlu1 %v9587_v19, %s7283_s7 }
 0x36f   : > { %2676 = vrot.lane.b32.xlu0 %v9590_v2, %s7283_s7  ;;  %s7296_s7 = smov 96  }
 0x370   : > { %v2438_v5 = vpop.permute.xlu1 %2437 }
 0x371   : > { %v2436_v8 = vpop.permute.xlu0 %2435  ;;  %2527 = vst.msk [vmem:[#allocation3 + $0x38] sm:$0xff] %vm2519_vm12, %v2438_v5 }
 0x372   : > { %2526 = vst.msk [vmem:[#allocation3 + $0x30] sm:$0xff] %vm2519_vm12, %v2436_v8  ;;  %2813 = vrot.lane.b32.xlu1 %v9179_v62, %s7284_s8 }
 0x373   : > { %2811 = vrot.lane.b32.xlu0 %v9167_v3, %s7284_s8  ;;  %v9617_v3 = vld [vmem:[%s7994_s10 + $0x120] sm:$0xff] }
 0x374   : > { %v2442_v13 = vpop.permute.xlu1 %2441 }
 0x375   : > { %v2440_v9 = vpop.permute.xlu0 %2439  ;;  %2529 = vst.msk [vmem:[#allocation3 + $0x48] sm:$0xff] %vm2519_vm12, %v2442_v13  ;;  %v9716_v13 = vld [vmem:[%s7994_s10 + $0xe1] sm:$0xff] }
 0x376   : > { %2528 = vst.msk [vmem:[#allocation3 + $0x40] sm:$0xff] %vm2519_vm12, %v2440_v9  ;;  %2817 = vrot.lane.b32.xlu1 %v9191_v29, %s7284_s8 }
 0x377   : > { %2815 = vrot.lane.b32.xlu0 %v9176_v23, %s7284_s8 }
 0x378   : > { %v2446_v33 = vpop.permute.xlu1 %2445 }
 0x379   : > { %v2444_v28 = vpop.permute.xlu0 %2443  ;;  %2531 = vst.msk [vmem:[#allocation3 + $0x58] sm:$0xff] %vm2519_vm12, %v2446_v33 }
 0x37a   : > { %2530 = vst.msk [vmem:[#allocation3 + $0x50] sm:$0xff] %vm2519_vm12, %v2444_v28  ;;  %2821 = vrot.lane.b32.xlu1 %v9203_v40, %s7284_s8  ;;  %v9728_v28 = vld [vmem:[%s7994_s10 + $0x101] sm:$0xff] }
 0x37b   : > { %2819 = vrot.lane.b32.xlu0 %v9188_v27, %s7284_s8 }
 0x37c   : > { %v2450_v62 = vpop.permute.xlu1 %2449 }
 0x37d   : > { %v2448_v38 = vpop.permute.xlu0 %2447  ;;  %2533 = vst.msk [vmem:[#allocation3 + $0x68] sm:$0xff] %vm2519_vm12, %v2450_v62 }
 0x37e   : > { %2532 = vst.msk [vmem:[#allocation3 + $0x60] sm:$0xff] %vm2519_vm12, %v2448_v38  ;;  %2825 = vrot.lane.b32.xlu1 %v9617_v3, %s7284_s8 }
 0x37f   : > { %2823 = vrot.lane.b32.xlu0 %v9200_v11, %s7284_s8 }
 0x380   : > { %v2454_v23 = vpop.permute.xlu1 %2453 }
 0x381   : > { %v2452_v29 = vpop.permute.xlu0 %2451  ;;  %2535 = vst.msk [vmem:[#allocation3 + $0x78] sm:$0xff] %vm2519_vm12, %v2454_v23  ;;  %v9740_v23 = vld [vmem:[%s7994_s10 + $0x121] sm:$0xff] }
 0x382   : > { %2534 = vst.msk [vmem:[#allocation3 + $0x70] sm:$0xff] %vm2519_vm12, %v2452_v29  ;;  %2829 = vrot.lane.b32.xlu1 %v9224_v45, %s7284_s8  ;;  %v9743_v29 = vld [vmem:[%s7994_s10 + $0x111] sm:$0xff] }
 0x383   : > { %2827 = vrot.lane.b32.xlu0 %v9212_v53, %s7284_s8  ;;  %v9644_v53 = vld [vmem:[%s7994_s10 + $0x1c0] sm:$0xff] }
 0x384   : > { %v2458_v27 = vpop.permute.xlu1 %2457 }
 0x385   : > { %v2456_v40 = vpop.permute.xlu0 %2455  ;;  %2537 = vst.msk [vmem:[#allocation3 + $0x88] sm:$0xff] %vm2519_vm12, %v2458_v27 }
 0x386   : > { %2536 = vst.msk [vmem:[#allocation3 + $0x80] sm:$0xff] %vm2519_vm12, %v2456_v40  ;;  %2833 = vrot.lane.b32.xlu1 %v9236_v52, %s7284_s8 }
 0x387   : > { %2831 = vrot.lane.b32.xlu0 %v9221_v18, %s7284_s8 }
 0x388   : > { %v2462_v11 = vpop.permute.xlu1 %2461 }
 0x389   : > { %v2460_v14 = vpop.permute.xlu0 %2459  ;;  %2539 = vst.msk [vmem:[#allocation3 + $0x98] sm:$0xff] %vm2519_vm12, %v2462_v11  ;;  %v9752_v11 = vld [vmem:[%s7994_s10 + $0x161] sm:$0xff] }
 0x38a   : > { %2538 = vst.msk [vmem:[#allocation3 + $0x90] sm:$0xff] %vm2519_vm12, %v2460_v14  ;;  %2837 = vrot.lane.b32.xlu1 %v9248_v63, %s7284_s8 }
 0x38b   : > { %2835 = vrot.lane.b32.xlu0 %v9233_v47, %s7284_s8 }
 0x38c   : > { %v2466_v45 = vpop.permute.xlu1 %2465 }
 0x38d   : > { %v2464_v26 = vpop.permute.xlu0 %2463  ;;  %2541 = vst.msk [vmem:[#allocation3 + $0xa8] sm:$0xff] %vm2519_vm12, %v2466_v45 }
 0x38e   : > { %2540 = vst.msk [vmem:[#allocation3 + $0xa0] sm:$0xff] %vm2519_vm12, %v2464_v26  ;;  %2841 = vrot.lane.b32.xlu1 %v9644_v53, %s7284_s8  ;;  %v9761_v26 = vld [vmem:[%s7994_s10 + $0x181] sm:$0xff] }
 0x38f   : > { %2839 = vrot.lane.b32.xlu0 %v9245_v36, %s7284_s8 }
 0x390   : > { %v2470_v18 = vpop.permute.xlu1 %2469 }
 0x391   : > { %v2468_v52 = vpop.permute.xlu0 %2467  ;;  %2543 = vst.msk [vmem:[#allocation3 + $0xb8] sm:$0xff] %vm2519_vm12, %v2470_v18  ;;  %v9764_v18 = vld [vmem:[%s7994_s10 + $0x171] sm:$0xff] }
 0x392   : > { %2542 = vst.msk [vmem:[#allocation3 + $0xb0] sm:$0xff] %vm2519_vm12, %v2468_v52  ;;  %2845 = vrot.lane.b32.xlu1 %v9269_v54, %s7284_s8 }
 0x393   : > { %2843 = vrot.lane.b32.xlu0 %v9257_v7, %s7284_s8  ;;  %v9671_v7 = vld [vmem:[%s7994_s10 + $0x260] sm:$0xff] }
 0x394   : > { %v2474_v47 = vpop.permute.xlu1 %2473 }
 0x395   : > { %v2472_v63 = vpop.permute.xlu0 %2471  ;;  %2545 = vst.msk [vmem:[#allocation3 + $0xc8] sm:$0xff] %vm2519_vm12, %v2474_v47 }
 0x396   : > { %2544 = vst.msk [vmem:[#allocation3 + $0xc0] sm:$0xff] %vm2519_vm12, %v2472_v63  ;;  %2849 = vrot.lane.b32.xlu1 %v9281_v48, %s7284_s8  ;;  %v9773_v63 = vld [vmem:[%s7994_s10 + $0x1a1] sm:$0xff] }
 0x397   : > { %2847 = vrot.lane.b32.xlu0 %v9266_v16, %s7284_s8  ;;  %v11709_v16 = vld [vmem:[#allocation9_spill] sm:$0xff] }
 0x398   : > { %v2478_v36 = vpop.permute.xlu1 %2477 }
 0x399   : > { %v2476_v41 = vpop.permute.xlu0 %2475  ;;  %2547 = vst.msk [vmem:[#allocation3 + $0xd8] sm:$0xff] %vm2519_vm12, %v2478_v36 }
 0x39a   : > { %2546 = vst.msk [vmem:[#allocation3 + $0xd0] sm:$0xff] %vm2519_vm12, %v2476_v41  ;;  %2853 = vrot.lane.b32.xlu1 %v9293_v24, %s7284_s8  ;;  %v11711_v24 = vld [vmem:[#allocation7_spill] sm:$0xff] }
 0x39b   : > { %2851 = vrot.lane.b32.xlu0 %v9278_v55, %s7284_s8  ;;  %v11710_v55 = vld [vmem:[#allocation8_spill] sm:$0xff] }
 0x39c   : > { %v2482_v54 = vpop.permute.xlu1 %2481 }
 0x39d   : > { %v2480_v49 = vpop.permute.xlu0 %2479  ;;  %2549 = vst.msk [vmem:[#allocation3 + $0xe8] sm:$0xff] %vm2519_vm12, %v2482_v54  ;;  %v9785_v54 = vld [vmem:[%s7994_s10 + $0x1c1] sm:$0xff] }
 0x39e   : > { %2548 = vst.msk [vmem:[#allocation3 + $0xe0] sm:$0xff] %vm2519_vm12, %v2480_v49  ;;  %2857 = vrot.lane.b32.xlu1 %v9671_v7, %s7284_s8  ;;  %v9788_v49 = vld [vmem:[%s7994_s10 + $0x1b1] sm:$0xff] }
 0x39f   : > { %2855 = vrot.lane.b32.xlu0 %v11709_v16, %s7284_s8 }
 0x3a0   : > { %v2486_v48 = vpop.permute.xlu1 %2485 }
 0x3a1   : > { %v2484_v34 = vpop.permute.xlu0 %2483  ;;  %2551 = vst.msk [vmem:[#allocation3 + $0xf8] sm:$0xff] %vm2519_vm12, %v2486_v48 }
 0x3a2   : > { %2550 = vst.msk [vmem:[#allocation3 + $0xf0] sm:$0xff] %vm2519_vm12, %v2484_v34  ;;  %2861 = vrot.lane.b32.xlu1 %v11710_v55, %s7284_s8  ;;  %v9797_v34 = vld [vmem:[%s7994_s10 + $0x201] sm:$0xff]  ;;  %vm5618_vm12 = vcmask 884544  }
 0x3a3   : > { %2859 = vrot.lane.b32.xlu0 %v11711_v24, %s7284_s8 }
 0x3a4   : > { %v2619_v46 = vpop.permute.xlu1 %2618 }
 0x3a5   : > { %v2617_v58 = vpop.permute.xlu0 %2616  ;;  %2714 = vst.msk [vmem:[#allocation3 + $0x8] sm:$0xff] %vm2712_vm13, %v2619_v46  ;;  %v9806_v46 = vld [vmem:[%s7994_s10 + $0x221] sm:$0xff] }
 0x3a6   : > { %2713 = vst.msk [vmem:[#allocation3] sm:$0xff] %vm2712_vm13, %v2617_v58  ;;  %2865 = vrot.lane.b32.xlu1 %v11712_v22, %s7284_s8  ;;  %v9809_v58 = vld [vmem:[%s7994_s10 + $0x211] sm:$0xff] }
 0x3a7   : > { %2863 = vrot.lane.b32.xlu0 %v11713_v44, %s7284_s8 }
 0x3a8   : > { %v2623_v37 = vpop.permute.xlu1 %2622 }
 0x3a9   : > { %v2621_v30 = vpop.permute.xlu0 %2620  ;;  %2716 = vst.msk [vmem:[#allocation3 + $0x18] sm:$0xff] %vm2712_vm13, %v2623_v37  ;;  %v9818_v37 = vld [vmem:[%s7994_s10 + $0x241] sm:$0xff] }
 0x3aa   : > { %2715 = vst.msk [vmem:[#allocation3 + $0x10] sm:$0xff] %vm2712_vm13, %v2621_v30  ;;  %2869 = vrot.lane.b32.xlu1 %v9338_v25, %s7284_s8  ;;  %v9707_v25 = vld [vmem:[%s7994_s10 + $0xc1] sm:$0xff] }
 0x3ab   : > { %2867 = vrot.lane.b32.xlu0 %v11714_v15, %s7284_s8 }
 0x3ac   : > { %v2627_v31 = vpop.permute.xlu1 %2626 }
 0x3ad   : > { %v2625_v51 = vpop.permute.xlu0 %2624  ;;  %2718 = vst.msk [vmem:[#allocation3 + $0x28] sm:$0xff] %vm2712_vm13, %v2627_v31  ;;  %v9830_v31 = vld [vmem:[%s7994_s10 + $0x261] sm:$0xff] }
 0x3ae   : > { %2717 = vst.msk [vmem:[#allocation3 + $0x20] sm:$0xff] %vm2712_vm13, %v2625_v51  ;;  %2873 = vrot.lane.b32.xlu1 %v9698_v0, %s7284_s8  ;;  %v9833_v51 = vld [vmem:[%s7994_s10 + $0x251] sm:$0xff] }
 0x3af   : > { %2871 = vrot.lane.b32.xlu0 %v9335_v17, %s7284_s8  ;;  %v9719_v17 = vld [vmem:[%s7994_s10 + $0xd1] sm:$0xff]  ;;  %s6912_s8 = sshll.u32 %s7258_s16, 6 }
 0x3b0   : > { %v2631_v5 = vpop.permute.xlu1 %2630 }
 0x3b1   : > { %v2629_v8 = vpop.permute.xlu0 %2628  ;;  %2720 = vst.msk [vmem:[#allocation3 + $0x38] sm:$0xff] %vm2712_vm13, %v2631_v5 }
 0x3b2   : > { %2719 = vst.msk [vmem:[#allocation3 + $0x30] sm:$0xff] %vm2712_vm13, %v2629_v8  ;;  %3006 = vrot.lane.b32.xlu1 %v9707_v25, %s7285_s9 }
 0x3b3   : > { %3004 = vrot.lane.b32.xlu0 %v9347_v50, %s7285_s9  ;;  %v9731_v50 = vld [vmem:[%s7994_s10 + $0xf1] sm:$0xff] }
 0x3b4   : > { %v2635_v9 = vpop.permute.xlu1 %2634 }
 0x3b5   : > { %v2633_v33 = vpop.permute.xlu0 %2632  ;;  %2722 = vst.msk [vmem:[#allocation3 + $0x48] sm:$0xff] %vm2712_vm13, %v2635_v9 }
 0x3b6   : > { %2721 = vst.msk [vmem:[#allocation3 + $0x40] sm:$0xff] %vm2712_vm13, %v2633_v33  ;;  %3010 = vrot.lane.b32.xlu1 %v9716_v13, %s7285_s9 }
 0x3b7   : > { %3008 = vrot.lane.b32.xlu0 %v9719_v17, %s7285_s9 }
 0x3b8   : > { %v2639_v62 = vpop.permute.xlu1 %2638 }
 0x3b9   : > { %v2637_v38 = vpop.permute.xlu0 %2636  ;;  %2724 = vst.msk [vmem:[#allocation3 + $0x58] sm:$0xff] %vm2712_vm13, %v2639_v62 }
 0x3ba   : > { %2723 = vst.msk [vmem:[#allocation3 + $0x50] sm:$0xff] %vm2712_vm13, %v2637_v38  ;;  %3014 = vrot.lane.b32.xlu1 %v9728_v28, %s7285_s9 }
 0x3bb   : > { %3012 = vrot.lane.b32.xlu0 %v9731_v50, %s7285_s9 }
 0x3bc   : > { %v2643_v27 = vpop.permute.xlu1 %2642 }
 0x3bd   : > { %v2641_v40 = vpop.permute.xlu0 %2640  ;;  %2726 = vst.msk [vmem:[#allocation3 + $0x68] sm:$0xff] %vm2712_vm13, %v2643_v27 }
 0x3be   : > { %2725 = vst.msk [vmem:[#allocation3 + $0x60] sm:$0xff] %vm2712_vm13, %v2641_v40  ;;  %3018 = vrot.lane.b32.xlu1 %v9740_v23, %s7285_s9 }
 0x3bf   : > { %3016 = vrot.lane.b32.xlu0 %v9743_v29, %s7285_s9 }
 0x3c0   : > { %v2647_v14 = vpop.permute.xlu1 %2646 }
 0x3c1   : > { %v2645_v45 = vpop.permute.xlu0 %2644  ;;  %2728 = vst.msk [vmem:[#allocation3 + $0x78] sm:$0xff] %vm2712_vm13, %v2647_v14  ;;  %v9878_v14 = vld [vmem:[%s7994_s10 + $0xe2] sm:$0xff] }
 0x3c2   : > { %2727 = vst.msk [vmem:[#allocation3 + $0x70] sm:$0xff] %vm2712_vm13, %v2645_v45  ;;  %3022 = vrot.lane.b32.xlu1 %v9752_v11, %s7285_s9 }
 0x3c3   : > { %3020 = vrot.lane.b32.xlu0 %v9374_v60, %s7285_s9  ;;  %v9776_v60 = vld [vmem:[%s7994_s10 + $0x191] sm:$0xff] }
 0x3c4   : > { %v2651_v52 = vpop.permute.xlu1 %2650 }
 0x3c5   : > { %v2649_v47 = vpop.permute.xlu0 %2648  ;;  %2730 = vst.msk [vmem:[#allocation3 + $0x88] sm:$0xff] %vm2712_vm13, %v2651_v52 }
 0x3c6   : > { %2729 = vst.msk [vmem:[#allocation3 + $0x80] sm:$0xff] %vm2712_vm13, %v2649_v47  ;;  %3026 = vrot.lane.b32.xlu1 %v9761_v26, %s7285_s9  ;;  %v9890_v47 = vld [vmem:[%s7994_s10 + $0x102] sm:$0xff] }
 0x3c7   : > { %3024 = vrot.lane.b32.xlu0 %v9764_v18, %s7285_s9 }
 0x3c8   : > { %v2655_v36 = vpop.permute.xlu1 %2654 }
 0x3c9   : > { %v2653_v41 = vpop.permute.xlu0 %2652  ;;  %2732 = vst.msk [vmem:[#allocation3 + $0x98] sm:$0xff] %vm2712_vm13, %v2655_v36 }
 0x3ca   : > { %2731 = vst.msk [vmem:[#allocation3 + $0x90] sm:$0xff] %vm2712_vm13, %v2653_v41  ;;  %3030 = vrot.lane.b32.xlu1 %v9773_v63, %s7285_s9 }
 0x3cb   : > { %3028 = vrot.lane.b32.xlu0 %v9776_v60, %s7285_s9 }
 0x3cc   : > { %v2659_v16 = vpop.permute.xlu1 %2658 }
 0x3cd   : > { %v2657_v48 = vpop.permute.xlu0 %2656  ;;  %2734 = vst.msk [vmem:[#allocation3 + $0xa8] sm:$0xff] %vm2712_vm13, %v2659_v16  ;;  %v9902_v16 = vld [vmem:[%s7994_s10 + $0x122] sm:$0xff] }
 0x3ce   : > { %2733 = vst.msk [vmem:[#allocation3 + $0xa0] sm:$0xff] %vm2712_vm13, %v2657_v48  ;;  %3034 = vrot.lane.b32.xlu1 %v9785_v54, %s7285_s9  ;;  %v9905_v48 = vld [vmem:[%s7994_s10 + $0x112] sm:$0xff] }
 0x3cf   : > { %3032 = vrot.lane.b32.xlu0 %v9788_v49, %s7285_s9 }
 0x3d0   : > { %v2663_v55 = vpop.permute.xlu1 %2662 }
 0x3d1   : > { %v2661_v24 = vpop.permute.xlu0 %2660  ;;  %2736 = vst.msk [vmem:[#allocation3 + $0xb8] sm:$0xff] %vm2712_vm13, %v2663_v55 }
 0x3d2   : > { %2735 = vst.msk [vmem:[#allocation3 + $0xb0] sm:$0xff] %vm2712_vm13, %v2661_v24  ;;  %3038 = vrot.lane.b32.xlu1 %v9797_v34, %s7285_s9 }
 0x3d3   : > { %3036 = vrot.lane.b32.xlu0 %v9401_v20, %s7285_s9  ;;  %v9821_v20 = vld [vmem:[%s7994_s10 + $0x231] sm:$0xff] }
 0x3d4   : > { %v2667_v22 = vpop.permute.xlu1 %2666 }
 0x3d5   : > { %v2665_v44 = vpop.permute.xlu0 %2664  ;;  %2738 = vst.msk [vmem:[#allocation3 + $0xc8] sm:$0xff] %vm2712_vm13, %v2667_v22  ;;  %v9914_v22 = vld [vmem:[%s7994_s10 + $0x162] sm:$0xff] }
 0x3d6   : > { %2737 = vst.msk [vmem:[#allocation3 + $0xc0] sm:$0xff] %vm2712_vm13, %v2665_v44  ;;  %3042 = vrot.lane.b32.xlu1 %v9806_v46, %s7285_s9 }
 0x3d7   : > { %3040 = vrot.lane.b32.xlu0 %v9809_v58, %s7285_s9 }
 0x3d8   : > { %v2671_v30 = vpop.permute.xlu1 %2670 }
 0x3d9   : > { %v2669_v15 = vpop.permute.xlu0 %2668  ;;  %2740 = vst.msk [vmem:[#allocation3 + $0xd8] sm:$0xff] %vm2712_vm13, %v2671_v30 }
 0x3da   : > { %2739 = vst.msk [vmem:[#allocation3 + $0xd0] sm:$0xff] %vm2712_vm13, %v2669_v15  ;;  %3046 = vrot.lane.b32.xlu1 %v9818_v37, %s7285_s9  ;;  %v9923_v15 = vld [vmem:[%s7994_s10 + $0x182] sm:$0xff] }
 0x3db   : > { %3044 = vrot.lane.b32.xlu0 %v9821_v20, %s7285_s9 }
 0x3dc   : > { %v2675_v5 = vpop.permute.xlu1 %2674 }
 0x3dd   : > { %v2673_v8 = vpop.permute.xlu0 %2672  ;;  %2742 = vst.msk [vmem:[#allocation3 + $0xe8] sm:$0xff] %vm2712_vm13, %v2675_v5  ;;  %v9926_v5 = vld [vmem:[%s7994_s10 + $0x172] sm:$0xff] }
 0x3de   : > { %2741 = vst.msk [vmem:[#allocation3 + $0xe0] sm:$0xff] %vm2712_vm13, %v2673_v8  ;;  %3050 = vrot.lane.b32.xlu1 %v9830_v31, %s7285_s9 }
 0x3df   : > { %3048 = vrot.lane.b32.xlu0 %v9833_v51, %s7285_s9 }
 0x3e0   : > { %v2679_v9 = vpop.permute.xlu1 %2678 }
 0x3e1   : > { %v2677_v33 = vpop.permute.xlu0 %2676  ;;  %2744 = vst.msk [vmem:[#allocation3 + $0xf8] sm:$0xff] %vm2712_vm13, %v2679_v9 }
 0x3e2   : > { %2743 = vst.msk [vmem:[#allocation3 + $0xf0] sm:$0xff] %vm2712_vm13, %v2677_v33  ;;  %3054 = vrot.lane.b32.xlu1 %v9440_v35, %s7285_s9  ;;  %v9935_v33 = vld [vmem:[%s7994_s10 + $0x1a2] sm:$0xff] }
 0x3e3   : > { %3052 = vrot.lane.b32.xlu0 %v9428_v12, %s7285_s9  ;;  %v9860_v12 = vld [vmem:[%s7994_s10 + $0x301] sm:$0xff] }
 0x3e4   : > { %v2814_v62 = vpop.permute.xlu1 %2813 }
 0x3e5   : > { %v2812_v38 = vpop.permute.xlu0 %2811  ;;  %2909 = vst.msk [vmem:[#allocation3 + $0x8] sm:$0xff] %vm2907_vm14, %v2814_v62 }
 0x3e6   : > { %2908 = vst.msk [vmem:[#allocation3] sm:$0xff] %vm2907_vm14, %v2812_v38  ;;  %3058 = vrot.lane.b32.xlu1 %v9452_v6, %s7285_s9 }
 0x3e7   : > { %3056 = vrot.lane.b32.xlu0 %v9437_v42, %s7285_s9  ;;  %v9869_v42 = vld [vmem:[%s7994_s10 + $0xc2] sm:$0xff] }
 0x3e8   : > { %v2818_v27 = vpop.permute.xlu1 %2817 }
 0x3e9   : > { %v2816_v40 = vpop.permute.xlu0 %2815  ;;  %2911 = vst.msk [vmem:[#allocation3 + $0x18] sm:$0xff] %vm2907_vm14, %v2818_v27  ;;  %v9947_v27 = vld [vmem:[%s7994_s10 + $0x1c2] sm:$0xff] }
 0x3ea   : > { %2910 = vst.msk [vmem:[#allocation3 + $0x10] sm:$0xff] %vm2907_vm14, %v2816_v40  ;;  %3062 = vrot.lane.b32.xlu1 %v9464_v4, %s7285_s9  ;;  %v9950_v40 = vld [vmem:[%s7994_s10 + $0x1b2] sm:$0xff] }
 0x3eb   : > { %3060 = vrot.lane.b32.xlu0 %v9449_v56, %s7285_s9 }
 0x3ec   : > { %v2822_v35 = vpop.permute.xlu1 %2821 }
 0x3ed   : > { %v2820_v6 = vpop.permute.xlu0 %2819  ;;  %2913 = vst.msk [vmem:[#allocation3 + $0x28] sm:$0xff] %vm2907_vm14, %v2822_v35 }
 0x3ee   : > { %2912 = vst.msk [vmem:[#allocation3 + $0x20] sm:$0xff] %vm2907_vm14, %v2820_v6  ;;  %3066 = vrot.lane.b32.xlu1 %v9860_v12, %s7285_s9 }
 0x3ef   : > { %3064 = vrot.lane.b32.xlu0 %v9461_v21, %s7285_s9  ;;  %v9881_v21 = vld [vmem:[%s7994_s10 + $0xd2] sm:$0xff]  ;;  %s7295_s9 = smov 92  }
 0x3f0   : > { %v2826_v56 = vpop.permute.xlu1 %2825 }
 0x3f1   : > { %v2824_v4 = vpop.permute.xlu0 %2823  ;;  %2915 = vst.msk [vmem:[#allocation3 + $0x38] sm:$0xff] %vm2907_vm14, %v2826_v56  ;;  %v9959_v56 = vld [vmem:[%s7994_s10 + $0x202] sm:$0xff] }
 0x3f2   : > { %2914 = vst.msk [vmem:[#allocation3 + $0x30] sm:$0xff] %vm2907_vm14, %v2824_v4  ;;  %3199 = vrot.lane.b32.xlu1 %v9869_v42, %s7286_s11 }
 0x3f3   : > { %3197 = vrot.lane.b32.xlu0 %v9473_v59, %s7286_s11  ;;  %v9893_v59 = vld [vmem:[%s7994_s10 + $0xf2] sm:$0xff] }
 0x3f4   : > { %v2830_v45 = vpop.permute.xlu1 %2829 }
 0x3f5   : > { %v2828_v52 = vpop.permute.xlu0 %2827  ;;  %2917 = vst.msk [vmem:[#allocation3 + $0x48] sm:$0xff] %vm2907_vm14, %v2830_v45 }
 0x3f6   : > { %2916 = vst.msk [vmem:[#allocation3 + $0x40] sm:$0xff] %vm2907_vm14, %v2828_v52  ;;  %3203 = vrot.lane.b32.xlu1 %v9878_v14, %s7286_s11  ;;  %v9968_v52 = vld [vmem:[%s7994_s10 + $0x222] sm:$0xff] }
 0x3f7   : > { %3201 = vrot.lane.b32.xlu0 %v9881_v21, %s7286_s11 }
 0x3f8   : > { %v2834_v36 = vpop.permute.xlu1 %2833 }
 0x3f9   : > { %v2832_v41 = vpop.permute.xlu0 %2831  ;;  %2919 = vst.msk [vmem:[#allocation3 + $0x58] sm:$0xff] %vm2907_vm14, %v2834_v36  ;;  %v9971_v36 = vld [vmem:[%s7994_s10 + $0x212] sm:$0xff] }
 0x3fa   : > { %2918 = vst.msk [vmem:[#allocation3 + $0x50] sm:$0xff] %vm2907_vm14, %v2832_v41  ;;  %3207 = vrot.lane.b32.xlu1 %v9890_v47, %s7286_s11 }
 0x3fb   : > { %3205 = vrot.lane.b32.xlu0 %v9893_v59, %s7286_s11 }
 0x3fc   : > { %v2838_v55 = vpop.permute.xlu1 %2837 }
 0x3fd   : > { %v2836_v24 = vpop.permute.xlu0 %2835  ;;  %2921 = vst.msk [vmem:[#allocation3 + $0x68] sm:$0xff] %vm2907_vm14, %v2838_v55 }
 0x3fe   : > { %2920 = vst.msk [vmem:[#allocation3 + $0x60] sm:$0xff] %vm2907_vm14, %v2836_v24  ;;  %3211 = vrot.lane.b32.xlu1 %v9902_v16, %s7286_s11  ;;  %v9980_v24 = vld [vmem:[%s7994_s10 + $0x242] sm:$0xff] }
 0x3ff   : > { %3209 = vrot.lane.b32.xlu0 %v9905_v48, %s7286_s11 }
 0x400   : > { %v2842_v44 = vpop.permute.xlu1 %2841 }
 0x401   : > { %v2840_v30 = vpop.permute.xlu0 %2839  ;;  %2923 = vst.msk [vmem:[#allocation3 + $0x78] sm:$0xff] %vm2907_vm14, %v2842_v44 }
 0x402   : > { %2922 = vst.msk [vmem:[#allocation3 + $0x70] sm:$0xff] %vm2907_vm14, %v2840_v30  ;;  %3215 = vrot.lane.b32.xlu1 %v9914_v22, %s7286_s11 }
 0x403   : > { %3213 = vrot.lane.b32.xlu0 %v9500_v61, %s7286_s11  ;;  %v9938_v61 = vld [vmem:[%s7994_s10 + $0x192] sm:$0xff] }
 0x404   : > { %v2846_v8 = vpop.permute.xlu1 %2845 }
 0x405   : > { %v2844_v9 = vpop.permute.xlu0 %2843  ;;  %2925 = vst.msk [vmem:[#allocation3 + $0x88] sm:$0xff] %vm2907_vm14, %v2846_v8  ;;  %v9992_v8 = vld [vmem:[%s7994_s10 + $0x262] sm:$0xff] }
 0x406   : > { %2924 = vst.msk [vmem:[#allocation3 + $0x80] sm:$0xff] %vm2907_vm14, %v2844_v9  ;;  %3219 = vrot.lane.b32.xlu1 %v9923_v15, %s7286_s11  ;;  %v9995_v9 = vld [vmem:[%s7994_s10 + $0x252] sm:$0xff] }
 0x407   : > { %3217 = vrot.lane.b32.xlu0 %v9926_v5, %s7286_s11 }
 0x408   : > { %v2850_v62 = vpop.permute.xlu1 %2849 }
 0x409   : > { %v2848_v38 = vpop.permute.xlu0 %2847  ;;  %2927 = vst.msk [vmem:[#allocation3 + $0x98] sm:$0xff] %vm2907_vm14, %v2850_v62 }
 0x40a   : > { %2926 = vst.msk [vmem:[#allocation3 + $0x90] sm:$0xff] %vm2907_vm14, %v2848_v38  ;;  %3223 = vrot.lane.b32.xlu1 %v9935_v33, %s7286_s11 }
 0x40b   : > { %3221 = vrot.lane.b32.xlu0 %v9938_v61, %s7286_s11 }
 0x40c   : > { %v2854_v35 = vpop.permute.xlu1 %2853 }
 0x40d   : > { %v2852_v6 = vpop.permute.xlu0 %2851  ;;  %2929 = vst.msk [vmem:[#allocation3 + $0xa8] sm:$0xff] %vm2907_vm14, %v2854_v35 }
 0x40e   : > { %2928 = vst.msk [vmem:[#allocation3 + $0xa0] sm:$0xff] %vm2907_vm14, %v2852_v6  ;;  %3227 = vrot.lane.b32.xlu1 %v9947_v27, %s7286_s11 }
 0x40f   : > { %3225 = vrot.lane.b32.xlu0 %v9950_v40, %s7286_s11 }
 0x410   : > { %v2858_v4 = vpop.permute.xlu1 %2857 }
 0x411   : > { %v2856_v45 = vpop.permute.xlu0 %2855  ;;  %2931 = vst.msk [vmem:[#allocation3 + $0xb8] sm:$0xff] %vm2907_vm14, %v2858_v4 }
 0x412   : > { %2930 = vst.msk [vmem:[#allocation3 + $0xb0] sm:$0xff] %vm2907_vm14, %v2856_v45  ;;  %3231 = vrot.lane.b32.xlu1 %v9959_v56, %s7286_s11 }
 0x413   : > { %3229 = vrot.lane.b32.xlu0 %v9527_v32, %s7286_s11  ;;  %v9983_v32 = vld [vmem:[%s7994_s10 + $0x232] sm:$0xff] }
 0x414   : > { %v2862_v41 = vpop.permute.xlu1 %2861 }
 0x415   : > { %v2860_v55 = vpop.permute.xlu0 %2859  ;;  %2933 = vst.msk [vmem:[#allocation3 + $0xc8] sm:$0xff] %vm2907_vm14, %v2862_v41 }
 0x416   : > { %2932 = vst.msk [vmem:[#allocation3 + $0xc0] sm:$0xff] %vm2907_vm14, %v2860_v55  ;;  %3235 = vrot.lane.b32.xlu1 %v9968_v52, %s7286_s11 }
 0x417   : > { %3233 = vrot.lane.b32.xlu0 %v9971_v36, %s7286_s11 }
 0x418   : > { %v2866_v44 = vpop.permute.xlu1 %2865 }
 0x419   : > { %v2864_v30 = vpop.permute.xlu0 %2863  ;;  %2935 = vst.msk [vmem:[#allocation3 + $0xd8] sm:$0xff] %vm2907_vm14, %v2866_v44 }
 0x41a   : > { %2934 = vst.msk [vmem:[#allocation3 + $0xd0] sm:$0xff] %vm2907_vm14, %v2864_v30  ;;  %3239 = vrot.lane.b32.xlu1 %v9980_v24, %s7286_s11  ;;  %v6522_v30 = vld [vmem:[%s7994_s10 + $0xf0] sm:$0xff] }
 0x41b   : > { %3237 = vrot.lane.b32.xlu0 %v9983_v32, %s7286_s11 }
 0x41c   : > { %v2870_v62 = vpop.permute.xlu1 %2869 }
 0x41d   : > { %v2868_v38 = vpop.permute.xlu0 %2867  ;;  %2937 = vst.msk [vmem:[#allocation3 + $0xe8] sm:$0xff] %vm2907_vm14, %v2870_v62  ;;  %v6521_v62 = vld [vmem:[%s7994_s10 + $0xe0] sm:$0xff] }
 0x41e   : > { %2936 = vst.msk [vmem:[#allocation3 + $0xe0] sm:$0xff] %vm2907_vm14, %v2868_v38  ;;  %3243 = vrot.lane.b32.xlu1 %v9992_v8, %s7286_s11 }
 0x41f   : > { %3241 = vrot.lane.b32.xlu0 %v9995_v9, %s7286_s11 }
 0x420   : > { %v2874_v35 = vpop.permute.xlu1 %2873 }
 0x421   : > { %v2872_v6 = vpop.permute.xlu0 %2871  ;;  %2939 = vst.msk [vmem:[#allocation3 + $0xf8] sm:$0xff] %vm2907_vm14, %v2874_v35  ;;  %v6524_v35 = vld [vmem:[%s7994_s10 + $0x110] sm:$0xff] }
 0x422   : > { %2938 = vst.msk [vmem:[#allocation3 + $0xf0] sm:$0xff] %vm2907_vm14, %v2872_v6  ;;  %3247 = vrot.lane.b32.xlu1 %v9566_v43, %s7286_s11  ;;  %v6523_v6 = vld [vmem:[%s7994_s10 + $0x100] sm:$0xff] }
 0x423   : > { %3245 = vrot.lane.b32.xlu0 %v9554_v57, %s7286_s11  ;;  %v10022_v57 = vld [vmem:[%s7994_s10 + $0x302] sm:$0xff] }
 0x424   : > { %v3007_v4 = vpop.permute.xlu1 %3006 }
 0x425   : > { %v3005_v45 = vpop.permute.xlu0 %3004  ;;  %3102 = vst.msk [vmem:[#allocation3 + $0x8] sm:$0xff] %vm3100_vm15, %v3007_v4 }
 0x426   : > { %3101 = vst.msk [vmem:[#allocation3] sm:$0xff] %vm3100_vm15, %v3005_v45  ;;  %3251 = vrot.lane.b32.xlu1 %v9578_v1, %s7286_s11 }
 0x427   : > { %3249 = vrot.lane.b32.xlu0 %v9563_v10, %s7286_s11  ;;  %v6520_v10 = vld [vmem:[%s7994_s10 + $0xd0] sm:$0xff] }
 0x428   : > { %v3011_v41 = vpop.permute.xlu1 %3010 }
 0x429   : > { %v3009_v43 = vpop.permute.xlu0 %3008  ;;  %3104 = vst.msk [vmem:[#allocation3 + $0x18] sm:$0xff] %vm3100_vm15, %v3011_v41  ;;  %v6526_v41 = vld [vmem:[%s7994_s10 + $0x130] sm:$0xff] }
 0x42a   : > { %3103 = vst.msk [vmem:[#allocation3 + $0x10] sm:$0xff] %vm3100_vm15, %v3009_v43  ;;  %3255 = vrot.lane.b32.xlu1 %v9590_v2, %s7286_s11  ;;  %v6519_v2 = vld [vmem:[%s7994_s10 + $0xc0] sm:$0xff] }
 0x42b   : > { %3253 = vrot.lane.b32.xlu0 %v9575_v39, %s7286_s11 }
 0x42c   : > { %v3015_v1 = vpop.permute.xlu1 %3014 }
 0x42d   : > { %v3013_v55 = vpop.permute.xlu0 %3012  ;;  %3106 = vst.msk [vmem:[#allocation3 + $0x28] sm:$0xff] %vm3100_vm15, %v3015_v1 }
 0x42e   : > { %3105 = vst.msk [vmem:[#allocation3 + $0x20] sm:$0xff] %vm3100_vm15, %v3013_v55  ;;  %3259 = vrot.lane.b32.xlu1 %v10022_v57, %s7286_s11  ;;  %v10055_v55 = vld [vmem:[%s7994_s10 + $0x170] sm:$0xff] }
 0x42f   : > { %3257 = vrot.lane.b32.xlu0 %v9587_v19, %s7286_s11 }
 0x430   : > { %v3019_v39 = vpop.permute.xlu1 %3018 }
 0x431   : > { %v3017_v44 = vpop.permute.xlu0 %3016  ;;  %3108 = vst.msk [vmem:[#allocation3 + $0x38] sm:$0xff] %vm3100_vm15, %v3019_v39 }
 0x432   : > { %3107 = vst.msk [vmem:[#allocation3 + $0x30] sm:$0xff] %vm3100_vm15, %v3017_v44  ;;  %3394 = vrot.lane.b32.xlu1 %v6520_v10, %s7287_s21  ;;  %v10058_v10 = vld [vmem:[%s7994_s10 + $0x160] sm:$0xff]  ;;  %v10067_v44 = vld [vmem:[%s7994_s10 + $0x190] sm:$0xff] }
 0x433   : > { %3392 = vrot.lane.b32.xlu0 %v6519_v2, %s7287_s21 }
 0x434   : > { %v3023_v38 = vpop.permute.xlu1 %3022 }
 0x435   : > { %v3021_v19 = vpop.permute.xlu0 %3020  ;;  %3110 = vst.msk [vmem:[#allocation3 + $0x48] sm:$0xff] %vm3100_vm15, %v3023_v38  ;;  %v10079_v38 = vld [vmem:[%s7994_s10 + $0x1b0] sm:$0xff] }
 0x436   : > { %3109 = vst.msk [vmem:[#allocation3 + $0x40] sm:$0xff] %vm3100_vm15, %v3021_v19  ;;  %3398 = vrot.lane.b32.xlu1 %v6522_v30, %s7287_s21  ;;  %v10082_v19 = vld [vmem:[%s7994_s10 + $0x1a0] sm:$0xff] }
 0x437   : > { %3396 = vrot.lane.b32.xlu0 %v6521_v62, %s7287_s21 }
 0x438   : > { %v3027_v4 = vpop.permute.xlu1 %3026 }
 0x439   : > { %v3025_v45 = vpop.permute.xlu0 %3024  ;;  %3112 = vst.msk [vmem:[#allocation3 + $0x58] sm:$0xff] %vm3100_vm15, %v3027_v4  ;;  %v6534_v4 = vld [vmem:[%s7994_s10 + $0x1d0] sm:$0xff] }
 0x43a   : > { %3111 = vst.msk [vmem:[#allocation3 + $0x50] sm:$0xff] %vm3100_vm15, %v3025_v45  ;;  %3402 = vrot.lane.b32.xlu1 %v6524_v35, %s7287_s21 }
 0x43b   : > { %3400 = vrot.lane.b32.xlu0 %v6523_v6, %s7287_s21 }
 0x43c   : > { %v3031_v43 = vpop.permute.xlu1 %3030 }
 0x43d   : > { %v3029_v1 = vpop.permute.xlu0 %3028  ;;  %3114 = vst.msk [vmem:[#allocation3 + $0x68] sm:$0xff] %vm3100_vm15, %v3031_v43  ;;  %v10097_v43 = vld [vmem:[%s7994_s10 + $0x210] sm:$0xff] }
 0x43e   : > { %3113 = vst.msk [vmem:[#allocation3 + $0x60] sm:$0xff] %vm3100_vm15, %v3029_v1  ;;  %3406 = vrot.lane.b32.xlu1 %v6526_v41, %s7287_s21  ;;  %v10100_v1 = vld [vmem:[%s7994_s10 + $0x200] sm:$0xff] }
 0x43f   : > { %3404 = vrot.lane.b32.xlu0 %v9617_v3, %s7287_s21  ;;  %v10070_v3 = vld [vmem:[%s7994_s10 + $0x180] sm:$0xff] }
 0x440   : > { %v3035_v2 = vpop.permute.xlu1 %3034 }
 0x441   : > { %v3033_v39 = vpop.permute.xlu0 %3032  ;;  %3116 = vst.msk [vmem:[#allocation3 + $0x78] sm:$0xff] %vm3100_vm15, %v3035_v2 }
 0x442   : > { %3115 = vst.msk [vmem:[#allocation3 + $0x70] sm:$0xff] %vm3100_vm15, %v3033_v39  ;;  %3410 = vrot.lane.b32.xlu1 %v10055_v55, %s7287_s21 }
 0x443   : > { %3408 = vrot.lane.b32.xlu0 %v10058_v10, %s7287_s21 }
 0x444   : > { %v3039_v30 = vpop.permute.xlu1 %3038 }
 0x445   : > { %v3037_v62 = vpop.permute.xlu0 %3036  ;;  %3118 = vst.msk [vmem:[#allocation3 + $0x88] sm:$0xff] %vm3100_vm15, %v3039_v30  ;;  %v10109_v30 = vld [vmem:[%s7994_s10 + $0x230] sm:$0xff] }
 0x446   : > { %3117 = vst.msk [vmem:[#allocation3 + $0x80] sm:$0xff] %vm3100_vm15, %v3037_v62  ;;  %3414 = vrot.lane.b32.xlu1 %v10067_v44, %s7287_s21 }
 0x447   : > { %3412 = vrot.lane.b32.xlu0 %v10070_v3, %s7287_s21 }
 0x448   : > { %v3043_v35 = vpop.permute.xlu1 %3042 }
 0x449   : > { %v3041_v6 = vpop.permute.xlu0 %3040  ;;  %3120 = vst.msk [vmem:[#allocation3 + $0x98] sm:$0xff] %vm3100_vm15, %v3043_v35 }
 0x44a   : > { %3119 = vst.msk [vmem:[#allocation3 + $0x90] sm:$0xff] %vm3100_vm15, %v3041_v6  ;;  %3418 = vrot.lane.b32.xlu1 %v10079_v38, %s7287_s21  ;;  %v10121_v6 = vld [vmem:[%s7994_s10 + $0x250] sm:$0xff] }
 0x44b   : > { %3416 = vrot.lane.b32.xlu0 %v10082_v19, %s7287_s21 }
 0x44c   : > { %v3047_v45 = vpop.permute.xlu1 %3046 }
 0x44d   : > { %v3045_v41 = vpop.permute.xlu0 %3044  ;;  %3122 = vst.msk [vmem:[#allocation3 + $0xa8] sm:$0xff] %vm3100_vm15, %v3047_v45 }
 0x44e   : > { %3121 = vst.msk [vmem:[#allocation3 + $0xa0] sm:$0xff] %vm3100_vm15, %v3045_v41  ;;  %3422 = vrot.lane.b32.xlu1 %v6534_v4, %s7287_s21  ;;  %v10124_v4 = vld [vmem:[%s7994_s10 + $0x240] sm:$0xff] }
 0x44f   : > { %3420 = vrot.lane.b32.xlu0 %v9644_v53, %s7287_s21  ;;  %v10112_v53 = vld [vmem:[%s7994_s10 + $0x220] sm:$0xff]  ;;  %11715 = vst [vmem:[#allocation12_spill] sm:$0xff] %v10124_v4 }
 0x450   : > { %v3051_v2 = vpop.permute.xlu1 %3050 }
 0x451   : > { %v3049_v39 = vpop.permute.xlu0 %3048  ;;  %3124 = vst.msk [vmem:[#allocation3 + $0xb8] sm:$0xff] %vm3100_vm15, %v3051_v2  ;;  %v6542_v2 = vld [vmem:[%s7994_s10 + $0x270] sm:$0xff] }
 0x452   : > { %3123 = vst.msk [vmem:[#allocation3 + $0xb0] sm:$0xff] %vm3100_vm15, %v3049_v39  ;;  %3426 = vrot.lane.b32.xlu1 %v10097_v43, %s7287_s21 }
 0x453   : > { %3424 = vrot.lane.b32.xlu0 %v10100_v1, %s7287_s21 }
 0x454   : > { %v3055_v62 = vpop.permute.xlu1 %3054 }
 0x455   : > { %v3053_v35 = vpop.permute.xlu0 %3052  ;;  %3126 = vst.msk [vmem:[#allocation3 + $0xc8] sm:$0xff] %vm3100_vm15, %v3055_v62 }
 0x456   : > { %3125 = vst.msk [vmem:[#allocation3 + $0xc0] sm:$0xff] %vm3100_vm15, %v3053_v35  ;;  %3430 = vrot.lane.b32.xlu1 %v10109_v30, %s7287_s21  ;;  %v10139_v35 = vld [vmem:[%s7994_s10 + $0x2b0] sm:$0xff] }
 0x457   : > { %3428 = vrot.lane.b32.xlu0 %v10112_v53, %s7287_s21  ;;  %11716 = vst [vmem:[#allocation16_spill] sm:$0xff] %v10139_v35 }
 0x458   : > { %v3059_v45 = vpop.permute.xlu1 %3058 }
 0x459   : > { %v3057_v41 = vpop.permute.xlu0 %3056  ;;  %3128 = vst.msk [vmem:[#allocation3 + $0xd8] sm:$0xff] %vm3100_vm15, %v3059_v45  ;;  %v10142_v45 = vld [vmem:[%s7994_s10 + $0x2a0] sm:$0xff] }
 0x45a   : > { %3127 = vst.msk [vmem:[#allocation3 + $0xd0] sm:$0xff] %vm3100_vm15, %v3057_v41  ;;  %3434 = vrot.lane.b32.xlu1 %v10121_v6, %s7287_s21  ;;  %11717 = vst [vmem:[#allocation14_spill] sm:$0xff] %v10142_v45 }
 0x45b   : > { %3432 = vrot.lane.b32.xlu0 %v10124_v4, %s7287_s21 }
 0x45c   : > { %v3063_v39 = vpop.permute.xlu1 %3062 }
 0x45d   : > { %v3061_v62 = vpop.permute.xlu0 %3060  ;;  %3130 = vst.msk [vmem:[#allocation3 + $0xe8] sm:$0xff] %vm3100_vm15, %v3063_v39 }
 0x45e   : > { %3129 = vst.msk [vmem:[#allocation3 + $0xe0] sm:$0xff] %vm3100_vm15, %v3061_v62  ;;  %3438 = vrot.lane.b32.xlu1 %v6542_v2, %s7287_s21  ;;  %v10154_v2 = vld [vmem:[%s7994_s10 + $0x2c0] sm:$0xff] }
 0x45f   : > { %3436 = vrot.lane.b32.xlu0 %v9671_v7, %s7287_s21  ;;  %v10151_v7 = vld [vmem:[%s7994_s10 + $0x2d0] sm:$0xff] }
 0x460   : > { %v3067_v41 = vpop.permute.xlu1 %3066  ;;  %11718 = vst [vmem:[#allocation18_spill] sm:$0xff] %v10151_v7 }
 0x461   : > { %v3065_v4 = vpop.permute.xlu0 %3064  ;;  %3132 = vst.msk [vmem:[#allocation3 + $0xf8] sm:$0xff] %vm3100_vm15, %v3067_v41  ;;  %v10166_v41 = vld [vmem:[%s7994_s10 + $0x2e0] sm:$0xff] }
 0x462   : > { %3131 = vst.msk [vmem:[#allocation3 + $0xf0] sm:$0xff] %vm3100_vm15, %v3065_v4  ;;  %3442 = vrot.lane.b32.xlu1 %v10139_v35, %s7287_s21  ;;  %v10163_v4 = vld [vmem:[%s7994_s10 + $0x2f0] sm:$0xff] }
 0x463   : > { %3440 = vrot.lane.b32.xlu0 %v10142_v45, %s7287_s21 }
 0x464   : > { %v3200_v39 = vpop.permute.xlu1 %3199 }
 0x465   : > { %v3198_v62 = vpop.permute.xlu0 %3197  ;;  %3295 = vst.msk [vmem:[#allocation3 + $0x8] sm:$0xff] %vm3293_vm0, %v3200_v39  ;;  %v6550_v39 = vld [vmem:[%s7994_s10 + $0x310] sm:$0xff] }
 0x466   : > { %3294 = vst.msk [vmem:[#allocation3] sm:$0xff] %vm3293_vm0, %v3198_v62  ;;  %3446 = vrot.lane.b32.xlu1 %v10151_v7, %s7287_s21 }
 0x467   : > { %3444 = vrot.lane.b32.xlu0 %v10154_v2, %s7287_s21 }
 0x468   : > { %v3204_v45 = vpop.permute.xlu1 %3203 }
 0x469   : > { %v3202_v35 = vpop.permute.xlu0 %3201  ;;  %3297 = vst.msk [vmem:[#allocation3 + $0x18] sm:$0xff] %vm3293_vm0, %v3204_v45 }
 0x46a   : > { %3296 = vst.msk [vmem:[#allocation3 + $0x10] sm:$0xff] %vm3293_vm0, %v3202_v35  ;;  %3450 = vrot.lane.b32.xlu1 %v10163_v4, %s7287_s21 }
 0x46b   : > { %3448 = vrot.lane.b32.xlu0 %v10166_v41, %s7287_s21 }
 0x46c   : > { %v3208_v62 = vpop.permute.xlu1 %3207 }
 0x46d   : > { %v3206_v7 = vpop.permute.xlu0 %3205  ;;  %3299 = vst.msk [vmem:[#allocation3 + $0x28] sm:$0xff] %vm3293_vm0, %v3208_v62 }
 0x46e   : > { %3298 = vst.msk [vmem:[#allocation3 + $0x20] sm:$0xff] %vm3293_vm0, %v3206_v7  ;;  %3454 = vrot.lane.b32.xlu1 %v6550_v39, %s7287_s21 }
 0x46f   : > { %3452 = vrot.lane.b32.xlu0 %v9698_v0, %s7287_s21 }
 0x470   : > { %v3212_v45 = vpop.permute.xlu1 %3211 }
 0x471   : > { %v3210_v35 = vpop.permute.xlu0 %3209  ;;  %3301 = vst.msk [vmem:[#allocation3 + $0x38] sm:$0xff] %vm3293_vm0, %v3212_v45 }
 0x472   : > { %3300 = vst.msk [vmem:[#allocation3 + $0x30] sm:$0xff] %vm3293_vm0, %v3210_v35  ;;  %3587 = vrot.lane.b32.xlu1 %v9719_v17, %s7288_s24 }
 0x473   : > { %3585 = vrot.lane.b32.xlu0 %v9707_v25, %s7288_s24  ;;  %v6558_v25 = vld [vmem:[%s7994_s10 + $0x131] sm:$0xff] }
 0x474   : > { %v3216_v7 = vpop.permute.xlu1 %3215 }
 0x475   : > { %v3214_v62 = vpop.permute.xlu0 %3213  ;;  %3303 = vst.msk [vmem:[#allocation3 + $0x48] sm:$0xff] %vm3293_vm0, %v3216_v7 }
 0x476   : > { %3302 = vst.msk [vmem:[#allocation3 + $0x40] sm:$0xff] %vm3293_vm0, %v3214_v62  ;;  %3591 = vrot.lane.b32.xlu1 %v9731_v50, %s7288_s24 }
 0x477   : > { %3589 = vrot.lane.b32.xlu0 %v9716_v13, %s7288_s24 }
 0x478   : > { %v3220_v0 = vpop.permute.xlu1 %3219 }
 0x479   : > { %v3218_v39 = vpop.permute.xlu0 %3217  ;;  %3305 = vst.msk [vmem:[#allocation3 + $0x58] sm:$0xff] %vm3293_vm0, %v3220_v0 }
 0x47a   : > { %3304 = vst.msk [vmem:[#allocation3 + $0x50] sm:$0xff] %vm3293_vm0, %v3218_v39  ;;  %3595 = vrot.lane.b32.xlu1 %v9743_v29, %s7288_s24  ;;  %v10268_v39 = vld [vmem:[%s7994_s10 + $0x2c1] sm:$0xff] }
 0x47b   : > { %3593 = vrot.lane.b32.xlu0 %v9728_v28, %s7288_s24 }
 0x47c   : > { %v3224_v17 = vpop.permute.xlu1 %3223 }
 0x47d   : > { %v3222_v45 = vpop.permute.xlu0 %3221  ;;  %3307 = vst.msk [vmem:[#allocation3 + $0x68] sm:$0xff] %vm3293_vm0, %v3224_v17 }
 0x47e   : > { %3306 = vst.msk [vmem:[#allocation3 + $0x60] sm:$0xff] %vm3293_vm0, %v3222_v45  ;;  %3599 = vrot.lane.b32.xlu1 %v6558_v25, %s7288_s24  ;;  %v10277_v45 = vld [vmem:[%s7994_s10 + $0x2f1] sm:$0xff] }
 0x47f   : > { %3597 = vrot.lane.b32.xlu0 %v9740_v23, %s7288_s24 }
 0x480   : > { %v3228_v13 = vpop.permute.xlu1 %3227 }
 0x481   : > { %v3226_v50 = vpop.permute.xlu0 %3225  ;;  %3309 = vst.msk [vmem:[#allocation3 + $0x78] sm:$0xff] %vm3293_vm0, %v3228_v13  ;;  %v10280_v13 = vld [vmem:[%s7994_s10 + $0x2e1] sm:$0xff] }
 0x482   : > { %3308 = vst.msk [vmem:[#allocation3 + $0x70] sm:$0xff] %vm3293_vm0, %v3226_v50  ;;  %3603 = vrot.lane.b32.xlu1 %v9764_v18, %s7288_s24 }
 0x483   : > { %3601 = vrot.lane.b32.xlu0 %v9752_v11, %s7288_s24  ;;  %v6566_v11 = vld [vmem:[%s7994_s10 + $0x1d1] sm:$0xff] }
 0x484   : > { %v3232_v28 = vpop.permute.xlu1 %3231 }
 0x485   : > { %v3230_v29 = vpop.permute.xlu0 %3229  ;;  %3311 = vst.msk [vmem:[#allocation3 + $0x88] sm:$0xff] %vm3293_vm0, %v3232_v28 }
 0x486   : > { %3310 = vst.msk [vmem:[#allocation3 + $0x80] sm:$0xff] %vm3293_vm0, %v3230_v29  ;;  %3607 = vrot.lane.b32.xlu1 %v9776_v60, %s7288_s24  ;;  %v6582_v29 = vld [vmem:[%s7994_s10 + $0x311] sm:$0xff] }
 0x487   : > { %3605 = vrot.lane.b32.xlu0 %v9761_v26, %s7288_s24 }
 0x488   : > { %v3236_v23 = vpop.permute.xlu1 %3235 }
 0x489   : > { %v3234_v35 = vpop.permute.xlu0 %3233  ;;  %3313 = vst.msk [vmem:[#allocation3 + $0x98] sm:$0xff] %vm3293_vm0, %v3236_v23 }
 0x48a   : > { %3312 = vst.msk [vmem:[#allocation3 + $0x90] sm:$0xff] %vm3293_vm0, %v3234_v35  ;;  %3611 = vrot.lane.b32.xlu1 %v9788_v49, %s7288_s24 }
 0x48b   : > { %3609 = vrot.lane.b32.xlu0 %v9773_v63, %s7288_s24 }
 0x48c   : > { %v3240_v18 = vpop.permute.xlu1 %3239 }
 0x48d   : > { %v3238_v7 = vpop.permute.xlu0 %3237  ;;  %3315 = vst.msk [vmem:[#allocation3 + $0xa8] sm:$0xff] %vm3293_vm0, %v3240_v18 }
 0x48e   : > { %3314 = vst.msk [vmem:[#allocation3 + $0xa0] sm:$0xff] %vm3293_vm0, %v3238_v7  ;;  %3615 = vrot.lane.b32.xlu1 %v6566_v11, %s7288_s24 }
 0x48f   : > { %3613 = vrot.lane.b32.xlu0 %v9785_v54, %s7288_s24 }
 0x490   : > { %v3244_v26 = vpop.permute.xlu1 %3243 }
 0x491   : > { %v3242_v60 = vpop.permute.xlu0 %3241  ;;  %3317 = vst.msk [vmem:[#allocation3 + $0xb8] sm:$0xff] %vm3293_vm0, %v3244_v26 }
 0x492   : > { %3316 = vst.msk [vmem:[#allocation3 + $0xb0] sm:$0xff] %vm3293_vm0, %v3242_v60  ;;  %3619 = vrot.lane.b32.xlu1 %v9809_v58, %s7288_s24 }
 0x493   : > { %3617 = vrot.lane.b32.xlu0 %v9797_v34, %s7288_s24  ;;  %v6574_v34 = vld [vmem:[%s7994_s10 + $0x271] sm:$0xff] }
 0x494   : > { %v3248_v63 = vpop.permute.xlu1 %3247 }
 0x495   : > { %v3246_v49 = vpop.permute.xlu0 %3245  ;;  %3319 = vst.msk [vmem:[#allocation3 + $0xc8] sm:$0xff] %vm3293_vm0, %v3248_v63 }
 0x496   : > { %3318 = vst.msk [vmem:[#allocation3 + $0xc0] sm:$0xff] %vm3293_vm0, %v3246_v49  ;;  %3623 = vrot.lane.b32.xlu1 %v9821_v20, %s7288_s24 }
 0x497   : > { %3621 = vrot.lane.b32.xlu0 %v9806_v46, %s7288_s24  ;;  %v10253_v46 = vld [vmem:[%s7994_s10 + $0x2b1] sm:$0xff] }
 0x498   : > { %v3252_v54 = vpop.permute.xlu1 %3251 }
 0x499   : > { %v3250_v62 = vpop.permute.xlu0 %3249  ;;  %3321 = vst.msk [vmem:[#allocation3 + $0xd8] sm:$0xff] %vm3293_vm0, %v3252_v54 }
 0x49a   : > { %3320 = vst.msk [vmem:[#allocation3 + $0xd0] sm:$0xff] %vm3293_vm0, %v3250_v62  ;;  %3627 = vrot.lane.b32.xlu1 %v9833_v51, %s7288_s24  ;;  %v10256_v51 = vld [vmem:[%s7994_s10 + $0x2a1] sm:$0xff] }
 0x49b   : > { %3625 = vrot.lane.b32.xlu0 %v9818_v37, %s7288_s24 }
 0x49c   : > { %v3256_v58 = vpop.permute.xlu1 %3255 }
 0x49d   : > { %v3254_v20 = vpop.permute.xlu0 %3253  ;;  %3323 = vst.msk [vmem:[#allocation3 + $0xe8] sm:$0xff] %vm3293_vm0, %v3256_v58  ;;  %v10382_v58 = vld [vmem:[%s7994_s10 + $0x2c2] sm:$0xff] }
 0x49e   : > { %3322 = vst.msk [vmem:[#allocation3 + $0xe0] sm:$0xff] %vm3293_vm0, %v3254_v20  ;;  %3631 = vrot.lane.b32.xlu1 %v6574_v34, %s7288_s24 }
 0x49f   : > { %3629 = vrot.lane.b32.xlu0 %v9830_v31, %s7288_s24  ;;  %v10265_v31 = vld [vmem:[%s7994_s10 + $0x2d1] sm:$0xff] }
 0x4a0   : > { %v3260_v37 = vpop.permute.xlu1 %3259 }
 0x4a1   : > { %v3258_v0 = vpop.permute.xlu0 %3257  ;;  %3325 = vst.msk [vmem:[#allocation3 + $0xf8] sm:$0xff] %vm3293_vm0, %v3260_v37 }
 0x4a2   : > { %3324 = vst.msk [vmem:[#allocation3 + $0xf0] sm:$0xff] %vm3293_vm0, %v3258_v0  ;;  %3635 = vrot.lane.b32.xlu1 %v10253_v46, %s7288_s24  ;;  %v10391_v0 = vld [vmem:[%s7994_s10 + $0x2f2] sm:$0xff] }
 0x4a3   : > { %3633 = vrot.lane.b32.xlu0 %v10256_v51, %s7288_s24 }
 0x4a4   : > { %v3395_v25 = vpop.permute.xlu1 %3394 }
 0x4a5   : > { %v3393_v17 = vpop.permute.xlu0 %3392  ;;  %3490 = vst.msk [vmem:[#allocation3 + $0x8] sm:$0xff] %vm3488_vm1, %v3395_v25  ;;  %v10394_v25 = vld [vmem:[%s7994_s10 + $0x2e2] sm:$0xff] }
 0x4a6   : > { %3489 = vst.msk [vmem:[#allocation3] sm:$0xff] %vm3488_vm1, %v3393_v17  ;;  %3639 = vrot.lane.b32.xlu1 %v10265_v31, %s7288_s24 }
 0x4a7   : > { %3637 = vrot.lane.b32.xlu0 %v10268_v39, %s7288_s24 }
 0x4a8   : > { %v3399_v50 = vpop.permute.xlu1 %3398 }
 0x4a9   : > { %v3397_v28 = vpop.permute.xlu0 %3396  ;;  %3492 = vst.msk [vmem:[#allocation3 + $0x18] sm:$0xff] %vm3488_vm1, %v3399_v50 }
 0x4aa   : > { %3491 = vst.msk [vmem:[#allocation3 + $0x10] sm:$0xff] %vm3488_vm1, %v3397_v28  ;;  %3643 = vrot.lane.b32.xlu1 %v10277_v45, %s7288_s24  ;;  %v6614_v28 = vld [vmem:[%s7994_s10 + $0x312] sm:$0xff] }
 0x4ab   : > { %3641 = vrot.lane.b32.xlu0 %v10280_v13, %s7288_s24 }
 0x4ac   : > { %v3403_v23 = vpop.permute.xlu1 %3402 }
 0x4ad   : > { %v3401_v35 = vpop.permute.xlu0 %3400  ;;  %3494 = vst.msk [vmem:[#allocation3 + $0x28] sm:$0xff] %vm3488_vm1, %v3403_v23 }
 0x4ae   : > { %3493 = vst.msk [vmem:[#allocation3 + $0x20] sm:$0xff] %vm3488_vm1, %v3401_v35  ;;  %3647 = vrot.lane.b32.xlu1 %v6582_v29, %s7288_s24  ;;  %v10409_v35 = vld [vmem:[%s7994_s10 + $0x150] sm:$0xff] }
 0x4af   : > { %3645 = vrot.lane.b32.xlu0 %v9860_v12, %s7288_s24 }
 0x4b0   : > { %v3407_v11 = vpop.permute.xlu1 %3406 }
 0x4b1   : > { %v3405_v18 = vpop.permute.xlu0 %3404  ;;  %3496 = vst.msk [vmem:[#allocation3 + $0x38] sm:$0xff] %vm3488_vm1, %v3407_v11  ;;  %v6617_v11 = vld [vmem:[%s7994_s10 + $0x140] sm:$0xff] }
 0x4b2   : > { %3495 = vst.msk [vmem:[#allocation3 + $0x30] sm:$0xff] %vm3488_vm1, %v3405_v18  ;;  %3780 = vrot.lane.b32.xlu1 %v9881_v21, %s7289_s27 }
 0x4b3   : > { %3778 = vrot.lane.b32.xlu0 %v9869_v42, %s7289_s27  ;;  %v6590_v42 = vld [vmem:[%s7994_s10 + $0x132] sm:$0xff] }
 0x4b4   : > { %v3411_v7 = vpop.permute.xlu1 %3410 }
 0x4b5   : > { %v3409_v26 = vpop.permute.xlu0 %3408  ;;  %3498 = vst.msk [vmem:[#allocation3 + $0x48] sm:$0xff] %vm3488_vm1, %v3411_v7 }
 0x4b6   : > { %3497 = vst.msk [vmem:[#allocation3 + $0x40] sm:$0xff] %vm3488_vm1, %v3409_v26  ;;  %3784 = vrot.lane.b32.xlu1 %v9893_v59, %s7289_s27 }
 0x4b7   : > { %3782 = vrot.lane.b32.xlu0 %v9878_v14, %s7289_s27 }
 0x4b8   : > { %v3415_v12 = vpop.permute.xlu1 %3414 }
 0x4b9   : > { %v3413_v60 = vpop.permute.xlu0 %3412  ;;  %3500 = vst.msk [vmem:[#allocation3 + $0x58] sm:$0xff] %vm3488_vm1, %v3415_v12 }
 0x4ba   : > { %3499 = vst.msk [vmem:[#allocation3 + $0x50] sm:$0xff] %vm3488_vm1, %v3413_v60  ;;  %3788 = vrot.lane.b32.xlu1 %v9905_v48, %s7289_s27 }
 0x4bb   : > { %3786 = vrot.lane.b32.xlu0 %v9890_v47, %s7289_s27 }
 0x4bc   : > { %v3419_v21 = vpop.permute.xlu1 %3418 }
 0x4bd   : > { %v3417_v63 = vpop.permute.xlu0 %3416  ;;  %3502 = vst.msk [vmem:[#allocation3 + $0x68] sm:$0xff] %vm3488_vm1, %v3419_v21 }
 0x4be   : > { %3501 = vst.msk [vmem:[#allocation3 + $0x60] sm:$0xff] %vm3488_vm1, %v3417_v63  ;;  %3792 = vrot.lane.b32.xlu1 %v6590_v42, %s7289_s27 }
 0x4bf   : > { %3790 = vrot.lane.b32.xlu0 %v9902_v16, %s7289_s27 }
 0x4c0   : > { %v3423_v14 = vpop.permute.xlu1 %3422 }
 0x4c1   : > { %v3421_v59 = vpop.permute.xlu0 %3420  ;;  %3504 = vst.msk [vmem:[#allocation3 + $0x78] sm:$0xff] %vm3488_vm1, %v3423_v14 }
 0x4c2   : > { %3503 = vst.msk [vmem:[#allocation3 + $0x70] sm:$0xff] %vm3488_vm1, %v3421_v59  ;;  %3796 = vrot.lane.b32.xlu1 %v9926_v5, %s7289_s27 }
 0x4c3   : > { %3794 = vrot.lane.b32.xlu0 %v9914_v22, %s7289_s27  ;;  %v6598_v22 = vld [vmem:[%s7994_s10 + $0x1d2] sm:$0xff] }
 0x4c4   : > { %v3427_v47 = vpop.permute.xlu1 %3426 }
 0x4c5   : > { %v3425_v48 = vpop.permute.xlu0 %3424  ;;  %3506 = vst.msk [vmem:[#allocation3 + $0x88] sm:$0xff] %vm3488_vm1, %v3427_v47 }
 0x4c6   : > { %3505 = vst.msk [vmem:[#allocation3 + $0x80] sm:$0xff] %vm3488_vm1, %v3425_v48  ;;  %3800 = vrot.lane.b32.xlu1 %v9938_v61, %s7289_s27  ;;  %v6633_v48 = vld [vmem:[%s7994_s10 + $0x280] sm:$0xff] }
 0x4c7   : > { %3798 = vrot.lane.b32.xlu0 %v9923_v15, %s7289_s27 }
 0x4c8   : > { %v3431_v16 = vpop.permute.xlu1 %3430 }
 0x4c9   : > { %v3429_v49 = vpop.permute.xlu0 %3428  ;;  %3508 = vst.msk [vmem:[#allocation3 + $0x98] sm:$0xff] %vm3488_vm1, %v3431_v16 }
 0x4ca   : > { %3507 = vst.msk [vmem:[#allocation3 + $0x90] sm:$0xff] %vm3488_vm1, %v3429_v49  ;;  %3804 = vrot.lane.b32.xlu1 %v9950_v40, %s7289_s27 }
 0x4cb   : > { %3802 = vrot.lane.b32.xlu0 %v9935_v33, %s7289_s27 }
 0x4cc   : > { %v3435_v5 = vpop.permute.xlu1 %3434 }
 0x4cd   : > { %v3433_v54 = vpop.permute.xlu0 %3432  ;;  %3510 = vst.msk [vmem:[#allocation3 + $0xa8] sm:$0xff] %vm3488_vm1, %v3435_v5 }
 0x4ce   : > { %3509 = vst.msk [vmem:[#allocation3 + $0xa0] sm:$0xff] %vm3488_vm1, %v3433_v54  ;;  %3808 = vrot.lane.b32.xlu1 %v6598_v22, %s7289_s27  ;;  %v11721_v22 = vld [vmem:[#allocation14_spill] sm:$0xff] }
 0x4cf   : > { %3806 = vrot.lane.b32.xlu0 %v9947_v27, %s7289_s27 }
 0x4d0   : > { %v3439_v15 = vpop.permute.xlu1 %3438 }
 0x4d1   : > { %v3437_v61 = vpop.permute.xlu0 %3436  ;;  %3512 = vst.msk [vmem:[#allocation3 + $0xb8] sm:$0xff] %vm3488_vm1, %v3439_v15  ;;  %v11722_v15 = vld [vmem:[#allocation18_spill] sm:$0xff] }
 0x4d2   : > { %3511 = vst.msk [vmem:[#allocation3 + $0xb0] sm:$0xff] %vm3488_vm1, %v3437_v61  ;;  %3812 = vrot.lane.b32.xlu1 %v9971_v36, %s7289_s27 }
 0x4d3   : > { %3810 = vrot.lane.b32.xlu0 %v9959_v56, %s7289_s27  ;;  %v6606_v56 = vld [vmem:[%s7994_s10 + $0x272] sm:$0xff] }
 0x4d4   : > { %v3443_v33 = vpop.permute.xlu1 %3442 }
 0x4d5   : > { %v3441_v40 = vpop.permute.xlu0 %3440  ;;  %3514 = vst.msk [vmem:[#allocation3 + $0xc8] sm:$0xff] %vm3488_vm1, %v3443_v33 }
 0x4d6   : > { %3513 = vst.msk [vmem:[#allocation3 + $0xc0] sm:$0xff] %vm3488_vm1, %v3441_v40  ;;  %3816 = vrot.lane.b32.xlu1 %v9983_v32, %s7289_s27  ;;  %v10490_v40 = vld [vmem:[%s7994_s10 + $0x330] sm:$0xff] }
 0x4d7   : > { %3814 = vrot.lane.b32.xlu0 %v9968_v52, %s7289_s27  ;;  %v10367_v52 = vld [vmem:[%s7994_s10 + $0x2b2] sm:$0xff] }
 0x4d8   : > { %v3447_v27 = vpop.permute.xlu1 %3446 }
 0x4d9   : > { %v3445_v62 = vpop.permute.xlu0 %3444  ;;  %3516 = vst.msk [vmem:[#allocation3 + $0xd8] sm:$0xff] %vm3488_vm1, %v3447_v27  ;;  %v6641_v27 = vld [vmem:[%s7994_s10 + $0x320] sm:$0xff] }
 0x4da   : > { %3515 = vst.msk [vmem:[#allocation3 + $0xd0] sm:$0xff] %vm3488_vm1, %v3445_v62  ;;  %3820 = vrot.lane.b32.xlu1 %v9995_v9, %s7289_s27  ;;  %v10370_v9 = vld [vmem:[%s7994_s10 + $0x2a2] sm:$0xff] }
 0x4db   : > { %3818 = vrot.lane.b32.xlu0 %v9980_v24, %s7289_s27 }
 0x4dc   : > { %v3451_v36 = vpop.permute.xlu1 %3450 }
 0x4dd   : > { %v3449_v32 = vpop.permute.xlu0 %3448  ;;  %3518 = vst.msk [vmem:[#allocation3 + $0xe8] sm:$0xff] %vm3488_vm1, %v3451_v36 }
 0x4de   : > { %3517 = vst.msk [vmem:[#allocation3 + $0xe0] sm:$0xff] %vm3488_vm1, %v3449_v32  ;;  %3824 = vrot.lane.b32.xlu1 %v6606_v56, %s7289_s27  ;;  %v10511_v32 = vld [vmem:[%s7994_s10 + $0x370] sm:$0xff] }
 0x4df   : > { %3822 = vrot.lane.b32.xlu0 %v9992_v8, %s7289_s27  ;;  %v10379_v8 = vld [vmem:[%s7994_s10 + $0x2d2] sm:$0xff] }
 0x4e0   : > { %v3455_v24 = vpop.permute.xlu1 %3454 }
 0x4e1   : > { %v3453_v34 = vpop.permute.xlu0 %3452  ;;  %3520 = vst.msk [vmem:[#allocation3 + $0xf8] sm:$0xff] %vm3488_vm1, %v3455_v24  ;;  %v10514_v24 = vld [vmem:[%s7994_s10 + $0x360] sm:$0xff] }
 0x4e2   : > { %3519 = vst.msk [vmem:[#allocation3 + $0xf0] sm:$0xff] %vm3488_vm1, %v3453_v34  ;;  %3828 = vrot.lane.b32.xlu1 %v10367_v52, %s7289_s27 }
 0x4e3   : > { %3826 = vrot.lane.b32.xlu0 %v10370_v9, %s7289_s27 }
 0x4e4   : > { %v3588_v20 = vpop.permute.xlu1 %3587 }
 0x4e5   : > { %v3586_v37 = vpop.permute.xlu0 %3585  ;;  %3683 = vst.msk [vmem:[#allocation3 + $0x8] sm:$0xff] %vm3681_vm2, %v3588_v20 }
 0x4e6   : > { %3682 = vst.msk [vmem:[#allocation3] sm:$0xff] %vm3681_vm2, %v3586_v37  ;;  %3832 = vrot.lane.b32.xlu1 %v10379_v8, %s7289_s27  ;;  %v10523_v37 = vld [vmem:[%s7994_s10 + $0x390] sm:$0xff] }
 0x4e7   : > { %3830 = vrot.lane.b32.xlu0 %v10382_v58, %s7289_s27 }
 0x4e8   : > { %v3592_v17 = vpop.permute.xlu1 %3591 }
 0x4e9   : > { %v3590_v50 = vpop.permute.xlu0 %3589  ;;  %3685 = vst.msk [vmem:[#allocation3 + $0x18] sm:$0xff] %vm3681_vm2, %v3592_v17  ;;  %v10526_v17 = vld [vmem:[%s7994_s10 + $0x380] sm:$0xff] }
 0x4ea   : > { %3684 = vst.msk [vmem:[#allocation3 + $0x10] sm:$0xff] %vm3681_vm2, %v3590_v50  ;;  %3836 = vrot.lane.b32.xlu1 %v10391_v0, %s7289_s27 }
 0x4eb   : > { %3834 = vrot.lane.b32.xlu0 %v10394_v25, %s7289_s27 }
 0x4ec   : > { %v3596_v29 = vpop.permute.xlu1 %3595 }
 0x4ed   : > { %v3594_v23 = vpop.permute.xlu0 %3593  ;;  %3687 = vst.msk [vmem:[#allocation3 + $0x28] sm:$0xff] %vm3681_vm2, %v3596_v29  ;;  %v10535_v29 = vld [vmem:[%s7994_s10 + $0x151] sm:$0xff] }
 0x4ee   : > { %3686 = vst.msk [vmem:[#allocation3 + $0x20] sm:$0xff] %vm3681_vm2, %v3594_v23  ;;  %3840 = vrot.lane.b32.xlu1 %v6614_v28, %s7289_s27  ;;  %v6649_v23 = vld [vmem:[%s7994_s10 + $0x141] sm:$0xff] }
 0x4ef   : > { %3838 = vrot.lane.b32.xlu0 %v10022_v57, %s7289_s27 }
 0x4f0   : > { %v3600_v18 = vpop.permute.xlu1 %3599 }
 0x4f1   : > { %v3598_v7 = vpop.permute.xlu0 %3597  ;;  %3689 = vst.msk [vmem:[#allocation3 + $0x38] sm:$0xff] %vm3681_vm2, %v3600_v18 }
 0x4f2   : > { %3688 = vst.msk [vmem:[#allocation3 + $0x30] sm:$0xff] %vm3681_vm2, %v3598_v7  ;;  %3976 = vrot.lane.b32.xlu1 %v10409_v35, %s7290_s28  ;;  %v10544_v7 = vld [vmem:[%s7994_s10 + $0x171] sm:$0xff] }
 0x4f3   : > { %3974 = vrot.lane.b32.xlu0 %v6617_v11, %s7290_s28 }
 0x4f4   : > { %v3604_v26 = vpop.permute.xlu1 %3603 }
 0x4f5   : > { %v3602_v12 = vpop.permute.xlu0 %3601  ;;  %3691 = vst.msk [vmem:[#allocation3 + $0x48] sm:$0xff] %vm3681_vm2, %v3604_v26  ;;  %v10547_v26 = vld [vmem:[%s7994_s10 + $0x161] sm:$0xff] }
 0x4f6   : > { %3690 = vst.msk [vmem:[#allocation3 + $0x40] sm:$0xff] %vm3681_vm2, %v3602_v12  ;;  %3980 = vrot.lane.b32.xlu1 %v10055_v55, %s7290_s28  ;;  %v10436_v55 = vld [vmem:[%s7994_s10 + $0x1f0] sm:$0xff] }
 0x4f7   : > { %3978 = vrot.lane.b32.xlu0 %v10058_v10, %s7290_s28  ;;  %v6625_v10 = vld [vmem:[%s7994_s10 + $0x1e0] sm:$0xff] }
 0x4f8   : > { %v3608_v57 = vpop.permute.xlu1 %3607 }
 0x4f9   : > { %v3606_v60 = vpop.permute.xlu0 %3605  ;;  %3693 = vst.msk [vmem:[#allocation3 + $0x58] sm:$0xff] %vm3681_vm2, %v3608_v57 }
 0x4fa   : > { %3692 = vst.msk [vmem:[#allocation3 + $0x50] sm:$0xff] %vm3681_vm2, %v3606_v60  ;;  %3984 = vrot.lane.b32.xlu1 %v10067_v44, %s7290_s28  ;;  %v10556_v60 = vld [vmem:[%s7994_s10 + $0x191] sm:$0xff] }
 0x4fb   : > { %3982 = vrot.lane.b32.xlu0 %v10070_v3, %s7290_s28 }
 0x4fc   : > { %v3612_v42 = vpop.permute.xlu1 %3611 }
 0x4fd   : > { %v3610_v21 = vpop.permute.xlu0 %3609  ;;  %3695 = vst.msk [vmem:[#allocation3 + $0x68] sm:$0xff] %vm3681_vm2, %v3612_v42  ;;  %v10559_v42 = vld [vmem:[%s7994_s10 + $0x181] sm:$0xff] }
 0x4fe   : > { %3694 = vst.msk [vmem:[#allocation3 + $0x60] sm:$0xff] %vm3681_vm2, %v3610_v21  ;;  %3988 = vrot.lane.b32.xlu1 %v10079_v38, %s7290_s28 }
 0x4ff   : > { %3986 = vrot.lane.b32.xlu0 %v10082_v19, %s7290_s28 }
 0x500   : > { %v3616_v63 = vpop.permute.xlu1 %3615 }
 0x501   : > { %v3614_v44 = vpop.permute.xlu0 %3613  ;;  %3697 = vst.msk [vmem:[#allocation3 + $0x78] sm:$0xff] %vm3681_vm2, %v3616_v63  ;;  %v10568_v63 = vld [vmem:[%s7994_s10 + $0x1b1] sm:$0xff] }
 0x502   : > { %3696 = vst.msk [vmem:[#allocation3 + $0x70] sm:$0xff] %vm3681_vm2, %v3614_v44  ;;  %3992 = vrot.lane.b32.xlu1 %v10436_v55, %s7290_s28  ;;  %v10571_v44 = vld [vmem:[%s7994_s10 + $0x1a1] sm:$0xff] }
 0x503   : > { %3990 = vrot.lane.b32.xlu0 %v6625_v10, %s7290_s28 }
 0x504   : > { %v3620_v3 = vpop.permute.xlu1 %3619 }
 0x505   : > { %v3618_v14 = vpop.permute.xlu0 %3617  ;;  %3699 = vst.msk [vmem:[#allocation3 + $0x88] sm:$0xff] %vm3681_vm2, %v3620_v3 }
 0x506   : > { %3698 = vst.msk [vmem:[#allocation3 + $0x80] sm:$0xff] %vm3681_vm2, %v3618_v14  ;;  %3996 = vrot.lane.b32.xlu1 %v10097_v43, %s7290_s28  ;;  %v11719_v43 = vld [vmem:[#allocation12_spill] sm:$0xff] }
 0x507   : > { %3994 = vrot.lane.b32.xlu0 %v10100_v1, %s7290_s28  ;;  %v10463_v1 = vld [vmem:[%s7994_s10 + $0x290] sm:$0xff] }
 0x508   : > { %v3624_v38 = vpop.permute.xlu1 %3623 }
 0x509   : > { %v3622_v19 = vpop.permute.xlu0 %3621  ;;  %3701 = vst.msk [vmem:[#allocation3 + $0x98] sm:$0xff] %vm3681_vm2, %v3624_v38  ;;  %v10580_v38 = vld [vmem:[%s7994_s10 + $0x1f1] sm:$0xff] }
 0x50a   : > { %3700 = vst.msk [vmem:[#allocation3 + $0x90] sm:$0xff] %vm3681_vm2, %v3622_v19  ;;  %4000 = vrot.lane.b32.xlu1 %v10109_v30, %s7290_s28  ;;  %v6657_v19 = vld [vmem:[%s7994_s10 + $0x1e1] sm:$0xff] }
 0x50b   : > { %3998 = vrot.lane.b32.xlu0 %v10112_v53, %s7290_s28 }
 0x50c   : > { %v3628_v59 = vpop.permute.xlu1 %3627 }
 0x50d   : > { %v3626_v47 = vpop.permute.xlu0 %3625  ;;  %3703 = vst.msk [vmem:[#allocation3 + $0xa8] sm:$0xff] %vm3681_vm2, %v3628_v59 }
 0x50e   : > { %3702 = vst.msk [vmem:[#allocation3 + $0xa0] sm:$0xff] %vm3681_vm2, %v3626_v47  ;;  %4004 = vrot.lane.b32.xlu1 %v10121_v6, %s7290_s28  ;;  %v11720_v6 = vld [vmem:[#allocation16_spill] sm:$0xff] }
 0x50f   : > { %4002 = vrot.lane.b32.xlu0 %v11719_v43, %s7290_s28  ;;  %v10589_v43 = vld [vmem:[%s7994_s10 + $0x211] sm:$0xff] }
 0x510   : > { %v3632_v16 = vpop.permute.xlu1 %3631 }
 0x511   : > { %v3630_v30 = vpop.permute.xlu0 %3629  ;;  %3705 = vst.msk [vmem:[#allocation3 + $0xb8] sm:$0xff] %vm3681_vm2, %v3632_v16 }
 0x512   : > { %3704 = vst.msk [vmem:[#allocation3 + $0xb0] sm:$0xff] %vm3681_vm2, %v3630_v30  ;;  %4008 = vrot.lane.b32.xlu1 %v10463_v1, %s7290_s28 }
 0x513   : > { %4006 = vrot.lane.b32.xlu0 %v6633_v48, %s7290_s28  ;;  %v10592_v48 = vld [vmem:[%s7994_s10 + $0x201] sm:$0xff] }
 0x514   : > { %v3636_v53 = vpop.permute.xlu1 %3635 }
 0x515   : > { %v3634_v49 = vpop.permute.xlu0 %3633  ;;  %3707 = vst.msk [vmem:[#allocation3 + $0xc8] sm:$0xff] %vm3681_vm2, %v3636_v53  ;;  %v6662_v53 = vld [vmem:[%s7994_s10 + $0x231] sm:$0xff] }
 0x516   : > { %3706 = vst.msk [vmem:[#allocation3 + $0xc0] sm:$0xff] %vm3681_vm2, %v3634_v49  ;;  %4012 = vrot.lane.b32.xlu1 %v11720_v6, %s7290_s28  ;;  %v6661_v49 = vld [vmem:[%s7994_s10 + $0x221] sm:$0xff] }
 0x517   : > { %4010 = vrot.lane.b32.xlu0 %v11721_v22, %s7290_s28 }
 0x518   : > { %v3640_v5 = vpop.permute.xlu1 %3639 }
 0x519   : > { %v3638_v54 = vpop.permute.xlu0 %3637  ;;  %3709 = vst.msk [vmem:[#allocation3 + $0xd8] sm:$0xff] %vm3681_vm2, %v3640_v5  ;;  %v6664_v5 = vld [vmem:[%s7994_s10 + $0x251] sm:$0xff] }
 0x51a   : > { %3708 = vst.msk [vmem:[#allocation3 + $0xd0] sm:$0xff] %vm3681_vm2, %v3638_v54  ;;  %4016 = vrot.lane.b32.xlu1 %v11722_v15, %s7290_s28  ;;  %v6663_v54 = vld [vmem:[%s7994_s10 + $0x241] sm:$0xff] }
 0x51b   : > { %4014 = vrot.lane.b32.xlu0 %v10154_v2, %s7290_s28 }
 0x51c   : > { %v3644_v61 = vpop.permute.xlu1 %3643 }
 0x51d   : > { %v3642_v33 = vpop.permute.xlu0 %3641  ;;  %3711 = vst.msk [vmem:[#allocation3 + $0xe8] sm:$0xff] %vm3681_vm2, %v3644_v61 }
 0x51e   : > { %3710 = vst.msk [vmem:[#allocation3 + $0xe0] sm:$0xff] %vm3681_vm2, %v3642_v33  ;;  %4020 = vrot.lane.b32.xlu1 %v10163_v4, %s7290_s28  ;;  %v10499_v4 = vld [vmem:[%s7994_s10 + $0x350] sm:$0xff] }
 0x51f   : > { %4018 = vrot.lane.b32.xlu0 %v10166_v41, %s7290_s28  ;;  %v10502_v41 = vld [vmem:[%s7994_s10 + $0x340] sm:$0xff]  ;;  %v10613_v33 = vld [vmem:[%s7994_s10 + $0x291] sm:$0xff] }
 0x520   : > { %v3648_v62 = vpop.permute.xlu1 %3647 }
 0x521   : > { %v3646_v2 = vpop.permute.xlu0 %3645  ;;  %3713 = vst.msk [vmem:[#allocation3 + $0xf8] sm:$0xff] %vm3681_vm2, %v3648_v62 }
 0x522   : > { %3712 = vst.msk [vmem:[#allocation3 + $0xf0] sm:$0xff] %vm3681_vm2, %v3646_v2  ;;  %4024 = vrot.lane.b32.xlu1 %v10490_v40, %s7290_s28 }
 0x523   : > { %4022 = vrot.lane.b32.xlu0 %v6641_v27, %s7290_s28  ;;  %v6665_v27 = vld [vmem:[%s7994_s10 + $0x281] sm:$0xff] }
 0x524   : > { %v3781_v56 = vpop.permute.xlu1 %3780 }
 0x525   : > { %v3779_v36 = vpop.permute.xlu0 %3778  ;;  %3876 = vst.msk [vmem:[#allocation3 + $0x8] sm:$0xff] %vm3874_vm3, %v3781_v56 }
 0x526   : > { %3875 = vst.msk [vmem:[#allocation3] sm:$0xff] %vm3874_vm3, %v3779_v36  ;;  %4028 = vrot.lane.b32.xlu1 %v10499_v4, %s7290_s28 }
 0x527   : > { %4026 = vrot.lane.b32.xlu0 %v10502_v41, %s7290_s28 }
 0x528   : > { %v3785_v34 = vpop.permute.xlu1 %3784 }
 0x529   : > { %v3783_v20 = vpop.permute.xlu0 %3782  ;;  %3878 = vst.msk [vmem:[#allocation3 + $0x18] sm:$0xff] %vm3874_vm3, %v3785_v34 }
 0x52a   : > { %3877 = vst.msk [vmem:[#allocation3 + $0x10] sm:$0xff] %vm3874_vm3, %v3783_v20  ;;  %4032 = vrot.lane.b32.xlu1 %v10511_v32, %s7290_s28 }
 0x52b   : > { %4030 = vrot.lane.b32.xlu0 %v10514_v24, %s7290_s28 }
 0x52c   : > { %v3789_v50 = vpop.permute.xlu1 %3788 }
 0x52d   : > { %v3787_v28 = vpop.permute.xlu0 %3786  ;;  %3880 = vst.msk [vmem:[#allocation3 + $0x28] sm:$0xff] %vm3874_vm3, %v3789_v50 }
 0x52e   : > { %3879 = vst.msk [vmem:[#allocation3 + $0x20] sm:$0xff] %vm3874_vm3, %v3787_v28  ;;  %4036 = vrot.lane.b32.xlu1 %v10523_v37, %s7290_s28 }
 0x52f   : > { %4034 = vrot.lane.b32.xlu0 %v10526_v17, %s7290_s28 }
 0x530   : > { %v3793_v11 = vpop.permute.xlu1 %3792 }
 0x531   : > { %v3791_v18 = vpop.permute.xlu0 %3790  ;;  %3882 = vst.msk [vmem:[#allocation3 + $0x38] sm:$0xff] %vm3874_vm3, %v3793_v11 }
 0x532   : > { %3881 = vst.msk [vmem:[#allocation3 + $0x30] sm:$0xff] %vm3874_vm3, %v3791_v18  ;;  %4169 = vrot.lane.b32.xlu1 %v10535_v29, %s7291_s29  ;;  %v6678_v18 = vld [vmem:[%s7994_s10 + $0x371] sm:$0xff] }
 0x533   : > { %4167 = vrot.lane.b32.xlu0 %v6649_v23, %s7291_s29  ;;  %v6676_v23 = vld [vmem:[%s7994_s10 + $0x351] sm:$0xff] }
 0x534   : > { %v3797_v12 = vpop.permute.xlu1 %3796 }
 0x535   : > { %v3795_v57 = vpop.permute.xlu0 %3794  ;;  %3884 = vst.msk [vmem:[#allocation3 + $0x48] sm:$0xff] %vm3874_vm3, %v3797_v12  ;;  %v6677_v12 = vld [vmem:[%s7994_s10 + $0x361] sm:$0xff] }
 0x536   : > { %3883 = vst.msk [vmem:[#allocation3 + $0x40] sm:$0xff] %vm3874_vm3, %v3795_v57  ;;  %4173 = vrot.lane.b32.xlu1 %v10544_v7, %s7291_s29 }
 0x537   : > { %4171 = vrot.lane.b32.xlu0 %v10547_v26, %s7291_s29 }
 0x538   : > { %v3801_v21 = vpop.permute.xlu1 %3800 }
 0x539   : > { %v3799_v10 = vpop.permute.xlu0 %3798  ;;  %3886 = vst.msk [vmem:[#allocation3 + $0x58] sm:$0xff] %vm3874_vm3, %v3801_v21 }
 0x53a   : > { %3885 = vst.msk [vmem:[#allocation3 + $0x50] sm:$0xff] %vm3874_vm3, %v3799_v10  ;;  %4177 = vrot.lane.b32.xlu1 %v10556_v60, %s7291_s29  ;;  %v6680_v10 = vld [vmem:[%s7994_s10 + $0x391] sm:$0xff] }
 0x53b   : > { %4175 = vrot.lane.b32.xlu0 %v10559_v42, %s7291_s29 }
 0x53c   : > { %v3805_v3 = vpop.permute.xlu1 %3804 }
 0x53d   : > { %v3803_v14 = vpop.permute.xlu0 %3802  ;;  %3888 = vst.msk [vmem:[#allocation3 + $0x68] sm:$0xff] %vm3874_vm3, %v3805_v3  ;;  %v6679_v3 = vld [vmem:[%s7994_s10 + $0x381] sm:$0xff] }
 0x53e   : > { %3887 = vst.msk [vmem:[#allocation3 + $0x60] sm:$0xff] %vm3874_vm3, %v3803_v14  ;;  %4181 = vrot.lane.b32.xlu1 %v10568_v63, %s7291_s29 }
 0x53f   : > { %4179 = vrot.lane.b32.xlu0 %v10571_v44, %s7291_s29 }
 0x540   : > { %v3809_v59 = vpop.permute.xlu1 %3808 }
 0x541   : > { %v3807_v47 = vpop.permute.xlu0 %3806  ;;  %3890 = vst.msk [vmem:[#allocation3 + $0x78] sm:$0xff] %vm3874_vm3, %v3809_v59  ;;  %v10664_v59 = vld [vmem:[%s7994_s10 + $0x152] sm:$0xff] }
 0x542   : > { %3889 = vst.msk [vmem:[#allocation3 + $0x70] sm:$0xff] %vm3874_vm3, %v3807_v47  ;;  %4185 = vrot.lane.b32.xlu1 %v10580_v38, %s7291_s29  ;;  %v6681_v47 = vld [vmem:[%s7994_s10 + $0x142] sm:$0xff] }
 0x543   : > { %4183 = vrot.lane.b32.xlu0 %v6657_v19, %s7291_s29 }
 0x544   : > { %v3813_v16 = vpop.permute.xlu1 %3812 }
 0x545   : > { %v3811_v30 = vpop.permute.xlu0 %3810  ;;  %3892 = vst.msk [vmem:[#allocation3 + $0x88] sm:$0xff] %vm3874_vm3, %v3813_v16 }
 0x546   : > { %3891 = vst.msk [vmem:[#allocation3 + $0x80] sm:$0xff] %vm3874_vm3, %v3811_v30  ;;  %4189 = vrot.lane.b32.xlu1 %v10589_v43, %s7291_s29 }
 0x547   : > { %4187 = vrot.lane.b32.xlu0 %v10592_v48, %s7291_s29 }
 0x548   : > { %v3817_v6 = vpop.permute.xlu1 %3816 }
 0x549   : > { %v3815_v22 = vpop.permute.xlu0 %3814  ;;  %3894 = vst.msk [vmem:[#allocation3 + $0x98] sm:$0xff] %vm3874_vm3, %v3817_v6 }
 0x54a   : > { %3893 = vst.msk [vmem:[#allocation3 + $0x90] sm:$0xff] %vm3874_vm3, %v3815_v22  ;;  %4193 = vrot.lane.b32.xlu1 %v6662_v53, %s7291_s29  ;;  %v10673_v53 = vld [vmem:[%s7994_s10 + $0x172] sm:$0xff] }
 0x54b   : > { %4191 = vrot.lane.b32.xlu0 %v6661_v49, %s7291_s29  ;;  %v10676_v49 = vld [vmem:[%s7994_s10 + $0x162] sm:$0xff] }
 0x54c   : > { %v3821_v15 = vpop.permute.xlu1 %3820 }
 0x54d   : > { %v3819_v61 = vpop.permute.xlu0 %3818  ;;  %3896 = vst.msk [vmem:[#allocation3 + $0xa8] sm:$0xff] %vm3874_vm3, %v3821_v15 }
 0x54e   : > { %3895 = vst.msk [vmem:[#allocation3 + $0xa0] sm:$0xff] %vm3874_vm3, %v3819_v61  ;;  %4197 = vrot.lane.b32.xlu1 %v6664_v5, %s7291_s29  ;;  %v10685_v5 = vld [vmem:[%s7994_s10 + $0x192] sm:$0xff] }
 0x54f   : > { %4195 = vrot.lane.b32.xlu0 %v6663_v54, %s7291_s29  ;;  %v10688_v54 = vld [vmem:[%s7994_s10 + $0x182] sm:$0xff] }
 0x550   : > { %v3825_v62 = vpop.permute.xlu1 %3824 }
 0x551   : > { %v3823_v2 = vpop.permute.xlu0 %3822  ;;  %3898 = vst.msk [vmem:[#allocation3 + $0xb8] sm:$0xff] %vm3874_vm3, %v3825_v62  ;;  %v10698_v62 = vld [vmem:[%s7994_s10 + $0x1a2] sm:$0xff] }
 0x552   : > { %3897 = vst.msk [vmem:[#allocation3 + $0xb0] sm:$0xff] %vm3874_vm3, %v3823_v2  ;;  %4201 = vrot.lane.b32.xlu1 %v10613_v33, %s7291_s29 }
 0x553   : > { %4199 = vrot.lane.b32.xlu0 %v6665_v27, %s7291_s29  ;;  %v6688_v27 = vld [vmem:[%s7994_s10 + $0x1b2] sm:$0xff] }
 0x554   : > { %v3829_v56 = vpop.permute.xlu1 %3828 }
 0x555   : > { %v3827_v36 = vpop.permute.xlu0 %3826  ;;  %3900 = vst.msk [vmem:[#allocation3 + $0xc8] sm:$0xff] %vm3874_vm3, %v3829_v56 }
 0x556   : > { %3899 = vst.msk [vmem:[#allocation3 + $0xc0] sm:$0xff] %vm3874_vm3, %v3827_v36  ;;  %4205 = vrot.lane.b32.xlu1 %v10253_v46, %s7291_s29  ;;  %v6674_v46 = vld [vmem:[%s7994_s10 + $0x331] sm:$0xff] }
 0x557   : > { %4203 = vrot.lane.b32.xlu0 %v10256_v51, %s7291_s29  ;;  %v6673_v51 = vld [vmem:[%s7994_s10 + $0x321] sm:$0xff]  ;;  %v6690_v36 = vld [vmem:[%s7994_s10 + $0x1f2] sm:$0xff] }
 0x558   : > { %v3833_v34 = vpop.permute.xlu1 %3832 }
 0x559   : > { %v3831_v20 = vpop.permute.xlu0 %3830  ;;  %3902 = vst.msk [vmem:[#allocation3 + $0xd8] sm:$0xff] %vm3874_vm3, %v3833_v34  ;;  %v6689_v34 = vld [vmem:[%s7994_s10 + $0x1e2] sm:$0xff] }
 0x55a   : > { %3901 = vst.msk [vmem:[#allocation3 + $0xd0] sm:$0xff] %vm3874_vm3, %v3831_v20  ;;  %4209 = vrot.lane.b32.xlu1 %v10265_v31, %s7291_s29 }
 0x55b   : > { %4207 = vrot.lane.b32.xlu0 %v10268_v39, %s7291_s29 }
 0x55c   : > { %v3837_v50 = vpop.permute.xlu1 %3836 }
 0x55d   : > { %v3835_v28 = vpop.permute.xlu0 %3834  ;;  %3904 = vst.msk [vmem:[#allocation3 + $0xe8] sm:$0xff] %vm3874_vm3, %v3837_v50 }
 0x55e   : > { %3903 = vst.msk [vmem:[#allocation3 + $0xe0] sm:$0xff] %vm3874_vm3, %v3835_v28  ;;  %4213 = vrot.lane.b32.xlu1 %v10277_v45, %s7291_s29  ;;  %v6675_v45 = vld [vmem:[%s7994_s10 + $0x341] sm:$0xff]  ;;  %v6692_v28 = vld [vmem:[%s7994_s10 + $0x212] sm:$0xff] }
 0x55f   : > { %4211 = vrot.lane.b32.xlu0 %v10280_v13, %s7291_s29 }
 0x560   : > { %v3841_v31 = vpop.permute.xlu1 %3840 }
 0x561   : > { %v3839_v39 = vpop.permute.xlu0 %3838  ;;  %3906 = vst.msk [vmem:[#allocation3 + $0xf8] sm:$0xff] %vm3874_vm3, %v3841_v31 }
 0x562   : > { %3905 = vst.msk [vmem:[#allocation3 + $0xf0] sm:$0xff] %vm3874_vm3, %v3839_v39  ;;  %4217 = vrot.lane.b32.xlu1 %v6674_v46, %s7291_s29  ;;  %v6691_v46 = vld [vmem:[%s7994_s10 + $0x202] sm:$0xff]  ;;  %v6694_v39 = vld [vmem:[%s7994_s10 + $0x232] sm:$0xff] }
 0x563   : > { %4215 = vrot.lane.b32.xlu0 %v6673_v51, %s7291_s29 }
 0x564   : > { %v3977_v13 = vpop.permute.xlu1 %3976 }
 0x565   : > { %v3975_v11 = vpop.permute.xlu0 %3974  ;;  %4072 = vst.msk [vmem:[#allocation3 + $0x8] sm:$0xff] %vm4070_vm4, %v3977_v13 }
 0x566   : > { %4071 = vst.msk [vmem:[#allocation3] sm:$0xff] %vm4070_vm4, %v3975_v11  ;;  %4221 = vrot.lane.b32.xlu1 %v6676_v23, %s7291_s29  ;;  %v6693_v23 = vld [vmem:[%s7994_s10 + $0x222] sm:$0xff]  ;;  %v6696_v11 = vld [vmem:[%s7994_s10 + $0x252] sm:$0xff] }
 0x567   : > { %4219 = vrot.lane.b32.xlu0 %v6675_v45, %s7291_s29 }
 0x568   : > { %v3981_v57 = vpop.permute.xlu1 %3980 }
 0x569   : > { %v3979_v21 = vpop.permute.xlu0 %3978  ;;  %4074 = vst.msk [vmem:[#allocation3 + $0x18] sm:$0xff] %vm4070_vm4, %v3981_v57 }
 0x56a   : > { %4073 = vst.msk [vmem:[#allocation3 + $0x10] sm:$0xff] %vm4070_vm4, %v3979_v21  ;;  %4225 = vrot.lane.b32.xlu1 %v6678_v18, %s7291_s29  ;;  %v6695_v18 = vld [vmem:[%s7994_s10 + $0x242] sm:$0xff]  ;;  %v10730_v21 = vld [vmem:[%s7994_s10 + $0x292] sm:$0xff] }
 0x56b   : > { %4223 = vrot.lane.b32.xlu0 %v6677_v12, %s7291_s29 }
 0x56c   : > { %v3985_v14 = vpop.permute.xlu1 %3984 }
 0x56d   : > { %v3983_v19 = vpop.permute.xlu0 %3982  ;;  %4076 = vst.msk [vmem:[#allocation3 + $0x28] sm:$0xff] %vm4070_vm4, %v3985_v14 }
 0x56e   : > { %4075 = vst.msk [vmem:[#allocation3 + $0x20] sm:$0xff] %vm4070_vm4, %v3983_v19  ;;  %4229 = vrot.lane.b32.xlu1 %v6680_v10, %s7291_s29  ;;  %v6697_v10 = vld [vmem:[%s7994_s10 + $0x282] sm:$0xff] }
 0x56f   : > { %4227 = vrot.lane.b32.xlu0 %v6679_v3, %s7291_s29  ;;  %s7297_s29 = smov 100  }
 0x570   : > { %v3989_v16 = vpop.permute.xlu1 %3988 }
 0x571   : > { %v3987_v30 = vpop.permute.xlu0 %3986  ;;  %4078 = vst.msk [vmem:[#allocation3 + $0x38] sm:$0xff] %vm4070_vm4, %v3989_v16 }
 0x572   : > { %4077 = vst.msk [vmem:[#allocation3 + $0x30] sm:$0xff] %vm4070_vm4, %v3987_v30  ;;  %4362 = vrot.lane.b32.xlu1 %v10664_v59, %s7292_s4 }
 0x573   : > { %4360 = vrot.lane.b32.xlu0 %v6681_v47, %s7292_s4 }
 0x574   : > { %v3993_v6 = vpop.permute.xlu1 %3992 }
 0x575   : > { %v3991_v22 = vpop.permute.xlu0 %3990  ;;  %4080 = vst.msk [vmem:[#allocation3 + $0x48] sm:$0xff] %vm4070_vm4, %v3993_v6 }
 0x576   : > { %4079 = vst.msk [vmem:[#allocation3 + $0x40] sm:$0xff] %vm4070_vm4, %v3991_v22  ;;  %4366 = vrot.lane.b32.xlu1 %v10673_v53, %s7292_s4 }
 0x577   : > { %4364 = vrot.lane.b32.xlu0 %v10676_v49, %s7292_s4 }
 0x578   : > { %v3997_v15 = vpop.permute.xlu1 %3996 }
 0x579   : > { %v3995_v61 = vpop.permute.xlu0 %3994  ;;  %4082 = vst.msk [vmem:[#allocation3 + $0x58] sm:$0xff] %vm4070_vm4, %v3997_v15  ;;  %v6708_v15 = vld [vmem:[%s7994_s10 + $0x352] sm:$0xff] }
 0x57a   : > { %4081 = vst.msk [vmem:[#allocation3 + $0x50] sm:$0xff] %vm4070_vm4, %v3995_v61  ;;  %4370 = vrot.lane.b32.xlu1 %v10685_v5, %s7292_s4 }
 0x57b   : > { %4368 = vrot.lane.b32.xlu0 %v10688_v54, %s7292_s4 }
 0x57c   : > { %v4001_v2 = vpop.permute.xlu1 %4000 }
 0x57d   : > { %v3999_v56 = vpop.permute.xlu0 %3998  ;;  %4084 = vst.msk [vmem:[#allocation3 + $0x68] sm:$0xff] %vm4070_vm4, %v4001_v2  ;;  %v6709_v2 = vld [vmem:[%s7994_s10 + $0x362] sm:$0xff] }
 0x57e   : > { %4083 = vst.msk [vmem:[#allocation3 + $0x60] sm:$0xff] %vm4070_vm4, %v3999_v56  ;;  %4374 = vrot.lane.b32.xlu1 %v6688_v27, %s7292_s4  ;;  %v6710_v27 = vld [vmem:[%s7994_s10 + $0x372] sm:$0xff] }
 0x57f   : > { %4372 = vrot.lane.b32.xlu0 %v10698_v62, %s7292_s4 }
 0x580   : > { %v4005_v20 = vpop.permute.xlu1 %4004 }
 0x581   : > { %v4003_v50 = vpop.permute.xlu0 %4002  ;;  %4086 = vst.msk [vmem:[#allocation3 + $0x78] sm:$0xff] %vm4070_vm4, %v4005_v20  ;;  %v6711_v20 = vld [vmem:[%s7994_s10 + $0x382] sm:$0xff] }
 0x582   : > { %4085 = vst.msk [vmem:[#allocation3 + $0x70] sm:$0xff] %vm4070_vm4, %v4003_v50  ;;  %4378 = vrot.lane.b32.xlu1 %v6690_v36, %s7292_s4 }
 0x583   : > { %4376 = vrot.lane.b32.xlu0 %v6689_v34, %s7292_s4  ;;  %v6712_v34 = vld [vmem:[%s7994_s10 + $0x392] sm:$0xff] }
 0x584   : > { %v4009_v51 = vpop.permute.xlu1 %4008 }
 0x585   : > { %v4007_v31 = vpop.permute.xlu0 %4006  ;;  %4088 = vst.msk [vmem:[#allocation3 + $0x88] sm:$0xff] %vm4070_vm4, %v4009_v51 }
 0x586   : > { %4087 = vst.msk [vmem:[#allocation3 + $0x80] sm:$0xff] %vm4070_vm4, %v4007_v31  ;;  %4382 = vrot.lane.b32.xlu1 %v6692_v28, %s7292_s4 }
 0x587   : > { %4380 = vrot.lane.b32.xlu0 %v6691_v46, %s7292_s4  ;;  %v10781_v46 = vld [vmem:[%s7994_s10 + $0x160] sm:$0xff] }
 0x588   : > { %v4013_v45 = vpop.permute.xlu1 %4012 }
 0x589   : > { %v4011_v13 = vpop.permute.xlu0 %4010  ;;  %4090 = vst.msk [vmem:[#allocation3 + $0x98] sm:$0xff] %vm4070_vm4, %v4013_v45 }
 0x58a   : > { %4089 = vst.msk [vmem:[#allocation3 + $0x90] sm:$0xff] %vm4070_vm4, %v4011_v13  ;;  %4386 = vrot.lane.b32.xlu1 %v6694_v39, %s7292_s4  ;;  %v10790_v39 = vld [vmem:[%s7994_s10 + $0x180] sm:$0xff] }
 0x58b   : > { %4384 = vrot.lane.b32.xlu0 %v6693_v23, %s7292_s4  ;;  %v10793_v23 = vld [vmem:[%s7994_s10 + $0x170] sm:$0xff] }
 0x58c   : > { %v4017_v12 = vpop.permute.xlu1 %4016 }
 0x58d   : > { %v4015_v57 = vpop.permute.xlu0 %4014  ;;  %4092 = vst.msk [vmem:[#allocation3 + $0xa8] sm:$0xff] %vm4070_vm4, %v4017_v12 }
 0x58e   : > { %4091 = vst.msk [vmem:[#allocation3 + $0xa0] sm:$0xff] %vm4070_vm4, %v4015_v57  ;;  %4390 = vrot.lane.b32.xlu1 %v6696_v11, %s7292_s4  ;;  %v10802_v11 = vld [vmem:[%s7994_s10 + $0x1a0] sm:$0xff] }
 0x58f   : > { %4388 = vrot.lane.b32.xlu0 %v6695_v18, %s7292_s4  ;;  %v10814_v57 = vld [vmem:[%s7994_s10 + $0x1c0] sm:$0xff] }
 0x590   : > { %v4021_v3 = vpop.permute.xlu1 %4020 }
 0x591   : > { %v4019_v14 = vpop.permute.xlu0 %4018  ;;  %4094 = vst.msk [vmem:[#allocation3 + $0xb8] sm:$0xff] %vm4070_vm4, %v4021_v3 }
 0x592   : > { %4093 = vst.msk [vmem:[#allocation3 + $0xb0] sm:$0xff] %vm4070_vm4, %v4019_v14  ;;  %4394 = vrot.lane.b32.xlu1 %v10730_v21, %s7292_s4 }
 0x593   : > { %4392 = vrot.lane.b32.xlu0 %v6697_v10, %s7292_s4  ;;  %v10817_v10 = vld [vmem:[%s7994_s10 + $0x1b0] sm:$0xff] }
 0x594   : > { %v4025_v19 = vpop.permute.xlu1 %4024 }
 0x595   : > { %v4023_v47 = vpop.permute.xlu0 %4022  ;;  %4096 = vst.msk [vmem:[#allocation3 + $0xc8] sm:$0xff] %vm4070_vm4, %v4025_v19  ;;  %v6724_v19 = vld [vmem:[%s7994_s10 + $0x200] sm:$0xff] }
 0x596   : > { %4095 = vst.msk [vmem:[#allocation3 + $0xc0] sm:$0xff] %vm4070_vm4, %v4023_v47  ;;  %4398 = vrot.lane.b32.xlu1 %v10367_v52, %s7292_s4  ;;  %v6706_v52 = vld [vmem:[%s7994_s10 + $0x332] sm:$0xff] }
 0x597   : > { %4396 = vrot.lane.b32.xlu0 %v10370_v9, %s7292_s4  ;;  %v6705_v9 = vld [vmem:[%s7994_s10 + $0x322] sm:$0xff] }
 0x598   : > { %v4029_v16 = vpop.permute.xlu1 %4028 }
 0x599   : > { %v4027_v30 = vpop.permute.xlu0 %4026  ;;  %4098 = vst.msk [vmem:[#allocation3 + $0xd8] sm:$0xff] %vm4070_vm4, %v4029_v16 }
 0x59a   : > { %4097 = vst.msk [vmem:[#allocation3 + $0xd0] sm:$0xff] %vm4070_vm4, %v4027_v30  ;;  %4402 = vrot.lane.b32.xlu1 %v10379_v8, %s7292_s4  ;;  %v6726_v30 = vld [vmem:[%s7994_s10 + $0x220] sm:$0xff] }
 0x59b   : > { %4400 = vrot.lane.b32.xlu0 %v10382_v58, %s7292_s4 }
 0x59c   : > { %v4033_v6 = vpop.permute.xlu1 %4032 }
 0x59d   : > { %v4031_v22 = vpop.permute.xlu0 %4030  ;;  %4100 = vst.msk [vmem:[#allocation3 + $0xe8] sm:$0xff] %vm4070_vm4, %v4033_v6  ;;  %v6725_v6 = vld [vmem:[%s7994_s10 + $0x210] sm:$0xff] }
 0x59e   : > { %4099 = vst.msk [vmem:[#allocation3 + $0xe0] sm:$0xff] %vm4070_vm4, %v4031_v22  ;;  %4406 = vrot.lane.b32.xlu1 %v10391_v0, %s7292_s4  ;;  %v6707_v0 = vld [vmem:[%s7994_s10 + $0x342] sm:$0xff] }
 0x59f   : > { %4404 = vrot.lane.b32.xlu0 %v10394_v25, %s7292_s4 }
 0x5a0   : > { %v4037_v8 = vpop.permute.xlu1 %4036 }
 0x5a1   : > { %v4035_v58 = vpop.permute.xlu0 %4034  ;;  %4102 = vst.msk [vmem:[#allocation3 + $0xf8] sm:$0xff] %vm4070_vm4, %v4037_v8  ;;  %v6727_v8 = vld [vmem:[%s7994_s10 + $0x230] sm:$0xff] }
 0x5a2   : > { %4101 = vst.msk [vmem:[#allocation3 + $0xf0] sm:$0xff] %vm4070_vm4, %v4035_v58  ;;  %4410 = vrot.lane.b32.xlu1 %v6706_v52, %s7292_s4 }
 0x5a3   : > { %4408 = vrot.lane.b32.xlu0 %v6705_v9, %s7292_s4  ;;  %v6728_v9 = vld [vmem:[%s7994_s10 + $0x240] sm:$0xff] }
 0x5a4   : > { %v4170_v25 = vpop.permute.xlu1 %4169 }
 0x5a5   : > { %v4168_v61 = vpop.permute.xlu0 %4167  ;;  %4265 = vst.msk [vmem:[#allocation3 + $0x8] sm:$0xff] %vm4263_vm5, %v4170_v25 }
 0x5a6   : > { %4264 = vst.msk [vmem:[#allocation3] sm:$0xff] %vm4263_vm5, %v4168_v61  ;;  %4414 = vrot.lane.b32.xlu1 %v6708_v15, %s7292_s4 }
 0x5a7   : > { %4412 = vrot.lane.b32.xlu0 %v6707_v0, %s7292_s4  ;;  %v6729_v0 = vld [vmem:[%s7994_s10 + $0x250] sm:$0xff] }
 0x5a8   : > { %v4174_v56 = vpop.permute.xlu1 %4173 }
 0x5a9   : > { %v4172_v36 = vpop.permute.xlu0 %4171  ;;  %4267 = vst.msk [vmem:[#allocation3 + $0x18] sm:$0xff] %vm4263_vm5, %v4174_v56 }
 0x5aa   : > { %4266 = vst.msk [vmem:[#allocation3 + $0x10] sm:$0xff] %vm4263_vm5, %v4172_v36  ;;  %4418 = vrot.lane.b32.xlu1 %v6710_v27, %s7292_s4  ;;  %v10850_v27 = vld [vmem:[%s7994_s10 + $0x2a0] sm:$0xff] }
 0x5ab   : > { %4416 = vrot.lane.b32.xlu0 %v6709_v2, %s7292_s4  ;;  %v10859_v36 = vld [vmem:[%s7994_s10 + $0x2c0] sm:$0xff] }
 0x5ac   : > { %v4178_v50 = vpop.permute.xlu1 %4177 }
 0x5ad   : > { %v4176_v28 = vpop.permute.xlu0 %4175  ;;  %4269 = vst.msk [vmem:[#allocation3 + $0x28] sm:$0xff] %vm4263_vm5, %v4178_v50 }
 0x5ae   : > { %4268 = vst.msk [vmem:[#allocation3 + $0x20] sm:$0xff] %vm4263_vm5, %v4176_v28  ;;  %4422 = vrot.lane.b32.xlu1 %v6712_v34, %s7292_s4  ;;  %v10862_v34 = vld [vmem:[%s7994_s10 + $0x2b0] sm:$0xff]  ;;  %v10871_v28 = vld [vmem:[%s7994_s10 + $0x2e0] sm:$0xff] }
 0x5af   : > { %4420 = vrot.lane.b32.xlu0 %v6711_v20, %s7292_s4  ;;  %s7298_s4 = smov 104  }
 0x5b0   : > { %v4182_v51 = vpop.permute.xlu1 %4181 }
 0x5b1   : > { %v4180_v31 = vpop.permute.xlu0 %4179  ;;  %4271 = vst.msk [vmem:[#allocation3 + $0x38] sm:$0xff] %vm4263_vm5, %v4182_v51 }
 0x5b2   : > { %4270 = vst.msk [vmem:[#allocation3 + $0x30] sm:$0xff] %vm4263_vm5, %v4180_v31  ;;  %4557 = vrot.lane.b32.xlu1 %v10781_v46, %s7293_s5 }
 0x5b3   : > { %4555 = vrot.lane.b32.xlu0 %v10409_v35, %s7293_s5  ;;  %v10805_v35 = vld [vmem:[%s7994_s10 + $0x190] sm:$0xff] }
 0x5b4   : > { %v4186_v45 = vpop.permute.xlu1 %4185 }
 0x5b5   : > { %v4184_v13 = vpop.permute.xlu0 %4183  ;;  %4273 = vst.msk [vmem:[#allocation3 + $0x48] sm:$0xff] %vm4263_vm5, %v4186_v45  ;;  %v10883_v45 = vld [vmem:[%s7994_s10 + $0x300] sm:$0xff] }
 0x5b6   : > { %4272 = vst.msk [vmem:[#allocation3 + $0x40] sm:$0xff] %vm4263_vm5, %v4184_v13  ;;  %4561 = vrot.lane.b32.xlu1 %v10790_v39, %s7293_s5  ;;  %v10886_v13 = vld [vmem:[%s7994_s10 + $0x2f0] sm:$0xff] }
 0x5b7   : > { %4559 = vrot.lane.b32.xlu0 %v10793_v23, %s7293_s5 }
 0x5b8   : > { %v4190_v18 = vpop.permute.xlu1 %4189 }
 0x5b9   : > { %v4188_v12 = vpop.permute.xlu0 %4187  ;;  %4275 = vst.msk [vmem:[#allocation3 + $0x58] sm:$0xff] %vm4263_vm5, %v4190_v18 }
 0x5ba   : > { %4274 = vst.msk [vmem:[#allocation3 + $0x50] sm:$0xff] %vm4263_vm5, %v4188_v12  ;;  %4565 = vrot.lane.b32.xlu1 %v10802_v11, %s7293_s5 }
 0x5bb   : > { %4563 = vrot.lane.b32.xlu0 %v10805_v35, %s7293_s5 }
 0x5bc   : > { %v4194_v3 = vpop.permute.xlu1 %4193 }
 0x5bd   : > { %v4192_v14 = vpop.permute.xlu0 %4191  ;;  %4277 = vst.msk [vmem:[#allocation3 + $0x68] sm:$0xff] %vm4263_vm5, %v4194_v3 }
 0x5be   : > { %4276 = vst.msk [vmem:[#allocation3 + $0x60] sm:$0xff] %vm4263_vm5, %v4192_v14  ;;  %4569 = vrot.lane.b32.xlu1 %v10814_v57, %s7293_s5 }
 0x5bf   : > { %4567 = vrot.lane.b32.xlu0 %v10817_v10, %s7293_s5 }
 0x5c0   : > { %v4198_v47 = vpop.permute.xlu1 %4197 }
 0x5c1   : > { %v4196_v16 = vpop.permute.xlu0 %4195  ;;  %4279 = vst.msk [vmem:[#allocation3 + $0x78] sm:$0xff] %vm4263_vm5, %v4198_v47 }
 0x5c2   : > { %4278 = vst.msk [vmem:[#allocation3 + $0x70] sm:$0xff] %vm4263_vm5, %v4196_v16  ;;  %4573 = vrot.lane.b32.xlu1 %v6724_v19, %s7293_s5 }
 0x5c3   : > { %4571 = vrot.lane.b32.xlu0 %v10436_v55, %s7293_s5  ;;  %v6730_v55 = vld [vmem:[%s7994_s10 + $0x260] sm:$0xff] }
 0x5c4   : > { %v4202_v22 = vpop.permute.xlu1 %4201 }
 0x5c5   : > { %v4200_v52 = vpop.permute.xlu0 %4199  ;;  %4281 = vst.msk [vmem:[#allocation3 + $0x88] sm:$0xff] %vm4263_vm5, %v4202_v22 }
 0x5c6   : > { %4280 = vst.msk [vmem:[#allocation3 + $0x80] sm:$0xff] %vm4263_vm5, %v4200_v52  ;;  %4577 = vrot.lane.b32.xlu1 %v6726_v30, %s7293_s5 }
 0x5c7   : > { %4575 = vrot.lane.b32.xlu0 %v6725_v6, %s7293_s5 }
 0x5c8   : > { %v4206_v58 = vpop.permute.xlu1 %4205 }
 0x5c9   : > { %v4204_v15 = vpop.permute.xlu0 %4203  ;;  %4283 = vst.msk [vmem:[#allocation3 + $0x98] sm:$0xff] %vm4263_vm5, %v4206_v58 }
 0x5ca   : > { %4282 = vst.msk [vmem:[#allocation3 + $0x90] sm:$0xff] %vm4263_vm5, %v4204_v15  ;;  %4581 = vrot.lane.b32.xlu1 %v6728_v9, %s7293_s5 }
 0x5cb   : > { %4579 = vrot.lane.b32.xlu0 %v6727_v8, %s7293_s5 }
 0x5cc   : > { %v4210_v25 = vpop.permute.xlu1 %4209 }
 0x5cd   : > { %v4208_v61 = vpop.permute.xlu0 %4207  ;;  %4285 = vst.msk [vmem:[#allocation3 + $0xa8] sm:$0xff] %vm4263_vm5, %v4210_v25 }
 0x5ce   : > { %4284 = vst.msk [vmem:[#allocation3 + $0xa0] sm:$0xff] %vm4263_vm5, %v4208_v61  ;;  %4585 = vrot.lane.b32.xlu1 %v6730_v55, %s7293_s5  ;;  %v5696_v55 = vld [vmem:[%s11616_s1 + $0x68] sm:$0xff] }
 0x5cf   : > { %4583 = vrot.lane.b32.xlu0 %v6729_v0, %s7293_s5  ;;  %v10985_v0 = vld [vmem:[%s7994_s10 + $0x2a2] sm:$0xff] }
 0x5d0   : > { %v4214_v2 = vpop.permute.xlu1 %4213 }
 0x5d1   : > { %v4212_v56 = vpop.permute.xlu0 %4211  ;;  %4287 = vst.msk [vmem:[#allocation3 + $0xb8] sm:$0xff] %vm4263_vm5, %v4214_v2 }
 0x5d2   : > { %4286 = vst.msk [vmem:[#allocation3 + $0xb0] sm:$0xff] %vm4263_vm5, %v4212_v56  ;;  %4589 = vrot.lane.b32.xlu1 %v10850_v27, %s7293_s5 }
 0x5d3   : > { %4587 = vrot.lane.b32.xlu0 %v10463_v1, %s7293_s5  ;;  %v10874_v1 = vld [vmem:[%s7994_s10 + $0x2d0] sm:$0xff] }
 0x5d4   : > { %v4218_v20 = vpop.permute.xlu1 %4217 }
 0x5d5   : > { %v4216_v50 = vpop.permute.xlu0 %4215  ;;  %4289 = vst.msk [vmem:[#allocation3 + $0xc8] sm:$0xff] %vm4263_vm5, %v4218_v20  ;;  %v5693_v20 = vld [vmem:[%s11616_s1 + $0x50] sm:$0xff] }
 0x5d6   : > { %4288 = vst.msk [vmem:[#allocation3 + $0xc0] sm:$0xff] %vm4263_vm5, %v4216_v50  ;;  %4593 = vrot.lane.b32.xlu1 %v10859_v36, %s7293_s5 }
 0x5d7   : > { %4591 = vrot.lane.b32.xlu0 %v10862_v34, %s7293_s5 }
 0x5d8   : > { %v4222_v51 = vpop.permute.xlu1 %4221 }
 0x5d9   : > { %v4220_v31 = vpop.permute.xlu0 %4219  ;;  %4291 = vst.msk [vmem:[#allocation3 + $0xd8] sm:$0xff] %vm4263_vm5, %v4222_v51 }
 0x5da   : > { %4290 = vst.msk [vmem:[#allocation3 + $0xd0] sm:$0xff] %vm4263_vm5, %v4220_v31  ;;  %4597 = vrot.lane.b32.xlu1 %v10871_v28, %s7293_s5 }
 0x5db   : > { %4595 = vrot.lane.b32.xlu0 %v10874_v1, %s7293_s5 }
 0x5dc   : > { %v4226_v18 = vpop.permute.xlu1 %4225 }
 0x5dd   : > { %v4224_v12 = vpop.permute.xlu0 %4223  ;;  %4293 = vst.msk [vmem:[#allocation3 + $0xe8] sm:$0xff] %vm4263_vm5, %v4226_v18 }
 0x5de   : > { %4292 = vst.msk [vmem:[#allocation3 + $0xe0] sm:$0xff] %vm4263_vm5, %v4224_v12  ;;  %4601 = vrot.lane.b32.xlu1 %v10883_v45, %s7293_s5  ;;  %v5690_v12 = vld [vmem:[%s11616_s1 + $0x38] sm:$0xff] }
 0x5df   : > { %4599 = vrot.lane.b32.xlu0 %v10886_v13, %s7293_s5 }
 0x5e0   : > { %v4230_v3 = vpop.permute.xlu1 %4229 }
 0x5e1   : > { %v4228_v14 = vpop.permute.xlu0 %4227  ;;  %4295 = vst.msk [vmem:[#allocation3 + $0xf8] sm:$0xff] %vm4263_vm5, %v4230_v3 }
 0x5e2   : > { %4294 = vst.msk [vmem:[#allocation3 + $0xf0] sm:$0xff] %vm4263_vm5, %v4228_v14  ;;  %4605 = vrot.lane.b32.xlu1 %v10502_v41, %s7293_s5  ;;  %v5688_v14 = vld [vmem:[%s11616_s1 + $0x28] sm:$0xff] }
 0x5e3   : > { %4603 = vrot.lane.b32.xlu0 %v10490_v40, %s7293_s5  ;;  %v6746_v40 = vld [vmem:[%s7994_s10 + $0x3a0] sm:$0xff] }
 0x5e4   : > { %v4363_v19 = vpop.permute.xlu1 %4362 }
 0x5e5   : > { %v4361_v47 = vpop.permute.xlu0 %4360  ;;  %4458 = vst.msk [vmem:[#allocation3 + $0x8] sm:$0xff] %vm4456_vm6, %v4363_v19 }
 0x5e6   : > { %4457 = vst.msk [vmem:[#allocation3] sm:$0xff] %vm4456_vm6, %v4361_v47  ;;  %4609 = vrot.lane.b32.xlu1 %v10514_v24, %s7293_s5 }
 0x5e7   : > { %4607 = vrot.lane.b32.xlu0 %v10499_v4, %s7293_s5 }
 0x5e8   : > { %v4367_v16 = vpop.permute.xlu1 %4366 }
 0x5e9   : > { %v4365_v30 = vpop.permute.xlu0 %4364  ;;  %4460 = vst.msk [vmem:[#allocation3 + $0x18] sm:$0xff] %vm4456_vm6, %v4367_v16  ;;  %v5687_v16 = vld [vmem:[%s11616_s1 + $0x20] sm:$0xff] }
 0x5ea   : > { %4459 = vst.msk [vmem:[#allocation3 + $0x10] sm:$0xff] %vm4456_vm6, %v4365_v30  ;;  %4613 = vrot.lane.b32.xlu1 %v10526_v17, %s7293_s5  ;;  %v11050_v30 = vld [vmem:[%s7994_s10 + $0x2c1] sm:$0xff] }
 0x5eb   : > { %4611 = vrot.lane.b32.xlu0 %v10511_v32, %s7293_s5 }
 0x5ec   : > { %v4371_v41 = vpop.permute.xlu1 %4370 }
 0x5ed   : > { %v4369_v6 = vpop.permute.xlu0 %4368  ;;  %4462 = vst.msk [vmem:[#allocation3 + $0x28] sm:$0xff] %vm4456_vm6, %v4371_v41 }
 0x5ee   : > { %4461 = vst.msk [vmem:[#allocation3 + $0x20] sm:$0xff] %vm4456_vm6, %v4369_v6  ;;  %4617 = vrot.lane.b32.xlu1 %v6746_v40, %s7293_s5  ;;  %v6797_v6 = vld [vmem:[%s7994_s10 + $0x2b2] sm:$0xff] }
 0x5ef   : > { %4615 = vrot.lane.b32.xlu0 %v10523_v37, %s7293_s5 }
 0x5f0   : > { %v4375_v4 = vpop.permute.xlu1 %4374 }
 0x5f1   : > { %v4373_v24 = vpop.permute.xlu0 %4372  ;;  %4464 = vst.msk [vmem:[#allocation3 + $0x38] sm:$0xff] %vm4456_vm6, %v4375_v4 }
 0x5f2   : > { %4463 = vst.msk [vmem:[#allocation3 + $0x30] sm:$0xff] %vm4456_vm6, %v4373_v24  ;;  %4750 = vrot.lane.b32.xlu1 %v10547_v26, %s7294_s6 }
 0x5f3   : > { %4748 = vrot.lane.b32.xlu0 %v10535_v29, %s7294_s6  ;;  %v10937_v29 = vld [vmem:[%s7994_s10 + $0x1c1] sm:$0xff] }
 0x5f4   : > { %v4379_v32 = vpop.permute.xlu1 %4378 }
 0x5f5   : > { %v4377_v17 = vpop.permute.xlu0 %4376  ;;  %4466 = vst.msk [vmem:[#allocation3 + $0x48] sm:$0xff] %vm4456_vm6, %v4379_v32  ;;  %v5684_v32 = vld [vmem:[%s11616_s1 + $0x8] sm:$0xff] }
 0x5f6   : > { %4465 = vst.msk [vmem:[#allocation3 + $0x40] sm:$0xff] %vm4456_vm6, %v4377_v17  ;;  %4754 = vrot.lane.b32.xlu1 %v10559_v42, %s7294_s6  ;;  %v5683_v17 = vld [vmem:[%s11616_s1] sm:$0xff] }
 0x5f7   : > { %4752 = vrot.lane.b32.xlu0 %v10544_v7, %s7294_s6 }
 0x5f8   : > { %v4383_v37 = vpop.permute.xlu1 %4382 }
 0x5f9   : > { %v4381_v22 = vpop.permute.xlu0 %4380  ;;  %4468 = vst.msk [vmem:[#allocation3 + $0x58] sm:$0xff] %vm4456_vm6, %v4383_v37 }
 0x5fa   : > { %4467 = vst.msk [vmem:[#allocation3 + $0x50] sm:$0xff] %vm4456_vm6, %v4381_v22  ;;  %4758 = vrot.lane.b32.xlu1 %v10571_v44, %s7294_s6 }
 0x5fb   : > { %4756 = vrot.lane.b32.xlu0 %v10556_v60, %s7294_s6 }
 0x5fc   : > { %v4387_v52 = vpop.permute.xlu1 %4386 }
 0x5fd   : > { %v4385_v9 = vpop.permute.xlu0 %4384  ;;  %4470 = vst.msk [vmem:[#allocation3 + $0x68] sm:$0xff] %vm4456_vm6, %v4387_v52 }
 0x5fe   : > { %4469 = vst.msk [vmem:[#allocation3 + $0x60] sm:$0xff] %vm4456_vm6, %v4385_v9  ;;  %4762 = vrot.lane.b32.xlu1 %v10937_v29, %s7294_s6 }
 0x5ff   : > { %4760 = vrot.lane.b32.xlu0 %v10568_v63, %s7294_s6  ;;  %v10958_v63 = vld [vmem:[%s7994_s10 + $0x2a1] sm:$0xff] }
 0x600   : > { %v4391_v42 = vpop.permute.xlu1 %4390 }
 0x601   : > { %v4389_v44 = vpop.permute.xlu0 %4388  ;;  %4472 = vst.msk [vmem:[#allocation3 + $0x78] sm:$0xff] %vm4456_vm6, %v4391_v42 }
 0x602   : > { %4471 = vst.msk [vmem:[#allocation3 + $0x70] sm:$0xff] %vm4456_vm6, %v4389_v44  ;;  %4766 = vrot.lane.b32.xlu1 %v10592_v48, %s7294_s6 }
 0x603   : > { %4764 = vrot.lane.b32.xlu0 %v10580_v38, %s7294_s6  ;;  %v5698_v38 = vld [vmem:[%s11616_s1 + $0x78] sm:$0xff] }
 0x604   : > { %v4395_v60 = vpop.permute.xlu1 %4394  ;;  %6965 = vmatprep.subr.mxu0 %v5698_v38  ;;  %7045 = vmatprep.subr.mxu1 %v5698_v38 }
 0x605   : > { %v4393_v8 = vpop.permute.xlu0 %4392  ;;  %4474 = vst.msk [vmem:[#allocation3 + $0x88] sm:$0xff] %vm4456_vm6, %v4395_v60  ;;  %6966 = vmatpush3.msra.mxu0 %v5698_v38  ;;  %7061 = vmatpush3.msra.mxu1 %v5698_v38  ;;  %v6847_v60 = vld [vmem:[%s7994_s10 + $0x181] sm:$0xff] }
 0x606   : > { %4473 = vst.msk [vmem:[#allocation3 + $0x80] sm:$0xff] %vm4456_vm6, %v4393_v8  ;;  %4780 = vrot.lane.b32.xlu1 %v10613_v33, %s7294_s6 }
 0x607   : > { %4768 = vrot.lane.b32.xlu0 %v10589_v43, %s7294_s6  ;;  %v5697_v43 = vld [vmem:[%s11616_s1 + $0x70] sm:$0xff] }
 0x608   : > { %v4399_v58 = vpop.permute.xlu1 %4398  ;;  %6967 = vmatprep.subr.mxu0 %v5697_v43  ;;  %7046 = vmatprep.subr.mxu1 %v5697_v43 }
 0x609   : > { %v4397_v15 = vpop.permute.xlu0 %4396  ;;  %4476 = vst.msk [vmem:[#allocation3 + $0x98] sm:$0xff] %vm4456_vm6, %v4399_v58  ;;  %6968 = vmatpush3.msra.mxu0 %v5697_v43  ;;  %7062 = vmatpush3.msra.mxu1 %v5697_v43 }
 0x60a   : > { %4475 = vst.msk [vmem:[#allocation3 + $0x90] sm:$0xff] %vm4456_vm6, %v4397_v15  ;;  %4941 = vrot.lane.b32.xlu1 %v10664_v59, %s7295_s9  ;;  %v5695_v59 = vld [vmem:[%s11616_s1 + $0x60] sm:$0xff]  ;;  %6969 = vmatprep.subr.mxu0 %v5696_v55 }
 0x60b   : > { %4782 = vrot.lane.b32.xlu0 %v10958_v63, %s7294_s6  ;;  %7047 = vmatprep.subr.mxu1 %v5696_v55 }
 0x60c   : > { %v4403_v48 = vpop.permute.xlu1 %4402  ;;  %6970 = vmatpush3.msra.mxu0 %v5696_v55  ;;  %7063 = vmatpush3.msra.mxu1 %v5696_v55 }
 0x60d   : > { %v4401_v33 = vpop.permute.xlu0 %4400  ;;  %4478 = vst.msk [vmem:[#allocation3 + $0xa8] sm:$0xff] %vm4456_vm6, %v4403_v48  ;;  %6971 = vmatprep.subr.mxu0 %v5695_v59  ;;  %7048 = vmatprep.subr.mxu1 %v5695_v59  ;;  %v6768_v48 = vld [vmem:[%s7994_s10 + $0x2e1] sm:$0xff] }
 0x60e   : > { %4477 = vst.msk [vmem:[#allocation3 + $0xa0] sm:$0xff] %vm4456_vm6, %v4401_v33  ;;  %4943 = vrot.lane.b32.xlu1 %v10676_v49, %s7295_s9  ;;  %6972 = vmatpush3.msra.mxu0 %v5695_v59 }
 0x60f   : > { %4973 = vrot.lane.b32.xlu0 %v10730_v21, %s7295_s9  ;;  %v5694_v21 = vld [vmem:[%s11616_s1 + $0x58] sm:$0xff]  ;;  %7064 = vmatpush3.msra.mxu1 %v5695_v59 }
 0x610   : > { %v4407_v25 = vpop.permute.xlu1 %4406  ;;  %6973 = vmatprep.subr.mxu0 %v5694_v21  ;;  %7049 = vmatprep.subr.mxu1 %v5694_v21  ;;  %v6799_v59 = vld [vmem:[%s7994_s10 + $0x2d2] sm:$0xff] }
 0x611   : > { %v4405_v61 = vpop.permute.xlu0 %4404  ;;  %4480 = vst.msk [vmem:[#allocation3 + $0xb8] sm:$0xff] %vm4456_vm6, %v4407_v25  ;;  %6974 = vmatpush3.msra.mxu0 %v5694_v21  ;;  %7065 = vmatpush3.msra.mxu1 %v5694_v21  ;;  %v6800_v21 = vld [vmem:[%s7994_s10 + $0x2e2] sm:$0xff] }
 0x612   : > { %4479 = vst.msk [vmem:[#allocation3 + $0xb0] sm:$0xff] %vm4456_vm6, %v4405_v61  ;;  %5136 = vrot.lane.b32.xlu1 %v10781_v46, %s7296_s7  ;;  %v5692_v46 = vld [vmem:[%s11616_s1 + $0x48] sm:$0xff]  ;;  %6975 = vmatprep.subr.mxu0 %v5693_v20 }
 0x613   : > { %4975 = vrot.lane.b32.xlu0 %v10985_v0, %s7295_s9  ;;  %7050 = vmatprep.subr.mxu1 %v5693_v20 }
 0x614   : > { %v4411_v2 = vpop.permute.xlu1 %4410  ;;  %6976 = vmatpush3.msra.mxu0 %v5693_v20  ;;  %7066 = vmatpush3.msra.mxu1 %v5693_v20 }
 0x615   : > { %v4409_v56 = vpop.permute.xlu0 %4408  ;;  %4482 = vst.msk [vmem:[#allocation3 + $0xc8] sm:$0xff] %vm4456_vm6, %v4411_v2  ;;  %6977 = vmatprep.subr.mxu0 %v5692_v46  ;;  %7051 = vmatprep.subr.mxu1 %v5692_v46 }
 0x616   : > { %4481 = vst.msk [vmem:[#allocation3 + $0xc0] sm:$0xff] %vm4456_vm6, %v4409_v56  ;;  %5138 = vrot.lane.b32.xlu1 %v10793_v23, %s7296_s7  ;;  %v5691_v23 = vld [vmem:[%s11616_s1 + $0x40] sm:$0xff]  ;;  %6978 = vmatpush3.msra.mxu0 %v5692_v46 }
 0x617   : > { %5168 = vrot.lane.b32.xlu0 %v10850_v27, %s7296_s7  ;;  %v6765_v27 = vld [vmem:[%s7994_s10 + $0x2b1] sm:$0xff]  ;;  %7067 = vmatpush3.msra.mxu1 %v5692_v46 }
 0x618   : > { %v4415_v50 = vpop.permute.xlu1 %4414  ;;  %6979 = vmatprep.subr.mxu0 %v5691_v23  ;;  %7052 = vmatprep.subr.mxu1 %v5691_v23 }
 0x619   : > { %v4413_v51 = vpop.permute.xlu0 %4412  ;;  %4484 = vst.msk [vmem:[#allocation3 + $0xd8] sm:$0xff] %vm4456_vm6, %v4415_v50  ;;  %6980 = vmatpush3.msra.mxu0 %v5691_v23  ;;  %7068 = vmatpush3.msra.mxu1 %v5691_v23 }
 0x61a   : > { %4483 = vst.msk [vmem:[#allocation3 + $0xd0] sm:$0xff] %vm4456_vm6, %v4413_v51  ;;  %5329 = vrot.lane.b32.xlu1 %v10547_v26, %s7297_s29  ;;  %v5689_v26 = vld [vmem:[%s11616_s1 + $0x30] sm:$0xff]  ;;  %6981 = vmatprep.subr.mxu0 %v5690_v12 }
 0x61b   : > { %5170 = vrot.lane.b32.xlu0 %v10862_v34, %s7296_s7  ;;  %7053 = vmatprep.subr.mxu1 %v5690_v12 }
 0x61c   : > { %v4419_v31 = vpop.permute.xlu1 %4418  ;;  %6982 = vmatpush3.msra.mxu0 %v5690_v12  ;;  %7069 = vmatpush3.msra.mxu1 %v5690_v12  ;;  %v6770_v12 = vld [vmem:[%s7994_s10 + $0x301] sm:$0xff] }
 0x61d   : > { %v4417_v18 = vpop.permute.xlu0 %4416  ;;  %4486 = vst.msk [vmem:[#allocation3 + $0xe8] sm:$0xff] %vm4456_vm6, %v4419_v31  ;;  %6983 = vmatprep.subr.mxu0 %v5689_v26  ;;  %7054 = vmatprep.subr.mxu1 %v5689_v26 }
 0x61e   : > { %4485 = vst.msk [vmem:[#allocation3 + $0xe0] sm:$0xff] %vm4456_vm6, %v4417_v18  ;;  %4784 = vrot.lane.b32.xlu1 %v6765_v27, %s7294_s6  ;;  %6984 = vmatpush3.msra.mxu0 %v5689_v26  ;;  %v7176_v18 = vld [vmem:[%s7994_s10 + $0x1a2] sm:$0xff] }
 0x61f   : > { %5361 = vrot.lane.b32.xlu0 %v10958_v63, %s7297_s29  ;;  %7070 = vmatpush3.msra.mxu1 %v5689_v26 }
 0x620   : > { %v4423_v34 = vpop.permute.xlu1 %4422  ;;  %6985 = vmatprep.subr.mxu0 %v5688_v14  ;;  %7055 = vmatprep.subr.mxu1 %v5688_v14 }
 0x621   : > { %v4421_v3 = vpop.permute.xlu0 %4420  ;;  %4488 = vst.msk [vmem:[#allocation3 + $0xf8] sm:$0xff] %vm4456_vm6, %v4423_v34  ;;  %6986 = vmatpush3.msra.mxu0 %v5688_v14  ;;  %7071 = vmatpush3.msra.mxu1 %v5688_v14  ;;  %v6801_v14 = vld [vmem:[%s7994_s10 + $0x2f2] sm:$0xff] }
 0x622   : > { %4487 = vst.msk [vmem:[#allocation3 + $0xf0] sm:$0xff] %vm4456_vm6, %v4421_v3  ;;  %5363 = vrot.lane.b32.xlu1 %v6765_v27, %s7297_s29  ;;  %6987 = vmatprep.subr.mxu0 %v5687_v16  ;;  %v7177_v3 = vld [vmem:[%s7994_s10 + $0x1b2] sm:$0xff] }
 0x623   : > { %5331 = vrot.lane.b32.xlu0 %v10544_v7, %s7297_s29  ;;  %v5686_v7 = vld [vmem:[%s11616_s1 + $0x18] sm:$0xff]  ;;  %7056 = vmatprep.subr.mxu1 %v5687_v16 }
 0x624   : > { %v4558_v19 = vpop.permute.xlu1 %4557  ;;  %6988 = vmatpush3.msra.mxu0 %v5687_v16  ;;  %7072 = vmatpush3.msra.mxu1 %v5687_v16  ;;  %v6786_v16 = vld [vmem:[%s7994_s10 + $0x1c2] sm:$0xff] }
 0x625   : > { %v4556_v47 = vpop.permute.xlu0 %4555  ;;  %4653 = vst.msk [vmem:[#allocation3 + $0x8] sm:$0xff] %vm4651_vm7, %v4558_v19  ;;  %6989 = vmatprep.subr.mxu0 %v5686_v7  ;;  %7057 = vmatprep.subr.mxu1 %v5686_v7 }
 0x626   : > { %4652 = vst.msk [vmem:[#allocation3] sm:$0xff] %vm4651_vm7, %v4556_v47  ;;  %5554 = vrot.lane.b32.xlu1 %v10985_v0, %s7298_s4  ;;  %6990 = vmatpush3.msra.mxu0 %v5686_v7 }
 0x627   : > { %5522 = vrot.lane.b32.xlu0 %v10676_v49, %s7298_s4  ;;  %v5685_v49 = vld [vmem:[%s11616_s1 + $0x10] sm:$0xff]  ;;  %7073 = vmatpush3.msra.mxu1 %v5686_v7 }
 0x628   : > { %v4562_v40 = vpop.permute.xlu1 %4561  ;;  %6991 = vmatprep.subr.mxu0 %v5685_v49  ;;  %7058 = vmatprep.subr.mxu1 %v5685_v49 }
 0x629   : > { %v4560_v41 = vpop.permute.xlu0 %4559  ;;  %4655 = vst.msk [vmem:[#allocation3 + $0x18] sm:$0xff] %vm4651_vm7, %v4562_v40  ;;  %6992 = vmatpush3.msra.mxu0 %v5685_v49  ;;  %7074 = vmatpush3.msra.mxu1 %v5685_v49  ;;  %v6802_v40 = vld [vmem:[%s7994_s10 + $0x302] sm:$0xff] }
 0x62a   : > { %4654 = vst.msk [vmem:[#allocation3 + $0x10] sm:$0xff] %vm4651_vm7, %v4560_v41  ;;  %4945 = vrot.lane.b32.xlu1 %v10673_v53, %s7295_s9  ;;  %6993 = vmatprep.subr.mxu0 %v5684_v32 }
 0x62b   : > { %4786 = vrot.lane.b32.xlu0 %v11050_v30, %s7294_s6  ;;  %7059 = vmatprep.subr.mxu1 %v5684_v32 }
 0x62c   : > { %v4566_v4 = vpop.permute.xlu1 %4565  ;;  %6994 = vmatpush3.msra.mxu0 %v5684_v32  ;;  %7075 = vmatpush3.msra.mxu1 %v5684_v32  ;;  %v6836_v32 = vld [vmem:[%s7994_s10 + $0x310] sm:$0xff] }
 0x62d   : > { %v4564_v24 = vpop.permute.xlu0 %4563  ;;  %4657 = vst.msk [vmem:[#allocation3 + $0x28] sm:$0xff] %vm4651_vm7, %v4566_v4  ;;  %6995 = vmatprep.subr.mxu0 %v5683_v17  ;;  %7060 = vmatprep.subr.mxu1 %v5683_v17 }
 0x62e   : > { %4656 = vst.msk [vmem:[#allocation3 + $0x20] sm:$0xff] %vm4651_vm7, %v4564_v24  ;;  %5524 = vrot.lane.b32.xlu1 %v10673_v53, %s7298_s4  ;;  %v6798_v53 = vld [vmem:[%s7994_s10 + $0x2c2] sm:$0xff]  ;;  %6996 = vmatpush3.msra.mxu0 %v5683_v17 }
 0x62f   : > { %4977 = vrot.lane.b32.xlu0 %v6797_v6, %s7295_s9  ;;  %7076 = vmatpush3.msra.mxu1 %v5683_v17 }
 0x630   : > { %v4570_v37 = vpop.permute.xlu1 %4569 }
 0x631   : > { %v4568_v22 = vpop.permute.xlu0 %4567  ;;  %4659 = vst.msk [vmem:[#allocation3 + $0x38] sm:$0xff] %vm4651_vm7, %v4570_v37  ;;  %v6771_v37 = vld [vmem:[%s7994_s10 + $0x331] sm:$0xff] }
 0x632   : > { %4658 = vst.msk [vmem:[#allocation3 + $0x30] sm:$0xff] %vm4651_vm7, %v4568_v22  ;;  %4947 = vrot.lane.b32.xlu1 %v10688_v54, %s7295_s9 }
 0x633   : > { %5556 = vrot.lane.b32.xlu0 %v6797_v6, %s7298_s4  ;;  %v6820_v6 = vld [vmem:[%s7994_s10 + $0x1d0] sm:$0xff] }
 0x634   : > { %v4574_v52 = vpop.permute.xlu1 %4573 }
 0x635   : > { %v4572_v9 = vpop.permute.xlu0 %4571  ;;  %4661 = vst.msk [vmem:[#allocation3 + $0x48] sm:$0xff] %vm4651_vm7, %v4574_v52  ;;  %v6852_v52 = vld [vmem:[%s7994_s10 + $0x1d1] sm:$0xff] }
 0x636   : > { %4660 = vst.msk [vmem:[#allocation3 + $0x40] sm:$0xff] %vm4651_vm7, %v4572_v9  ;;  %5140 = vrot.lane.b32.xlu1 %v10790_v39, %s7296_s7  ;;  %v6767_v39 = vld [vmem:[%s7994_s10 + $0x2d1] sm:$0xff] }
 0x637   : > { %4979 = vrot.lane.b32.xlu0 %v6798_v53, %s7295_s9 }
 0x638   : > { %v4578_v42 = vpop.permute.xlu1 %4577 }
 0x639   : > { %v4576_v44 = vpop.permute.xlu0 %4575  ;;  %4663 = vst.msk [vmem:[#allocation3 + $0x58] sm:$0xff] %vm4651_vm7, %v4578_v42 }
 0x63a   : > { %4662 = vst.msk [vmem:[#allocation3 + $0x50] sm:$0xff] %vm4651_vm7, %v4576_v44  ;;  %5142 = vrot.lane.b32.xlu1 %v10805_v35, %s7296_s7  ;;  %v6848_v35 = vld [vmem:[%s7994_s10 + $0x191] sm:$0xff] }
 0x63b   : > { %5172 = vrot.lane.b32.xlu0 %v10859_v36, %s7296_s7 }
 0x63c   : > { %v4582_v8 = vpop.permute.xlu1 %4581 }
 0x63d   : > { %v4580_v63 = vpop.permute.xlu0 %4579  ;;  %4665 = vst.msk [vmem:[#allocation3 + $0x68] sm:$0xff] %vm4651_vm7, %v4582_v8  ;;  %v6772_v8 = vld [vmem:[%s7994_s10 + $0x341] sm:$0xff] }
 0x63e   : > { %4664 = vst.msk [vmem:[#allocation3 + $0x60] sm:$0xff] %vm4651_vm7, %v4580_v63  ;;  %5333 = vrot.lane.b32.xlu1 %v6847_v60, %s7297_s29  ;;  %v6787_v60 = vld [vmem:[%s7994_s10 + $0x1f2] sm:$0xff] }
 0x63f   : > { %5174 = vrot.lane.b32.xlu0 %v10874_v1, %s7296_s7 }
 0x640   : > { %v4586_v58 = vpop.permute.xlu1 %4585 }
 0x641   : > { %v4584_v15 = vpop.permute.xlu0 %4583  ;;  %4667 = vst.msk [vmem:[#allocation3 + $0x78] sm:$0xff] %vm4651_vm7, %v4586_v58  ;;  %v6884_v58 = vld [vmem:[%s7994_s10 + $0x1d2] sm:$0xff] }
 0x642   : > { %4666 = vst.msk [vmem:[#allocation3 + $0x70] sm:$0xff] %vm4651_vm7, %v4584_v15  ;;  %4788 = vrot.lane.b32.xlu1 %v6767_v39, %s7294_s6  ;;  %v6803_v15 = vld [vmem:[%s7994_s10 + $0x332] sm:$0xff] }
 0x643   : > { %5365 = vrot.lane.b32.xlu0 %v11050_v30, %s7297_s29 }
 0x644   : > { %v4590_v36 = vpop.permute.xlu1 %4589 }
 0x645   : > { %v4588_v38 = vpop.permute.xlu0 %4587  ;;  %4669 = vst.msk [vmem:[#allocation3 + $0x88] sm:$0xff] %vm4651_vm7, %v4590_v36 }
 0x646   : > { %4668 = vst.msk [vmem:[#allocation3 + $0x80] sm:$0xff] %vm4651_vm7, %v4588_v38  ;;  %5367 = vrot.lane.b32.xlu1 %v6767_v39, %s7297_s29  ;;  %v6788_v38 = vld [vmem:[%s7994_s10 + $0x202] sm:$0xff] }
 0x647   : > { %5335 = vrot.lane.b32.xlu0 %v6848_v35, %s7297_s29 }
 0x648   : > { %v4594_v1 = vpop.permute.xlu1 %4593 }
 0x649   : > { %v4592_v43 = vpop.permute.xlu0 %4591  ;;  %4671 = vst.msk [vmem:[#allocation3 + $0x98] sm:$0xff] %vm4651_vm7, %v4594_v1  ;;  %v6900_v1 = vld [vmem:[%s7994_s10 + $0x312] sm:$0xff] }
 0x64a   : > { %4670 = vst.msk [vmem:[#allocation3 + $0x90] sm:$0xff] %vm4651_vm7, %v4592_v43  ;;  %5558 = vrot.lane.b32.xlu1 %v6798_v53, %s7298_s4 }
 0x64b   : > { %5526 = vrot.lane.b32.xlu0 %v10688_v54, %s7298_s4 }
 0x64c   : > { %v4598_v33 = vpop.permute.xlu1 %4597 }
 0x64d   : > { %v4596_v55 = vpop.permute.xlu0 %4595  ;;  %4673 = vst.msk [vmem:[#allocation3 + $0xa8] sm:$0xff] %vm4651_vm7, %v4598_v33  ;;  %v6821_v33 = vld [vmem:[%s7994_s10 + $0x200] sm:$0xff] }
 0x64e   : > { %4672 = vst.msk [vmem:[#allocation3 + $0xa0] sm:$0xff] %vm4651_vm7, %v4596_v55  ;;  %4949 = vrot.lane.b32.xlu1 %v10685_v5, %s7295_s9  ;;  %v6804_v55 = vld [vmem:[%s7994_s10 + $0x342] sm:$0xff] }
 0x64f   : > { %4790 = vrot.lane.b32.xlu0 %v6768_v48, %s7294_s6 }
 0x650   : > { %v4602_v0 = vpop.permute.xlu1 %4601 }
 0x651   : > { %v4600_v25 = vpop.permute.xlu0 %4599  ;;  %4675 = vst.msk [vmem:[#allocation3 + $0xb8] sm:$0xff] %vm4651_vm7, %v4602_v0 }
 0x652   : > { %4674 = vst.msk [vmem:[#allocation3 + $0xb0] sm:$0xff] %vm4651_vm7, %v4600_v25  ;;  %5528 = vrot.lane.b32.xlu1 %v10685_v5, %s7298_s4 }
 0x653   : > { %4981 = vrot.lane.b32.xlu0 %v6799_v59, %s7295_s9 }
 0x654   : > { %v4606_v54 = vpop.permute.xlu1 %4605 }
 0x655   : > { %v4604_v61 = vpop.permute.xlu0 %4603  ;;  %4677 = vst.msk [vmem:[#allocation3 + $0xc8] sm:$0xff] %vm4651_vm7, %v4606_v54 }
 0x656   : > { %4676 = vst.msk [vmem:[#allocation3 + $0xc0] sm:$0xff] %vm4651_vm7, %v4604_v61  ;;  %4951 = vrot.lane.b32.xlu1 %v10698_v62, %s7295_s9  ;;  %v6849_v62 = vld [vmem:[%s7994_s10 + $0x1a1] sm:$0xff]  ;;  %v6822_v61 = vld [vmem:[%s7994_s10 + $0x210] sm:$0xff] }
 0x657   : > { %5560 = vrot.lane.b32.xlu0 %v6799_v59, %s7298_s4 }
 0x658   : > { %v4610_v2 = vpop.permute.xlu1 %4609 }
 0x659   : > { %v4608_v56 = vpop.permute.xlu0 %4607  ;;  %4679 = vst.msk [vmem:[#allocation3 + $0xd8] sm:$0xff] %vm4651_vm7, %v4610_v2 }
 0x65a   : > { %4678 = vst.msk [vmem:[#allocation3 + $0xd0] sm:$0xff] %vm4651_vm7, %v4608_v56  ;;  %5144 = vrot.lane.b32.xlu1 %v10802_v11, %s7296_s7  ;;  %v6769_v11 = vld [vmem:[%s7994_s10 + $0x2f1] sm:$0xff] }
 0x65b   : > { %4983 = vrot.lane.b32.xlu0 %v6800_v21, %s7295_s9 }
 0x65c   : > { %v4614_v5 = vpop.permute.xlu1 %4613 }
 0x65d   : > { %v4612_v20 = vpop.permute.xlu0 %4611  ;;  %4681 = vst.msk [vmem:[#allocation3 + $0xe8] sm:$0xff] %vm4651_vm7, %v4614_v5  ;;  %v6853_v5 = vld [vmem:[%s7994_s10 + $0x201] sm:$0xff] }
 0x65e   : > { %4680 = vst.msk [vmem:[#allocation3 + $0xe0] sm:$0xff] %vm4651_vm7, %v4612_v20  ;;  %5146 = vrot.lane.b32.xlu1 %v10817_v10, %s7296_s7  ;;  %v6838_v20 = vld [vmem:[%s7994_s10 + $0x350] sm:$0xff] }
 0x65f   : > { %5176 = vrot.lane.b32.xlu0 %v10871_v28, %s7296_s7  ;;  %v6850_v28 = vld [vmem:[%s7994_s10 + $0x1b1] sm:$0xff] }
 0x660   : > { %v4618_v46 = vpop.permute.xlu1 %4617 }
 0x661   : > { %v4616_v50 = vpop.permute.xlu0 %4615  ;;  %4683 = vst.msk [vmem:[#allocation3 + $0xf8] sm:$0xff] %vm4651_vm7, %v4618_v46 }
 0x662   : > { %4682 = vst.msk [vmem:[#allocation3 + $0xf0] sm:$0xff] %vm4651_vm7, %v4616_v50  ;;  %5337 = vrot.lane.b32.xlu1 %v6849_v62, %s7297_s29 }
 0x663   : > { %5178 = vrot.lane.b32.xlu0 %v10886_v13, %s7296_s7 }
 0x664   : > { %v4751_v51 = vpop.permute.xlu1 %4750 }
 0x665   : > { %v4749_v10 = vpop.permute.xlu0 %4748  ;;  %4846 = vst.msk [vmem:[#allocation3 + $0x8] sm:$0xff] %vm4844_vm8, %v4751_v51 }
 0x666   : > { %4845 = vst.msk [vmem:[#allocation3] sm:$0xff] %vm4844_vm8, %v4749_v10  ;;  %4792 = vrot.lane.b32.xlu1 %v6769_v11, %s7294_s6 }
 0x667   : > { %5369 = vrot.lane.b32.xlu0 %v6768_v48, %s7297_s29 }
 0x668   : > { %v4755_v23 = vpop.permute.xlu1 %4754 }
 0x669   : > { %v4753_v27 = vpop.permute.xlu0 %4752  ;;  %4848 = vst.msk [vmem:[#allocation3 + $0x18] sm:$0xff] %vm4844_vm8, %v4755_v23  ;;  %v6854_v23 = vld [vmem:[%s7994_s10 + $0x211] sm:$0xff] }
 0x66a   : > { %4847 = vst.msk [vmem:[#allocation3 + $0x10] sm:$0xff] %vm4844_vm8, %v4753_v27  ;;  %5371 = vrot.lane.b32.xlu1 %v6769_v11, %s7297_s29  ;;  %v6773_v11 = vld [vmem:[%s7994_s10 + $0x351] sm:$0xff] }
 0x66b   : > { %5339 = vrot.lane.b32.xlu0 %v6850_v28, %s7297_s29 }
 0x66c   : > { %v4759_v13 = vpop.permute.xlu1 %4758 }
 0x66d   : > { %v4757_v31 = vpop.permute.xlu0 %4756  ;;  %4850 = vst.msk [vmem:[#allocation3 + $0x28] sm:$0xff] %vm4844_vm8, %v4759_v13 }
 0x66e   : > { %4849 = vst.msk [vmem:[#allocation3 + $0x20] sm:$0xff] %vm4844_vm8, %v4757_v31  ;;  %5562 = vrot.lane.b32.xlu1 %v6800_v21, %s7298_s4  ;;  %v6837_v21 = vld [vmem:[%s7994_s10 + $0x340] sm:$0xff] }
 0x66f   : > { %5530 = vrot.lane.b32.xlu0 %v7176_v18, %s7298_s4 }
 0x670   : > { %v4763_v26 = vpop.permute.xlu1 %4762 }
 0x671   : > { %v4761_v34 = vpop.permute.xlu0 %4760  ;;  %4852 = vst.msk [vmem:[#allocation3 + $0x38] sm:$0xff] %vm4844_vm8, %v4763_v26  ;;  %v6758_v26 = vld [vmem:[%s7994_s10 + $0x221] sm:$0xff] }
 0x672   : > { %4851 = vst.msk [vmem:[#allocation3 + $0x30] sm:$0xff] %vm4844_vm8, %v4761_v34  ;;  %4953 = vrot.lane.b32.xlu1 %v7177_v3, %s7295_s9 }
 0x673   : > { %4794 = vrot.lane.b32.xlu0 %v6770_v12, %s7294_s6 }
 0x674   : > { %v4767_v19 = vpop.permute.xlu1 %4766 }
 0x675   : > { %v4765_v47 = vpop.permute.xlu0 %4764  ;;  %4854 = vst.msk [vmem:[#allocation3 + $0x48] sm:$0xff] %vm4844_vm8, %v4767_v19  ;;  %v6789_v19 = vld [vmem:[%s7994_s10 + $0x212] sm:$0xff] }
 0x676   : > { %4853 = vst.msk [vmem:[#allocation3 + $0x40] sm:$0xff] %vm4844_vm8, %v4765_v47  ;;  %5532 = vrot.lane.b32.xlu1 %v7177_v3, %s7298_s4 }
 0x677   : > { %4985 = vrot.lane.b32.xlu0 %v6801_v14, %s7295_s9 }
 0x678   : > { %v4781_v7 = vpop.permute.xlu1 %4780 }
 0x679   : > { %v4769_v30 = vpop.permute.xlu0 %4768  ;;  %4861 = vst.msk [vmem:[#allocation3 + $0x80] sm:$0xff] %vm4844_vm8, %v4781_v7 }
 0x67a   : > { %4855 = vst.msk [vmem:[#allocation3 + $0x50] sm:$0xff] %vm4844_vm8, %v4769_v30  ;;  %4955 = vrot.lane.b32.xlu1 %v6786_v16, %s7295_s9 }
 0x67b   : > { %5564 = vrot.lane.b32.xlu0 %v6801_v14, %s7298_s4  ;;  %v6805_v14 = vld [vmem:[%s7994_s10 + $0x352] sm:$0xff] }
 0x67c   : > { %v4942_v41 = vpop.permute.xlu1 %4941 }
 0x67d   : > { %v4783_v49 = vpop.permute.xlu0 %4782  ;;  %5038 = vst.msk [vmem:[#allocation3] sm:$0xff] %vm5037_vm9, %v4942_v41  ;;  %v6790_v41 = vld [vmem:[%s7994_s10 + $0x222] sm:$0xff] }
 0x67e   : > { %4862 = vst.msk [vmem:[#allocation3 + $0x88] sm:$0xff] %vm4844_vm8, %v4783_v49  ;;  %5148 = vrot.lane.b32.xlu1 %v10814_v57, %s7296_s7 }
 0x67f   : > { %4987 = vrot.lane.b32.xlu0 %v6802_v40, %s7295_s9 }
 0x680   : > { %v4944_v4 = vpop.permute.xlu1 %4943 }
 0x681   : > { %v4974_v24 = vpop.permute.xlu0 %4973  ;;  %5039 = vst.msk [vmem:[#allocation3 + $0x8] sm:$0xff] %vm5037_vm9, %v4944_v4 }
 0x682   : > { %5054 = vst.msk [vmem:[#allocation3 + $0x80] sm:$0xff] %vm5037_vm9, %v4974_v24  ;;  %5150 = vrot.lane.b32.xlu1 %v6820_v6, %s7296_s7 }
 0x683   : > { %5180 = vrot.lane.b32.xlu0 %v10883_v45, %s7296_s7  ;;  %v6868_v45 = vld [vmem:[%s7994_s10 + $0x311] sm:$0xff] }
 0x684   : > { %v5137_v57 = vpop.permute.xlu1 %5136 }
 0x685   : > { %v4976_v17 = vpop.permute.xlu0 %4975  ;;  %5233 = vst.msk [vmem:[#allocation3] sm:$0xff] %vm5232_vm10, %v5137_v57  ;;  %v6823_v57 = vld [vmem:[%s7994_s10 + $0x220] sm:$0xff] }
 0x686   : > { %5055 = vst.msk [vmem:[#allocation3 + $0x88] sm:$0xff] %vm5037_vm9, %v4976_v17  ;;  %5341 = vrot.lane.b32.xlu1 %v10937_v29, %s7297_s29 }
 0x687   : > { %5182 = vrot.lane.b32.xlu0 %v6836_v32, %s7296_s7  ;;  %v6839_v32 = vld [vmem:[%s7994_s10 + $0x360] sm:$0xff] }
 0x688   : > { %v5139_v22 = vpop.permute.xlu1 %5138 }
 0x689   : > { %v5169_v53 = vpop.permute.xlu0 %5168  ;;  %5234 = vst.msk [vmem:[#allocation3 + $0x8] sm:$0xff] %vm5232_vm10, %v5139_v22  ;;  %v6840_v22 = vld [vmem:[%s7994_s10 + $0x370] sm:$0xff] }
 0x68a   : > { %5249 = vst.msk [vmem:[#allocation3 + $0x80] sm:$0xff] %vm5232_vm10, %v5169_v53  ;;  %4796 = vrot.lane.b32.xlu1 %v6771_v37, %s7294_s6  ;;  %v6824_v53 = vld [vmem:[%s7994_s10 + $0x230] sm:$0xff] }
 0x68b   : > { %5373 = vrot.lane.b32.xlu0 %v6770_v12, %s7297_s29  ;;  %v6774_v12 = vld [vmem:[%s7994_s10 + $0x361] sm:$0xff] }
 0x68c   : > { %v5330_v9 = vpop.permute.xlu1 %5329 }
 0x68d   : > { %v5171_v29 = vpop.permute.xlu0 %5170  ;;  %5426 = vst.msk [vmem:[#allocation3] sm:$0xff] %vm5425_vm11, %v5330_v9 }
 0x68e   : > { %5250 = vst.msk [vmem:[#allocation3 + $0x88] sm:$0xff] %vm5232_vm10, %v5171_v29  ;;  %5375 = vrot.lane.b32.xlu1 %v6868_v45, %s7297_s29 }
 0x68f   : > { %5343 = vrot.lane.b32.xlu0 %v6852_v52, %s7297_s29 }
 0x690   : > { %v4785_v42 = vpop.permute.xlu1 %4784 }
 0x691   : > { %v5362_v44 = vpop.permute.xlu0 %5361  ;;  %4863 = vst.msk [vmem:[#allocation3 + $0x90] sm:$0xff] %vm4844_vm8, %v4785_v42 }
 0x692   : > { %5442 = vst.msk [vmem:[#allocation3 + $0x80] sm:$0xff] %vm5425_vm11, %v5362_v44  ;;  %5566 = vrot.lane.b32.xlu1 %v6802_v40, %s7298_s4  ;;  %v6806_v40 = vld [vmem:[%s7994_s10 + $0x362] sm:$0xff] }
 0x693   : > { %5534 = vrot.lane.b32.xlu0 %v6786_v16, %s7298_s4 }
 0x694   : > { %v5364_v63 = vpop.permute.xlu1 %5363 }
 0x695   : > { %v5332_v39 = vpop.permute.xlu0 %5331  ;;  %5443 = vst.msk [vmem:[#allocation3 + $0x88] sm:$0xff] %vm5425_vm11, %v5364_v63 }
 0x696   : > { %5427 = vst.msk [vmem:[#allocation3 + $0x8] sm:$0xff] %vm5425_vm11, %v5332_v39  ;;  %4957 = vrot.lane.b32.xlu1 %v6787_v60, %s7295_s9  ;;  %v6775_v60 = vld [vmem:[%s7994_s10 + $0x371] sm:$0xff] }
 0x697   : > { %4798 = vrot.lane.b32.xlu0 %v6772_v8, %s7294_s6 }
 0x698   : > { %v5555_v35 = vpop.permute.xlu1 %5554 }
 0x699   : > { %v5523_v36 = vpop.permute.xlu0 %5522  ;;  %5635 = vst.msk [vmem:[#allocation3 + $0x80] sm:$0xff] %vm5618_vm12, %v5555_v35 }
 0x69a   : > { %5619 = vst.msk [vmem:[#allocation3] sm:$0xff] %vm5618_vm12, %v5523_v36  ;;  %5536 = vrot.lane.b32.xlu1 %v6884_v58, %s7298_s4 }
 0x69b   : > { %4989 = vrot.lane.b32.xlu0 %v6803_v15, %s7295_s9 }
 0x69c   : > { %v4946_v43 = vpop.permute.xlu1 %4945 }
 0x69d   : > { %v4787_v48 = vpop.permute.xlu0 %4786  ;;  %5040 = vst.msk [vmem:[#allocation3 + $0x10] sm:$0xff] %vm5037_vm9, %v4946_v43 }
 0x69e   : > { %4864 = vst.msk [vmem:[#allocation3 + $0x98] sm:$0xff] %vm4844_vm8, %v4787_v48  ;;  %4959 = vrot.lane.b32.xlu1 %v6788_v38, %s7295_s9 }
 0x69f   : > { %5568 = vrot.lane.b32.xlu0 %v6900_v1, %s7298_s4  ;;  %v6760_v1 = vld [vmem:[%s7994_s10 + $0x241] sm:$0xff] }
 0x6a0   : > { %v5525_v59 = vpop.permute.xlu1 %5524  ;;  %v5667_v54 = vld [vmem:[#allocation3 + $0x80] sm:$0xff] }
 0x6a1   : > { %v4978_v0 = vpop.permute.xlu0 %4977  ;;  %v5651_v25 = vld [vmem:[#allocation3] sm:$0xff]  ;;  %5620 = vst.msk [vmem:[#allocation3 + $0x8] sm:$0xff] %vm5618_vm12, %v5525_v59  ;;  %7021 = vmatprep.mubr.f32.mxu1 %v5667_v54 }
 0x6a2   : > { %5056 = vst.msk [vmem:[#allocation3 + $0x90] sm:$0xff] %vm5037_vm9, %v4978_v0  ;;  %6997 = vmatprep.mubr.f32.mxu0 %v5651_v25  ;;  %5152 = vrot.lane.b32.xlu1 %v6821_v33, %s7296_s7  ;;  %v6807_v33 = vld [vmem:[%s7994_s10 + $0x372] sm:$0xff] }
 0x6a3   : > { %4991 = vrot.lane.b32.xlu0 %v6804_v55, %s7295_s9 }
 0x6a4   : > { %v4948_v2 = vpop.permute.xlu1 %4947 }
 0x6a5   : > { %v5557_v56 = vpop.permute.xlu0 %5556  ;;  %5041 = vst.msk [vmem:[#allocation3 + $0x18] sm:$0xff] %vm5037_vm9, %v4948_v2  ;;  %v6808_v2 = vld [vmem:[%s7994_s10 + $0x382] sm:$0xff] }
 0x6a6   : > { %5636 = vst.msk [vmem:[#allocation3 + $0x88] sm:$0xff] %vm5618_vm12, %v5557_v56  ;;  %5154 = vrot.lane.b32.xlu1 %v6822_v61, %s7296_s7  ;;  %v6792_v56 = vld [vmem:[%s7994_s10 + $0x242] sm:$0xff] }
 0x6a7   : > { %5184 = vrot.lane.b32.xlu0 %v6837_v21, %s7296_s7 }
 0x6a8   : > { %v5141_v62 = vpop.permute.xlu1 %5140  ;;  %v5652_v50 = vld [vmem:[#allocation3 + $0x8] sm:$0xff] }
 0x6a9   : > { %v4980_v46 = vpop.permute.xlu0 %4979  ;;  %5235 = vst.msk [vmem:[#allocation3 + $0x10] sm:$0xff] %vm5232_vm10, %v5141_v62  ;;  %6998 = vmatmul.mubr.f32.vlgmr.msra.gmra.mxu0 %v5652_v50  ;;  %v6841_v62 = vld [vmem:[%s7994_s10 + $0x380] sm:$0xff] }
 0x6aa   : > { %5057 = vst.msk [vmem:[#allocation3 + $0x98] sm:$0xff] %vm5037_vm9, %v4980_v46  ;;  %5345 = vrot.lane.b32.xlu1 %v6853_v5, %s7297_s29  ;;  %v6825_v46 = vld [vmem:[%s7994_s10 + $0x240] sm:$0xff] }
 0x6ab   : > { %5186 = vrot.lane.b32.xlu0 %v6838_v20, %s7296_s7 }
 0x6ac   : > { %v5143_v51 = vpop.permute.xlu1 %5142 }
 0x6ad   : > { %v5173_v10 = vpop.permute.xlu0 %5172  ;;  %v5668_v28 = vld [vmem:[#allocation3 + $0x88] sm:$0xff]  ;;  %5236 = vst.msk [vmem:[#allocation3 + $0x18] sm:$0xff] %vm5232_vm10, %v5143_v51 }
 0x6ae   : > { %5251 = vst.msk [vmem:[#allocation3 + $0x90] sm:$0xff] %vm5232_vm10, %v5173_v10  ;;  %7022 = vmatmul.mubr.f32.vlgmr.msra.gmra.mxu1 %v5668_v28  ;;  %4800 = vrot.lane.b32.xlu1 %v6773_v11, %s7294_s6  ;;  %v6842_v10 = vld [vmem:[%s7994_s10 + $0x390] sm:$0xff] }
 0x6af   : > { %5377 = vrot.lane.b32.xlu0 %v6772_v8, %s7297_s29  ;;  %v6759_v8 = vld [vmem:[%s7994_s10 + $0x231] sm:$0xff] }
 0x6b0   : > { %v5334_v27 = vpop.permute.xlu1 %5333  ;;  %v6826_v28 = vld [vmem:[%s7994_s10 + $0x250] sm:$0xff] }
 0x6b1   : > { %v5175_v13 = vpop.permute.xlu0 %5174  ;;  %5428 = vst.msk [vmem:[#allocation3 + $0x10] sm:$0xff] %vm5425_vm11, %v5334_v27 }
 0x6b2   : > { %5252 = vst.msk [vmem:[#allocation3 + $0x98] sm:$0xff] %vm5232_vm10, %v5175_v13  ;;  %5379 = vrot.lane.b32.xlu1 %v6773_v11, %s7297_s29 }
 0x6b3   : > { %5347 = vrot.lane.b32.xlu0 %v6854_v23, %s7297_s29 }
 0x6b4   : > { %v4789_v31 = vpop.permute.xlu1 %4788 }
 0x6b5   : > { %v5366_v18 = vpop.permute.xlu0 %5365  ;;  %4865 = vst.msk [vmem:[#allocation3 + $0xa0] sm:$0xff] %vm4844_vm8, %v4789_v31 }
 0x6b6   : > { %5444 = vst.msk [vmem:[#allocation3 + $0x90] sm:$0xff] %vm5425_vm11, %v5366_v18  ;;  %5570 = vrot.lane.b32.xlu1 %v6804_v55, %s7298_s4  ;;  %v6791_v55 = vld [vmem:[%s7994_s10 + $0x232] sm:$0xff] }
 0x6b7   : > { %5538 = vrot.lane.b32.xlu0 %v6788_v38, %s7298_s4  ;;  %v6776_v38 = vld [vmem:[%s7994_s10 + $0x381] sm:$0xff] }
 0x6b8   : > { %v5368_v34 = vpop.permute.xlu1 %5367 }
 0x6b9   : > { %v5336_v3 = vpop.permute.xlu0 %5335  ;;  %5445 = vst.msk [vmem:[#allocation3 + $0x98] sm:$0xff] %vm5425_vm11, %v5368_v34 }
 0x6ba   : > { %5429 = vst.msk [vmem:[#allocation3 + $0x18] sm:$0xff] %vm5425_vm11, %v5336_v3  ;;  %4802 = vrot.lane.b32.xlu1 %v6774_v12, %s7294_s6 }
 0x6bb   : > { %4770 = vrot.lane.b32.xlu0 %v6758_v26, %s7294_s6 }
 0x6bc   : > { %v5559_v47 = vpop.permute.xlu1 %5558 }
 0x6bd   : > { %v5527_v16 = vpop.permute.xlu0 %5526  ;;  %5637 = vst.msk [vmem:[#allocation3 + $0x90] sm:$0xff] %vm5618_vm12, %v5559_v47 }
 0x6be   : > { %5621 = vst.msk [vmem:[#allocation3 + $0x10] sm:$0xff] %vm5618_vm12, %v5527_v16  ;;  %4993 = vrot.lane.b32.xlu1 %v6805_v14, %s7295_s9 }
 0x6bf   : > { %4961 = vrot.lane.b32.xlu0 %v6789_v19, %s7295_s9 }
 0x6c0   : > { %v4950_v7 = vpop.permute.xlu1 %4949 }
 0x6c1   : > { %v4791_v30 = vpop.permute.xlu0 %4790  ;;  %5042 = vst.msk [vmem:[#allocation3 + $0x20] sm:$0xff] %vm5037_vm9, %v4950_v7  ;;  %v6778_v7 = vld [vmem:[%s7994_s10 + $0x3a1] sm:$0xff] }
 0x6c2   : > { %4866 = vst.msk [vmem:[#allocation3 + $0xa8] sm:$0xff] %vm4844_vm8, %v4791_v30  ;;  %5572 = vrot.lane.b32.xlu1 %v6805_v14, %s7298_s4  ;;  %v6762_v30 = vld [vmem:[%s7994_s10 + $0x261] sm:$0xff] }
 0x6c3   : > { %5540 = vrot.lane.b32.xlu0 %v6789_v19, %s7298_s4 }
 0x6c4   : > { %v5529_v49 = vpop.permute.xlu1 %5528  ;;  %v5669_v24 = vld [vmem:[#allocation3 + $0x90] sm:$0xff] }
 0x6c5   : > { %v4982_v6 = vpop.permute.xlu0 %4981  ;;  %v5653_v4 = vld [vmem:[#allocation3 + $0x10] sm:$0xff]  ;;  %5622 = vst.msk [vmem:[#allocation3 + $0x18] sm:$0xff] %vm5618_vm12, %v5529_v49  ;;  %7024 = vmatprep.mubr.f32.mxu1 %v5669_v24 }
 0x6c6   : > { %5058 = vst.msk [vmem:[#allocation3 + $0xa0] sm:$0xff] %vm5037_vm9, %v4982_v6  ;;  %7000 = vmatprep.mubr.f32.mxu0 %v5653_v4  ;;  %4995 = vrot.lane.b32.xlu1 %v6806_v40, %s7295_s9  ;;  %v6809_v49 = vld [vmem:[%s7994_s10 + $0x392] sm:$0xff] }
 0x6c7   : > { %4963 = vrot.lane.b32.xlu0 %v6790_v41, %s7295_s9  ;;  %v6793_v6 = vld [vmem:[%s7994_s10 + $0x252] sm:$0xff] }
 0x6c8   : > { %v4952_v17 = vpop.permute.xlu1 %4951 }
 0x6c9   : > { %v5561_v37 = vpop.permute.xlu0 %5560  ;;  %5043 = vst.msk [vmem:[#allocation3 + $0x28] sm:$0xff] %vm5037_vm9, %v4952_v17 }
 0x6ca   : > { %5638 = vst.msk [vmem:[#allocation3 + $0x98] sm:$0xff] %vm5618_vm12, %v5561_v37  ;;  %5188 = vrot.lane.b32.xlu1 %v6839_v32, %s7296_s7 }
 0x6cb   : > { %5156 = vrot.lane.b32.xlu0 %v6823_v57, %s7296_s7 }
 0x6cc   : > { %v5145_v45 = vpop.permute.xlu1 %5144  ;;  %v5654_v9 = vld [vmem:[#allocation3 + $0x18] sm:$0xff] }
 0x6cd   : > { %v4984_v52 = vpop.permute.xlu0 %4983  ;;  %5237 = vst.msk [vmem:[#allocation3 + $0x20] sm:$0xff] %vm5232_vm10, %v5145_v45  ;;  %7001 = vmatmul.mubr.f32.gmra.mxu0 %v5654_v9 }
 0x6ce   : > { %5059 = vst.msk [vmem:[#allocation3 + $0xa8] sm:$0xff] %vm5037_vm9, %v4984_v52  ;;  %5190 = vrot.lane.b32.xlu1 %v6840_v22, %s7296_s7  ;;  %v6810_v22 = vld [vmem:[%s7994_s10 + $0x3a2] sm:$0xff] }
 0x6cf   : > { %5158 = vrot.lane.b32.xlu0 %v6824_v53, %s7296_s7  ;;  %v6794_v53 = vld [vmem:[%s7994_s10 + $0x262] sm:$0xff] }
 0x6d0   : > { %v5147_v29 = vpop.permute.xlu1 %5146 }
 0x6d1   : > { %v5177_v42 = vpop.permute.xlu0 %5176  ;;  %v5670_v44 = vld [vmem:[#allocation3 + $0x98] sm:$0xff]  ;;  %5238 = vst.msk [vmem:[#allocation3 + $0x28] sm:$0xff] %vm5232_vm10, %v5147_v29  ;;  %v6843_v29 = vld [vmem:[%s7994_s10 + $0x3a0] sm:$0xff] }
 0x6d2   : > { %5253 = vst.msk [vmem:[#allocation3 + $0xa0] sm:$0xff] %vm5232_vm10, %v5177_v42  ;;  %7025 = vmatmul.mubr.f32.gmra.mxu1 %v5670_v44  ;;  %5381 = vrot.lane.b32.xlu1 %v6774_v12, %s7297_s29  ;;  %v6777_v12 = vld [vmem:[%s7994_s10 + $0x391] sm:$0xff]  ;;  %v6827_v42 = vld [vmem:[%s7994_s10 + $0x260] sm:$0xff] }
 0x6d3   : > { %5349 = vrot.lane.b32.xlu0 %v6758_v26, %s7297_s29  ;;  %v6761_v26 = vld [vmem:[%s7994_s10 + $0x251] sm:$0xff] }
 0x6d4   : > { %v5338_v63 = vpop.permute.xlu1 %5337 }
 0x6d5   : > { %v5179_v39 = vpop.permute.xlu0 %5178  ;;  %5430 = vst.msk [vmem:[#allocation3 + $0x20] sm:$0xff] %vm5425_vm11, %v5338_v63  ;;  %v6844_v63 = vld [vmem:[%s7994_s10 + $0x3b0] sm:$0xff] }
 0x6d6   : > { %5254 = vst.msk [vmem:[#allocation3 + $0xa8] sm:$0xff] %vm5232_vm10, %v5179_v39  ;;  %4804 = vrot.lane.b32.xlu1 %v6775_v60, %s7294_s6  ;;  %v6828_v39 = vld [vmem:[%s7994_s10 + $0x270] sm:$0xff] }
 0x6d7   : > { %4772 = vrot.lane.b32.xlu0 %v6759_v8, %s7294_s6 }
 0x6d8   : > { %v4793_v58 = vpop.permute.xlu1 %4792 }
 0x6d9   : > { %v5370_v15 = vpop.permute.xlu0 %5369  ;;  %4867 = vst.msk [vmem:[#allocation3 + $0xb0] sm:$0xff] %vm4844_vm8, %v4793_v58 }
 0x6da   : > { %5446 = vst.msk [vmem:[#allocation3 + $0xa0] sm:$0xff] %vm5425_vm11, %v5370_v15  ;;  %5383 = vrot.lane.b32.xlu1 %v6775_v60, %s7297_s29 }
 0x6db   : > { %5351 = vrot.lane.b32.xlu0 %v6759_v8, %s7297_s29 }
 0x6dc   : > { %v5372_v35 = vpop.permute.xlu1 %5371 }
 0x6dd   : > { %v5340_v36 = vpop.permute.xlu0 %5339  ;;  %5447 = vst.msk [vmem:[#allocation3 + $0xa8] sm:$0xff] %vm5425_vm11, %v5372_v35 }
 0x6de   : > { %5431 = vst.msk [vmem:[#allocation3 + $0x28] sm:$0xff] %vm5425_vm11, %v5340_v36  ;;  %5574 = vrot.lane.b32.xlu1 %v6806_v40, %s7298_s4 }
 0x6df   : > { %5542 = vrot.lane.b32.xlu0 %v6790_v41, %s7298_s4 }
 0x6e0   : > { %v5563_v43 = vpop.permute.xlu1 %5562 }
 0x6e1   : > { %v5531_v48 = vpop.permute.xlu0 %5530  ;;  %5639 = vst.msk [vmem:[#allocation3 + $0xa0] sm:$0xff] %vm5618_vm12, %v5563_v43 }
 0x6e2   : > { %5623 = vst.msk [vmem:[#allocation3 + $0x20] sm:$0xff] %vm5618_vm12, %v5531_v48  ;;  %4806 = vrot.lane.b32.xlu1 %v6776_v38, %s7294_s6 }
 0x6e3   : > { %4774 = vrot.lane.b32.xlu0 %v6760_v1, %s7294_s6 }
 0x6e4   : > { %v4954_v59 = vpop.permute.xlu1 %4953 }
 0x6e5   : > { %v4795_v0 = vpop.permute.xlu0 %4794  ;;  %5044 = vst.msk [vmem:[#allocation3 + $0x30] sm:$0xff] %vm5037_vm9, %v4954_v59  ;;  %v6908_v59 = vld [vmem:[%s7994_s10 + $0x3b2] sm:$0xff] }
 0x6e6   : > { %4868 = vst.msk [vmem:[#allocation3 + $0xb8] sm:$0xff] %vm4844_vm8, %v4795_v0  ;;  %4997 = vrot.lane.b32.xlu1 %v6807_v33, %s7295_s9  ;;  %v6892_v0 = vld [vmem:[%s7994_s10 + $0x272] sm:$0xff] }
 0x6e7   : > { %4965 = vrot.lane.b32.xlu0 %v6791_v55, %s7295_s9 }
 0x6e8   : > { %v5533_v25 = vpop.permute.xlu1 %5532  ;;  %v5671_v21 = vld [vmem:[#allocation3 + $0xa0] sm:$0xff] }
 0x6e9   : > { %v4986_v54 = vpop.permute.xlu0 %4985  ;;  %v5655_v61 = vld [vmem:[#allocation3 + $0x20] sm:$0xff]  ;;  %5624 = vst.msk [vmem:[#allocation3 + $0x28] sm:$0xff] %vm5618_vm12, %v5533_v25  ;;  %7027 = vmatprep.mubr.f32.mxu1 %v5671_v21 }
 0x6ea   : > { %5060 = vst.msk [vmem:[#allocation3 + $0xb0] sm:$0xff] %vm5037_vm9, %v4986_v54  ;;  %7003 = vmatprep.mubr.f32.mxu0 %v5655_v61  ;;  %5576 = vrot.lane.b32.xlu1 %v6807_v33, %s7298_s4 }
 0x6eb   : > { %5544 = vrot.lane.b32.xlu0 %v6791_v55, %s7298_s4 }
 0x6ec   : > { %v4956_v5 = vpop.permute.xlu1 %4955 }
 0x6ed   : > { %v5565_v20 = vpop.permute.xlu0 %5564  ;;  %5045 = vst.msk [vmem:[#allocation3 + $0x38] sm:$0xff] %vm5037_vm9, %v4956_v5 }
 0x6ee   : > { %5640 = vst.msk [vmem:[#allocation3 + $0xa8] sm:$0xff] %vm5618_vm12, %v5565_v20  ;;  %4999 = vrot.lane.b32.xlu1 %v6808_v2, %s7295_s9 }
 0x6ef   : > { %4967 = vrot.lane.b32.xlu0 %v6792_v56, %s7295_s9 }
 0x6f0   : > { %v5149_v50 = vpop.permute.xlu1 %5148  ;;  %v5656_v51 = vld [vmem:[#allocation3 + $0x28] sm:$0xff] }
 0x6f1   : > { %v4988_v11 = vpop.permute.xlu0 %4987  ;;  %5239 = vst.msk [vmem:[#allocation3 + $0x30] sm:$0xff] %vm5232_vm10, %v5149_v50  ;;  %7004 = vmatmul.mubr.f32.gmra.mxu0 %v5656_v51 }
 0x6f2   : > { %5061 = vst.msk [vmem:[#allocation3 + $0xb8] sm:$0xff] %vm5037_vm9, %v4988_v11  ;;  %5192 = vrot.lane.b32.xlu1 %v6841_v62, %s7296_s7 }
 0x6f3   : > { %5160 = vrot.lane.b32.xlu0 %v6825_v46, %s7296_s7 }
 0x6f4   : > { %v5151_v23 = vpop.permute.xlu1 %5150 }
 0x6f5   : > { %v5181_v27 = vpop.permute.xlu0 %5180  ;;  %v5672_v13 = vld [vmem:[#allocation3 + $0xa8] sm:$0xff]  ;;  %5240 = vst.msk [vmem:[#allocation3 + $0x38] sm:$0xff] %vm5232_vm10, %v5151_v23 }
 0x6f6   : > { %5255 = vst.msk [vmem:[#allocation3 + $0xb0] sm:$0xff] %vm5232_vm10, %v5181_v27  ;;  %7028 = vmatmul.mubr.f32.gmra.mxu1 %v5672_v13  ;;  %5194 = vrot.lane.b32.xlu1 %v6842_v10, %s7296_s7 }
 0x6f7   : > { %5162 = vrot.lane.b32.xlu0 %v6826_v28, %s7296_s7 }
 0x6f8   : > { %v5342_v31 = vpop.permute.xlu1 %5341 }
 0x6f9   : > { %v5183_v18 = vpop.permute.xlu0 %5182  ;;  %5432 = vst.msk [vmem:[#allocation3 + $0x30] sm:$0xff] %vm5425_vm11, %v5342_v31 }
 0x6fa   : > { %5256 = vst.msk [vmem:[#allocation3 + $0xb8] sm:$0xff] %vm5232_vm10, %v5183_v18  ;;  %5385 = vrot.lane.b32.xlu1 %v6776_v38, %s7297_s29  ;;  %v6876_v38 = vld [vmem:[%s7994_s10 + $0x3b1] sm:$0xff] }
 0x6fb   : > { %5353 = vrot.lane.b32.xlu0 %v6760_v1, %s7297_s29  ;;  %v6860_v1 = vld [vmem:[%s7994_s10 + $0x271] sm:$0xff]  ;;  %s175_s10 = sand.u32 1, %s7246_s13  }
 0x6fc   : > { %v4797_v34 = vpop.permute.xlu1 %4796  ;;  %s11563_s28 = scalar_lea.sflag [#allocation5], %s175_s10 }
 0x6fd   : > { %v5374_v3 = vpop.permute.xlu0 %5373  ;;  %4869 = vst.msk [vmem:[#allocation3 + $0xc0] sm:$0xff] %vm4844_vm8, %v4797_v34 }
 0x6fe   : > { %5448 = vst.msk [vmem:[#allocation3 + $0xb0] sm:$0xff] %vm5425_vm11, %v5374_v3  ;;  %4808 = vrot.lane.b32.xlu1 %v6777_v12, %s7294_s6 }
 0x6ff   : > { %4776 = vrot.lane.b32.xlu0 %v6761_v26, %s7294_s6 }
 0x700   : > { %v5376_v14 = vpop.permute.xlu1 %5375 }
 0x701   : > { %v5344_v19 = vpop.permute.xlu0 %5343  ;;  %5449 = vst.msk [vmem:[#allocation3 + $0xb8] sm:$0xff] %vm5425_vm11, %v5376_v14 }
 0x702   : > { %5433 = vst.msk [vmem:[#allocation3 + $0x38] sm:$0xff] %vm5425_vm11, %v5344_v19  ;;  %5387 = vrot.lane.b32.xlu1 %v6777_v12, %s7297_s29 }
 0x703   : > { %5355 = vrot.lane.b32.xlu0 %v6761_v26, %s7297_s29 }
 0x704   : > { %v5567_v47 = vpop.permute.xlu1 %5566 }
 0x705   : > { %v5535_v16 = vpop.permute.xlu0 %5534  ;;  %5641 = vst.msk [vmem:[#allocation3 + $0xb0] sm:$0xff] %vm5618_vm12, %v5567_v47 }
 0x706   : > { %5625 = vst.msk [vmem:[#allocation3 + $0x30] sm:$0xff] %vm5618_vm12, %v5535_v16  ;;  %5578 = vrot.lane.b32.xlu1 %v6808_v2, %s7298_s4 }
 0x707   : > { %5546 = vrot.lane.b32.xlu0 %v6792_v56, %s7298_s4 }
 0x708   : > { %v4958_v40 = vpop.permute.xlu1 %4957 }
 0x709   : > { %v4799_v41 = vpop.permute.xlu0 %4798  ;;  %5046 = vst.msk [vmem:[#allocation3 + $0x40] sm:$0xff] %vm5037_vm9, %v4958_v40 }
 0x70a   : > { %4870 = vst.msk [vmem:[#allocation3 + $0xc8] sm:$0xff] %vm4844_vm8, %v4799_v41  ;;  %4810 = vrot.lane.b32.xlu1 %v6778_v7, %s7294_s6 }
 0x70b   : > { %4778 = vrot.lane.b32.xlu0 %v6762_v30, %s7294_s6  ;;  %s7299_s6 = smov [#allocation4]  }
 0x70c   : > { %v5537_v4 = vpop.permute.xlu1 %5536  ;;  %v5673_v57 = vld [vmem:[#allocation3 + $0xb0] sm:$0xff] }
 0x70d   : > { %v4990_v24 = vpop.permute.xlu0 %4989  ;;  %v5657_v32 = vld [vmem:[#allocation3 + $0x30] sm:$0xff]  ;;  %5626 = vst.msk [vmem:[#allocation3 + $0x38] sm:$0xff] %vm5618_vm12, %v5537_v4  ;;  %7030 = vmatprep.mubr.f32.mxu1 %v5673_v57 }
 0x70e   : > { %5062 = vst.msk [vmem:[#allocation3 + $0xc0] sm:$0xff] %vm5037_vm9, %v4990_v24  ;;  %7006 = vmatprep.mubr.f32.mxu0 %v5657_v32  ;;  %5001 = vrot.lane.b32.xlu1 %v6809_v49, %s7295_s9 }
 0x70f   : > { %4969 = vrot.lane.b32.xlu0 %v6793_v6, %s7295_s9 }
 0x710   : > { %v4960_v17 = vpop.permute.xlu1 %4959 }
 0x711   : > { %v5569_v37 = vpop.permute.xlu0 %5568  ;;  %5047 = vst.msk [vmem:[#allocation3 + $0x48] sm:$0xff] %vm5037_vm9, %v4960_v17  ;;  %v11451_v17 = vld [vmem:[%s11617_s2] ss:$0 sm:$0xff] }
 0x712   : > { %5642 = vst.msk [vmem:[#allocation3 + $0xb8] sm:$0xff] %vm5618_vm12, %v5569_v37  ;;  %5580 = vrot.lane.b32.xlu1 %v6809_v49, %s7298_s4 }
 0x713   : > { %5548 = vrot.lane.b32.xlu0 %v6793_v6, %s7298_s4 }
 0x714   : > { %v5153_v45 = vpop.permute.xlu1 %5152  ;;  %v5658_v9 = vld [vmem:[#allocation3 + $0x38] sm:$0xff] }
 0x715   : > { %v4992_v52 = vpop.permute.xlu0 %4991  ;;  %5241 = vst.msk [vmem:[#allocation3 + $0x40] sm:$0xff] %vm5232_vm10, %v5153_v45  ;;  %7007 = vmatmul.mubr.f32.gmra.mxu0 %v5658_v9 }
 0x716   : > { %5063 = vst.msk [vmem:[#allocation3 + $0xc8] sm:$0xff] %vm5037_vm9, %v4992_v52  ;;  %5003 = vrot.lane.b32.xlu1 %v6810_v22, %s7295_s9 }
 0x717   : > { %4971 = vrot.lane.b32.xlu0 %v6794_v53, %s7295_s9  ;;  %s7182_s9 = sshll.u32 %s7299_s6, 4  ;;  %s7183_s9 = int_to_ptr.vmem [resolvable:$false] %s7182_s9 }
 0x718   : > { %v5155_v44 = vpop.permute.xlu1 %5154 }
 0x719   : > { %v5185_v60 = vpop.permute.xlu0 %5184  ;;  %v5674_v8 = vld [vmem:[#allocation3 + $0xb8] sm:$0xff]  ;;  %5242 = vst.msk [vmem:[#allocation3 + $0x48] sm:$0xff] %vm5232_vm10, %v5155_v44 }
 0x71a   : > { %5257 = vst.msk [vmem:[#allocation3 + $0xc0] sm:$0xff] %vm5232_vm10, %v5185_v60  ;;  %7031 = vmatmul.mubr.f32.gmra.mxu1 %v5674_v8  ;;  %5196 = vrot.lane.b32.xlu1 %v6843_v29, %s7296_s7 }
 0x71b   : > { %5164 = vrot.lane.b32.xlu0 %v6827_v42, %s7296_s7 }
 0x71c   : > { %v5346_v58 = vpop.permute.xlu1 %5345 }
 0x71d   : > { %v5187_v15 = vpop.permute.xlu0 %5186  ;;  %5434 = vst.msk [vmem:[#allocation3 + $0x40] sm:$0xff] %vm5425_vm11, %v5346_v58 }
 0x71e   : > { %5258 = vst.msk [vmem:[#allocation3 + $0xc8] sm:$0xff] %vm5232_vm10, %v5187_v15  ;;  %5198 = vrot.lane.b32.xlu1 %v6844_v63, %s7296_s7 }
 0x71f   : > { %5166 = vrot.lane.b32.xlu0 %v6828_v39, %s7296_s7  ;;  %s6124_s7 = sshll.u32 %s175_s10, 8 }
 0x720   : > { %v4801_v35 = vpop.permute.xlu1 %4800 }
 0x721   : > { %v5378_v36 = vpop.permute.xlu0 %5377  ;;  %4871 = vst.msk [vmem:[#allocation3 + $0xd0] sm:$0xff] %vm4844_vm8, %v4801_v35 }
 0x722   : > { %5450 = vst.msk [vmem:[#allocation3 + $0xc0] sm:$0xff] %vm5425_vm11, %v5378_v36  ;;  %5389 = vrot.lane.b32.xlu1 %v6778_v7, %s7297_s29 }
 0x723   : > { %5357 = vrot.lane.b32.xlu0 %v6762_v30, %s7297_s29 }
 0x724   : > { %v5380_v43 = vpop.permute.xlu1 %5379 }
 0x725   : > { %v5348_v48 = vpop.permute.xlu0 %5347  ;;  %5451 = vst.msk [vmem:[#allocation3 + $0xc8] sm:$0xff] %vm5425_vm11, %v5380_v43 }
 0x726   : > { %5435 = vst.msk [vmem:[#allocation3 + $0x48] sm:$0xff] %vm5425_vm11, %v5348_v48  ;;  %5391 = vrot.lane.b32.xlu1 %v6876_v38, %s7297_s29 }
 0x727   : > { %5359 = vrot.lane.b32.xlu0 %v6860_v1, %s7297_s29  ;;  %s11461_s29 = scalar_lea.vmem [#allocation4], %s6124_s7  ;;  %s7184_s7 = scalar_lea.vmem %s7183_s9, 8192 }
 0x728   : > { %v5571_v33 = vpop.permute.xlu1 %5570  ;;  %s6011_s24 = sshll.u32 %s11461_s29, 4  ;;  %s11557_s24 = int_to_ptr.vmem [resolvable:$true] %s6011_s24 }
 0x729   : > { %v5539_v55 = vpop.permute.xlu0 %5538  ;;  %5643 = vst.msk [vmem:[#allocation3 + $0xc0] sm:$0xff] %vm5618_vm12, %v5571_v33  ;;  %s7178_s5 = scalar_lea.vmem %s11557_s24, 4096  ;;  %p7185_p2 = scmp.lt.s32.totalorder %s11557_s24, %s7183_s9 }
 0x72a   : > { %5627 = vst.msk [vmem:[#allocation3 + $0x40] sm:$0xff] %vm5618_vm12, %v5539_v55  ;;  %5582 = vrot.lane.b32.xlu1 %v6810_v22, %s7298_s4  ;;  %p7179_p13 = scmp.ne.s32.totalorder %s11557_s24, %s7178_s5  ;;  %p7186_p4 = scmp.lt.s32.totalorder %s7184_s7, %s7178_s5 }
 0x72b   : > { %5550 = vrot.lane.b32.xlu0 %v6794_v53, %s7298_s4 }
 0x72c   : > { %v4803_v25 = vpop.permute.xlu1 %4802  ;;  %p7180_p0 = pnand %p7179_p13, %p7372_p3  ;;  %p7187_p5 = por %p7186_p4, %p7185_p2 }
 0x72d   : > { %v4771_v54 = vpop.permute.xlu0 %4770  ;;  %4872 = vst.msk [vmem:[#allocation3 + $0xd8] sm:$0xff] %vm4844_vm8, %v4803_v25 }
 0x72e   : > { %4856 = vst.msk [vmem:[#allocation3 + $0x58] sm:$0xff] %vm4844_vm8, %v4771_v54  ;;  %5584 = vrot.lane.b32.xlu1 %v6908_v59, %s7298_s4  ;;  %p7181_p1 = pneg %p7180_p0 }
 0x72f   : > { %5552 = vrot.lane.b32.xlu0 %v6892_v0, %s7298_s4  ;;  %s6911_s4 = sshll.u32 %s7254_s15, 5 }
 0x730   : > { %v4994_v61 = vpop.permute.xlu1 %4993  ;;  %v5675_v56 = vld [vmem:[#allocation3 + $0xc0] sm:$0xff]  ;;  %s6008_s11 = sadd.s32 %s6912_s8, %s6911_s4  ;;  %p7188_p6 = pnand %p7187_p5, %p7181_p1 }
 0x731   : > { %v4962_v21 = vpop.permute.xlu0 %4961  ;;  %v5659_v2 = vld [vmem:[#allocation3 + $0x40] sm:$0xff]  ;;  %5064 = vst.msk [vmem:[#allocation3 + $0xd0] sm:$0xff] %vm5037_vm9, %v4994_v61  ;;  %7033 = vmatprep.mubr.f32.mxu1 %v5675_v56  ;;  %s6913_s21 = sshll.u32 %s6008_s11, 7 }
 0x732   : > { %5048 = vst.msk [vmem:[#allocation3 + $0x50] sm:$0xff] %vm5037_vm9, %v4962_v21  ;;  %7009 = vmatprep.mubr.f32.mxu0 %v5659_v2  ;;  %s11553_s27 = scalar_lea.hbm %s11618_s3, %s6913_s21 }
 0x734   : > { %v5573_v5 = vpop.permute.xlu1 %5572 }
 0x735   : > { %v5541_v20 = vpop.permute.xlu0 %5540  ;;  %5644 = vst.msk [vmem:[#allocation3 + $0xc8] sm:$0xff] %vm5618_vm12, %v5573_v5 }
 0x736   : > { %5628 = vst.msk [vmem:[#allocation3 + $0x48] sm:$0xff] %vm5618_vm12, %v5541_v20 }
 0x738   : > { %v4996_v62 = vpop.permute.xlu1 %4995 }
 0x739   : > { %v4964_v46 = vpop.permute.xlu0 %4963  ;;  %5065 = vst.msk [vmem:[#allocation3 + $0xd8] sm:$0xff] %vm5037_vm9, %v4996_v62 }
 0x73a   : > { %5049 = vst.msk [vmem:[#allocation3 + $0x58] sm:$0xff] %vm5037_vm9, %v4964_v46 }
 0x73c   : > { %v5189_v50 = vpop.permute.xlu1 %5188  ;;  %v5676_v10 = vld [vmem:[#allocation3 + $0xc8] sm:$0xff] }
 0x73d   : > { %v5157_v11 = vpop.permute.xlu0 %5156  ;;  %v5660_v51 = vld [vmem:[#allocation3 + $0x48] sm:$0xff]  ;;  %5259 = vst.msk [vmem:[#allocation3 + $0xd0] sm:$0xff] %vm5232_vm10, %v5189_v50  ;;  %7034 = vmatmul.mubr.f32.gmra.mxu1 %v5676_v10 }
 0x73e   : > { %5243 = vst.msk [vmem:[#allocation3 + $0x50] sm:$0xff] %vm5232_vm10, %v5157_v11  ;;  %7010 = vmatmul.mubr.f32.gmra.mxu0 %v5660_v51 }
 0x740   : > { %v5191_v28 = vpop.permute.xlu1 %5190 }
 0x741   : > { %v5159_v23 = vpop.permute.xlu0 %5158  ;;  %5260 = vst.msk [vmem:[#allocation3 + $0xd8] sm:$0xff] %vm5232_vm10, %v5191_v28 }
 0x742   : > { %5244 = vst.msk [vmem:[#allocation3 + $0x58] sm:$0xff] %vm5232_vm10, %v5159_v23 }
 0x744   : > { %v5382_v27 = vpop.permute.xlu1 %5381 }
 0x745   : > { %v5350_v13 = vpop.permute.xlu0 %5349  ;;  %5452 = vst.msk [vmem:[#allocation3 + $0xd0] sm:$0xff] %vm5425_vm11, %v5382_v27 }
 0x746   : > { %5436 = vst.msk [vmem:[#allocation3 + $0x50] sm:$0xff] %vm5425_vm11, %v5350_v13 }
 0x748   : > { %v4805_v31 = vpop.permute.xlu1 %4804 }
 0x749   : > { %v4773_v18 = vpop.permute.xlu0 %4772  ;;  %4873 = vst.msk [vmem:[#allocation3 + $0xe0] sm:$0xff] %vm4844_vm8, %v4805_v31 }
 0x74a   : > { %4857 = vst.msk [vmem:[#allocation3 + $0x60] sm:$0xff] %vm4844_vm8, %v4773_v18 }
 0x74c   : > { %v5384_v12 = vpop.permute.xlu1 %5383 }
 0x74d   : > { %v5352_v26 = vpop.permute.xlu0 %5351  ;;  %5453 = vst.msk [vmem:[#allocation3 + $0xd8] sm:$0xff] %vm5425_vm11, %v5384_v12 }
 0x74e   : > { %5437 = vst.msk [vmem:[#allocation3 + $0x58] sm:$0xff] %vm5425_vm11, %v5352_v26 }
 0x750   : > { %v5575_v34 = vpop.permute.xlu1 %5574 }
 0x751   : > { %v5543_v3 = vpop.permute.xlu0 %5542  ;;  %5645 = vst.msk [vmem:[#allocation3 + $0xd0] sm:$0xff] %vm5618_vm12, %v5575_v34 }
 0x752   : > { %5629 = vst.msk [vmem:[#allocation3 + $0x50] sm:$0xff] %vm5618_vm12, %v5543_v3 }
 0x754   : > { %v4807_v14 = vpop.permute.xlu1 %4806 }
 0x755   : > { %v4775_v19 = vpop.permute.xlu0 %4774  ;;  %4874 = vst.msk [vmem:[#allocation3 + $0xe8] sm:$0xff] %vm4844_vm8, %v4807_v14 }
 0x756   : > { %4858 = vst.msk [vmem:[#allocation3 + $0x68] sm:$0xff] %vm4844_vm8, %v4775_v19 }
 0x758   : > { %v4998_v47 = vpop.permute.xlu1 %4997  ;;  %v5677_v30 = vld [vmem:[#allocation3 + $0xd0] sm:$0xff] }
 0x759   : > { %v4966_v16 = vpop.permute.xlu0 %4965  ;;  %v5661_v7 = vld [vmem:[#allocation3 + $0x50] sm:$0xff]  ;;  %5066 = vst.msk [vmem:[#allocation3 + $0xe0] sm:$0xff] %vm5037_vm9, %v4998_v47  ;;  %7036 = vmatprep.mubr.f32.mxu1 %v5677_v30 }
 0x75a   : > { %5050 = vst.msk [vmem:[#allocation3 + $0x60] sm:$0xff] %vm5037_vm9, %v4966_v16  ;;  %7012 = vmatprep.mubr.f32.mxu0 %v5661_v7 }
 0x75c   : > { %v5577_v40 = vpop.permute.xlu1 %5576 }
 0x75d   : > { %v5545_v41 = vpop.permute.xlu0 %5544  ;;  %5646 = vst.msk [vmem:[#allocation3 + $0xd8] sm:$0xff] %vm5618_vm12, %v5577_v40 }
 0x75e   : > { %5630 = vst.msk [vmem:[#allocation3 + $0x58] sm:$0xff] %vm5618_vm12, %v5545_v41 }
 0x760   : > { %v5000_v49 = vpop.permute.xlu1 %4999 }
 0x761   : > { %v4968_v6 = vpop.permute.xlu0 %4967  ;;  %5067 = vst.msk [vmem:[#allocation3 + $0xe8] sm:$0xff] %vm5037_vm9, %v5000_v49 }
 0x762   : > { %5051 = vst.msk [vmem:[#allocation3 + $0x68] sm:$0xff] %vm5037_vm9, %v4968_v6 }
 0x764   : > { %v5193_v4 = vpop.permute.xlu1 %5192  ;;  %v5678_v57 = vld [vmem:[#allocation3 + $0xd8] sm:$0xff] }
 0x765   : > { %v5161_v24 = vpop.permute.xlu0 %5160  ;;  %v5662_v32 = vld [vmem:[#allocation3 + $0x58] sm:$0xff]  ;;  %5261 = vst.msk [vmem:[#allocation3 + $0xe0] sm:$0xff] %vm5232_vm10, %v5193_v4  ;;  %7037 = vmatmul.mubr.f32.gmra.mxu1 %v5678_v57 }
 0x766   : > { %5245 = vst.msk [vmem:[#allocation3 + $0x60] sm:$0xff] %vm5232_vm10, %v5161_v24  ;;  %7013 = vmatmul.mubr.f32.gmra.mxu0 %v5662_v32 }
 0x768   : > { %v5195_v37 = vpop.permute.xlu1 %5194 }
 0x769   : > { %v5163_v22 = vpop.permute.xlu0 %5162  ;;  %5262 = vst.msk [vmem:[#allocation3 + $0xe8] sm:$0xff] %vm5232_vm10, %v5195_v37  ;;  %v6999_v53 = vpop.f32.mrf.mxu0 }
 0x76a   : > { %5246 = vst.msk [vmem:[#allocation3 + $0x68] sm:$0xff] %vm5232_vm10, %v5163_v22  ;;  %v5778_v45 = vadd.f32 %v6999_v53, %v11451_v17 }
 0x76b   : > { %v5772_v52 = vpop.f32.mrf.mxu0 }
 0x76c   : > { %v5932_v9 = vmax.f32 %v5778_v45, 0.0  ;;  %v5773_v29 = vadd.f32 %v11451_v17, %v5772_v52  ;;  %v5386_v42 = vpop.permute.xlu1 %5385 }
 0x76d   : > { %v5354_v44 = vpop.permute.xlu0 %5353  ;;  %5454 = vst.msk [vmem:[#allocation3 + $0xe0] sm:$0xff] %vm5425_vm11, %v5386_v42 }
 0x76e   : > { %5438 = vst.msk [vmem:[#allocation3 + $0x60] sm:$0xff] %vm5425_vm11, %v5354_v44  ;;  %v7023_v60 = vpop.f32.mrf.mxu1  ;;  %5964 = vst [vmem:[%s11461_s29 + $0x8] sm:$0xff] %v5932_v9  ;;  %v5931_v8 = vmax.f32 %v5773_v29, 0.0 }
 0x76f   : > { %v5858_v63 = vadd.f32 %v7023_v60, %v11451_v17 }
 0x770   : > { %v5852_v39 = vpop.f32.mrf.mxu1  ;;  %5963 = vst [vmem:[%s11461_s29] sm:$0xff] %v5931_v8  ;;  %v4809_v35 = vpop.permute.xlu1 %4808 }
 0x771   : > { %v5948_v58 = vmax.f32 %v5858_v63, 0.0  ;;  %v5853_v15 = vadd.f32 %v11451_v17, %v5852_v39  ;;  %v4777_v36 = vpop.permute.xlu0 %4776  ;;  %4875 = vst.msk [vmem:[#allocation3 + $0xf0] sm:$0xff] %vm4844_vm8, %v4809_v35 }
 0x772   : > { %4859 = vst.msk [vmem:[#allocation3 + $0x70] sm:$0xff] %vm4844_vm8, %v4777_v36 }
 0x773   : > { %5980 = vst [vmem:[%s11461_s29 + $0x88] sm:$0xff] %v5948_v58  ;;  %v5947_v38 = vmax.f32 %v5853_v15, 0.0 }
 0x774   : > { %v5388_v1 = vpop.permute.xlu1 %5387 }
 0x775   : > { %5979 = vst [vmem:[%s11461_s29 + $0x80] sm:$0xff] %v5947_v38  ;;  %v5356_v43 = vpop.permute.xlu0 %5355  ;;  %5455 = vst.msk [vmem:[#allocation3 + $0xe8] sm:$0xff] %vm5425_vm11, %v5388_v1 }
 0x776   : > { %5439 = vst.msk [vmem:[#allocation3 + $0x68] sm:$0xff] %vm5425_vm11, %v5356_v43 }
 0x778   : > { %v5579_v48 = vpop.permute.xlu1 %5578 }
 0x779   : > { %v5547_v33 = vpop.permute.xlu0 %5546  ;;  %5647 = vst.msk [vmem:[#allocation3 + $0xe0] sm:$0xff] %vm5618_vm12, %v5579_v48 }
 0x77a   : > { %5631 = vst.msk [vmem:[#allocation3 + $0x60] sm:$0xff] %vm5618_vm12, %v5547_v33 }
 0x77c   : > { %v4811_v55 = vpop.permute.xlu1 %4810 }
 0x77d   : > { %v4779_v59 = vpop.permute.xlu0 %4778  ;;  %4876 = vst.msk [vmem:[#allocation3 + $0xf8] sm:$0xff] %vm4844_vm8, %v4811_v55 }
 0x77e   : > { %4860 = vst.msk [vmem:[#allocation3 + $0x78] sm:$0xff] %vm4844_vm8, %v4779_v59 }
 0x780   : > { %v5002_v0 = vpop.permute.xlu1 %5001  ;;  %v5679_v61 = vld [vmem:[#allocation3 + $0xe0] sm:$0xff] }
 0x781   : > { %v4970_v25 = vpop.permute.xlu0 %4969  ;;  %v5663_v54 = vld [vmem:[#allocation3 + $0x60] sm:$0xff]  ;;  %5068 = vst.msk [vmem:[#allocation3 + $0xf0] sm:$0xff] %vm5037_vm9, %v5002_v0  ;;  %7039 = vmatprep.mubr.f32.mxu1 %v5679_v61 }
 0x782   : > { %5052 = vst.msk [vmem:[#allocation3 + $0x70] sm:$0xff] %vm5037_vm9, %v4970_v25  ;;  %7015 = vmatprep.mubr.f32.mxu0 %v5663_v54 }
 0x784   : > { %v5581_v21 = vpop.permute.xlu1 %5580 }
 0x785   : > { %v5549_v2 = vpop.permute.xlu0 %5548  ;;  %5648 = vst.msk [vmem:[#allocation3 + $0xe8] sm:$0xff] %vm5618_vm12, %v5581_v21 }
 0x786   : > { %5632 = vst.msk [vmem:[#allocation3 + $0x68] sm:$0xff] %vm5618_vm12, %v5549_v2 }
 0x788   : > { %v5004_v56 = vpop.permute.xlu1 %5003 }
 0x789   : > { %v4972_v5 = vpop.permute.xlu0 %4971  ;;  %5069 = vst.msk [vmem:[#allocation3 + $0xf8] sm:$0xff] %vm5037_vm9, %v5004_v56 }
 0x78a   : > { %5053 = vst.msk [vmem:[#allocation3 + $0x78] sm:$0xff] %vm5037_vm9, %v4972_v5 }
 0x78c   : > { %v5197_v20 = vpop.permute.xlu1 %5196  ;;  %v5680_v50 = vld [vmem:[#allocation3 + $0xe8] sm:$0xff] }
 0x78d   : > { %v5165_v62 = vpop.permute.xlu0 %5164  ;;  %v5664_v46 = vld [vmem:[#allocation3 + $0x68] sm:$0xff]  ;;  %5263 = vst.msk [vmem:[#allocation3 + $0xf0] sm:$0xff] %vm5232_vm10, %v5197_v20  ;;  %v7002_v11 = vpop.f32.mrf.mxu0  ;;  %7040 = vmatmul.mubr.f32.gmra.mxu1 %v5680_v50 }
 0x78e   : > { %5247 = vst.msk [vmem:[#allocation3 + $0x70] sm:$0xff] %vm5232_vm10, %v5165_v62  ;;  %7016 = vmatmul.mubr.f32.gmra.mxu0 %v5664_v46  ;;  %v5788_v51 = vadd.f32 %v7002_v11, %v11451_v17 }
 0x78f   : > { %v5782_v10 = vpop.f32.mrf.mxu0 }
 0x790   : > { %v5934_v28 = vmax.f32 %v5788_v51, 0.0  ;;  %v5783_v23 = vadd.f32 %v11451_v17, %v5782_v10  ;;  %v5199_v27 = vpop.permute.xlu1 %5198 }
 0x791   : > { %v5167_v13 = vpop.permute.xlu0 %5166  ;;  %5264 = vst.msk [vmem:[#allocation3 + $0xf8] sm:$0xff] %vm5232_vm10, %v5199_v27 }
 0x792   : > { %5248 = vst.msk [vmem:[#allocation3 + $0x78] sm:$0xff] %vm5232_vm10, %v5167_v13  ;;  %v7026_v31 = vpop.f32.mrf.mxu1  ;;  %5966 = vst [vmem:[%s11461_s29 + $0x18] sm:$0xff] %v5934_v28  ;;  %v5933_v18 = vmax.f32 %v5783_v23, 0.0 }
 0x793   : > { %v5868_v12 = vadd.f32 %v7026_v31, %v11451_v17 }
 0x794   : > { %v5862_v26 = vpop.f32.mrf.mxu1  ;;  %5965 = vst [vmem:[%s11461_s29 + $0x10] sm:$0xff] %v5933_v18  ;;  %v5390_v14 = vpop.permute.xlu1 %5389 }
 0x795   : > { %v5950_v34 = vmax.f32 %v5868_v12, 0.0  ;;  %v5863_v3 = vadd.f32 %v11451_v17, %v5862_v26  ;;  %v5358_v19 = vpop.permute.xlu0 %5357  ;;  %5456 = vst.msk [vmem:[#allocation3 + $0xf0] sm:$0xff] %vm5425_vm11, %v5390_v14 }
 0x796   : > { %5440 = vst.msk [vmem:[#allocation3 + $0x70] sm:$0xff] %vm5425_vm11, %v5358_v19 }
 0x797   : > { %5982 = vst [vmem:[%s11461_s29 + $0x98] sm:$0xff] %v5950_v34  ;;  %v5949_v47 = vmax.f32 %v5863_v3, 0.0 }
 0x798   : > { %v5392_v16 = vpop.permute.xlu1 %5391 }
 0x799   : > { %5981 = vst [vmem:[%s11461_s29 + $0x90] sm:$0xff] %v5949_v47  ;;  %v5360_v7 = vpop.permute.xlu0 %5359  ;;  %5457 = vst.msk [vmem:[#allocation3 + $0xf8] sm:$0xff] %vm5425_vm11, %v5392_v16 }
 0x79a   : > { %5441 = vst.msk [vmem:[#allocation3 + $0x78] sm:$0xff] %vm5425_vm11, %v5360_v7 }
 0x79c   : > { %v5583_v30 = vpop.permute.xlu1 %5582 }
 0x79d   : > { %v5551_v40 = vpop.permute.xlu0 %5550  ;;  %5649 = vst.msk [vmem:[#allocation3 + $0xf0] sm:$0xff] %vm5618_vm12, %v5583_v30 }
 0x79e   : > { %5633 = vst.msk [vmem:[#allocation3 + $0x70] sm:$0xff] %vm5618_vm12, %v5551_v40 }
 0x7a0   : > { %v5585_v41 = vpop.permute.xlu1 %5584 }
 0x7a1   : > { %v5553_v49 = vpop.permute.xlu0 %5552  ;;  %5650 = vst.msk [vmem:[#allocation3 + $0xf8] sm:$0xff] %vm5618_vm12, %v5585_v41 }
 0x7a2   : > { %5634 = vst.msk [vmem:[#allocation3 + $0x78] sm:$0xff] %vm5618_vm12, %v5553_v49 }
 0x7a4   : > { %v5681_v4 = vld [vmem:[#allocation3 + $0xf0] sm:$0xff] }
 0x7a5   : > { %v5665_v6 = vld [vmem:[#allocation3 + $0x70] sm:$0xff]  ;;  %7042 = vmatprep.mubr.f32.mxu1 %v5681_v4 }
 0x7a6   : > { %7018 = vmatprep.mubr.f32.mxu0 %v5665_v6 }
 0x7a8   : > { %v5682_v32 = vld [vmem:[#allocation3 + $0xf8] sm:$0xff] }
 0x7a9   : > { %v5666_v24 = vld [vmem:[#allocation3 + $0x78] sm:$0xff]  ;;  %7043 = vmatmul.mubr.f32.gmra.mxu1 %v5682_v32 }
 0x7aa   : > { %7019 = vmatmul.mubr.f32.gmra.mxu0 %v5666_v24 }
 0x7b1   : > { %v7005_v57 = vpop.f32.mrf.mxu0 }
 0x7b2   : > { %v5798_v37 = vadd.f32 %v7005_v57, %v11451_v17 }
 0x7b3   : > { %v5792_v22 = vpop.f32.mrf.mxu0 }
 0x7b4   : > { %v5936_v53 = vmax.f32 %v5798_v37, 0.0  ;;  %v5793_v45 = vadd.f32 %v11451_v17, %v5792_v22 }
 0x7b6   : > { %v7029_v52 = vpop.f32.mrf.mxu1  ;;  %5968 = vst [vmem:[%s11461_s29 + $0x28] sm:$0xff] %v5936_v53  ;;  %v5935_v9 = vmax.f32 %v5793_v45, 0.0 }
 0x7b7   : > { %v5878_v29 = vadd.f32 %v7029_v52, %v11451_v17 }
 0x7b8   : > { %v5872_v42 = vpop.f32.mrf.mxu1  ;;  %5967 = vst [vmem:[%s11461_s29 + $0x20] sm:$0xff] %v5935_v9 }
 0x7b9   : > { %v5952_v44 = vmax.f32 %v5878_v29, 0.0  ;;  %v5873_v60 = vadd.f32 %v11451_v17, %v5872_v42 }
 0x7bb   : > { %5984 = vst [vmem:[%s11461_s29 + $0xa8] sm:$0xff] %v5952_v44  ;;  %v5951_v8 = vmax.f32 %v5873_v60, 0.0 }
 0x7bd   : > { %5983 = vst [vmem:[%s11461_s29 + $0xa0] sm:$0xff] %v5951_v8 }
 0x7d5   : > { %v7008_v63 = vpop.f32.mrf.mxu0 }
 0x7d6   : > { %v5808_v39 = vadd.f32 %v7008_v63, %v11451_v17 }
 0x7d7   : > { %v5802_v58 = vpop.f32.mrf.mxu0 }
 0x7d8   : > { %v5938_v15 = vmax.f32 %v5808_v39, 0.0  ;;  %v5803_v35 = vadd.f32 %v11451_v17, %v5802_v58 }
 0x7da   : > { %v7032_v36 = vpop.f32.mrf.mxu1  ;;  %5970 = vst [vmem:[%s11461_s29 + $0x38] sm:$0xff] %v5938_v15  ;;  %v5937_v38 = vmax.f32 %v5803_v35, 0.0 }
 0x7db   : > { %v5888_v1 = vadd.f32 %v7032_v36, %v11451_v17 }
 0x7dc   : > { %v5882_v43 = vpop.f32.mrf.mxu1  ;;  %5969 = vst [vmem:[%s11461_s29 + $0x30] sm:$0xff] %v5937_v38 }
 0x7dd   : > { %v5954_v48 = vmax.f32 %v5888_v1, 0.0  ;;  %v5883_v33 = vadd.f32 %v11451_v17, %v5882_v43 }
 0x7df   : > { %5986 = vst [vmem:[%s11461_s29 + $0xb8] sm:$0xff] %v5954_v48  ;;  %v5953_v55 = vmax.f32 %v5883_v33, 0.0 }
 0x7e1   : > { %5985 = vst [vmem:[%s11461_s29 + $0xb0] sm:$0xff] %v5953_v55 }
 0x7fd   : > { %v7035_v0 = vpop.f32.mrf.mxu1 }
 0x7fe   : > { %v7011_v59 = vpop.f32.mrf.mxu0  ;;  %v5898_v54 = vadd.f32 %v7035_v0, %v11451_v17 }
 0x7ff   : > { %v5818_v25 = vadd.f32 %v7011_v59, %v11451_v17  ;;  %v5892_v21 = vpop.f32.mrf.mxu1 }
 0x800   : > { %v5812_v61 = vpop.f32.mrf.mxu0  ;;  %v5956_v56 = vmax.f32 %v5898_v54, 0.0  ;;  %v5893_v20 = vadd.f32 %v11451_v17, %v5892_v21 }
 0x801   : > { %v5940_v2 = vmax.f32 %v5818_v25, 0.0  ;;  %v5813_v5 = vadd.f32 %v11451_v17, %v5812_v61 }
 0x802   : > { %5988 = vst [vmem:[%s11461_s29 + $0xc8] sm:$0xff] %v5956_v56  ;;  %v5955_v46 = vmax.f32 %v5893_v20, 0.0 }
 0x803   : > { %5972 = vst [vmem:[%s11461_s29 + $0x48] sm:$0xff] %v5940_v2  ;;  %v5939_v62 = vmax.f32 %v5813_v5, 0.0 }
 0x804   : > { %5987 = vst [vmem:[%s11461_s29 + $0xc0] sm:$0xff] %v5955_v46 }
 0x805   : > { %5971 = vst [vmem:[%s11461_s29 + $0x40] sm:$0xff] %v5939_v62 }
 0x825   : > { %v7038_v11 = vpop.f32.mrf.mxu1 }
 0x826   : > { %v7014_v50 = vpop.f32.mrf.mxu0  ;;  %v5908_v10 = vadd.f32 %v7038_v11, %v11451_v17 }
 0x827   : > { %v5828_v51 = vadd.f32 %v7014_v50, %v11451_v17  ;;  %v5902_v23 = vpop.f32.mrf.mxu1 }
 0x828   : > { %v5822_v28 = vpop.f32.mrf.mxu0  ;;  %v5958_v13 = vmax.f32 %v5908_v10, 0.0  ;;  %v5903_v18 = vadd.f32 %v11451_v17, %v5902_v23 }
 0x829   : > { %v5942_v27 = vmax.f32 %v5828_v51, 0.0  ;;  %v5823_v31 = vadd.f32 %v11451_v17, %v5822_v28 }
 0x82a   : > { %5990 = vst [vmem:[%s11461_s29 + $0xd8] sm:$0xff] %v5958_v13  ;;  %v5957_v26 = vmax.f32 %v5903_v18, 0.0 }
 0x82b   : > { %5974 = vst [vmem:[%s11461_s29 + $0x58] sm:$0xff] %v5942_v27  ;;  %v5941_v12 = vmax.f32 %v5823_v31, 0.0 }
 0x82c   : > { %5989 = vst [vmem:[%s11461_s29 + $0xd0] sm:$0xff] %v5957_v26 }
 0x82d   : > { %5973 = vst [vmem:[%s11461_s29 + $0x50] sm:$0xff] %v5941_v12 }
 0x84d   : > { %v7041_v3 = vpop.f32.mrf.mxu1 }
 0x84e   : > { %v7017_v34 = vpop.f32.mrf.mxu0  ;;  %v5918_v19 = vadd.f32 %v7041_v3, %v11451_v17 }
 0x84f   : > { %v5838_v14 = vadd.f32 %v7017_v34, %v11451_v17  ;;  %v5912_v16 = vpop.f32.mrf.mxu1 }
 0x850   : > { %v5832_v47 = vpop.f32.mrf.mxu0  ;;  %v5960_v30 = vmax.f32 %v5918_v19, 0.0  ;;  %v5913_v41 = vadd.f32 %v11451_v17, %v5912_v16 }
 0x851   : > { %v5944_v7 = vmax.f32 %v5838_v14, 0.0  ;;  %v5833_v40 = vadd.f32 %v11451_v17, %v5832_v47 }
 0x852   : > { %5992 = vst [vmem:[%s11461_s29 + $0xe8] sm:$0xff] %v5960_v30  ;;  %v5959_v6 = vmax.f32 %v5913_v41, 0.0 }
 0x853   : > { %5976 = vst [vmem:[%s11461_s29 + $0x68] sm:$0xff] %v5944_v7  ;;  %v5943_v49 = vmax.f32 %v5833_v40, 0.0 }
 0x854   : > { %5991 = vst [vmem:[%s11461_s29 + $0xe0] sm:$0xff] %v5959_v6 }
 0x855   : > { %5975 = vst [vmem:[%s11461_s29 + $0x60] sm:$0xff] %v5943_v49 }
 0x869   : > { %v7044_v24 = vpop.f32.mrf.mxu1 }
 0x86a   : > { %v7020_v4 = vpop.f32.mrf.mxu0  ;;  %v5928_v57 = vadd.f32 %v7044_v24, %v11451_v17 }
 0x86b   : > { %v5848_v32 = vadd.f32 %v7020_v4, %v11451_v17  ;;  %v5922_v22 = vpop.f32.mrf.mxu1 }
 0x86c   : > { %v5842_v37 = vpop.f32.mrf.mxu0  ;;  %v5962_v45 = vmax.f32 %v5928_v57, 0.0  ;;  %v5923_v9 = vadd.f32 %v11451_v17, %v5922_v22 }
 0x86d   : > { %v5946_v53 = vmax.f32 %v5848_v32, 0.0  ;;  %v5843_v52 = vadd.f32 %v11451_v17, %v5842_v37 }
 0x86e   : > { %5994 = vst [vmem:[%s11461_s29 + $0xf8] sm:$0xff] %v5962_v45  ;;  %v5961_v42 = vmax.f32 %v5923_v9, 0.0 }
 0x86f   : > { %5978 = vst [vmem:[%s11461_s29 + $0x78] sm:$0xff] %v5946_v53  ;;  %v5945_v29 = vmax.f32 %v5843_v52, 0.0 }
 0x870   : > { %5993 = vst [vmem:[%s11461_s29 + $0xf0] sm:$0xff] %v5961_v42 }
 0x871   : > { %5977 = vst [vmem:[%s11461_s29 + $0x70] sm:$0xff] %v5945_v29 }
 0x872   : > { %7191 = shalt.err (!%p7188_p6)
}
 0x873   : > { %s7192_s10 = scalar_lea.hbm %s11553_s27, 4096  ;;  %s7196_s8 = scalar_lea.hbm %s11618_s3, 16384 }
 0x874   : > { %p7193_p7 = scmp.ne.s32.totalorder %s11553_s27, %s7192_s10  ;;  %p7197_p11 = scmp.lt.s32.totalorder %s11553_s27, %s11618_s3 }
 0x875   : > { %p7198_p12 = scmp.lt.s32.totalorder %s7196_s8, %s7192_s10 }
 0x876   : > { %p7194_p9 = pnand %p7193_p7, %p7372_p3 }
 0x877   : > { %p7199_p13 = por %p7198_p12, %p7197_p11 }
 0x878   : > { %p7195_p10 = pneg %p7194_p9 }
 0x87a   : > { %p7200_p0 = pnand %p7199_p13, %p7195_p10 }
 0x87c   : > { %7203 = shalt.err (!%p7200_p0)
}
 0x87d   : > { %s7300_s15 = smov 128  }
 0x87e   : > { %7077 = dma.vmem_to_hbm [thread:$0]  (%p7372_p3), %s11557_s24, 4096, %s11553_s27, %s11563_s28, %s7300_s15, %s7300_s15, %s7274_s20  }
 0x87f PF: > { %p7083_p1 = scmp.ge.s32.totalorder %s7270_s19, 2  ;;  %s6026_s16 = sand.u32 1, %s7242_s12  }
 0x880   : > { %s6027_s5 = scalar_lea.sflag [#allocation5], %s6026_s16 }
 0x881   : > { %p7080_p2 = pnand %p7083_p1, %p7381_p8 }
 0x883   : > { %p7081_p4 = pneg %p7080_p2 }
 0x885   : > { %7237 = dma.done.wait (%p7081_p4), %s6027_s5, 4096  }
 0x886   : > { %7239 = vsyncadd (%p7081_p4), %s6027_s5, 4294963200  ;;  %s16_s19 = sadd.s32 1, %s7270_s19   ;;  %s11723_s12 = smov %s7246_s13 }
 0x887   : > { %p13_p5 = scmp.ge.s32.totalorder %s16_s19, 6   ;;  %s11724_s13 = smov %s7250_s14 }
 0x888   : > { %s11725_s14 = smov %s7390_s30  ;;  %s11726_s15 = smov %s7262_s17 }
 0x889   : > { %s11727_s16 = smov %s7266_s18  ;;  %s11728_s17 = smov %s11731_s22 }
 0x88a   : > { %s11729_s18 = smov %s11735_s23  ;;  %15 = sbr.rel (!%p13_p5) target bundleno = 5 (0x5), region = 77 }
 0x88f   :  { %6032 = vsyncpa [#allocation5], 1 }
 0x890   :  { %6034 = vsyncpa [#allocation5 + $0x1], 1 }

</bundles_post_ra>
